<compile_context>
chip_gen: v6e
topology: v6e:2x2x1
jax: 0.10.0
libtpu: 0.0.40
codegen_flags: <defaults>
</compile_context>

<pallas_src>
import functools

import jax
import jax.numpy as jnp
from jax.experimental import pallas as pl
from jax.experimental.pallas import tpu as pltpu

EPS = 1e-5
_VMEM_LIMIT = 64 * 1024 * 1024


def _cparams(*sem):
    return pltpu.CompilerParams(dimension_semantics=sem,
                                vmem_limit_bytes=_VMEM_LIMIT)


# ------------------------------ Pallas kernels ------------------------------

def _mm_kernel(x_ref, w_ref, b_ref, o_ref):
    """1x1 conv + folded BN + ReLU:  o = relu(x @ w + b)."""
    acc = jnp.dot(x_ref[...], w_ref[...], preferred_element_type=jnp.float32)
    o_ref[...] = jnp.maximum(acc + b_ref[...], 0.0).astype(o_ref.dtype)


def _conv7_kernel(x_ref, w_ref, b_ref, o_ref, *, M, tl):
    """7-tap conv along the major spatial axis + BN + ReLU.

    x_ref : ((L+6)*M, Cin) bf16, conv-axis-major, conv-axis padded by 3.
    Output rows [rt*tl*M, (rt+1)*tl*M): tap k is the contiguous, aligned
    slice starting at (rt*tl + k)*M -- read in bf16, no relayout, no upcast.
    """
    rows = tl * M
    base = pl.program_id(1) * rows
    acc = jnp.zeros((rows, w_ref.shape[-1]), jnp.float32)
    for k in range(7):                                   # static unroll
        start = pl.multiple_of(base + k * M, M)
        xk = x_ref[pl.ds(start, rows), :]                # bf16 slice -> MXU
        acc = acc + jnp.dot(xk, w_ref[k], preferred_element_type=jnp.float32)
    o_ref[...] = jnp.maximum(acc + b_ref[...], 0.0).astype(o_ref.dtype)


def _tail_kernel(xp_ref, t4_ref, w1_ref, w2_ref, w4_ref,
                 b1_ref, b2_ref, b4_ref, o_ref, *, W, th):
    """Fused tail: [avgpool3x3+1x1 | 1x1 | (7,1)] -> one (rows, 768) f32 slab.

    xp_ref : (H+2, W+2, Cin) bf16  -- 1-pixel-padded activation (read once,
             used by both branch 1 and branch 2).
    t4_ref : ((H+6)*W, C4) bf16    -- H-padded, H-major branch-4 activation.
    """
    rows = th * W
    h0 = pl.program_id(1) * th
    c1, c2, c4 = w1_ref.shape[-1], w2_ref.shape[-1], w4_ref.shape[-1]
    cin = xp_ref.shape[-1]

    # Branch 1: separable 3x3 avg-pool (the 1/9 is folded into w1) + 1x1.
    xs = xp_ref[pl.ds(pl.multiple_of(h0, th), th + 2), :, :]   # (th+2, W+2, cin)
    rowsum = (xs[:, 0:W, :].astype(jnp.float32)
              + xs[:, 1:W + 1, :] + xs[:, 2:W + 2, :])          # (th+2, W, cin)
    pool = rowsum[0:th] + rowsum[1:th + 1] + rowsum[2:th + 2]   # (th,   W, cin)
    pooled = pool.reshape(rows, cin).astype(jnp.bfloat16)
    y1 = jnp.dot(pooled, w1_ref[...], preferred_element_type=jnp.float32)
    o_ref[:, 0:c1] = jnp.maximum(y1 + b1_ref[...], 0.0).astype(o_ref.dtype)

    # Branch 2: 1x1 -> 384, from the interior of the already-loaded slab
    # (no second DMA of the Cin-wide activation).
    xi = xs[1:th + 1, 1:W + 1, :].reshape(rows, cin)
    y2 = jnp.dot(xi, w2_ref[...], preferred_element_type=jnp.float32)
    o_ref[:, c1:c1 + c2] = jnp.maximum(y2 + b2_ref[...], 0.0).astype(o_ref.dtype)

    # Branch 4 tail: (7,1) conv -> 256 via aligned flat row shifts.
    acc = jnp.zeros((rows, c4), jnp.float32)
    for k in range(7):
        start = pl.multiple_of((h0 + k) * W, W)
        xk = t4_ref[pl.ds(start, rows), :]
        acc = acc + jnp.dot(xk, w4_ref[k], preferred_element_type=jnp.float32)
    o_ref[:, c1 + c2:c1 + c2 + c4] = jnp.maximum(
        acc + b4_ref[...], 0.0).astype(o_ref.dtype)


# --------------------------------- wrappers ---------------------------------

def _pick_tile(L, M):
    """Row tile along the conv axis: ~128 output rows, divides L, 8-aligned."""
    for t in (8, 4, 2, 16, 32):
        if L % t == 0 and (t * M) % 8 == 0:
            return t
    return L                     # whole image (block == full dim is allowed)


def conv1x1(x_flat, p):
    """Row-tiled (cdiv) fused 1x1 conv + BN + ReLU over (M, Cin)."""
    M, Cin = x_flat.shape
    Cout = p["w"].shape[-1]
    tm = 256 if M >= 256 else M
    return pl.pallas_call(
        _mm_kernel,
        out_shape=jax.ShapeDtypeStruct((M, Cout), jnp.bfloat16),
        grid=(pl.cdiv(M, tm),),
        in_specs=[pl.BlockSpec((tm, Cin), lambda i: (i, 0)),
                  pl.BlockSpec((Cin, Cout), lambda i: (0, 0)),
                  pl.BlockSpec((1, Cout), lambda i: (0, 0))],
        out_specs=pl.BlockSpec((tm, Cout), lambda i: (i, 0)),
        compiler_params=_cparams("parallel"),
    )(x_flat, p["w"], p["b"])


def conv7(xpad_flat, p, L, M, *, out_dtype=jnp.bfloat16):
    """Generic 7-tap conv along the major axis of (N, (L+6)*M, Cin)."""
    N, _, Cin = xpad_flat.shape
    Cout = p["w"].shape[-1]
    tl = _pick_tile(L, M)
    return pl.pallas_call(
        functools.partial(_conv7_kernel, M=M, tl=tl),
        out_shape=jax.ShapeDtypeStruct((N, L * M, Cout), out_dtype),
        grid=(N, L // tl),
        in_specs=[
            # whole padded image; index map ignores the row-tile axis so the
            # DMA happens once per image (revisit) and is hidden by row tiles.
            pl.BlockSpec((None, (L + 6) * M, Cin), lambda n, r: (n, 0, 0)),
            pl.BlockSpec((7, Cin, Cout), lambda n, r: (0, 0, 0)),
            pl.BlockSpec((1, Cout), lambda n, r: (0, 0)),
        ],
        out_specs=pl.BlockSpec((None, tl * M, Cout), lambda n, r: (n, r, 0)),
        compiler_params=_cparams("parallel", "arbitrary"),
    )(xpad_flat, p["w"], p["b"])


def tail_fused(xpool, t4p, params, H, W):
    """Fused branch tails (b1 pool+1x1, b2 1x1, b4 (7,1)) -> (N, HW, 768)."""
    N, _, _, Cin = xpool.shape
    C4 = t4p.shape[-1]
    p1, p2, p4 = params["b1"], params["b2"], params["b4_5"]
    c1, c2, c4 = p1["w"].shape[-1], p2["w"].shape[-1], p4["w"].shape[-1]
    ctot = c1 + c2 + c4
    th = _pick_tile(H, W)
    return pl.pallas_call(
        functools.partial(_tail_kernel, W=W, th=th),
        out_shape=jax.ShapeDtypeStruct((N, H * W, ctot), jnp.float32),
        grid=(N, H // th),
        in_specs=[
            pl.BlockSpec((None, H + 2, W + 2, Cin), lambda n, r: (n, 0, 0, 0)),
            pl.BlockSpec((None, (H + 6) * W, C4), lambda n, r: (n, 0, 0)),
            pl.BlockSpec(p1["w"].shape, lambda n, r: (0, 0)),
            pl.BlockSpec(p2["w"].shape, lambda n, r: (0, 0)),
            pl.BlockSpec(p4["w"].shape, lambda n, r: (0, 0, 0)),
            pl.BlockSpec(p1["b"].shape, lambda n, r: (0, 0)),
            pl.BlockSpec(p2["b"].shape, lambda n, r: (0, 0)),
            pl.BlockSpec(p4["b"].shape, lambda n, r: (0, 0)),
        ],
        out_specs=pl.BlockSpec((None, th * W, ctot), lambda n, r: (n, r, 0)),
        compiler_params=_cparams("parallel", "arbitrary"),
    )(xpool, t4p, p1["w"], p2["w"], p4["w"], p1["b"], p2["b"], p4["b"])


# --------------------------- XLA layout glue ops -----------------------------
# Each is ONE fused XLA copy: any halo pad is fused with the transpose / slice
# that had to materialize the intermediate anyway (no standalone pad pass).

def _pad_major(x_nhwc, *, swap):
    """(N, A, B, C) -> conv-axis-major, padded-by-3 flat (N, (A'+6)*B', C)."""
    if swap:
        x_nhwc = jnp.transpose(x_nhwc, (0, 2, 1, 3))
    N, A, B, C = x_nhwc.shape
    x_nhwc = jnp.pad(x_nhwc, ((0, 0), (3, 3), (0, 0), (0, 0)))
    return x_nhwc.reshape(N, (A + 6) * B, C)


def _reorient_and_pad(flat, A, B, *, swap):
    """flat (N, A*B, C) in A-major order -> padded flat for the next conv."""
    N, _, C = flat.shape
    return _pad_major(flat.reshape(N, A, B, C), swap=swap)


# -------------------------------- parameters --------------------------------

def _conv_bn_params(key, cin, cout, taps, *, cin_pad=None, cout_pad=None,
                    pre_scale=1.0):
    """Random conv+BN params; inference-mode BN and conv bias folded in.

    cin/cout may be zero-padded to lane-friendly widths (padded channels are
    exact zeros, so results for the real channels are unchanged).
    """
    cin_pad = cin if cin_pad is None else cin_pad
    cout_pad = cout if cout_pad is None else cout_pad
    kw_, kb_, kg_, kbe_, km_, kv_ = jax.random.split(key, 6)
    fan_in = cin * taps
    w = jax.random.normal(kw_, (taps, cin, cout), jnp.float32) / jnp.sqrt(fan_in)
    conv_b = 0.01 * jax.random.normal(kb_, (cout,), jnp.float32)
    gamma = 1.0 + 0.1 * jax.random.normal(kg_, (cout,), jnp.float32)
    beta = 0.1 * jax.random.normal(kbe_, (cout,), jnp.float32)
    run_mean = 0.05 * jax.random.normal(km_, (cout,), jnp.float32)
    run_var = jnp.abs(1.0 + 0.1 * jax.random.normal(kv_, (cout,), jnp.float32))
    scale = gamma / jnp.sqrt(run_var + EPS)
    bias = beta - scale * run_mean + scale * conv_b          # fold conv bias
    w_eff = w * (scale[None, None, :] * pre_scale)           # fold BN scale
    w_eff = jnp.pad(w_eff, ((0, 0), (0, cin_pad - cin), (0, cout_pad - cout)))
    bias = jnp.pad(bias, (0, cout_pad - cout))
    if taps == 1:
        w_eff = w_eff[0]                                     # (cin_pad, cout_pad)
    return dict(w=w_eff.astype(jnp.bfloat16), b=bias.reshape(1, cout_pad))


def init_params(key, cin):
    ks = jax.random.split(key, 10)
    P = 256   # 192/224-wide intermediates zero-padded to 256 (lane-dense)
    p = {
        "b1":   _conv_bn_params(ks[0], cin, 128, 1, pre_scale=1.0 / 9.0),
        "b2":   _conv_bn_params(ks[1], cin, 384, 1),
        "b3_1": _conv_bn_params(ks[2], cin, 192, 1, cout_pad=P),
        "b3_2": _conv_bn_params(ks[3], 192, 224, 7, cin_pad=P, cout_pad=P),
        "b3_3": _conv_bn_params(ks[4], 224, 256, 7, cin_pad=P),
        "b4_1": _conv_bn_params(ks[5], cin, 192, 1, cout_pad=P),
        "b4_2": _conv_bn_params(ks[6], 192, 192, 7, cin_pad=P, cout_pad=P),
        "b4_3": _conv_bn_params(ks[7], 192, 224, 7, cin_pad=P, cout_pad=P),
        "b4_4": _conv_bn_params(ks[8], 224, 224, 7, cin_pad=P, cout_pad=P),
        "b4_5": _conv_bn_params(ks[9], 224, 256, 7, cin_pad=P),
    }
    # Fused head: the branch-3 and branch-4 1x1 convs share one (Cin, 512) RHS.
    p["head"] = dict(
        w=jnp.concatenate([p["b3_1"]["w"], p["b4_1"]["w"]], axis=-1),
        b=jnp.concatenate([p["b3_1"]["b"], p["b4_1"]["b"]], axis=-1),
    )
    return p


# ------------------------------- forward pass -------------------------------

def inception_b(x_nchw, params):
    N, Cin, H, W = x_nchw.shape
    HW = H * W
    x = jnp.transpose(x_nchw, (0, 2, 3, 1)).astype(jnp.bfloat16)     # NHWC bf16
    xflat = x.reshape(N * HW, Cin)
    xpool = jnp.pad(x, ((0, 0), (1, 1), (1, 1), (0, 0)))             # pool halo

    # Fused head: [b3_1 | b4_1] 1x1 convs in one matmul (one read of x).
    head = conv1x1(xflat, params["head"]).reshape(N, H, W, -1)       # (N,H,W,512)
    P = params["b3_1"]["w"].shape[-1]
    t3_0, t4_0 = head[..., :P], head[..., P:]

    # Branch 3: (7,1) -> 224 (H-major), then (1,7) -> 256 (W-major).
    t3_1 = conv7(_pad_major(t3_0, swap=False), params["b3_2"], H, W)
    b3 = conv7(_reorient_and_pad(t3_1, H, W, swap=True),
               params["b3_3"], W, H, out_dtype=jnp.float32)          # (N, W*H, 256)

    # Branch 4: (1,7) -> (7,1) -> (1,7); the final (7,1) lives in the tail.
    t = conv7(_pad_major(t4_0, swap=True), params["b4_2"], W, H)     # W-major
    t = conv7(_reorient_and_pad(t, W, H, swap=True), params["b4_3"], H, W)
    t = conv7(_reorient_and_pad(t, H, W, swap=True), params["b4_4"], W, H)
    t4p = _reorient_and_pad(t, W, H, swap=True)                      # (N,(H+6)W,P)

    # Fused tail: [pool+1x1(128) | 1x1(384) | (7,1)(256)] -> (N, HW, 768) f32.
    tail = tail_fused(xpool, t4p, params, H, W).reshape(N, H, W, -1)
    c1 = params["b1"]["w"].shape[-1]
    c2 = params["b2"]["w"].shape[-1]
    b1, b2, b4 = tail[..., :c1], tail[..., c1:c1 + c2], tail[..., c1 + c2:]
    b3 = b3.reshape(N, W, H, -1)                                     # W-major

    # Assemble NCHW output in the PyTorch concat order (b1, b2, b3, b4).
    return jnp.concatenate([
        jnp.transpose(b1, (0, 3, 1, 2)),
        jnp.transpose(b2, (0, 3, 1, 2)),
        jnp.transpose(b3, (0, 3, 2, 1)),     # W-major -> NCHW
        jnp.transpose(b4, (0, 3, 1, 2)),
    ], axis=1)


# ----------------------------------- main ------------------------------------

if __name__ == "__main__":
    key = jax.random.PRNGKey(0)
    kx, kp = jax.random.split(key)

    N, Cin, H, W = 2, 4, 16, 16
    x = jax.random.normal(kx, (N, Cin, H, W), jnp.float32)
    params = init_params(kp, Cin)

    fwd = jax.jit(inception_b)
    out = fwd(x, params)
    jax.block_until_ready(out)

    assert out.shape == (N, 128 + 384 + 256 + 256, H, W), out.shape
    assert out.dtype == jnp.float32
    assert bool(jnp.all(jnp.isfinite(out)))
    assert bool(jnp.all(out >= 0.0))  # every branch ends in ReLU

    print("KERNEL_OK")
</pallas_src>

<mosaic_0001>
module attributes {stable_mosaic.version = 11 : i64} {
  func.func @_mm_kernel(%arg0: i32, %arg1: memref<256x4xbf16, #tpu.memory_space<vmem>>, %arg2: memref<4x512xbf16, #tpu.memory_space<vmem>>, %arg3: memref<1x512xf32, #tpu.memory_space<vmem>>, %arg4: memref<256x512xbf16, #tpu.memory_space<vmem>>) attributes {dimension_semantics = [#tpu.dimension_semantics<parallel>], iteration_bounds = array<i64: 2>, scalar_prefetch = 0 : i64, scratch_operands = 0 : i64, tpu.core_type = #tpu.core_type<tc>, window_params = [{transform_indices = @transform_0, window_bounds = array<i64: 256, 4>}, {pipeline_mode = #tpu.pipeline_mode<synchronous>, transform_indices = @transform_1, window_bounds = array<i64: 4, 512>}, {pipeline_mode = #tpu.pipeline_mode<synchronous>, transform_indices = @transform_2, window_bounds = array<i64: 1, 512>}, {transform_indices = @transform_3, window_bounds = array<i64: 256, 512>}]} {
    %c0 = arith.constant 0 : index
    %c0_0 = arith.constant 0 : index
    %0 = vector.load %arg1[%c0, %c0_0] : memref<256x4xbf16, #tpu.memory_space<vmem>>, vector<256x4xbf16>
    %c0_1 = arith.constant 0 : index
    %c0_2 = arith.constant 0 : index
    %1 = vector.load %arg2[%c0_1, %c0_2] : memref<4x512xbf16, #tpu.memory_space<vmem>>, vector<4x512xbf16>
    %cst = arith.constant dense<0.000000e+00> : vector<256x512xf32>
    %2 = tpu.matmul %0, %1, %cst {dimension_numbers = #tpu.dot_dimension_numbers<[1], [0], [0], [1], [0, 0, 1, 1], [], []>} : vector<256x4xbf16>, vector<4x512xbf16>, vector<256x512xf32> -> vector<256x512xf32>
    %c0_3 = arith.constant 0 : index
    %c0_4 = arith.constant 0 : index
    %3 = vector.load %arg3[%c0_3, %c0_4] : memref<1x512xf32, #tpu.memory_space<vmem>>, vector<1x512xf32>
    %4 = vector.broadcast %3 : vector<1x512xf32> to vector<256x512xf32>
    %5 = arith.addf %2, %4 : vector<256x512xf32>
    %cst_5 = arith.constant 0.000000e+00 : f32
    %6 = vector.broadcast %cst_5 : f32 to vector<256x512xf32>
    %7 = arith.maximumf %5, %6 : vector<256x512xf32>
    %8 = arith.truncf %7 : vector<256x512xf32> to vector<256x512xbf16>
    %c0_6 = arith.constant 0 : index
    %c0_7 = arith.constant 0 : index
    %9 = vector.load %arg4[%c0_6, %c0_7] : memref<256x512xbf16, #tpu.memory_space<vmem>>, vector<256x512xbf16>
    tpu.vector_store %arg4[%c0_6, %c0_7], %8 {strides = array<i32>} : memref<256x512xbf16, #tpu.memory_space<vmem>>, vector<256x512xbf16>,
    return
  }
  func.func @transform_0(%arg0: i32) -> (i32, i32) {
    %c0_i32 = arith.constant 0 : i32
    %c0_i32_0 = arith.constant 0 : i32
    return %arg0, %c0_i32 : i32, i32
  }
  func.func @transform_1(%arg0: i32) -> (i32, i32) {
    %c0_i32 = arith.constant 0 : i32
    %c0_i32_0 = arith.constant 0 : i32
    %c0_i32_1 = arith.constant 0 : i32
    return %c0_i32, %c0_i32_0 : i32, i32
  }
  func.func @transform_2(%arg0: i32) -> (i32, i32) {
    %c0_i32 = arith.constant 0 : i32
    %c0_i32_0 = arith.constant 0 : i32
    %c0_i32_1 = arith.constant 0 : i32
    return %c0_i32, %c0_i32_0 : i32, i32
  }
  func.func @transform_3(%arg0: i32) -> (i32, i32) {
    %c0_i32 = arith.constant 0 : i32
    %c0_i32_0 = arith.constant 0 : i32
    return %arg0, %c0_i32 : i32, i32
  }
}

module attributes {stable_mosaic.version = 11 : i64} {
  func.func @_conv7_kernel(%arg0: i32, %arg1: i32, %arg2: memref<1x352x256xbf16, #tpu.memory_space<vmem>>, %arg3: memref<7x256x256xbf16, #tpu.memory_space<vmem>>, %arg4: memref<1x256xf32, #tpu.memory_space<vmem>>, %arg5: memref<1x128x256xbf16, #tpu.memory_space<vmem>>) attributes {dimension_semantics = [#tpu.dimension_semantics<parallel>, #tpu.dimension_semantics<arbitrary>], iteration_bounds = array<i64: 2, 2>, scalar_prefetch = 0 : i64, scratch_operands = 0 : i64, tpu.core_type = #tpu.core_type<tc>, window_params = [{transform_indices = @transform_0, window_bounds = array<i64: 1, 352, 256>}, {pipeline_mode = #tpu.pipeline_mode<synchronous>, transform_indices = @transform_1, window_bounds = array<i64: 7, 256, 256>}, {pipeline_mode = #tpu.pipeline_mode<synchronous>, transform_indices = @transform_2, window_bounds = array<i64: 1, 256>}, {transform_indices = @transform_3, window_bounds = array<i64: 1, 128, 256>}]} {
    %c128_i32 = arith.constant 128 : i32
    %0 = arith.muli %arg1, %c128_i32 : i32
    %cst = arith.constant 0.000000e+00 : f32
    %1 = vector.broadcast %cst : f32 to vector<128x256xf32>
    %c0_i32 = arith.constant 0 : i32
    %2 = arith.addi %0, %c0_i32 : i32
    %3 = tpu.assume_multiple %2, 16 : i32
    %c0 = arith.constant 0 : index
    %4 = arith.index_cast %3 : i32 to index
    %c0_0 = arith.constant 0 : index
    %5 = vector.load %arg2[%c0, %4, %c0_0] : memref<1x352x256xbf16, #tpu.memory_space<vmem>>, vector<1x128x256xbf16>
    %6 = vector.shape_cast %5 : vector<1x128x256xbf16> to vector<128x256xbf16>
    %c0_1 = arith.constant 0 : index
    %c0_2 = arith.constant 0 : index
    %c0_3 = arith.constant 0 : index
    %7 = vector.load %arg3[%c0_1, %c0_2, %c0_3] : memref<7x256x256xbf16, #tpu.memory_space<vmem>>, vector<1x256x256xbf16>
    %8 = vector.shape_cast %7 : vector<1x256x256xbf16> to vector<256x256xbf16>
    %cst_4 = arith.constant dense<0.000000e+00> : vector<128x256xf32>
    %9 = tpu.matmul %6, %8, %cst_4 {dimension_numbers = #tpu.dot_dimension_numbers<[1], [0], [0], [1], [0, 0, 1, 1], [], []>} : vector<128x256xbf16>, vector<256x256xbf16>, vector<128x256xf32> -> vector<128x256xf32>
    %10 = arith.addf %1, %9 : vector<128x256xf32>
    %c16_i32 = arith.constant 16 : i32
    %11 = arith.addi %0, %c16_i32 : i32
    %12 = tpu.assume_multiple %11, 16 : i32
    %c0_5 = arith.constant 0 : index
    %13 = arith.index_cast %12 : i32 to index
    %c0_6 = arith.constant 0 : index
    %14 = vector.load %arg2[%c0_5, %13, %c0_6] : memref<1x352x256xbf16, #tpu.memory_space<vmem>>, vector<1x128x256xbf16>
    %15 = vector.shape_cast %14 : vector<1x128x256xbf16> to vector<128x256xbf16>
    %c1 = arith.constant 1 : index
    %c0_7 = arith.constant 0 : index
    %c0_8 = arith.constant 0 : index
    %16 = vector.load %arg3[%c1, %c0_7, %c0_8] : memref<7x256x256xbf16, #tpu.memory_space<vmem>>, vector<1x256x256xbf16>
    %17 = vector.shape_cast %16 : vector<1x256x256xbf16> to vector<256x256xbf16>
    %cst_9 = arith.constant dense<0.000000e+00> : vector<128x256xf32>
    %18 = tpu.matmul %15, %17, %cst_9 {dimension_numbers = #tpu.dot_dimension_numbers<[1], [0], [0], [1], [0, 0, 1, 1], [], []>} : vector<128x256xbf16>, vector<256x256xbf16>, vector<128x256xf32> -> vector<128x256xf32>
    %19 = arith.addf %10, %18 : vector<128x256xf32>
    %c32_i32 = arith.constant 32 : i32
    %20 = arith.addi %0, %c32_i32 : i32
    %21 = tpu.assume_multiple %20, 16 : i32
    %c0_10 = arith.constant 0 : index
    %22 = arith.index_cast %21 : i32 to index
    %c0_11 = arith.constant 0 : index
    %23 = vector.load %arg2[%c0_10, %22, %c0_11] : memref<1x352x256xbf16, #tpu.memory_space<vmem>>, vector<1x128x256xbf16>
    %24 = vector.shape_cast %23 : vector<1x128x256xbf16> to vector<128x256xbf16>
    %c2 = arith.constant 2 : index
    %c0_12 = arith.constant 0 : index
    %c0_13 = arith.constant 0 : index
    %25 = vector.load %arg3[%c2, %c0_12, %c0_13] : memref<7x256x256xbf16, #tpu.memory_space<vmem>>, vector<1x256x256xbf16>
    %26 = vector.shape_cast %25 : vector<1x256x256xbf16> to vector<256x256xbf16>
    %cst_14 = arith.constant dense<0.000000e+00> : vector<128x256xf32>
    %27 = tpu.matmul %24, %26, %cst_14 {dimension_numbers = #tpu.dot_dimension_numbers<[1], [0], [0], [1], [0, 0, 1, 1], [], []>} : vector<128x256xbf16>, vector<256x256xbf16>, vector<128x256xf32> -> vector<128x256xf32>
    %28 = arith.addf %19, %27 : vector<128x256xf32>
    %c48_i32 = arith.constant 48 : i32
    %29 = arith.addi %0, %c48_i32 : i32
    %30 = tpu.assume_multiple %29, 16 : i32
    %c0_15 = arith.constant 0 : index
    %31 = arith.index_cast %30 : i32 to index
    %c0_16 = arith.constant 0 : index
    %32 = vector.load %arg2[%c0_15, %31, %c0_16] : memref<1x352x256xbf16, #tpu.memory_space<vmem>>, vector<1x128x256xbf16>
    %33 = vector.shape_cast %32 : vector<1x128x256xbf16> to vector<128x256xbf16>
    %c3 = arith.constant 3 : index
    %c0_17 = arith.constant 0 : index
    %c0_18 = arith.constant 0 : index
    %34 = vector.load %arg3[%c3, %c0_17, %c0_18] : memref<7x256x256xbf16, #tpu.memory_space<vmem>>, vector<1x256x256xbf16>
    %35 = vector.shape_cast %34 : vector<1x256x256xbf16> to vector<256x256xbf16>
    %cst_19 = arith.constant dense<0.000000e+00> : vector<128x256xf32>
    %36 = tpu.matmul %33, %35, %cst_19 {dimension_numbers = #tpu.dot_dimension_numbers<[1], [0], [0], [1], [0, 0, 1, 1], [], []>} : vector<128x256xbf16>, vector<256x256xbf16>, vector<128x256xf32> -> vector<128x256xf32>
    %37 = arith.addf %28, %36 : vector<128x256xf32>
    %c64_i32 = arith.constant 64 : i32
    %38 = arith.addi %0, %c64_i32 : i32
    %39 = tpu.assume_multiple %38, 16 : i32
    %c0_20 = arith.constant 0 : index
    %40 = arith.index_cast %39 : i32 to index
    %c0_21 = arith.constant 0 : index
    %41 = vector.load %arg2[%c0_20, %40, %c0_21] : memref<1x352x256xbf16, #tpu.memory_space<vmem>>, vector<1x128x256xbf16>
    %42 = vector.shape_cast %41 : vector<1x128x256xbf16> to vector<128x256xbf16>
    %c4 = arith.constant 4 : index
    %c0_22 = arith.constant 0 : index
    %c0_23 = arith.constant 0 : index
    %43 = vector.load %arg3[%c4, %c0_22, %c0_23] : memref<7x256x256xbf16, #tpu.memory_space<vmem>>, vector<1x256x256xbf16>
    %44 = vector.shape_cast %43 : vector<1x256x256xbf16> to vector<256x256xbf16>
    %cst_24 = arith.constant dense<0.000000e+00> : vector<128x256xf32>
    %45 = tpu.matmul %42, %44, %cst_24 {dimension_numbers = #tpu.dot_dimension_numbers<[1], [0], [0], [1], [0, 0, 1, 1], [], []>} : vector<128x256xbf16>, vector<256x256xbf16>, vector<128x256xf32> -> vector<128x256xf32>
    %46 = arith.addf %37, %45 : vector<128x256xf32>
    %c80_i32 = arith.constant 80 : i32
    %47 = arith.addi %0, %c80_i32 : i32
    %48 = tpu.assume_multiple %47, 16 : i32
    %c0_25 = arith.constant 0 : index
    %49 = arith.index_cast %48 : i32 to index
    %c0_26 = arith.constant 0 : index
    %50 = vector.load %arg2[%c0_25, %49, %c0_26] : memref<1x352x256xbf16, #tpu.memory_space<vmem>>, vector<1x128x256xbf16>
    %51 = vector.shape_cast %50 : vector<1x128x256xbf16> to vector<128x256xbf16>
    %c5 = arith.constant 5 : index
    %c0_27 = arith.constant 0 : index
    %c0_28 = arith.constant 0 : index
    %52 = vector.load %arg3[%c5, %c0_27, %c0_28] : memref<7x256x256xbf16, #tpu.memory_space<vmem>>, vector<1x256x256xbf16>
    %53 = vector.shape_cast %52 : vector<1x256x256xbf16> to vector<256x256xbf16>
    %cst_29 = arith.constant dense<0.000000e+00> : vector<128x256xf32>
    %54 = tpu.matmul %51, %53, %cst_29 {dimension_numbers = #tpu.dot_dimension_numbers<[1], [0], [0], [1], [0, 0, 1, 1], [], []>} : vector<128x256xbf16>, vector<256x256xbf16>, vector<128x256xf32> -> vector<128x256xf32>
    %55 = arith.addf %46, %54 : vector<128x256xf32>
    %c96_i32 = arith.constant 96 : i32
    %56 = arith.addi %0, %c96_i32 : i32
    %57 = tpu.assume_multiple %56, 16 : i32
    %c0_30 = arith.constant 0 : index
    %58 = arith.index_cast %57 : i32 to index
    %c0_31 = arith.constant 0 : index
    %59 = vector.load %arg2[%c0_30, %58, %c0_31] : memref<1x352x256xbf16, #tpu.memory_space<vmem>>, vector<1x128x256xbf16>
    %60 = vector.shape_cast %59 : vector<1x128x256xbf16> to vector<128x256xbf16>
    %c6 = arith.constant 6 : index
    %c0_32 = arith.constant 0 : index
    %c0_33 = arith.constant 0 : index
    %61 = vector.load %arg3[%c6, %c0_32, %c0_33] : memref<7x256x256xbf16, #tpu.memory_space<vmem>>, vector<1x256x256xbf16>
    %62 = vector.shape_cast %61 : vector<1x256x256xbf16> to vector<256x256xbf16>
    %cst_34 = arith.constant dense<0.000000e+00> : vector<128x256xf32>
    %63 = tpu.matmul %60, %62, %cst_34 {dimension_numbers = #tpu.dot_dimension_numbers<[1], [0], [0], [1], [0, 0, 1, 1], [], []>} : vector<128x256xbf16>, vector<256x256xbf16>, vector<128x256xf32> -> vector<128x256xf32>
    %64 = arith.addf %55, %63 : vector<128x256xf32>
    %c0_35 = arith.constant 0 : index
    %c0_36 = arith.constant 0 : index
    %65 = vector.load %arg4[%c0_35, %c0_36] : memref<1x256xf32, #tpu.memory_space<vmem>>, vector<1x256xf32>
    %66 = vector.broadcast %65 : vector<1x256xf32> to vector<128x256xf32>
    %67 = arith.addf %64, %66 : vector<128x256xf32>
    %cst_37 = arith.constant 0.000000e+00 : f32
    %68 = vector.broadcast %cst_37 : f32 to vector<128x256xf32>
    %69 = arith.maximumf %67, %68 : vector<128x256xf32>
    %70 = arith.truncf %69 : vector<128x256xf32> to vector<128x256xbf16>
    %c0_38 = arith.constant 0 : index
    %c0_39 = arith.constant 0 : index
    %c0_40 = arith.constant 0 : index
    %71 = vector.load %arg5[%c0_38, %c0_39, %c0_40] : memref<1x128x256xbf16, #tpu.memory_space<vmem>>, vector<1x128x256xbf16>
    %72 = vector.shape_cast %71 : vector<1x128x256xbf16> to vector<128x256xbf16>
    %73 = vector.shape_cast %70 : vector<128x256xbf16> to vector<1x128x256xbf16>
    tpu.vector_store %arg5[%c0_38, %c0_39, %c0_40], %73 {strides = array<i32>} : memref<1x128x256xbf16, #tpu.memory_space<vmem>>, vector<1x128x256xbf16>,
    return
  }
  func.func @transform_0(%arg0: i32, %arg1: i32) -> (i32, i32, i32) {
    %c0_i32 = arith.constant 0 : i32
    %c0_i32_0 = arith.constant 0 : i32
    %c0_i32_1 = arith.constant 0 : i32
    return %arg0, %c0_i32, %c0_i32_0 : i32, i32, i32
  }
  func.func @transform_1(%arg0: i32, %arg1: i32) -> (i32, i32, i32) {
    %c0_i32 = arith.constant 0 : i32
    %c0_i32_0 = arith.constant 0 : i32
    %c0_i32_1 = arith.constant 0 : i32
    %c0_i32_2 = arith.constant 0 : i32
    return %c0_i32, %c0_i32_0, %c0_i32_1 : i32, i32, i32
  }
  func.func @transform_2(%arg0: i32, %arg1: i32) -> (i32, i32) {
    %c0_i32 = arith.constant 0 : i32
    %c0_i32_0 = arith.constant 0 : i32
    %c0_i32_1 = arith.constant 0 : i32
    return %c0_i32, %c0_i32_0 : i32, i32
  }
  func.func @transform_3(%arg0: i32, %arg1: i32) -> (i32, i32, i32) {
    %c0_i32 = arith.constant 0 : i32
    %c0_i32_0 = arith.constant 0 : i32
    return %arg0, %arg1, %c0_i32 : i32, i32, i32
  }
}

module attributes {stable_mosaic.version = 11 : i64} {
  func.func @_conv7_kernel(%arg0: i32, %arg1: i32, %arg2: memref<1x352x256xbf16, #tpu.memory_space<vmem>>, %arg3: memref<7x256x256xbf16, #tpu.memory_space<vmem>>, %arg4: memref<1x256xf32, #tpu.memory_space<vmem>>, %arg5: memref<1x128x256xf32, #tpu.memory_space<vmem>>) attributes {dimension_semantics = [#tpu.dimension_semantics<parallel>, #tpu.dimension_semantics<arbitrary>], iteration_bounds = array<i64: 2, 2>, scalar_prefetch = 0 : i64, scratch_operands = 0 : i64, tpu.core_type = #tpu.core_type<tc>, window_params = [{transform_indices = @transform_0, window_bounds = array<i64: 1, 352, 256>}, {pipeline_mode = #tpu.pipeline_mode<synchronous>, transform_indices = @transform_1, window_bounds = array<i64: 7, 256, 256>}, {pipeline_mode = #tpu.pipeline_mode<synchronous>, transform_indices = @transform_2, window_bounds = array<i64: 1, 256>}, {transform_indices = @transform_3, window_bounds = array<i64: 1, 128, 256>}]} {
    %c128_i32 = arith.constant 128 : i32
    %0 = arith.muli %arg1, %c128_i32 : i32
    %cst = arith.constant 0.000000e+00 : f32
    %1 = vector.broadcast %cst : f32 to vector<128x256xf32>
    %c0_i32 = arith.constant 0 : i32
    %2 = arith.addi %0, %c0_i32 : i32
    %3 = tpu.assume_multiple %2, 16 : i32
    %c0 = arith.constant 0 : index
    %4 = arith.index_cast %3 : i32 to index
    %c0_0 = arith.constant 0 : index
    %5 = vector.load %arg2[%c0, %4, %c0_0] : memref<1x352x256xbf16, #tpu.memory_space<vmem>>, vector<1x128x256xbf16>
    %6 = vector.shape_cast %5 : vector<1x128x256xbf16> to vector<128x256xbf16>
    %c0_1 = arith.constant 0 : index
    %c0_2 = arith.constant 0 : index
    %c0_3 = arith.constant 0 : index
    %7 = vector.load %arg3[%c0_1, %c0_2, %c0_3] : memref<7x256x256xbf16, #tpu.memory_space<vmem>>, vector<1x256x256xbf16>
    %8 = vector.shape_cast %7 : vector<1x256x256xbf16> to vector<256x256xbf16>
    %cst_4 = arith.constant dense<0.000000e+00> : vector<128x256xf32>
    %9 = tpu.matmul %6, %8, %cst_4 {dimension_numbers = #tpu.dot_dimension_numbers<[1], [0], [0], [1], [0, 0, 1, 1], [], []>} : vector<128x256xbf16>, vector<256x256xbf16>, vector<128x256xf32> -> vector<128x256xf32>
    %10 = arith.addf %1, %9 : vector<128x256xf32>
    %c16_i32 = arith.constant 16 : i32
    %11 = arith.addi %0, %c16_i32 : i32
    %12 = tpu.assume_multiple %11, 16 : i32
    %c0_5 = arith.constant 0 : index
    %13 = arith.index_cast %12 : i32 to index
    %c0_6 = arith.constant 0 : index
    %14 = vector.load %arg2[%c0_5, %13, %c0_6] : memref<1x352x256xbf16, #tpu.memory_space<vmem>>, vector<1x128x256xbf16>
    %15 = vector.shape_cast %14 : vector<1x128x256xbf16> to vector<128x256xbf16>
    %c1 = arith.constant 1 : index
    %c0_7 = arith.constant 0 : index
    %c0_8 = arith.constant 0 : index
    %16 = vector.load %arg3[%c1, %c0_7, %c0_8] : memref<7x256x256xbf16, #tpu.memory_space<vmem>>, vector<1x256x256xbf16>
    %17 = vector.shape_cast %16 : vector<1x256x256xbf16> to vector<256x256xbf16>
    %cst_9 = arith.constant dense<0.000000e+00> : vector<128x256xf32>
    %18 = tpu.matmul %15, %17, %cst_9 {dimension_numbers = #tpu.dot_dimension_numbers<[1], [0], [0], [1], [0, 0, 1, 1], [], []>} : vector<128x256xbf16>, vector<256x256xbf16>, vector<128x256xf32> -> vector<128x256xf32>
    %19 = arith.addf %10, %18 : vector<128x256xf32>
    %c32_i32 = arith.constant 32 : i32
    %20 = arith.addi %0, %c32_i32 : i32
    %21 = tpu.assume_multiple %20, 16 : i32
    %c0_10 = arith.constant 0 : index
    %22 = arith.index_cast %21 : i32 to index
    %c0_11 = arith.constant 0 : index
    %23 = vector.load %arg2[%c0_10, %22, %c0_11] : memref<1x352x256xbf16, #tpu.memory_space<vmem>>, vector<1x128x256xbf16>
    %24 = vector.shape_cast %23 : vector<1x128x256xbf16> to vector<128x256xbf16>
    %c2 = arith.constant 2 : index
    %c0_12 = arith.constant 0 : index
    %c0_13 = arith.constant 0 : index
    %25 = vector.load %arg3[%c2, %c0_12, %c0_13] : memref<7x256x256xbf16, #tpu.memory_space<vmem>>, vector<1x256x256xbf16>
    %26 = vector.shape_cast %25 : vector<1x256x256xbf16> to vector<256x256xbf16>
    %cst_14 = arith.constant dense<0.000000e+00> : vector<128x256xf32>
    %27 = tpu.matmul %24, %26, %cst_14 {dimension_numbers = #tpu.dot_dimension_numbers<[1], [0], [0], [1], [0, 0, 1, 1], [], []>} : vector<128x256xbf16>, vector<256x256xbf16>, vector<128x256xf32> -> vector<128x256xf32>
    %28 = arith.addf %19, %27 : vector<128x256xf32>
    %c48_i32 = arith.constant 48 : i32
    %29 = arith.addi %0, %c48_i32 : i32
    %30 = tpu.assume_multiple %29, 16 : i32
    %c0_15 = arith.constant 0 : index
    %31 = arith.index_cast %30 : i32 to index
    %c0_16 = arith.constant 0 : index
    %32 = vector.load %arg2[%c0_15, %31, %c0_16] : memref<1x352x256xbf16, #tpu.memory_space<vmem>>, vector<1x128x256xbf16>
    %33 = vector.shape_cast %32 : vector<1x128x256xbf16> to vector<128x256xbf16>
    %c3 = arith.constant 3 : index
    %c0_17 = arith.constant 0 : index
    %c0_18 = arith.constant 0 : index
    %34 = vector.load %arg3[%c3, %c0_17, %c0_18] : memref<7x256x256xbf16, #tpu.memory_space<vmem>>, vector<1x256x256xbf16>
    %35 = vector.shape_cast %34 : vector<1x256x256xbf16> to vector<256x256xbf16>
    %cst_19 = arith.constant dense<0.000000e+00> : vector<128x256xf32>
    %36 = tpu.matmul %33, %35, %cst_19 {dimension_numbers = #tpu.dot_dimension_numbers<[1], [0], [0], [1], [0, 0, 1, 1], [], []>} : vector<128x256xbf16>, vector<256x256xbf16>, vector<128x256xf32> -> vector<128x256xf32>
    %37 = arith.addf %28, %36 : vector<128x256xf32>
    %c64_i32 = arith.constant 64 : i32
    %38 = arith.addi %0, %c64_i32 : i32
    %39 = tpu.assume_multiple %38, 16 : i32
    %c0_20 = arith.constant 0 : index
    %40 = arith.index_cast %39 : i32 to index
    %c0_21 = arith.constant 0 : index
    %41 = vector.load %arg2[%c0_20, %40, %c0_21] : memref<1x352x256xbf16, #tpu.memory_space<vmem>>, vector<1x128x256xbf16>
    %42 = vector.shape_cast %41 : vector<1x128x256xbf16> to vector<128x256xbf16>
    %c4 = arith.constant 4 : index
    %c0_22 = arith.constant 0 : index
    %c0_23 = arith.constant 0 : index
    %43 = vector.load %arg3[%c4, %c0_22, %c0_23] : memref<7x256x256xbf16, #tpu.memory_space<vmem>>, vector<1x256x256xbf16>
    %44 = vector.shape_cast %43 : vector<1x256x256xbf16> to vector<256x256xbf16>
    %cst_24 = arith.constant dense<0.000000e+00> : vector<128x256xf32>
    %45 = tpu.matmul %42, %44, %cst_24 {dimension_numbers = #tpu.dot_dimension_numbers<[1], [0], [0], [1], [0, 0, 1, 1], [], []>} : vector<128x256xbf16>, vector<256x256xbf16>, vector<128x256xf32> -> vector<128x256xf32>
    %46 = arith.addf %37, %45 : vector<128x256xf32>
    %c80_i32 = arith.constant 80 : i32
    %47 = arith.addi %0, %c80_i32 : i32
    %48 = tpu.assume_multiple %47, 16 : i32
    %c0_25 = arith.constant 0 : index
    %49 = arith.index_cast %48 : i32 to index
    %c0_26 = arith.constant 0 : index
    %50 = vector.load %arg2[%c0_25, %49, %c0_26] : memref<1x352x256xbf16, #tpu.memory_space<vmem>>, vector<1x128x256xbf16>
    %51 = vector.shape_cast %50 : vector<1x128x256xbf16> to vector<128x256xbf16>
    %c5 = arith.constant 5 : index
    %c0_27 = arith.constant 0 : index
    %c0_28 = arith.constant 0 : index
    %52 = vector.load %arg3[%c5, %c0_27, %c0_28] : memref<7x256x256xbf16, #tpu.memory_space<vmem>>, vector<1x256x256xbf16>
    %53 = vector.shape_cast %52 : vector<1x256x256xbf16> to vector<256x256xbf16>
    %cst_29 = arith.constant dense<0.000000e+00> : vector<128x256xf32>
    %54 = tpu.matmul %51, %53, %cst_29 {dimension_numbers = #tpu.dot_dimension_numbers<[1], [0], [0], [1], [0, 0, 1, 1], [], []>} : vector<128x256xbf16>, vector<256x256xbf16>, vector<128x256xf32> -> vector<128x256xf32>
    %55 = arith.addf %46, %54 : vector<128x256xf32>
    %c96_i32 = arith.constant 96 : i32
    %56 = arith.addi %0, %c96_i32 : i32
    %57 = tpu.assume_multiple %56, 16 : i32
    %c0_30 = arith.constant 0 : index
    %58 = arith.index_cast %57 : i32 to index
    %c0_31 = arith.constant 0 : index
    %59 = vector.load %arg2[%c0_30, %58, %c0_31] : memref<1x352x256xbf16, #tpu.memory_space<vmem>>, vector<1x128x256xbf16>
    %60 = vector.shape_cast %59 : vector<1x128x256xbf16> to vector<128x256xbf16>
    %c6 = arith.constant 6 : index
    %c0_32 = arith.constant 0 : index
    %c0_33 = arith.constant 0 : index
    %61 = vector.load %arg3[%c6, %c0_32, %c0_33] : memref<7x256x256xbf16, #tpu.memory_space<vmem>>, vector<1x256x256xbf16>
    %62 = vector.shape_cast %61 : vector<1x256x256xbf16> to vector<256x256xbf16>
    %cst_34 = arith.constant dense<0.000000e+00> : vector<128x256xf32>
    %63 = tpu.matmul %60, %62, %cst_34 {dimension_numbers = #tpu.dot_dimension_numbers<[1], [0], [0], [1], [0, 0, 1, 1], [], []>} : vector<128x256xbf16>, vector<256x256xbf16>, vector<128x256xf32> -> vector<128x256xf32>
    %64 = arith.addf %55, %63 : vector<128x256xf32>
    %c0_35 = arith.constant 0 : index
    %c0_36 = arith.constant 0 : index
    %65 = vector.load %arg4[%c0_35, %c0_36] : memref<1x256xf32, #tpu.memory_space<vmem>>, vector<1x256xf32>
    %66 = vector.broadcast %65 : vector<1x256xf32> to vector<128x256xf32>
    %67 = arith.addf %64, %66 : vector<128x256xf32>
    %cst_37 = arith.constant 0.000000e+00 : f32
    %68 = vector.broadcast %cst_37 : f32 to vector<128x256xf32>
    %69 = arith.maximumf %67, %68 : vector<128x256xf32>
    %c0_38 = arith.constant 0 : index
    %c0_39 = arith.constant 0 : index
    %c0_40 = arith.constant 0 : index
    %70 = vector.load %arg5[%c0_38, %c0_39, %c0_40] : memref<1x128x256xf32, #tpu.memory_space<vmem>>, vector<1x128x256xf32>
    %71 = vector.shape_cast %70 : vector<1x128x256xf32> to vector<128x256xf32>
    %72 = vector.shape_cast %69 : vector<128x256xf32> to vector<1x128x256xf32>
    tpu.vector_store %arg5[%c0_38, %c0_39, %c0_40], %72 {strides = array<i32>} : memref<1x128x256xf32, #tpu.memory_space<vmem>>, vector<1x128x256xf32>,
    return
  }
  func.func @transform_0(%arg0: i32, %arg1: i32) -> (i32, i32, i32) {
    %c0_i32 = arith.constant 0 : i32
    %c0_i32_0 = arith.constant 0 : i32
    %c0_i32_1 = arith.constant 0 : i32
    return %arg0, %c0_i32, %c0_i32_0 : i32, i32, i32
  }
  func.func @transform_1(%arg0: i32, %arg1: i32) -> (i32, i32, i32) {
    %c0_i32 = arith.constant 0 : i32
    %c0_i32_0 = arith.constant 0 : i32
    %c0_i32_1 = arith.constant 0 : i32
    %c0_i32_2 = arith.constant 0 : i32
    return %c0_i32, %c0_i32_0, %c0_i32_1 : i32, i32, i32
  }
  func.func @transform_2(%arg0: i32, %arg1: i32) -> (i32, i32) {
    %c0_i32 = arith.constant 0 : i32
    %c0_i32_0 = arith.constant 0 : i32
    %c0_i32_1 = arith.constant 0 : i32
    return %c0_i32, %c0_i32_0 : i32, i32
  }
  func.func @transform_3(%arg0: i32, %arg1: i32) -> (i32, i32, i32) {
    %c0_i32 = arith.constant 0 : i32
    %c0_i32_0 = arith.constant 0 : i32
    return %arg0, %arg1, %c0_i32 : i32, i32, i32
  }
}

module attributes {stable_mosaic.version = 11 : i64} {
  func.func @_tail_kernel(%arg0: i32, %arg1: i32, %arg2: memref<1x18x18x4xbf16, #tpu.memory_space<vmem>>, %arg3: memref<1x352x256xbf16, #tpu.memory_space<vmem>>, %arg4: memref<4x128xbf16, #tpu.memory_space<vmem>>, %arg5: memref<4x384xbf16, #tpu.memory_space<vmem>>, %arg6: memref<7x256x256xbf16, #tpu.memory_space<vmem>>, %arg7: memref<1x128xf32, #tpu.memory_space<vmem>>, %arg8: memref<1x384xf32, #tpu.memory_space<vmem>>, %arg9: memref<1x256xf32, #tpu.memory_space<vmem>>, %arg10: memref<1x128x768xf32, #tpu.memory_space<vmem>>) attributes {dimension_semantics = [#tpu.dimension_semantics<parallel>, #tpu.dimension_semantics<arbitrary>], iteration_bounds = array<i64: 2, 2>, scalar_prefetch = 0 : i64, scratch_operands = 0 : i64, tpu.core_type = #tpu.core_type<tc>, window_params = [{transform_indices = @transform_0, window_bounds = array<i64: 1, 18, 18, 4>}, {transform_indices = @transform_1, window_bounds = array<i64: 1, 352, 256>}, {pipeline_mode = #tpu.pipeline_mode<synchronous>, transform_indices = @transform_2, window_bounds = array<i64: 4, 128>}, {pipeline_mode = #tpu.pipeline_mode<synchronous>, transform_indices = @transform_3, window_bounds = array<i64: 4, 384>}, {pipeline_mode = #tpu.pipeline_mode<synchronous>, transform_indices = @transform_4, window_bounds = array<i64: 7, 256, 256>}, {pipeline_mode = #tpu.pipeline_mode<synchronous>, transform_indices = @transform_5, window_bounds = array<i64: 1, 128>}, {pipeline_mode = #tpu.pipeline_mode<synchronous>, transform_indices = @transform_6, window_bounds = array<i64: 1, 384>}, {pipeline_mode = #tpu.pipeline_mode<synchronous>, transform_indices = @transform_7, window_bounds = array<i64: 1, 256>}, {transform_indices = @transform_8, window_bounds = array<i64: 1, 128, 768>}]} {
    %c8_i32 = arith.constant 8 : i32
    %0 = arith.muli %arg1, %c8_i32 : i32
    %1 = tpu.assume_multiple %0, 8 : i32
    %c0 = arith.constant 0 : index
    %2 = arith.index_cast %1 : i32 to index
    %c0_0 = arith.constant 0 : index
    %c0_1 = arith.constant 0 : index
    %3 = vector.load %arg2[%c0, %2, %c0_0, %c0_1] : memref<1x18x18x4xbf16, #tpu.memory_space<vmem>>, vector<1x10x18x4xbf16>
    %4 = vector.shape_cast %3 : vector<1x10x18x4xbf16> to vector<10x18x4xbf16>
    %5 = vector.extract_strided_slice %4 {offsets = [0, 0, 0], sizes = [10, 16, 4], strides = [1, 1, 1]} : vector<10x18x4xbf16> to vector<10x16x4xbf16>
    %6 = arith.extf %5 : vector<10x16x4xbf16> to vector<10x16x4xf32>
    %7 = vector.extract_strided_slice %4 {offsets = [0, 1, 0], sizes = [10, 16, 4], strides = [1, 1, 1]} : vector<10x18x4xbf16> to vector<10x16x4xbf16>
    %8 = arith.extf %7 : vector<10x16x4xbf16> to vector<10x16x4xf32>
    %9 = arith.addf %6, %8 : vector<10x16x4xf32>
    %10 = vector.extract_strided_slice %4 {offsets = [0, 2, 0], sizes = [10, 16, 4], strides = [1, 1, 1]} : vector<10x18x4xbf16> to vector<10x16x4xbf16>
    %11 = arith.extf %10 : vector<10x16x4xbf16> to vector<10x16x4xf32>
    %12 = arith.addf %9, %11 : vector<10x16x4xf32>
    %13 = vector.extract_strided_slice %12 {offsets = [0, 0, 0], sizes = [8, 16, 4], strides = [1, 1, 1]} : vector<10x16x4xf32> to vector<8x16x4xf32>
    %14 = vector.extract_strided_slice %12 {offsets = [1, 0, 0], sizes = [8, 16, 4], strides = [1, 1, 1]} : vector<10x16x4xf32> to vector<8x16x4xf32>
    %15 = arith.addf %13, %14 : vector<8x16x4xf32>
    %16 = vector.extract_strided_slice %12 {offsets = [2, 0, 0], sizes = [8, 16, 4], strides = [1, 1, 1]} : vector<10x16x4xf32> to vector<8x16x4xf32>
    %17 = arith.addf %15, %16 : vector<8x16x4xf32>
    %18 = vector.shape_cast %17 : vector<8x16x4xf32> to vector<128x4xf32>
    %19 = arith.truncf %18 : vector<128x4xf32> to vector<128x4xbf16>
    %c0_2 = arith.constant 0 : index
    %c0_3 = arith.constant 0 : index
    %20 = vector.load %arg4[%c0_2, %c0_3] : memref<4x128xbf16, #tpu.memory_space<vmem>>, vector<4x128xbf16>
    %cst = arith.constant dense<0.000000e+00> : vector<128x128xf32>
    %21 = tpu.matmul %19, %20, %cst {dimension_numbers = #tpu.dot_dimension_numbers<[1], [0], [0], [1], [0, 0, 1, 1], [], []>} : vector<128x4xbf16>, vector<4x128xbf16>, vector<128x128xf32> -> vector<128x128xf32>
    %c0_4 = arith.constant 0 : index
    %c0_5 = arith.constant 0 : index
    %22 = vector.load %arg7[%c0_4, %c0_5] : memref<1x128xf32, #tpu.memory_space<vmem>>, vector<1x128xf32>
    %23 = vector.broadcast %22 : vector<1x128xf32> to vector<128x128xf32>
    %24 = arith.addf %21, %23 : vector<128x128xf32>
    %cst_6 = arith.constant 0.000000e+00 : f32
    %25 = vector.broadcast %cst_6 : f32 to vector<128x128xf32>
    %26 = arith.maximumf %24, %25 : vector<128x128xf32>
    %c0_7 = arith.constant 0 : index
    %c0_8 = arith.constant 0 : index
    %c0_9 = arith.constant 0 : index
    %27 = vector.load %arg10[%c0_7, %c0_8, %c0_9] : memref<1x128x768xf32, #tpu.memory_space<vmem>>, vector<1x128x128xf32>
    %28 = vector.shape_cast %27 : vector<1x128x128xf32> to vector<128x128xf32>
    %29 = vector.shape_cast %26 : vector<128x128xf32> to vector<1x128x128xf32>
    tpu.vector_store %arg10[%c0_7, %c0_8, %c0_9], %29 {strides = array<i32>} : memref<1x128x768xf32, #tpu.memory_space<vmem>>, vector<1x128x128xf32>,
    %30 = vector.extract_strided_slice %4 {offsets = [1, 1, 0], sizes = [8, 16, 4], strides = [1, 1, 1]} : vector<10x18x4xbf16> to vector<8x16x4xbf16>
    %31 = vector.shape_cast %30 : vector<8x16x4xbf16> to vector<128x4xbf16>
    %c0_10 = arith.constant 0 : index
    %c0_11 = arith.constant 0 : index
    %32 = vector.load %arg5[%c0_10, %c0_11] : memref<4x384xbf16, #tpu.memory_space<vmem>>, vector<4x384xbf16>
    %cst_12 = arith.constant dense<0.000000e+00> : vector<128x384xf32>
    %33 = tpu.matmul %31, %32, %cst_12 {dimension_numbers = #tpu.dot_dimension_numbers<[1], [0], [0], [1], [0, 0, 1, 1], [], []>} : vector<128x4xbf16>, vector<4x384xbf16>, vector<128x384xf32> -> vector<128x384xf32>
    %c0_13 = arith.constant 0 : index
    %c0_14 = arith.constant 0 : index
    %34 = vector.load %arg8[%c0_13, %c0_14] : memref<1x384xf32, #tpu.memory_space<vmem>>, vector<1x384xf32>
    %35 = vector.broadcast %34 : vector<1x384xf32> to vector<128x384xf32>
    %36 = arith.addf %33, %35 : vector<128x384xf32>
    %cst_15 = arith.constant 0.000000e+00 : f32
    %37 = vector.broadcast %cst_15 : f32 to vector<128x384xf32>
    %38 = arith.maximumf %36, %37 : vector<128x384xf32>
    %c0_16 = arith.constant 0 : index
    %c0_17 = arith.constant 0 : index
    %c128 = arith.constant 128 : index
    %39 = vector.load %arg10[%c0_16, %c0_17, %c128] : memref<1x128x768xf32, #tpu.memory_space<vmem>>, vector<1x128x384xf32>
    %40 = vector.shape_cast %39 : vector<1x128x384xf32> to vector<128x384xf32>
    %41 = vector.shape_cast %38 : vector<128x384xf32> to vector<1x128x384xf32>
    tpu.vector_store %arg10[%c0_16, %c0_17, %c128], %41 {strides = array<i32>} : memref<1x128x768xf32, #tpu.memory_space<vmem>>, vector<1x128x384xf32>,
    %cst_18 = arith.constant 0.000000e+00 : f32
    %42 = vector.broadcast %cst_18 : f32 to vector<128x256xf32>
    %c0_i32 = arith.constant 0 : i32
    %43 = arith.addi %0, %c0_i32 : i32
    %c16_i32 = arith.constant 16 : i32
    %44 = arith.muli %43, %c16_i32 : i32
    %45 = tpu.assume_multiple %44, 16 : i32
    %c0_19 = arith.constant 0 : index
    %46 = arith.index_cast %45 : i32 to index
    %c0_20 = arith.constant 0 : index
    %47 = vector.load %arg3[%c0_19, %46, %c0_20] : memref<1x352x256xbf16, #tpu.memory_space<vmem>>, vector<1x128x256xbf16>
    %48 = vector.shape_cast %47 : vector<1x128x256xbf16> to vector<128x256xbf16>
    %c0_21 = arith.constant 0 : index
    %c0_22 = arith.constant 0 : index
    %c0_23 = arith.constant 0 : index
    %49 = vector.load %arg6[%c0_21, %c0_22, %c0_23] : memref<7x256x256xbf16, #tpu.memory_space<vmem>>, vector<1x256x256xbf16>
    %50 = vector.shape_cast %49 : vector<1x256x256xbf16> to vector<256x256xbf16>
    %cst_24 = arith.constant dense<0.000000e+00> : vector<128x256xf32>
    %51 = tpu.matmul %48, %50, %cst_24 {dimension_numbers = #tpu.dot_dimension_numbers<[1], [0], [0], [1], [0, 0, 1, 1], [], []>} : vector<128x256xbf16>, vector<256x256xbf16>, vector<128x256xf32> -> vector<128x256xf32>
    %52 = arith.addf %42, %51 : vector<128x256xf32>
    %c1_i32 = arith.constant 1 : i32
    %53 = arith.addi %0, %c1_i32 : i32
    %c16_i32_25 = arith.constant 16 : i32
    %54 = arith.muli %53, %c16_i32_25 : i32
    %55 = tpu.assume_multiple %54, 16 : i32
    %c0_26 = arith.constant 0 : index
    %56 = arith.index_cast %55 : i32 to index
    %c0_27 = arith.constant 0 : index
    %57 = vector.load %arg3[%c0_26, %56, %c0_27] : memref<1x352x256xbf16, #tpu.memory_space<vmem>>, vector<1x128x256xbf16>
    %58 = vector.shape_cast %57 : vector<1x128x256xbf16> to vector<128x256xbf16>
    %c1 = arith.constant 1 : index
    %c0_28 = arith.constant 0 : index
    %c0_29 = arith.constant 0 : index
    %59 = vector.load %arg6[%c1, %c0_28, %c0_29] : memref<7x256x256xbf16, #tpu.memory_space<vmem>>, vector<1x256x256xbf16>
    %60 = vector.shape_cast %59 : vector<1x256x256xbf16> to vector<256x256xbf16>
    %cst_30 = arith.constant dense<0.000000e+00> : vector<128x256xf32>
    %61 = tpu.matmul %58, %60, %cst_30 {dimension_numbers = #tpu.dot_dimension_numbers<[1], [0], [0], [1], [0, 0, 1, 1], [], []>} : vector<128x256xbf16>, vector<256x256xbf16>, vector<128x256xf32> -> vector<128x256xf32>
    %62 = arith.addf %52, %61 : vector<128x256xf32>
    %c2_i32 = arith.constant 2 : i32
    %63 = arith.addi %0, %c2_i32 : i32
    %c16_i32_31 = arith.constant 16 : i32
    %64 = arith.muli %63, %c16_i32_31 : i32
    %65 = tpu.assume_multiple %64, 16 : i32
    %c0_32 = arith.constant 0 : index
    %66 = arith.index_cast %65 : i32 to index
    %c0_33 = arith.constant 0 : index
    %67 = vector.load %arg3[%c0_32, %66, %c0_33] : memref<1x352x256xbf16, #tpu.memory_space<vmem>>, vector<1x128x256xbf16>
    %68 = vector.shape_cast %67 : vector<1x128x256xbf16> to vector<128x256xbf16>
    %c2 = arith.constant 2 : index
    %c0_34 = arith.constant 0 : index
    %c0_35 = arith.constant 0 : index
    %69 = vector.load %arg6[%c2, %c0_34, %c0_35] : memref<7x256x256xbf16, #tpu.memory_space<vmem>>, vector<1x256x256xbf16>
    %70 = vector.shape_cast %69 : vector<1x256x256xbf16> to vector<256x256xbf16>
    %cst_36 = arith.constant dense<0.000000e+00> : vector<128x256xf32>
    %71 = tpu.matmul %68, %70, %cst_36 {dimension_numbers = #tpu.dot_dimension_numbers<[1], [0], [0], [1], [0, 0, 1, 1], [], []>} : vector<128x256xbf16>, vector<256x256xbf16>, vector<128x256xf32> -> vector<128x256xf32>
    %72 = arith.addf %62, %71 : vector<128x256xf32>
    %c3_i32 = arith.constant 3 : i32
    %73 = arith.addi %0, %c3_i32 : i32
    %c16_i32_37 = arith.constant 16 : i32
    %74 = arith.muli %73, %c16_i32_37 : i32
    %75 = tpu.assume_multiple %74, 16 : i32
    %c0_38 = arith.constant 0 : index
    %76 = arith.index_cast %75 : i32 to index
    %c0_39 = arith.constant 0 : index
    %77 = vector.load %arg3[%c0_38, %76, %c0_39] : memref<1x352x256xbf16, #tpu.memory_space<vmem>>, vector<1x128x256xbf16>
    %78 = vector.shape_cast %77 : vector<1x128x256xbf16> to vector<128x256xbf16>
    %c3 = arith.constant 3 : index
    %c0_40 = arith.constant 0 : index
    %c0_41 = arith.constant 0 : index
    %79 = vector.load %arg6[%c3, %c0_40, %c0_41] : memref<7x256x256xbf16, #tpu.memory_space<vmem>>, vector<1x256x256xbf16>
    %80 = vector.shape_cast %79 : vector<1x256x256xbf16> to vector<256x256xbf16>
    %cst_42 = arith.constant dense<0.000000e+00> : vector<128x256xf32>
    %81 = tpu.matmul %78, %80, %cst_42 {dimension_numbers = #tpu.dot_dimension_numbers<[1], [0], [0], [1], [0, 0, 1, 1], [], []>} : vector<128x256xbf16>, vector<256x256xbf16>, vector<128x256xf32> -> vector<128x256xf32>
    %82 = arith.addf %72, %81 : vector<128x256xf32>
    %c4_i32 = arith.constant 4 : i32
    %83 = arith.addi %0, %c4_i32 : i32
    %c16_i32_43 = arith.constant 16 : i32
    %84 = arith.muli %83, %c16_i32_43 : i32
    %85 = tpu.assume_multiple %84, 16 : i32
    %c0_44 = arith.constant 0 : index
    %86 = arith.index_cast %85 : i32 to index
    %c0_45 = arith.constant 0 : index
    %87 = vector.load %arg3[%c0_44, %86, %c0_45] : memref<1x352x256xbf16, #tpu.memory_space<vmem>>, vector<1x128x256xbf16>
    %88 = vector.shape_cast %87 : vector<1x128x256xbf16> to vector<128x256xbf16>
    %c4 = arith.constant 4 : index
    %c0_46 = arith.constant 0 : index
    %c0_47 = arith.constant 0 : index
    %89 = vector.load %arg6[%c4, %c0_46, %c0_47] : memref<7x256x256xbf16, #tpu.memory_space<vmem>>, vector<1x256x256xbf16>
    %90 = vector.shape_cast %89 : vector<1x256x256xbf16> to vector<256x256xbf16>
    %cst_48 = arith.constant dense<0.000000e+00> : vector<128x256xf32>
    %91 = tpu.matmul %88, %90, %cst_48 {dimension_numbers = #tpu.dot_dimension_numbers<[1], [0], [0], [1], [0, 0, 1, 1], [], []>} : vector<128x256xbf16>, vector<256x256xbf16>, vector<128x256xf32> -> vector<128x256xf32>
    %92 = arith.addf %82, %91 : vector<128x256xf32>
    %c5_i32 = arith.constant 5 : i32
    %93 = arith.addi %0, %c5_i32 : i32
    %c16_i32_49 = arith.constant 16 : i32
    %94 = arith.muli %93, %c16_i32_49 : i32
    %95 = tpu.assume_multiple %94, 16 : i32
    %c0_50 = arith.constant 0 : index
    %96 = arith.index_cast %95 : i32 to index
    %c0_51 = arith.constant 0 : index
    %97 = vector.load %arg3[%c0_50, %96, %c0_51] : memref<1x352x256xbf16, #tpu.memory_space<vmem>>, vector<1x128x256xbf16>
    %98 = vector.shape_cast %97 : vector<1x128x256xbf16> to vector<128x256xbf16>
    %c5 = arith.constant 5 : index
    %c0_52 = arith.constant 0 : index
    %c0_53 = arith.constant 0 : index
    %99 = vector.load %arg6[%c5, %c0_52, %c0_53] : memref<7x256x256xbf16, #tpu.memory_space<vmem>>, vector<1x256x256xbf16>
    %100 = vector.shape_cast %99 : vector<1x256x256xbf16> to vector<256x256xbf16>
    %cst_54 = arith.constant dense<0.000000e+00> : vector<128x256xf32>
    %101 = tpu.matmul %98, %100, %cst_54 {dimension_numbers = #tpu.dot_dimension_numbers<[1], [0], [0], [1], [0, 0, 1, 1], [], []>} : vector<128x256xbf16>, vector<256x256xbf16>, vector<128x256xf32> -> vector<128x256xf32>
    %102 = arith.addf %92, %101 : vector<128x256xf32>
    %c6_i32 = arith.constant 6 : i32
    %103 = arith.addi %0, %c6_i32 : i32
    %c16_i32_55 = arith.constant 16 : i32
    %104 = arith.muli %103, %c16_i32_55 : i32
    %105 = tpu.assume_multiple %104, 16 : i32
    %c0_56 = arith.constant 0 : index
    %106 = arith.index_cast %105 : i32 to index
    %c0_57 = arith.constant 0 : index
    %107 = vector.load %arg3[%c0_56, %106, %c0_57] : memref<1x352x256xbf16, #tpu.memory_space<vmem>>, vector<1x128x256xbf16>
    %108 = vector.shape_cast %107 : vector<1x128x256xbf16> to vector<128x256xbf16>
    %c6 = arith.constant 6 : index
    %c0_58 = arith.constant 0 : index
    %c0_59 = arith.constant 0 : index
    %109 = vector.load %arg6[%c6, %c0_58, %c0_59] : memref<7x256x256xbf16, #tpu.memory_space<vmem>>, vector<1x256x256xbf16>
    %110 = vector.shape_cast %109 : vector<1x256x256xbf16> to vector<256x256xbf16>
    %cst_60 = arith.constant dense<0.000000e+00> : vector<128x256xf32>
    %111 = tpu.matmul %108, %110, %cst_60 {dimension_numbers = #tpu.dot_dimension_numbers<[1], [0], [0], [1], [0, 0, 1, 1], [], []>} : vector<128x256xbf16>, vector<256x256xbf16>, vector<128x256xf32> -> vector<128x256xf32>
    %112 = arith.addf %102, %111 : vector<128x256xf32>
    %c0_61 = arith.constant 0 : index
    %c0_62 = arith.constant 0 : index
    %113 = vector.load %arg9[%c0_61, %c0_62] : memref<1x256xf32, #tpu.memory_space<vmem>>, vector<1x256xf32>
    %114 = vector.broadcast %113 : vector<1x256xf32> to vector<128x256xf32>
    %115 = arith.addf %112, %114 : vector<128x256xf32>
    %cst_63 = arith.constant 0.000000e+00 : f32
    %116 = vector.broadcast %cst_63 : f32 to vector<128x256xf32>
    %117 = arith.maximumf %115, %116 : vector<128x256xf32>
    %c0_64 = arith.constant 0 : index
    %c0_65 = arith.constant 0 : index
    %c512 = arith.constant 512 : index
    %118 = vector.load %arg10[%c0_64, %c0_65, %c512] : memref<1x128x768xf32, #tpu.memory_space<vmem>>, vector<1x128x256xf32>
    %119 = vector.shape_cast %118 : vector<1x128x256xf32> to vector<128x256xf32>
    %120 = vector.shape_cast %117 : vector<128x256xf32> to vector<1x128x256xf32>
    tpu.vector_store %arg10[%c0_64, %c0_65, %c512], %120 {strides = array<i32>} : memref<1x128x768xf32, #tpu.memory_space<vmem>>, vector<1x128x256xf32>,
    return
  }
  func.func @transform_0(%arg0: i32, %arg1: i32) -> (i32, i32, i32, i32) {
    %c0_i32 = arith.constant 0 : i32
    %c0_i32_0 = arith.constant 0 : i32
    %c0_i32_1 = arith.constant 0 : i32
    %c0_i32_2 = arith.constant 0 : i32
    return %arg0, %c0_i32, %c0_i32_0, %c0_i32_1 : i32, i32, i32, i32
  }
  func.func @transform_1(%arg0: i32, %arg1: i32) -> (i32, i32, i32) {
    %c0_i32 = arith.constant 0 : i32
    %c0_i32_0 = arith.constant 0 : i32
    %c0_i32_1 = arith.constant 0 : i32
    return %arg0, %c0_i32, %c0_i32_0 : i32, i32, i32
  }
  func.func @transform_2(%arg0: i32, %arg1: i32) -> (i32, i32) {
    %c0_i32 = arith.constant 0 : i32
    %c0_i32_0 = arith.constant 0 : i32
    %c0_i32_1 = arith.constant 0 : i32
    return %c0_i32, %c0_i32_0 : i32, i32
  }
  func.func @transform_3(%arg0: i32, %arg1: i32) -> (i32, i32) {
    %c0_i32 = arith.constant 0 : i32
    %c0_i32_0 = arith.constant 0 : i32
    %c0_i32_1 = arith.constant 0 : i32
    return %c0_i32, %c0_i32_0 : i32, i32
  }
  func.func @transform_4(%arg0: i32, %arg1: i32) -> (i32, i32, i32) {
    %c0_i32 = arith.constant 0 : i32
    %c0_i32_0 = arith.constant 0 : i32
    %c0_i32_1 = arith.constant 0 : i32
    %c0_i32_2 = arith.constant 0 : i32
    return %c0_i32, %c0_i32_0, %c0_i32_1 : i32, i32, i32
  }
  func.func @transform_5(%arg0: i32, %arg1: i32) -> (i32, i32) {
    %c0_i32 = arith.constant 0 : i32
    %c0_i32_0 = arith.constant 0 : i32
    %c0_i32_1 = arith.constant 0 : i32
    return %c0_i32, %c0_i32_0 : i32, i32
  }
  func.func @transform_6(%arg0: i32, %arg1: i32) -> (i32, i32) {
    %c0_i32 = arith.constant 0 : i32
    %c0_i32_0 = arith.constant 0 : i32
    %c0_i32_1 = arith.constant 0 : i32
    return %c0_i32, %c0_i32_0 : i32, i32
  }
  func.func @transform_7(%arg0: i32, %arg1: i32) -> (i32, i32) {
    %c0_i32 = arith.constant 0 : i32
    %c0_i32_0 = arith.constant 0 : i32
    %c0_i32_1 = arith.constant 0 : i32
    return %c0_i32, %c0_i32_0 : i32, i32
  }
  func.func @transform_8(%arg0: i32, %arg1: i32) -> (i32, i32, i32) {
    %c0_i32 = arith.constant 0 : i32
    %c0_i32_0 = arith.constant 0 : i32
    return %arg0, %arg1, %c0_i32 : i32, i32, i32
  }
}

</mosaic_0001>

<bundles_post_ra>
// kernel: inception_b.7
= control target key start
LH: loop header
LB: loop body
LE: loop exit
PB: predicated region body
PF: predicated region fallthrough
CT: control target
= control target key end

     0   :  { %8 = vsyncpa [#allocation3], 0  ;;  %s2155_s0 = inlined_call_operand.vmem [shape: bf16[512,4], index: 0, kind: input, shape index: {}]   ;;  %s2156_s1 = inlined_call_operand.hbm [shape: bf16[4,512], index: 1, kind: input, shape index: {}]   ;;  %s2157_s2 = inlined_call_operand.hbm [shape: f32[1,512], index: 2, kind: input, shape index: {}]   ;;  %s2158_s3 = inlined_call_operand.vmem [shape: bf16[512,512], index: 3, kind: output, shape index: {}]  }
   0x1   :  { %9 = vsyncpa [#allocation5], 0  ;;  %s1795_s12 = smov 0  }
   0x2 LB: > { %s1460_s13 = sadd.s32 4294967295, %s1769_s12   ;;  %p1462_p0 = scmp.ge.s32.totalorder %s1769_s12, 1  ;;  %s1769_s12 = sphi %s1795_s12, %s15_s12  }
   0x3   : > { %p114_p1 = scmp.lt.s32.totalorder %s1769_s12, 3  ;;  %p1805_p2 = scmp.eq.s32.totalorder %s1460_s13, 0 }
   0x4   : > { %s1771_s16 = smov [#allocation2]   ;;  %s1772_s18 = smov [#allocation4]  }
   0x5   : > { %s2162_s14 = scalar_select %p1805_p2, 1, 0 }
   0x6   : > { %p1809_p3 = pnand %p1462_p0, %p114_p1  ;;  %s127_s17 = sshll.u32 %s1771_s16, 4  ;;  %s128_s17 = int_to_ptr.vmem [resolvable:$true] %s127_s17 }
   0x7   : > { %s138_s19 = sshll.u32 %s1772_s18, 4  ;;  %s1714_s21 = scalar_lea.vmem %s128_s17, 128  ;;  %s139_s19 = int_to_ptr.vmem [resolvable:$true] %s138_s19 }
   0x8   : > { %s2163_s15 = scalar_select %p1809_p3, 1, 0 }
   0x9   : > { %p1663_p4 = pneg %p1809_p3  ;;  %p1715_p7 = scmp.ne.s32.totalorder %s128_s17, %s1714_s21 }
   0xa   : > { %p1722_p10 = scmp.lt.s32.totalorder %s128_s17, %s128_s17  ;;  %p1723_p11 = scmp.lt.s32.totalorder %s1714_s21, %s1714_s21 }
   0xb   : > { %p1817_p5 = pnand %p1805_p2, %p1663_p4 }
   0xc   : > { %p1724_p12 = por %p1723_p11, %p1722_p10 }
   0xd   : > { %p1705_p6 = pneg %p1817_p5 }
   0xf   : > { %p1717_p8 = pnand %p1715_p7, %p1705_p6 }
  0x11   : > { %p1718_p9 = pneg %p1717_p8 }
  0x13   : > { %p1725_p13 = pnand %p1724_p12, %p1718_p9 }
  0x15   : > { %1728 = shalt.err (!%p1725_p13)
}
  0x16   : > { %1666 = dma.hbm_to_vmem [thread:$0]  (!%p1817_p5), %s2156_s1, 128, %s128_s17, [#allocation3]  }
  0x17   : > { %s1740_s24 = scalar_lea.vmem %s139_s19, 64  ;;  %p1748_p7 = scmp.lt.s32.totalorder %s139_s19, %s139_s19 }
  0x18   : > { %p1741_p0 = scmp.ne.s32.totalorder %s139_s19, %s1740_s24  ;;  %p1749_p8 = scmp.lt.s32.totalorder %s1740_s24, %s1740_s24 }
  0x1a   : > { %p1743_p1 = pnand %p1741_p0, %p1705_p6  ;;  %p1750_p2 = por %p1749_p8, %p1748_p7 }
  0x1c   : > { %p1744_p4 = pneg %p1743_p1 }
  0x1e   : > { %p1751_p3 = pnand %p1750_p2, %p1744_p4 }
  0x20   : > { %1754 = shalt.err (!%p1751_p3)
}
  0x21   : > { %1669 = dma.hbm_to_vmem [thread:$0]  (!%p1817_p5), %s2157_s2, 64, %s139_s19, [#allocation5]  }
  0x22   : > { %p2165_p9 = scmp.ne.s32.totalorder %s2163_s15, 0 }
  0x23   : > { %p2166_p10 = scmp.ne.s32.totalorder (!%p2165_p9), %s2162_s14, 0 }
  0x24   : > { %160 = sbr.rel (%p2165_p9) target bundleno = 386 (0x182), region = 32 }
  0x29   : > { %1760 = dma.done.wait (%p2166_p10), [#allocation3], 128  }
  0x2a   : > { %1762 = vsyncadd (%p2166_p10), [#allocation3], 4294967168 }
  0x2b   : > { %1764 = dma.done.wait (%p2166_p10), [#allocation5], 64  }
  0x2c   : > { %1766 = vsyncadd (%p2166_p10), [#allocation5], 4294967232  ;;  %v238_v0 = vlaneseq  ;;  %v1773_v1 = vmov 1983009808   ;;  %v1774_v3 = vmov 0   ;;  %s1469_s27 = sshll.u32 %s1460_s13, 5 }
  0x2d   : > { %v341_v2 = vunpack.c.l.s4 %v1773_v1  ;;  %450 = vmatprep.mubr.bf16.mxu0 %v1774_v3  ;;  %643 = vmatprep.mubr.bf16.mxu1 %v1774_v3  ;;  %p190_p2 = scmp.lt.s32.totalorder %s1469_s27, 63  ;;  %v235_v7 = vld [vmem:[#allocation2] sm:$0xff]  ;;  %vm405_vm0 = vcmask 1041408   ;;  %vm356_vm1 = vcmask 31744   ;;  %v236_v32 = vld [vmem:[#allocation4] sm:$0xf] }
  0x2e   : > { %v1853_v4 = vshrl.u32 %v238_v0, 7  ;;  %v339_v9 = vcombine.high %v235_v7, %v235_v7 }
  0x2f   : > { %v342_v5 = vunpack.c.0.s8 %v341_v2  ;;  %s2168_s27 = smov (!%p190_p2, %s1469_s27), 63 }
  0x30   : > { %s1470_s28 = sshll.u32 %s2168_s27, 2  ;;  %v240_v31 = vsub.s32 0, %v1853_v4  ;;  %v244_v33 = vsub.s32 1, %v1853_v4  ;;  %v248_v34 = vsub.s32 2, %v1853_v4  ;;  %v252_v36 = vsub.s32 3, %v1853_v4  ;;  %s1590_s5 = sshll.u32 %s2168_s27, 4 }
  0x31   : > { %v345_v6 = vsub.s32 %v342_v5, %v1853_v4  ;;  %s1862_s4 = scalar_lea.vmem %s2155_s0, %s1470_s28  ;;  %s1963_s8 = scalar_lea.vmem %s2158_s3, %s1590_s5 }
  0x32   : > { %v1687_v15 = vld [vmem:[%s1862_s4] sm:$0xff]   ;;  %v1688_v16 = vld [vmem:[%s1862_s4 + $0x8] sm:$0xff]   ;;  %v1689_v17 = vld [vmem:[%s1862_s4 + $0x10] sm:$0xff]   ;;  %v1945_v35 = vrot.slane %v236_v32, %v240_v31  ;;  %v1948_v37 = vrot.slane %v236_v32, %v244_v33  ;;  %v1950_v38 = vrot.slane %v236_v32, %v248_v34  ;;  %v1953_v41 = vrot.slane %v236_v32, %v252_v36 }
  0x33   : > { %v346_v8 = vrot.slane %v235_v7, %v345_v6  ;;  %v353_v12 = vrot.slane %v339_v9, %v345_v6  ;;  %v1690_v18 = vld [vmem:[%s1862_s4 + $0x18] sm:$0xff]   ;;  %v1691_v19 = vld [vmem:[%s1862_s4 + $0x20] sm:$0xff]   ;;  %v1692_v20 = vld [vmem:[%s1862_s4 + $0x28] sm:$0xff]  }
  0x34   : > { %v1693_v21 = vld [vmem:[%s1862_s4 + $0x30] sm:$0xff]   ;;  %v1694_v22 = vld [vmem:[%s1862_s4 + $0x38] sm:$0xff]   ;;  %v1695_v23 = vld [vmem:[%s1862_s4 + $0x40] sm:$0xff]  }
  0x35   : > { %v354_v10 = vcombine.high %v346_v8, %v346_v8  ;;  %v407_v11 = vsel %vm405_vm0, %v346_v8, 0  ;;  %v355_v13 = vcombine.high %v353_v12, %v353_v12  ;;  %v413_v14 = vsel %vm405_vm0, %v353_v12, 0  ;;  %v1696_v24 = vld [vmem:[%s1862_s4 + $0x48] sm:$0xff]   ;;  %v1697_v25 = vld [vmem:[%s1862_s4 + $0x50] sm:$0xff]   ;;  %v1698_v26 = vld [vmem:[%s1862_s4 + $0x58] sm:$0xff]  }
  0x36   : > { %v1699_v27 = vld [vmem:[%s1862_s4 + $0x60] sm:$0xff]   ;;  %v1700_v28 = vld [vmem:[%s1862_s4 + $0x68] sm:$0xff]   ;;  %v1701_v29 = vld [vmem:[%s1862_s4 + $0x70] sm:$0xff]  }
  0x37   : > { %1490 = vmatprep.subr.msk.bf16.mxu0 %vm405_vm0, %v354_v10  ;;  %1507 = vmatprep.subr.msk.bf16.mxu1 %vm405_vm0, %v355_v13  ;;  %v1702_v30 = vld [vmem:[%s1862_s4 + $0x78] sm:$0xff]  }
  0x38   : > { %433 = vmatpush1.bf16.msra.mxu0 %v407_v11  ;;  %626 = vmatpush1.bf16.msra.mxu1 %v413_v14 }
  0x3b   : > { %1491 = vmatmul.mubr.msk.bf16.vlgmr.msra.gmra.mxu0 %vm356_vm1, %v1687_v15  ;;  %1508 = vmatmul.mubr.msk.bf16.vlgmr.msra.gmra.mxu1 %vm356_vm1, %v1687_v15 }
  0x3c   : > { %460 = vmatprep.mubr.bf16.mxu0 %v1774_v3  ;;  %653 = vmatprep.mubr.bf16.mxu1 %v1774_v3 }
  0x43   : > { %1492 = vmatmul.mubr.msk.bf16.gmra.mxu0 %vm356_vm1, %v1688_v16  ;;  %1509 = vmatmul.mubr.msk.bf16.gmra.mxu1 %vm356_vm1, %v1688_v16 }
  0x44   : > { %470 = vmatprep.mubr.bf16.mxu0 %v1774_v3  ;;  %663 = vmatprep.mubr.bf16.mxu1 %v1774_v3 }
  0x4b   : > { %1493 = vmatmul.mubr.msk.bf16.gmra.mxu0 %vm356_vm1, %v1689_v17  ;;  %1510 = vmatmul.mubr.msk.bf16.gmra.mxu1 %vm356_vm1, %v1689_v17 }
  0x4c   : > { %480 = vmatprep.mubr.bf16.mxu0 %v1774_v3  ;;  %673 = vmatprep.mubr.bf16.mxu1 %v1774_v3 }
  0x53   : > { %1494 = vmatmul.mubr.msk.bf16.gmra.mxu0 %vm356_vm1, %v1690_v18  ;;  %1511 = vmatmul.mubr.msk.bf16.gmra.mxu1 %vm356_vm1, %v1690_v18 }
  0x54   : > { %490 = vmatprep.mubr.bf16.mxu0 %v1774_v3  ;;  %683 = vmatprep.mubr.bf16.mxu1 %v1774_v3 }
  0x5b   : > { %1495 = vmatmul.mubr.msk.bf16.gmra.mxu0 %vm356_vm1, %v1691_v19  ;;  %1512 = vmatmul.mubr.msk.bf16.gmra.mxu1 %vm356_vm1, %v1691_v19 }
  0x5c   : > { %500 = vmatprep.mubr.bf16.mxu0 %v1774_v3  ;;  %693 = vmatprep.mubr.bf16.mxu1 %v1774_v3 }
  0x63   : > { %1496 = vmatmul.mubr.msk.bf16.gmra.mxu0 %vm356_vm1, %v1692_v20  ;;  %1513 = vmatmul.mubr.msk.bf16.gmra.mxu1 %vm356_vm1, %v1692_v20 }
  0x64   : > { %510 = vmatprep.mubr.bf16.mxu0 %v1774_v3  ;;  %703 = vmatprep.mubr.bf16.mxu1 %v1774_v3 }
  0x6b   : > { %1497 = vmatmul.mubr.msk.bf16.gmra.mxu0 %vm356_vm1, %v1693_v21  ;;  %1514 = vmatmul.mubr.msk.bf16.gmra.mxu1 %vm356_vm1, %v1693_v21 }
  0x6c   : > { %520 = vmatprep.mubr.bf16.mxu0 %v1774_v3  ;;  %713 = vmatprep.mubr.bf16.mxu1 %v1774_v3 }
  0x73   : > { %1498 = vmatmul.mubr.msk.bf16.gmra.mxu0 %vm356_vm1, %v1694_v22  ;;  %1515 = vmatmul.mubr.msk.bf16.gmra.mxu1 %vm356_vm1, %v1694_v22 }
  0x74   : > { %530 = vmatprep.mubr.bf16.mxu0 %v1774_v3  ;;  %723 = vmatprep.mubr.bf16.mxu1 %v1774_v3 }
  0x7b   : > { %1499 = vmatmul.mubr.msk.bf16.gmra.mxu0 %vm356_vm1, %v1695_v23  ;;  %1516 = vmatmul.mubr.msk.bf16.gmra.mxu1 %vm356_vm1, %v1695_v23 }
  0x7c   : > { %540 = vmatprep.mubr.bf16.mxu0 %v1774_v3  ;;  %733 = vmatprep.mubr.bf16.mxu1 %v1774_v3 }
  0x83   : > { %1500 = vmatmul.mubr.msk.bf16.gmra.mxu0 %vm356_vm1, %v1696_v24  ;;  %1517 = vmatmul.mubr.msk.bf16.gmra.mxu1 %vm356_vm1, %v1696_v24 }
  0x84   : > { %550 = vmatprep.mubr.bf16.mxu0 %v1774_v3  ;;  %743 = vmatprep.mubr.bf16.mxu1 %v1774_v3 }
  0x8b   : > { %1501 = vmatmul.mubr.msk.bf16.gmra.mxu0 %vm356_vm1, %v1697_v25  ;;  %1518 = vmatmul.mubr.msk.bf16.gmra.mxu1 %vm356_vm1, %v1697_v25 }
  0x8c   : > { %560 = vmatprep.mubr.bf16.mxu0 %v1774_v3  ;;  %753 = vmatprep.mubr.bf16.mxu1 %v1774_v3 }
  0x93   : > { %1502 = vmatmul.mubr.msk.bf16.gmra.mxu0 %vm356_vm1, %v1698_v26  ;;  %1519 = vmatmul.mubr.msk.bf16.gmra.mxu1 %vm356_vm1, %v1698_v26 }
  0x94   : > { %570 = vmatprep.mubr.bf16.mxu0 %v1774_v3  ;;  %763 = vmatprep.mubr.bf16.mxu1 %v1774_v3 }
  0x9b   : > { %1503 = vmatmul.mubr.msk.bf16.gmra.mxu0 %vm356_vm1, %v1699_v27  ;;  %1520 = vmatmul.mubr.msk.bf16.gmra.mxu1 %vm356_vm1, %v1699_v27 }
  0x9c   : > { %580 = vmatprep.mubr.bf16.mxu0 %v1774_v3  ;;  %773 = vmatprep.mubr.bf16.mxu1 %v1774_v3 }
  0xa3   : > { %1504 = vmatmul.mubr.msk.bf16.gmra.mxu0 %vm356_vm1, %v1700_v28  ;;  %1521 = vmatmul.mubr.msk.bf16.gmra.mxu1 %vm356_vm1, %v1700_v28 }
  0xa4   : > { %590 = vmatprep.mubr.bf16.mxu0 %v1774_v3  ;;  %783 = vmatprep.mubr.bf16.mxu1 %v1774_v3 }
  0xab   : > { %1505 = vmatmul.mubr.msk.bf16.gmra.mxu0 %vm356_vm1, %v1701_v29  ;;  %1522 = vmatmul.mubr.msk.bf16.gmra.mxu1 %vm356_vm1, %v1701_v29 }
  0xac   : > { %600 = vmatprep.mubr.bf16.mxu0 %v1774_v3  ;;  %793 = vmatprep.mubr.bf16.mxu1 %v1774_v3 }
  0xb3   : > { %1506 = vmatmul.mubr.msk.bf16.gmra.mxu0 %vm356_vm1, %v1702_v30  ;;  %1523 = vmatmul.mubr.msk.bf16.gmra.mxu1 %vm356_vm1, %v1702_v30 }
  0xfb   : > { %v452_v39 = vpop.f32.mrf.mxu0  ;;  %v645_v43 = vpop.f32.mrf.mxu1 }
  0xfc   : > { %v453_v40 = vadd.f32 %v452_v39, %v1945_v35  ;;  %v646_v46 = vadd.f32 %v645_v43, %v1950_v38 }
  0xfd   : > { %v454_v42 = vpop.f32.mrf.mxu0  ;;  %v647_v48 = vpop.f32.mrf.mxu1 }
  0xfe   : > { %v804_v44 = vmax.f32 %v453_v40, 0.0  ;;  %v455_v45 = vadd.f32 %v454_v42, %v1948_v37  ;;  %v648_v51 = vadd.f32 %v647_v48, %v1953_v41  ;;  %v806_v55 = vmax.f32 %v646_v46, 0.0 }
  0xff   : > { %v456_v47 = vpop.f32.mrf.mxu0  ;;  %v649_v53 = vpop.f32.mrf.mxu1 }
 0x100   : > { %v805_v49 = vmax.f32 %v455_v45, 0.0  ;;  %v457_v50 = vadd.f32 %v456_v47, %v1945_v35  ;;  %v807_v56 = vmax.f32 %v648_v51, 0.0  ;;  %v650_v59 = vadd.f32 %v649_v53, %v1950_v38 }
 0x101   : > { %v458_v52 = vpop.f32.mrf.mxu0  ;;  %v651_v61 = vpop.f32.mrf.mxu1 }
 0x102   : > { %v1591_v54 = vpack.c.bf16 %v805_v49, %v804_v44  ;;  %v459_v57 = vadd.f32 %v458_v52, %v1948_v37  ;;  %v808_v58 = vmax.f32 %v457_v50, 0.0  ;;  %v1592_v62 = vpack.c.bf16 %v807_v56, %v806_v55 }
 0x103   : > { %v462_v60 = vpop.f32.mrf.mxu0  ;;  %v652_v1 = vadd.f32 %v651_v61, %v1953_v41  ;;  %v810_v2 = vmax.f32 %v650_v59, 0.0  ;;  %v655_v4 = vpop.f32.mrf.mxu1 }
 0x104   : > { %1316 = vst [vmem:[%s1963_s8] sm:$0xff] %v1591_v54  ;;  %v809_v63 = vmax.f32 %v459_v57, 0.0  ;;  %v463_v0 = vadd.f32 %v462_v60, %v1945_v35  ;;  %1317 = vst [vmem:[%s1963_s8 + $0x8] sm:$0xff] %v1592_v62  ;;  %v656_v9 = vadd.f32 %v655_v4, %v1950_v38 }
 0x105   : > { %v464_v3 = vpop.f32.mrf.mxu0  ;;  %v811_v7 = vmax.f32 %v652_v1, 0.0  ;;  %v657_v11 = vpop.f32.mrf.mxu1 }
 0x106   : > { %v1593_v5 = vpack.c.bf16 %v809_v63, %v808_v58  ;;  %v812_v6 = vmax.f32 %v463_v0, 0.0  ;;  %v465_v8 = vadd.f32 %v464_v3, %v1948_v37  ;;  %v658_v15 = vadd.f32 %v657_v11, %v1953_v41 }
 0x107   : > { %v466_v10 = vpop.f32.mrf.mxu0  ;;  %v1594_v12 = vpack.c.bf16 %v811_v7, %v810_v2  ;;  %v659_v17 = vpop.f32.mrf.mxu1  ;;  %v814_v19 = vmax.f32 %v656_v9, 0.0 }
 0x108   : > { %1318 = vst [vmem:[%s1963_s8 + $0x10] sm:$0xff] %v1593_v5  ;;  %v813_v13 = vmax.f32 %v465_v8, 0.0  ;;  %v467_v14 = vadd.f32 %v466_v10, %v1945_v35  ;;  %v815_v20 = vmax.f32 %v658_v15, 0.0  ;;  %v660_v23 = vadd.f32 %v659_v17, %v1950_v38 }
 0x109   : > { %v468_v16 = vpop.f32.mrf.mxu0  ;;  %1319 = vst [vmem:[%s1963_s8 + $0x18] sm:$0xff] %v1594_v12  ;;  %v661_v25 = vpop.f32.mrf.mxu1 }
 0x10a   : > { %v1595_v18 = vpack.c.bf16 %v813_v13, %v812_v6  ;;  %v469_v21 = vadd.f32 %v468_v16, %v1948_v37  ;;  %v816_v22 = vmax.f32 %v467_v14, 0.0  ;;  %v1596_v26 = vpack.c.bf16 %v815_v20, %v814_v19 }
 0x10b   : > { %v472_v24 = vpop.f32.mrf.mxu0  ;;  %v662_v29 = vadd.f32 %v661_v25, %v1953_v41  ;;  %v818_v30 = vmax.f32 %v660_v23, 0.0  ;;  %v665_v32 = vpop.f32.mrf.mxu1 }
 0x10c   : > { %1320 = vst [vmem:[%s1963_s8 + $0x20] sm:$0xff] %v1595_v18  ;;  %v817_v27 = vmax.f32 %v469_v21, 0.0  ;;  %v473_v28 = vadd.f32 %v472_v24, %v1945_v35  ;;  %1321 = vst [vmem:[%s1963_s8 + $0x28] sm:$0xff] %v1596_v26  ;;  %v666_v40 = vadd.f32 %v665_v32, %v1950_v38 }
 0x10d   : > { %v474_v31 = vpop.f32.mrf.mxu0  ;;  %v819_v36 = vmax.f32 %v662_v29, 0.0  ;;  %v667_v43 = vpop.f32.mrf.mxu1 }
 0x10e   : > { %v1597_v33 = vpack.c.bf16 %v817_v27, %v816_v22  ;;  %v820_v34 = vmax.f32 %v473_v28, 0.0  ;;  %v475_v39 = vadd.f32 %v474_v31, %v1948_v37  ;;  %v668_v47 = vadd.f32 %v667_v43, %v1953_v41 }
 0x10f   : > { %v476_v42 = vpop.f32.mrf.mxu0  ;;  %v1598_v44 = vpack.c.bf16 %v819_v36, %v818_v30  ;;  %v669_v49 = vpop.f32.mrf.mxu1  ;;  %v822_v51 = vmax.f32 %v666_v40, 0.0 }
 0x110   : > { %1322 = vst [vmem:[%s1963_s8 + $0x30] sm:$0xff] %v1597_v33  ;;  %v821_v45 = vmax.f32 %v475_v39, 0.0  ;;  %v477_v46 = vadd.f32 %v476_v42, %v1945_v35  ;;  %v823_v52 = vmax.f32 %v668_v47, 0.0  ;;  %v670_v55 = vadd.f32 %v669_v49, %v1950_v38 }
 0x111   : > { %v478_v48 = vpop.f32.mrf.mxu0  ;;  %1323 = vst [vmem:[%s1963_s8 + $0x38] sm:$0xff] %v1598_v44  ;;  %v671_v57 = vpop.f32.mrf.mxu1 }
 0x112   : > { %v1599_v50 = vpack.c.bf16 %v821_v45, %v820_v34  ;;  %v479_v53 = vadd.f32 %v478_v48, %v1948_v37  ;;  %v824_v54 = vmax.f32 %v477_v46, 0.0  ;;  %v1600_v58 = vpack.c.bf16 %v823_v52, %v822_v51 }
 0x113   : > { %v482_v56 = vpop.f32.mrf.mxu0  ;;  %v672_v61 = vadd.f32 %v671_v57, %v1953_v41  ;;  %v826_v62 = vmax.f32 %v670_v55, 0.0  ;;  %v675_v0 = vpop.f32.mrf.mxu1 }
 0x114   : > { %1324 = vst [vmem:[%s1963_s8 + $0x40] sm:$0xff] %v1599_v50  ;;  %v825_v59 = vmax.f32 %v479_v53, 0.0  ;;  %v483_v60 = vadd.f32 %v482_v56, %v1945_v35  ;;  %1325 = vst [vmem:[%s1963_s8 + $0x48] sm:$0xff] %v1600_v58  ;;  %v676_v5 = vadd.f32 %v675_v0, %v1950_v38 }
 0x115   : > { %v484_v63 = vpop.f32.mrf.mxu0  ;;  %v827_v3 = vmax.f32 %v672_v61, 0.0  ;;  %v677_v7 = vpop.f32.mrf.mxu1 }
 0x116   : > { %v1601_v1 = vpack.c.bf16 %v825_v59, %v824_v54  ;;  %v828_v2 = vmax.f32 %v483_v60, 0.0  ;;  %v485_v4 = vadd.f32 %v484_v63, %v1948_v37  ;;  %v678_v11 = vadd.f32 %v677_v7, %v1953_v41 }
 0x117   : > { %v486_v6 = vpop.f32.mrf.mxu0  ;;  %v1602_v8 = vpack.c.bf16 %v827_v3, %v826_v62  ;;  %v679_v13 = vpop.f32.mrf.mxu1  ;;  %v830_v15 = vmax.f32 %v676_v5, 0.0 }
 0x118   : > { %1326 = vst [vmem:[%s1963_s8 + $0x50] sm:$0xff] %v1601_v1  ;;  %v829_v9 = vmax.f32 %v485_v4, 0.0  ;;  %v487_v10 = vadd.f32 %v486_v6, %v1945_v35  ;;  %v831_v16 = vmax.f32 %v678_v11, 0.0  ;;  %v680_v19 = vadd.f32 %v679_v13, %v1950_v38 }
 0x119   : > { %v488_v12 = vpop.f32.mrf.mxu0  ;;  %1327 = vst [vmem:[%s1963_s8 + $0x58] sm:$0xff] %v1602_v8  ;;  %v681_v21 = vpop.f32.mrf.mxu1 }
 0x11a   : > { %v1603_v14 = vpack.c.bf16 %v829_v9, %v828_v2  ;;  %v489_v17 = vadd.f32 %v488_v12, %v1948_v37  ;;  %v832_v18 = vmax.f32 %v487_v10, 0.0  ;;  %v1604_v22 = vpack.c.bf16 %v831_v16, %v830_v15 }
 0x11b   : > { %v492_v20 = vpop.f32.mrf.mxu0  ;;  %v682_v25 = vadd.f32 %v681_v21, %v1953_v41  ;;  %v834_v26 = vmax.f32 %v680_v19, 0.0  ;;  %v685_v28 = vpop.f32.mrf.mxu1 }
 0x11c   : > { %1328 = vst [vmem:[%s1963_s8 + $0x60] sm:$0xff] %v1603_v14  ;;  %v833_v23 = vmax.f32 %v489_v17, 0.0  ;;  %v493_v24 = vadd.f32 %v492_v20, %v1945_v35  ;;  %1329 = vst [vmem:[%s1963_s8 + $0x68] sm:$0xff] %v1604_v22  ;;  %v686_v33 = vadd.f32 %v685_v28, %v1950_v38 }
 0x11d   : > { %v494_v27 = vpop.f32.mrf.mxu0  ;;  %v835_v31 = vmax.f32 %v682_v25, 0.0  ;;  %v687_v36 = vpop.f32.mrf.mxu1 }
 0x11e   : > { %v1605_v29 = vpack.c.bf16 %v833_v23, %v832_v18  ;;  %v836_v30 = vmax.f32 %v493_v24, 0.0  ;;  %v495_v32 = vadd.f32 %v494_v27, %v1948_v37  ;;  %v688_v43 = vadd.f32 %v687_v36, %v1953_v41 }
 0x11f   : > { %v496_v34 = vpop.f32.mrf.mxu0  ;;  %v1606_v39 = vpack.c.bf16 %v835_v31, %v834_v26  ;;  %v689_v45 = vpop.f32.mrf.mxu1  ;;  %v838_v47 = vmax.f32 %v686_v33, 0.0 }
 0x120   : > { %1330 = vst [vmem:[%s1963_s8 + $0x70] sm:$0xff] %v1605_v29  ;;  %v837_v40 = vmax.f32 %v495_v32, 0.0  ;;  %v497_v42 = vadd.f32 %v496_v34, %v1945_v35  ;;  %v839_v48 = vmax.f32 %v688_v43, 0.0  ;;  %v690_v51 = vadd.f32 %v689_v45, %v1950_v38 }
 0x121   : > { %v498_v44 = vpop.f32.mrf.mxu0  ;;  %1331 = vst [vmem:[%s1963_s8 + $0x78] sm:$0xff] %v1606_v39  ;;  %v691_v53 = vpop.f32.mrf.mxu1 }
 0x122   : > { %v1607_v46 = vpack.c.bf16 %v837_v40, %v836_v30  ;;  %v499_v49 = vadd.f32 %v498_v44, %v1948_v37  ;;  %v840_v50 = vmax.f32 %v497_v42, 0.0  ;;  %v1608_v54 = vpack.c.bf16 %v839_v48, %v838_v47 }
 0x123   : > { %v502_v52 = vpop.f32.mrf.mxu0  ;;  %v692_v57 = vadd.f32 %v691_v53, %v1953_v41  ;;  %v842_v58 = vmax.f32 %v690_v51, 0.0  ;;  %v695_v60 = vpop.f32.mrf.mxu1 }
 0x124   : > { %1332 = vst [vmem:[%s1963_s8 + $0x80] sm:$0xff] %v1607_v46  ;;  %v841_v55 = vmax.f32 %v499_v49, 0.0  ;;  %v503_v56 = vadd.f32 %v502_v52, %v1945_v35  ;;  %1333 = vst [vmem:[%s1963_s8 + $0x88] sm:$0xff] %v1608_v54  ;;  %v696_v1 = vadd.f32 %v695_v60, %v1950_v38 }
 0x125   : > { %v504_v59 = vpop.f32.mrf.mxu0  ;;  %v843_v63 = vmax.f32 %v692_v57, 0.0  ;;  %v697_v3 = vpop.f32.mrf.mxu1 }
 0x126   : > { %v1609_v61 = vpack.c.bf16 %v841_v55, %v840_v50  ;;  %v844_v62 = vmax.f32 %v503_v56, 0.0  ;;  %v505_v0 = vadd.f32 %v504_v59, %v1948_v37  ;;  %v698_v7 = vadd.f32 %v697_v3, %v1953_v41 }
 0x127   : > { %v506_v2 = vpop.f32.mrf.mxu0  ;;  %v1610_v4 = vpack.c.bf16 %v843_v63, %v842_v58  ;;  %v699_v9 = vpop.f32.mrf.mxu1  ;;  %v846_v11 = vmax.f32 %v696_v1, 0.0 }
 0x128   : > { %1334 = vst [vmem:[%s1963_s8 + $0x90] sm:$0xff] %v1609_v61  ;;  %v845_v5 = vmax.f32 %v505_v0, 0.0  ;;  %v507_v6 = vadd.f32 %v506_v2, %v1945_v35  ;;  %v847_v12 = vmax.f32 %v698_v7, 0.0  ;;  %v700_v15 = vadd.f32 %v699_v9, %v1950_v38 }
 0x129   : > { %v508_v8 = vpop.f32.mrf.mxu0  ;;  %1335 = vst [vmem:[%s1963_s8 + $0x98] sm:$0xff] %v1610_v4  ;;  %v701_v17 = vpop.f32.mrf.mxu1 }
 0x12a   : > { %v1611_v10 = vpack.c.bf16 %v845_v5, %v844_v62  ;;  %v509_v13 = vadd.f32 %v508_v8, %v1948_v37  ;;  %v848_v14 = vmax.f32 %v507_v6, 0.0  ;;  %v1612_v18 = vpack.c.bf16 %v847_v12, %v846_v11 }
 0x12b   : > { %v512_v16 = vpop.f32.mrf.mxu0  ;;  %v702_v21 = vadd.f32 %v701_v17, %v1953_v41  ;;  %v850_v22 = vmax.f32 %v700_v15, 0.0  ;;  %v705_v24 = vpop.f32.mrf.mxu1 }
 0x12c   : > { %1336 = vst [vmem:[%s1963_s8 + $0xa0] sm:$0xff] %v1611_v10  ;;  %v849_v19 = vmax.f32 %v509_v13, 0.0  ;;  %v513_v20 = vadd.f32 %v512_v16, %v1945_v35  ;;  %1337 = vst [vmem:[%s1963_s8 + $0xa8] sm:$0xff] %v1612_v18  ;;  %v706_v29 = vadd.f32 %v705_v24, %v1950_v38 }
 0x12d   : > { %v514_v23 = vpop.f32.mrf.mxu0  ;;  %v851_v27 = vmax.f32 %v702_v21, 0.0  ;;  %v707_v31 = vpop.f32.mrf.mxu1 }
 0x12e   : > { %v1613_v25 = vpack.c.bf16 %v849_v19, %v848_v14  ;;  %v852_v26 = vmax.f32 %v513_v20, 0.0  ;;  %v515_v28 = vadd.f32 %v514_v23, %v1948_v37  ;;  %v708_v36 = vadd.f32 %v707_v31, %v1953_v41 }
 0x12f   : > { %v516_v30 = vpop.f32.mrf.mxu0  ;;  %v1614_v32 = vpack.c.bf16 %v851_v27, %v850_v22  ;;  %v709_v40 = vpop.f32.mrf.mxu1  ;;  %v854_v43 = vmax.f32 %v706_v29, 0.0 }
 0x130   : > { %1338 = vst [vmem:[%s1963_s8 + $0xb0] sm:$0xff] %v1613_v25  ;;  %v853_v33 = vmax.f32 %v515_v28, 0.0  ;;  %v517_v34 = vadd.f32 %v516_v30, %v1945_v35  ;;  %v855_v44 = vmax.f32 %v708_v36, 0.0  ;;  %v710_v47 = vadd.f32 %v709_v40, %v1950_v38 }
 0x131   : > { %v518_v39 = vpop.f32.mrf.mxu0  ;;  %1339 = vst [vmem:[%s1963_s8 + $0xb8] sm:$0xff] %v1614_v32  ;;  %v711_v49 = vpop.f32.mrf.mxu1 }
 0x132   : > { %v1615_v42 = vpack.c.bf16 %v853_v33, %v852_v26  ;;  %v519_v45 = vadd.f32 %v518_v39, %v1948_v37  ;;  %v856_v46 = vmax.f32 %v517_v34, 0.0  ;;  %v1616_v50 = vpack.c.bf16 %v855_v44, %v854_v43 }
 0x133   : > { %v522_v48 = vpop.f32.mrf.mxu0  ;;  %v712_v53 = vadd.f32 %v711_v49, %v1953_v41  ;;  %v858_v54 = vmax.f32 %v710_v47, 0.0  ;;  %v715_v56 = vpop.f32.mrf.mxu1 }
 0x134   : > { %1340 = vst [vmem:[%s1963_s8 + $0xc0] sm:$0xff] %v1615_v42  ;;  %v857_v51 = vmax.f32 %v519_v45, 0.0  ;;  %v523_v52 = vadd.f32 %v522_v48, %v1945_v35  ;;  %1341 = vst [vmem:[%s1963_s8 + $0xc8] sm:$0xff] %v1616_v50  ;;  %v716_v61 = vadd.f32 %v715_v56, %v1950_v38 }
 0x135   : > { %v524_v55 = vpop.f32.mrf.mxu0  ;;  %v859_v59 = vmax.f32 %v712_v53, 0.0  ;;  %v717_v63 = vpop.f32.mrf.mxu1 }
 0x136   : > { %v1617_v57 = vpack.c.bf16 %v857_v51, %v856_v46  ;;  %v860_v58 = vmax.f32 %v523_v52, 0.0  ;;  %v525_v60 = vadd.f32 %v524_v55, %v1948_v37  ;;  %v718_v3 = vadd.f32 %v717_v63, %v1953_v41 }
 0x137   : > { %v526_v62 = vpop.f32.mrf.mxu0  ;;  %v1618_v0 = vpack.c.bf16 %v859_v59, %v858_v54  ;;  %v719_v5 = vpop.f32.mrf.mxu1  ;;  %v862_v7 = vmax.f32 %v716_v61, 0.0 }
 0x138   : > { %1342 = vst [vmem:[%s1963_s8 + $0xd0] sm:$0xff] %v1617_v57  ;;  %v861_v1 = vmax.f32 %v525_v60, 0.0  ;;  %v527_v2 = vadd.f32 %v526_v62, %v1945_v35  ;;  %v863_v8 = vmax.f32 %v718_v3, 0.0  ;;  %v720_v11 = vadd.f32 %v719_v5, %v1950_v38 }
 0x139   : > { %v528_v4 = vpop.f32.mrf.mxu0  ;;  %1343 = vst [vmem:[%s1963_s8 + $0xd8] sm:$0xff] %v1618_v0  ;;  %v721_v13 = vpop.f32.mrf.mxu1 }
 0x13a   : > { %v1619_v6 = vpack.c.bf16 %v861_v1, %v860_v58  ;;  %v529_v9 = vadd.f32 %v528_v4, %v1948_v37  ;;  %v864_v10 = vmax.f32 %v527_v2, 0.0  ;;  %v1620_v14 = vpack.c.bf16 %v863_v8, %v862_v7 }
 0x13b   : > { %v532_v12 = vpop.f32.mrf.mxu0  ;;  %v722_v17 = vadd.f32 %v721_v13, %v1953_v41  ;;  %v866_v18 = vmax.f32 %v720_v11, 0.0  ;;  %v725_v20 = vpop.f32.mrf.mxu1 }
 0x13c   : > { %1344 = vst [vmem:[%s1963_s8 + $0xe0] sm:$0xff] %v1619_v6  ;;  %v865_v15 = vmax.f32 %v529_v9, 0.0  ;;  %v533_v16 = vadd.f32 %v532_v12, %v1945_v35  ;;  %1345 = vst [vmem:[%s1963_s8 + $0xe8] sm:$0xff] %v1620_v14  ;;  %v726_v25 = vadd.f32 %v725_v20, %v1950_v38 }
 0x13d   : > { %v534_v19 = vpop.f32.mrf.mxu0  ;;  %v867_v23 = vmax.f32 %v722_v17, 0.0  ;;  %v727_v27 = vpop.f32.mrf.mxu1 }
 0x13e   : > { %v1621_v21 = vpack.c.bf16 %v865_v15, %v864_v10  ;;  %v868_v22 = vmax.f32 %v533_v16, 0.0  ;;  %v535_v24 = vadd.f32 %v534_v19, %v1948_v37  ;;  %v728_v31 = vadd.f32 %v727_v27, %v1953_v41 }
 0x13f   : > { %v536_v26 = vpop.f32.mrf.mxu0  ;;  %v1622_v28 = vpack.c.bf16 %v867_v23, %v866_v18  ;;  %v729_v33 = vpop.f32.mrf.mxu1  ;;  %v870_v36 = vmax.f32 %v726_v25, 0.0 }
 0x140   : > { %1346 = vst [vmem:[%s1963_s8 + $0xf0] sm:$0xff] %v1621_v21  ;;  %v869_v29 = vmax.f32 %v535_v24, 0.0  ;;  %v537_v30 = vadd.f32 %v536_v26, %v1945_v35  ;;  %v871_v39 = vmax.f32 %v728_v31, 0.0  ;;  %v730_v43 = vadd.f32 %v729_v33, %v1950_v38 }
 0x141   : > { %v538_v32 = vpop.f32.mrf.mxu0  ;;  %1347 = vst [vmem:[%s1963_s8 + $0xf8] sm:$0xff] %v1622_v28  ;;  %v731_v45 = vpop.f32.mrf.mxu1 }
 0x142   : > { %v1623_v34 = vpack.c.bf16 %v869_v29, %v868_v22  ;;  %v539_v40 = vadd.f32 %v538_v32, %v1948_v37  ;;  %v872_v42 = vmax.f32 %v537_v30, 0.0  ;;  %v1624_v46 = vpack.c.bf16 %v871_v39, %v870_v36 }
 0x143   : > { %v542_v44 = vpop.f32.mrf.mxu0  ;;  %v732_v49 = vadd.f32 %v731_v45, %v1953_v41  ;;  %v874_v50 = vmax.f32 %v730_v43, 0.0  ;;  %v735_v52 = vpop.f32.mrf.mxu1 }
 0x144   : > { %1348 = vst [vmem:[%s1963_s8 + $0x100] sm:$0xff] %v1623_v34  ;;  %v873_v47 = vmax.f32 %v539_v40, 0.0  ;;  %v543_v48 = vadd.f32 %v542_v44, %v1945_v35  ;;  %1349 = vst [vmem:[%s1963_s8 + $0x108] sm:$0xff] %v1624_v46  ;;  %v736_v57 = vadd.f32 %v735_v52, %v1950_v38 }
 0x145   : > { %v544_v51 = vpop.f32.mrf.mxu0  ;;  %v875_v55 = vmax.f32 %v732_v49, 0.0  ;;  %v737_v59 = vpop.f32.mrf.mxu1 }
 0x146   : > { %v1625_v53 = vpack.c.bf16 %v873_v47, %v872_v42  ;;  %v876_v54 = vmax.f32 %v543_v48, 0.0  ;;  %v545_v56 = vadd.f32 %v544_v51, %v1948_v37  ;;  %v738_v63 = vadd.f32 %v737_v59, %v1953_v41 }
 0x147   : > { %v546_v58 = vpop.f32.mrf.mxu0  ;;  %v1626_v60 = vpack.c.bf16 %v875_v55, %v874_v50  ;;  %v739_v1 = vpop.f32.mrf.mxu1  ;;  %v878_v3 = vmax.f32 %v736_v57, 0.0 }
 0x148   : > { %1350 = vst [vmem:[%s1963_s8 + $0x110] sm:$0xff] %v1625_v53  ;;  %v877_v61 = vmax.f32 %v545_v56, 0.0  ;;  %v547_v62 = vadd.f32 %v546_v58, %v1945_v35  ;;  %v879_v4 = vmax.f32 %v738_v63, 0.0  ;;  %v740_v7 = vadd.f32 %v739_v1, %v1950_v38 }
 0x149   : > { %v548_v0 = vpop.f32.mrf.mxu0  ;;  %1351 = vst [vmem:[%s1963_s8 + $0x118] sm:$0xff] %v1626_v60  ;;  %v741_v9 = vpop.f32.mrf.mxu1 }
 0x14a   : > { %v1627_v2 = vpack.c.bf16 %v877_v61, %v876_v54  ;;  %v549_v5 = vadd.f32 %v548_v0, %v1948_v37  ;;  %v880_v6 = vmax.f32 %v547_v62, 0.0  ;;  %v1628_v10 = vpack.c.bf16 %v879_v4, %v878_v3 }
 0x14b   : > { %v552_v8 = vpop.f32.mrf.mxu0  ;;  %v742_v13 = vadd.f32 %v741_v9, %v1953_v41  ;;  %v882_v14 = vmax.f32 %v740_v7, 0.0  ;;  %v745_v16 = vpop.f32.mrf.mxu1 }
 0x14c   : > { %1352 = vst [vmem:[%s1963_s8 + $0x120] sm:$0xff] %v1627_v2  ;;  %v881_v11 = vmax.f32 %v549_v5, 0.0  ;;  %v553_v12 = vadd.f32 %v552_v8, %v1945_v35  ;;  %1353 = vst [vmem:[%s1963_s8 + $0x128] sm:$0xff] %v1628_v10  ;;  %v746_v21 = vadd.f32 %v745_v16, %v1950_v38 }
 0x14d   : > { %v554_v15 = vpop.f32.mrf.mxu0  ;;  %v883_v19 = vmax.f32 %v742_v13, 0.0  ;;  %v747_v23 = vpop.f32.mrf.mxu1 }
 0x14e   : > { %v1629_v17 = vpack.c.bf16 %v881_v11, %v880_v6  ;;  %v884_v18 = vmax.f32 %v553_v12, 0.0  ;;  %v555_v20 = vadd.f32 %v554_v15, %v1948_v37  ;;  %v748_v27 = vadd.f32 %v747_v23, %v1953_v41 }
 0x14f   : > { %v556_v22 = vpop.f32.mrf.mxu0  ;;  %v1630_v24 = vpack.c.bf16 %v883_v19, %v882_v14  ;;  %v749_v29 = vpop.f32.mrf.mxu1  ;;  %v886_v31 = vmax.f32 %v746_v21, 0.0 }
 0x150   : > { %1354 = vst [vmem:[%s1963_s8 + $0x130] sm:$0xff] %v1629_v17  ;;  %v885_v25 = vmax.f32 %v555_v20, 0.0  ;;  %v557_v26 = vadd.f32 %v556_v22, %v1945_v35  ;;  %v887_v32 = vmax.f32 %v748_v27, 0.0  ;;  %v750_v36 = vadd.f32 %v749_v29, %v1950_v38 }
 0x151   : > { %v558_v28 = vpop.f32.mrf.mxu0  ;;  %1355 = vst [vmem:[%s1963_s8 + $0x138] sm:$0xff] %v1630_v24  ;;  %v751_v40 = vpop.f32.mrf.mxu1 }
 0x152   : > { %v1631_v30 = vpack.c.bf16 %v885_v25, %v884_v18  ;;  %v559_v33 = vadd.f32 %v558_v28, %v1948_v37  ;;  %v888_v34 = vmax.f32 %v557_v26, 0.0  ;;  %v1632_v42 = vpack.c.bf16 %v887_v32, %v886_v31 }
 0x153   : > { %v562_v39 = vpop.f32.mrf.mxu0  ;;  %v752_v45 = vadd.f32 %v751_v40, %v1953_v41  ;;  %v890_v46 = vmax.f32 %v750_v36, 0.0  ;;  %v755_v48 = vpop.f32.mrf.mxu1 }
 0x154   : > { %1356 = vst [vmem:[%s1963_s8 + $0x140] sm:$0xff] %v1631_v30  ;;  %v889_v43 = vmax.f32 %v559_v33, 0.0  ;;  %v563_v44 = vadd.f32 %v562_v39, %v1945_v35  ;;  %1357 = vst [vmem:[%s1963_s8 + $0x148] sm:$0xff] %v1632_v42  ;;  %v756_v53 = vadd.f32 %v755_v48, %v1950_v38 }
 0x155   : > { %v564_v47 = vpop.f32.mrf.mxu0  ;;  %v891_v51 = vmax.f32 %v752_v45, 0.0  ;;  %v757_v55 = vpop.f32.mrf.mxu1 }
 0x156   : > { %v1633_v49 = vpack.c.bf16 %v889_v43, %v888_v34  ;;  %v892_v50 = vmax.f32 %v563_v44, 0.0  ;;  %v565_v52 = vadd.f32 %v564_v47, %v1948_v37  ;;  %v758_v59 = vadd.f32 %v757_v55, %v1953_v41 }
 0x157   : > { %v566_v54 = vpop.f32.mrf.mxu0  ;;  %v1634_v56 = vpack.c.bf16 %v891_v51, %v890_v46  ;;  %v759_v61 = vpop.f32.mrf.mxu1  ;;  %v894_v63 = vmax.f32 %v756_v53, 0.0 }
 0x158   : > { %1358 = vst [vmem:[%s1963_s8 + $0x150] sm:$0xff] %v1633_v49  ;;  %v893_v57 = vmax.f32 %v565_v52, 0.0  ;;  %v567_v58 = vadd.f32 %v566_v54, %v1945_v35  ;;  %v895_v0 = vmax.f32 %v758_v59, 0.0  ;;  %v760_v3 = vadd.f32 %v759_v61, %v1950_v38 }
 0x159   : > { %v568_v60 = vpop.f32.mrf.mxu0  ;;  %1359 = vst [vmem:[%s1963_s8 + $0x158] sm:$0xff] %v1634_v56  ;;  %v761_v5 = vpop.f32.mrf.mxu1 }
 0x15a   : > { %v1635_v62 = vpack.c.bf16 %v893_v57, %v892_v50  ;;  %v569_v1 = vadd.f32 %v568_v60, %v1948_v37  ;;  %v896_v2 = vmax.f32 %v567_v58, 0.0  ;;  %v1636_v6 = vpack.c.bf16 %v895_v0, %v894_v63 }
 0x15b   : > { %v572_v4 = vpop.f32.mrf.mxu0  ;;  %v762_v9 = vadd.f32 %v761_v5, %v1953_v41  ;;  %v898_v10 = vmax.f32 %v760_v3, 0.0  ;;  %v765_v12 = vpop.f32.mrf.mxu1 }
 0x15c   : > { %1360 = vst [vmem:[%s1963_s8 + $0x160] sm:$0xff] %v1635_v62  ;;  %v897_v7 = vmax.f32 %v569_v1, 0.0  ;;  %v573_v8 = vadd.f32 %v572_v4, %v1945_v35  ;;  %1361 = vst [vmem:[%s1963_s8 + $0x168] sm:$0xff] %v1636_v6  ;;  %v766_v17 = vadd.f32 %v765_v12, %v1950_v38 }
 0x15d   : > { %v574_v11 = vpop.f32.mrf.mxu0  ;;  %v899_v15 = vmax.f32 %v762_v9, 0.0  ;;  %v767_v19 = vpop.f32.mrf.mxu1 }
 0x15e   : > { %v1637_v13 = vpack.c.bf16 %v897_v7, %v896_v2  ;;  %v900_v14 = vmax.f32 %v573_v8, 0.0  ;;  %v575_v16 = vadd.f32 %v574_v11, %v1948_v37  ;;  %v768_v23 = vadd.f32 %v767_v19, %v1953_v41 }
 0x15f   : > { %v576_v18 = vpop.f32.mrf.mxu0  ;;  %v1638_v20 = vpack.c.bf16 %v899_v15, %v898_v10  ;;  %v769_v25 = vpop.f32.mrf.mxu1  ;;  %v902_v27 = vmax.f32 %v766_v17, 0.0 }
 0x160   : > { %1362 = vst [vmem:[%s1963_s8 + $0x170] sm:$0xff] %v1637_v13  ;;  %v901_v21 = vmax.f32 %v575_v16, 0.0  ;;  %v577_v22 = vadd.f32 %v576_v18, %v1945_v35  ;;  %v903_v28 = vmax.f32 %v768_v23, 0.0  ;;  %v770_v31 = vadd.f32 %v769_v25, %v1950_v38 }
 0x161   : > { %v578_v24 = vpop.f32.mrf.mxu0  ;;  %1363 = vst [vmem:[%s1963_s8 + $0x178] sm:$0xff] %v1638_v20  ;;  %v771_v33 = vpop.f32.mrf.mxu1 }
 0x162   : > { %v1639_v26 = vpack.c.bf16 %v901_v21, %v900_v14  ;;  %v579_v29 = vadd.f32 %v578_v24, %v1948_v37  ;;  %v904_v30 = vmax.f32 %v577_v22, 0.0  ;;  %v1640_v34 = vpack.c.bf16 %v903_v28, %v902_v27 }
 0x163   : > { %v582_v32 = vpop.f32.mrf.mxu0  ;;  %v772_v40 = vadd.f32 %v771_v33, %v1953_v41  ;;  %v906_v42 = vmax.f32 %v770_v31, 0.0  ;;  %v775_v44 = vpop.f32.mrf.mxu1 }
 0x164   : > { %1364 = vst [vmem:[%s1963_s8 + $0x180] sm:$0xff] %v1639_v26  ;;  %v905_v36 = vmax.f32 %v579_v29, 0.0  ;;  %v583_v39 = vadd.f32 %v582_v32, %v1945_v35  ;;  %1365 = vst [vmem:[%s1963_s8 + $0x188] sm:$0xff] %v1640_v34  ;;  %v776_v49 = vadd.f32 %v775_v44, %v1950_v38 }
 0x165   : > { %v584_v43 = vpop.f32.mrf.mxu0  ;;  %v907_v47 = vmax.f32 %v772_v40, 0.0  ;;  %v777_v51 = vpop.f32.mrf.mxu1 }
 0x166   : > { %v1641_v45 = vpack.c.bf16 %v905_v36, %v904_v30  ;;  %v908_v46 = vmax.f32 %v583_v39, 0.0  ;;  %v585_v48 = vadd.f32 %v584_v43, %v1948_v37  ;;  %v778_v55 = vadd.f32 %v777_v51, %v1953_v41 }
 0x167   : > { %v586_v50 = vpop.f32.mrf.mxu0  ;;  %v1642_v52 = vpack.c.bf16 %v907_v47, %v906_v42  ;;  %v779_v57 = vpop.f32.mrf.mxu1  ;;  %v910_v59 = vmax.f32 %v776_v49, 0.0 }
 0x168   : > { %1366 = vst [vmem:[%s1963_s8 + $0x190] sm:$0xff] %v1641_v45  ;;  %v909_v53 = vmax.f32 %v585_v48, 0.0  ;;  %v587_v54 = vadd.f32 %v586_v50, %v1945_v35  ;;  %v911_v60 = vmax.f32 %v778_v55, 0.0  ;;  %v780_v63 = vadd.f32 %v779_v57, %v1950_v38 }
 0x169   : > { %v588_v56 = vpop.f32.mrf.mxu0  ;;  %1367 = vst [vmem:[%s1963_s8 + $0x198] sm:$0xff] %v1642_v52  ;;  %v781_v1 = vpop.f32.mrf.mxu1 }
 0x16a   : > { %v1643_v58 = vpack.c.bf16 %v909_v53, %v908_v46  ;;  %v589_v61 = vadd.f32 %v588_v56, %v1948_v37  ;;  %v912_v62 = vmax.f32 %v587_v54, 0.0  ;;  %v1644_v2 = vpack.c.bf16 %v911_v60, %v910_v59 }
 0x16b   : > { %v592_v0 = vpop.f32.mrf.mxu0  ;;  %v782_v5 = vadd.f32 %v781_v1, %v1953_v41  ;;  %v914_v6 = vmax.f32 %v780_v63, 0.0  ;;  %v785_v8 = vpop.f32.mrf.mxu1 }
 0x16c   : > { %1368 = vst [vmem:[%s1963_s8 + $0x1a0] sm:$0xff] %v1643_v58  ;;  %v913_v3 = vmax.f32 %v589_v61, 0.0  ;;  %v593_v4 = vadd.f32 %v592_v0, %v1945_v35  ;;  %1369 = vst [vmem:[%s1963_s8 + $0x1a8] sm:$0xff] %v1644_v2  ;;  %v786_v13 = vadd.f32 %v785_v8, %v1950_v38 }
 0x16d   : > { %v594_v7 = vpop.f32.mrf.mxu0  ;;  %v915_v11 = vmax.f32 %v782_v5, 0.0  ;;  %v787_v15 = vpop.f32.mrf.mxu1 }
 0x16e   : > { %v1645_v9 = vpack.c.bf16 %v913_v3, %v912_v62  ;;  %v916_v10 = vmax.f32 %v593_v4, 0.0  ;;  %v595_v12 = vadd.f32 %v594_v7, %v1948_v37  ;;  %v788_v19 = vadd.f32 %v787_v15, %v1953_v41 }
 0x16f   : > { %v596_v14 = vpop.f32.mrf.mxu0  ;;  %v1646_v16 = vpack.c.bf16 %v915_v11, %v914_v6  ;;  %v789_v21 = vpop.f32.mrf.mxu1  ;;  %v918_v23 = vmax.f32 %v786_v13, 0.0 }
 0x170   : > { %1370 = vst [vmem:[%s1963_s8 + $0x1b0] sm:$0xff] %v1645_v9  ;;  %v917_v17 = vmax.f32 %v595_v12, 0.0  ;;  %v597_v18 = vadd.f32 %v596_v14, %v1945_v35  ;;  %v919_v24 = vmax.f32 %v788_v19, 0.0  ;;  %v790_v27 = vadd.f32 %v789_v21, %v1950_v38 }
 0x171   : > { %v598_v20 = vpop.f32.mrf.mxu0  ;;  %1371 = vst [vmem:[%s1963_s8 + $0x1b8] sm:$0xff] %v1646_v16  ;;  %v791_v29 = vpop.f32.mrf.mxu1 }
 0x172   : > { %v1647_v22 = vpack.c.bf16 %v917_v17, %v916_v10  ;;  %v599_v25 = vadd.f32 %v598_v20, %v1948_v37  ;;  %v920_v26 = vmax.f32 %v597_v18, 0.0  ;;  %v1648_v30 = vpack.c.bf16 %v919_v24, %v918_v23 }
 0x173   : > { %v602_v28 = vpop.f32.mrf.mxu0  ;;  %v792_v33 = vadd.f32 %v791_v29, %v1953_v41  ;;  %v922_v34 = vmax.f32 %v790_v27, 0.0  ;;  %v795_v39 = vpop.f32.mrf.mxu1 }
 0x174   : > { %1372 = vst [vmem:[%s1963_s8 + $0x1c0] sm:$0xff] %v1647_v22  ;;  %v921_v31 = vmax.f32 %v599_v25, 0.0  ;;  %v603_v32 = vadd.f32 %v602_v28, %v1945_v35  ;;  %1373 = vst [vmem:[%s1963_s8 + $0x1c8] sm:$0xff] %v1648_v30  ;;  %v796_v45 = vadd.f32 %v795_v39, %v1950_v38 }
 0x175   : > { %v604_v36 = vpop.f32.mrf.mxu0  ;;  %v923_v43 = vmax.f32 %v792_v33, 0.0  ;;  %v797_v47 = vpop.f32.mrf.mxu1 }
 0x176   : > { %v1649_v40 = vpack.c.bf16 %v921_v31, %v920_v26  ;;  %v924_v42 = vmax.f32 %v603_v32, 0.0  ;;  %v605_v44 = vadd.f32 %v604_v36, %v1948_v37  ;;  %v798_v51 = vadd.f32 %v797_v47, %v1953_v41 }
 0x177   : > { %v606_v46 = vpop.f32.mrf.mxu0  ;;  %v1650_v48 = vpack.c.bf16 %v923_v43, %v922_v34  ;;  %v799_v53 = vpop.f32.mrf.mxu1  ;;  %v926_v55 = vmax.f32 %v796_v45, 0.0 }
 0x178   : > { %1374 = vst [vmem:[%s1963_s8 + $0x1d0] sm:$0xff] %v1649_v40  ;;  %v925_v49 = vmax.f32 %v605_v44, 0.0  ;;  %v607_v50 = vadd.f32 %v606_v46, %v1945_v35  ;;  %v927_v56 = vmax.f32 %v798_v51, 0.0  ;;  %v800_v58 = vadd.f32 %v799_v53, %v1950_v38 }
 0x179   : > { %v608_v52 = vpop.f32.mrf.mxu0  ;;  %1375 = vst [vmem:[%s1963_s8 + $0x1d8] sm:$0xff] %v1650_v48  ;;  %v801_v59 = vpop.f32.mrf.mxu1 }
 0x17a   : > { %v1651_v54 = vpack.c.bf16 %v925_v49, %v924_v42  ;;  %v609_v57 = vadd.f32 %v608_v52, %v1948_v37  ;;  %v928_v60 = vmax.f32 %v607_v50, 0.0  ;;  %v1652_v61 = vpack.c.bf16 %v927_v56, %v926_v55 }
 0x17b   : > { %v802_v62 = vadd.f32 %v801_v59, %v1953_v41  ;;  %v930_v0 = vmax.f32 %v800_v58, 0.0 }
 0x17c   : > { %1376 = vst [vmem:[%s1963_s8 + $0x1e0] sm:$0xff] %v1651_v54  ;;  %v929_v35 = vmax.f32 %v609_v57, 0.0  ;;  %1377 = vst [vmem:[%s1963_s8 + $0x1e8] sm:$0xff] %v1652_v61 }
 0x17d   : > { %v931_v1 = vmax.f32 %v802_v62, 0.0 }
 0x17e   : > { %v1653_v63 = vpack.c.bf16 %v929_v35, %v928_v60 }
 0x17f   : > { %v1654_v2 = vpack.c.bf16 %v931_v1, %v930_v0 }
 0x180   : > { %1378 = vst [vmem:[%s1963_s8 + $0x1f0] sm:$0xff] %v1653_v63 }
 0x181   : > { %1379 = vst [vmem:[%s1963_s8 + $0x1f8] sm:$0xff] %v1654_v2 }
 0x182 PF: > { %s15_s12 = sadd.s32 1, %s1769_s12  }
 0x183   : > { %p12_p3 = scmp.ge.s32.totalorder %s15_s12, 4  }
 0x185   :  { %14 = sbr.rel (!%p12_p3) target bundleno = 2 (0x2), region = 71 }
 0x18a   :  { %1404 = vsyncpa [#allocation3], 1 }
 0x18b   :  { %1406 = vsyncpa [#allocation3 + $0x1], 1 }
 0x18c   :  { %1407 = vsyncpa [#allocation5], 1 }

// kernel: inception_b.8
= control target key start
LH: loop header
LB: loop body
LE: loop exit
PB: predicated region body
PF: predicated region fallthrough
CT: control target
= control target key end

     0   :  { %s4734_s12 = smov 0   ;;  %s4736_s13 = smov 0   ;;  %s6018_s0 = inlined_call_operand.vmem [shape: bf16[2,352,256], index: 0, kind: input, shape index: {}]   ;;  %s6019_s1 = inlined_call_operand.vmem [shape: bf16[7,256,256], index: 1, kind: input, shape index: {}]   ;;  %s6020_s2 = inlined_call_operand.vmem [shape: f32[1,256], index: 2, kind: input, shape index: {}]   ;;  %s6021_s3 = inlined_call_operand.vmem [shape: bf16[2,256,256], index: 3, kind: output, shape index: {}]  }
   0x1   :  { %s4738_s14 = smov 0   ;;  %s4740_s15 = smov 0  }
   0x2   :  { %s4742_s16 = smov 0  }
   0x3 LB: > { %s22_s17 = sadd.s32 1, %s4704_s14  ;;  %s25_s18 = sadd.s32 1, %s4708_s15  ;;  %s4712_s16 = sphi %s4742_s16, %s13_s16   ;;  %s4708_s15 = sphi %s4740_s15, %s6066_s15   ;;  %s4704_s14 = sphi %s4738_s14, %s6065_s14   ;;  %s4700_s13 = sphi %s4736_s13, %s6064_s13   ;;  %s4696_s12 = sphi %s4734_s12, %s6063_s12  }
   0x4   : > { %p23_p0 = scmp.ge.s32.totalorder %s22_s17, 2  ;;  %p3507_p1 = scmp.ge.s32.totalorder %s4712_s16, 1 }
   0x5   : > { %p151_p2 = scmp.lt.s32.totalorder %s4712_s16, 5 }
   0x6   : > { %s6068_s17 = smov (%p23_p0, %s22_s17), 0  ;;  %s6070_s18 = smov (!%p23_p0, %s25_s18), %s4708_s15 }
   0x7   : > { %p152_p3 = pnand %p3507_p1, %p151_p2  ;;  %p27_p4 = scmp.ge.s32.totalorder %s6070_s18, 2 }
   0x9   : > { %s6072_s18 = smov (%p27_p4, %s6070_s18), 0  ;;  %155 = sbr.rel (%p152_p3) target bundleno = 504 (0x1f8), region = 32 }
   0xe   : > { %v4170_v0 = vld [vmem:[%s6019_s1 + $0x174] ss:$8 sps:$4 sm:$0xff]   ;;  %v4174_v2 = vld [vmem:[%s6019_s1 + $0x170] ss:$8 sps:$4 sm:$0xff]   ;;  %v4176_v4 = vld [vmem:[%s6019_s1 + $0x164] ss:$8 sps:$4 sm:$0xff]  }
   0xf   : > { %v4172_v1 = vld [vmem:[%s6019_s1 + $0x74] ss:$8 sps:$4 sm:$0xff]   ;;  %545 = vmatprep.subr.bf16.mxu0 %v4170_v0  ;;  %v4175_v3 = vld [vmem:[%s6019_s1 + $0x70] ss:$8 sps:$4 sm:$0xff]   ;;  %v4178_v5 = vld [vmem:[%s6019_s1 + $0x64] ss:$8 sps:$4 sm:$0xff]  }
  0x10   : > { %898 = vmatprep.subr.bf16.mxu1 %v4172_v1  ;;  %546 = vmatpush1.bf16.msra.mxu0 %v4174_v2  ;;  %v4180_v6 = vld [vmem:[%s6019_s1 + $0x160] ss:$8 sps:$4 sm:$0xff]   ;;  %v4182_v8 = vld [vmem:[%s6019_s1 + $0x154] ss:$8 sps:$4 sm:$0xff]   ;;  %v4186_v10 = vld [vmem:[%s6019_s1 + $0x150] ss:$8 sps:$4 sm:$0xff]  }
  0x11   : > { %899 = vmatpush1.bf16.msra.mxu1 %v4175_v3  ;;  %547 = vmatprep.subr.bf16.mxu0 %v4176_v4  ;;  %v4181_v7 = vld [vmem:[%s6019_s1 + $0x60] ss:$8 sps:$4 sm:$0xff]   ;;  %v4184_v9 = vld [vmem:[%s6019_s1 + $0x54] ss:$8 sps:$4 sm:$0xff]   ;;  %v4187_v11 = vld [vmem:[%s6019_s1 + $0x50] ss:$8 sps:$4 sm:$0xff]  }
  0x12   : > { %900 = vmatprep.subr.bf16.mxu1 %v4178_v5  ;;  %v4188_v12 = vld [vmem:[%s6019_s1 + $0x144] ss:$8 sps:$4 sm:$0xff]   ;;  %v4192_v14 = vld [vmem:[%s6019_s1 + $0x140] ss:$8 sps:$4 sm:$0xff]   ;;  %v4194_v16 = vld [vmem:[%s6019_s1 + $0x134] ss:$8 sps:$4 sm:$0xff]  }
  0x13   : > { %v4190_v13 = vld [vmem:[%s6019_s1 + $0x44] ss:$8 sps:$4 sm:$0xff]   ;;  %v4193_v15 = vld [vmem:[%s6019_s1 + $0x40] ss:$8 sps:$4 sm:$0xff]   ;;  %v4196_v17 = vld [vmem:[%s6019_s1 + $0x34] ss:$8 sps:$4 sm:$0xff]  }
  0x14   : > { %548 = vmatpush1.bf16.msra.mxu0 %v4180_v6  ;;  %v4198_v18 = vld [vmem:[%s6019_s1 + $0x130] ss:$8 sps:$4 sm:$0xff]   ;;  %v4200_v20 = vld [vmem:[%s6019_s1 + $0x124] ss:$8 sps:$4 sm:$0xff]   ;;  %v4204_v22 = vld [vmem:[%s6019_s1 + $0x120] ss:$8 sps:$4 sm:$0xff]  }
  0x15   : > { %901 = vmatpush1.bf16.msra.mxu1 %v4181_v7  ;;  %549 = vmatprep.subr.bf16.mxu0 %v4182_v8  ;;  %v4199_v19 = vld [vmem:[%s6019_s1 + $0x30] ss:$8 sps:$4 sm:$0xff]   ;;  %v4202_v21 = vld [vmem:[%s6019_s1 + $0x24] ss:$8 sps:$4 sm:$0xff]   ;;  %v4205_v23 = vld [vmem:[%s6019_s1 + $0x20] ss:$8 sps:$4 sm:$0xff]  }
  0x16   : > { %902 = vmatprep.subr.bf16.mxu1 %v4184_v9  ;;  %v4206_v24 = vld [vmem:[%s6019_s1 + $0x114] ss:$8 sps:$4 sm:$0xff]   ;;  %v4210_v26 = vld [vmem:[%s6019_s1 + $0x110] ss:$8 sps:$4 sm:$0xff]   ;;  %v4212_v28 = vld [vmem:[%s6019_s1 + $0x104] ss:$8 sps:$4 sm:$0xff]  }
  0x17   : > { %v4208_v25 = vld [vmem:[%s6019_s1 + $0x14] ss:$8 sps:$4 sm:$0xff]   ;;  %v4211_v27 = vld [vmem:[%s6019_s1 + $0x10] ss:$8 sps:$4 sm:$0xff]   ;;  %v4214_v29 = vld [vmem:[%s6019_s1 + $0x4] ss:$8 sps:$4 sm:$0xff]  }
  0x18   : > { %550 = vmatpush1.bf16.msra.mxu0 %v4186_v10  ;;  %p180_p5 = scmp.lt.s32.totalorder %s4700_s13, 1  ;;  %v4216_v30 = vld [vmem:[%s6019_s1 + $0x100] ss:$8 sps:$4 sm:$0xff]   ;;  %v4218_v32 = vld [vmem:[%s6019_s1 + $0x1f4] ss:$8 sps:$4 sm:$0xff]   ;;  %s4869_s25 = sshll.u32 %s4696_s12, 7 }
  0x19   : > { %903 = vmatpush1.bf16.msra.mxu1 %v4187_v11  ;;  %551 = vmatprep.subr.bf16.mxu0 %v4188_v12  ;;  %v4217_v31 = vld [vmem:[%s6019_s1] ss:$8 sps:$4 sm:$0xff]   ;;  %v4220_v33 = vld [vmem:[%s6019_s1 + $0xf4] ss:$8 sps:$4 sm:$0xff]   ;;  %v4222_v34 = vld [vmem:[%s6019_s1 + $0x1f0] ss:$8 sps:$4 sm:$0xff]  }
  0x1a   : > { %904 = vmatprep.subr.bf16.mxu1 %v4190_v13  ;;  %s6074_s13 = smov (!%p180_p5, %s4700_s13), 1  ;;  %v4223_v35 = vld [vmem:[%s6019_s1 + $0xf0] ss:$8 sps:$4 sm:$0xff]   ;;  %s250_s5 = sadd.s32 16, %s4869_s25  ;;  %v4224_v36 = vld [vmem:[%s6019_s1 + $0x1e4] ss:$8 sps:$4 sm:$0xff]  }
  0x1b   : > { %v4226_v37 = vld [vmem:[%s6019_s1 + $0xe4] ss:$8 sps:$4 sm:$0xff]   ;;  %s4129_s10 = smul.u32 352, %s6074_s13  ;;  %s251_s11 = sshra.s32 %s250_s5, 3  ;;  %v4228_v38 = vld [vmem:[%s6019_s1 + $0x1e0] ss:$8 sps:$4 sm:$0xff]  }
  0x1c   : > { %552 = vmatpush1.bf16.msra.mxu0 %v4192_v14  ;;  %v4229_v39 = vld [vmem:[%s6019_s1 + $0xe0] ss:$8 sps:$4 sm:$0xff]   ;;  %v4230_v40 = vld [vmem:[%s6019_s1 + $0x1d4] ss:$8 sps:$4 sm:$0xff]   ;;  %s4075_s4 = sshll.u32 %s251_s11, 3  ;;  %s1451_s22 = sadd.s32 48, %s4869_s25 }
  0x1d   : > { %905 = vmatpush1.bf16.msra.mxu1 %v4193_v15  ;;  %553 = vmatprep.subr.bf16.mxu0 %v4194_v16  ;;  %v4232_v41 = vld [vmem:[%s6019_s1 + $0xd4] ss:$8 sps:$4 sm:$0xff]   ;;  %s4906_s30 = scalar_lea.vmem %s6018_s0, %s4129_s10  ;;  %v4234_v42 = vld [vmem:[%s6019_s1 + $0x1d0] ss:$8 sps:$4 sm:$0xff]   ;;  %v4236_v44 = vld [vmem:[%s6019_s1 + $0x1c4] ss:$8 sps:$4 sm:$0xff]  }
  0x1e   : > { %906 = vmatprep.subr.bf16.mxu1 %v4196_v17  ;;  %v4235_v43 = vld [vmem:[%s6019_s1 + $0xd0] ss:$8 sps:$4 sm:$0xff]   ;;  %s4918_s20 = scalar_lea.vmem %s4906_s30, %s4075_s4  ;;  %v4238_v45 = vld [vmem:[%s6019_s1 + $0xc4] ss:$8 sps:$4 sm:$0xff]   ;;  %v4240_v46 = vld [vmem:[%s6019_s1 + $0x1c0] ss:$8 sps:$4 sm:$0xff]   ;;  %s4931_s26 = scalar_lea.vmem %s4906_s30, %s4869_s25 }
  0x1f   : > { %v4241_v47 = vld [vmem:[%s6019_s1 + $0xc0] ss:$8 sps:$4 sm:$0xff]   ;;  %v4242_v48 = vld [vmem:[%s6019_s1 + $0x1b4] ss:$8 sps:$4 sm:$0xff]   ;;  %v4268_v49 = vld [vmem:[%s4918_s20 + $0x4] ss:$8 sps:$4 sm:$0xff]  }
  0x20   : > { %554 = vmatpush1.bf16.msra.mxu0 %v4198_v18  ;;  %v4244_v50 = vld [vmem:[%s6019_s1 + $0xb4] ss:$8 sps:$4 sm:$0xff]   ;;  %v4271_v51 = vld [vmem:[%s4931_s26 + $0x4] ss:$8 sps:$4 sm:$0xff]   ;;  %577 = vmatprep.mubr.bf16.mxu0 %v4268_v49  ;;  %v4246_v52 = vld [vmem:[%s6019_s1 + $0x1b0] ss:$8 sps:$4 sm:$0xff]  }
  0x21   : > { %907 = vmatpush1.bf16.msra.mxu1 %v4199_v19  ;;  %555 = vmatprep.subr.bf16.mxu0 %v4200_v20  ;;  %v4247_v53 = vld [vmem:[%s6019_s1 + $0xb0] ss:$8 sps:$4 sm:$0xff]   ;;  %v4248_v54 = vld [vmem:[%s6019_s1 + $0x1a4] ss:$8 sps:$4 sm:$0xff]   ;;  %v4252_v56 = vld [vmem:[%s6019_s1 + $0x1a0] ss:$8 sps:$4 sm:$0xff]  }
  0x22   : > { %908 = vmatprep.subr.bf16.mxu1 %v4202_v21  ;;  %930 = vmatprep.mubr.bf16.mxu1 %v4271_v51  ;;  %v4250_v55 = vld [vmem:[%s6019_s1 + $0xa4] ss:$8 sps:$4 sm:$0xff]   ;;  %v4253_v57 = vld [vmem:[%s6019_s1 + $0xa0] ss:$8 sps:$4 sm:$0xff]   ;;  %v4254_v58 = vld [vmem:[%s6019_s1 + $0x194] ss:$8 sps:$4 sm:$0xff]  }
  0x23   : > { %v4256_v59 = vld [vmem:[%s6019_s1 + $0x94] ss:$8 sps:$4 sm:$0xff]   ;;  %v4258_v60 = vld [vmem:[%s6019_s1 + $0x190] ss:$8 sps:$4 sm:$0xff]   ;;  %v4260_v62 = vld [vmem:[%s6019_s1 + $0x184] ss:$8 sps:$4 sm:$0xff]  }
  0x24   : > { %556 = vmatpush1.bf16.msra.mxu0 %v4204_v22  ;;  %v4259_v61 = vld [vmem:[%s6019_s1 + $0x90] ss:$8 sps:$4 sm:$0xff]   ;;  %v4262_v63 = vld [vmem:[%s6019_s1 + $0x84] ss:$8 sps:$4 sm:$0xff]   ;;  %v4264_v0 = vld [vmem:[%s6019_s1 + $0x180] ss:$8 sps:$4 sm:$0xff]  }
  0x25   : > { %909 = vmatpush1.bf16.msra.mxu1 %v4205_v23  ;;  %557 = vmatprep.subr.bf16.mxu0 %v4206_v24  ;;  %v4265_v1 = vld [vmem:[%s6019_s1 + $0x80] ss:$8 sps:$4 sm:$0xff]   ;;  %v4274_v2 = vld [vmem:[%s6019_s1 + $0x274] ss:$8 sps:$4 sm:$0xff]   ;;  %v4272_v6 = vld [vmem:[%s6019_s1 + $0x270] ss:$8 sps:$4 sm:$0xff]  }
  0x26   : > { %910 = vmatprep.subr.bf16.mxu1 %v4208_v25  ;;  %v4277_v3 = vld [vmem:[%s6019_s1 + $0x374] ss:$8 sps:$4 sm:$0xff]   ;;  %v4266_v4 = vld [vmem:[%s4918_s20] ss:$8 sps:$4 sm:$0xff]   ;;  %v4275_v7 = vld [vmem:[%s6019_s1 + $0x370] ss:$8 sps:$4 sm:$0xff]  }
  0x27   : > { %v4269_v5 = vld [vmem:[%s4931_s26] ss:$8 sps:$4 sm:$0xff]   ;;  %v4280_v8 = vld [vmem:[%s6019_s1 + $0x264] ss:$8 sps:$4 sm:$0xff]   ;;  %v4284_v10 = vld [vmem:[%s4918_s20 + $0x14] ss:$8 sps:$4 sm:$0xff]  }
  0x28   : > { %558 = vmatpush1.bf16.msra.mxu0 %v4210_v26  ;;  %v4283_v9 = vld [vmem:[%s6019_s1 + $0x364] ss:$8 sps:$4 sm:$0xff]   ;;  %v4286_v11 = vld [vmem:[%s4931_s26 + $0x14] ss:$8 sps:$4 sm:$0xff]   ;;  %v4278_v12 = vld [vmem:[%s6019_s1 + $0x260] ss:$8 sps:$4 sm:$0xff]  }
  0x29   : > { %911 = vmatpush1.bf16.msra.mxu1 %v4211_v27  ;;  %559 = vmatprep.subr.bf16.mxu0 %v4212_v28  ;;  %v4281_v13 = vld [vmem:[%s6019_s1 + $0x360] ss:$8 sps:$4 sm:$0xff]   ;;  %v4292_v14 = vld [vmem:[%s6019_s1 + $0x254] ss:$8 sps:$4 sm:$0xff]   ;;  %v4288_v16 = vld [vmem:[%s4918_s20 + $0x10] ss:$8 sps:$4 sm:$0xff]  }
  0x2a   : > { %912 = vmatprep.subr.bf16.mxu1 %v4214_v29  ;;  %v4295_v15 = vld [vmem:[%s6019_s1 + $0x354] ss:$8 sps:$4 sm:$0xff]   ;;  %v4289_v17 = vld [vmem:[%s4931_s26 + $0x10] ss:$8 sps:$4 sm:$0xff]   ;;  %v4298_v20 = vld [vmem:[%s6019_s1 + $0x244] ss:$8 sps:$4 sm:$0xff]  }
  0x2b   : > { %v4290_v18 = vld [vmem:[%s6019_s1 + $0x250] ss:$8 sps:$4 sm:$0xff]   ;;  %v4301_v21 = vld [vmem:[%s6019_s1 + $0x344] ss:$8 sps:$4 sm:$0xff]   ;;  %v4296_v24 = vld [vmem:[%s6019_s1 + $0x240] ss:$8 sps:$4 sm:$0xff]  }
  0x2c   : > { %560 = vmatpush1.bf16.msra.mxu0 %v4216_v30  ;;  %v4293_v19 = vld [vmem:[%s6019_s1 + $0x350] ss:$8 sps:$4 sm:$0xff]   ;;  %v4302_v22 = vld [vmem:[%s4918_s20 + $0x24] ss:$8 sps:$4 sm:$0xff]   ;;  %v4299_v25 = vld [vmem:[%s6019_s1 + $0x340] ss:$8 sps:$4 sm:$0xff]  }
  0x2d   : > { %913 = vmatpush1.bf16.msra.mxu1 %v4217_v31  ;;  %561 = vmatprep.subr.bf16.mxu0 %v4218_v32  ;;  %v4304_v23 = vld [vmem:[%s4931_s26 + $0x24] ss:$8 sps:$4 sm:$0xff]   ;;  %v4310_v26 = vld [vmem:[%s6019_s1 + $0x234] ss:$8 sps:$4 sm:$0xff]   ;;  %v4306_v28 = vld [vmem:[%s4918_s20 + $0x20] ss:$8 sps:$4 sm:$0xff]  }
  0x2e   : > { %914 = vmatprep.subr.bf16.mxu1 %v4220_v33  ;;  %v4313_v27 = vld [vmem:[%s6019_s1 + $0x334] ss:$8 sps:$4 sm:$0xff]   ;;  %v4307_v29 = vld [vmem:[%s4931_s26 + $0x20] ss:$8 sps:$4 sm:$0xff]   ;;  %v4308_v30 = vld [vmem:[%s6019_s1 + $0x230] ss:$8 sps:$4 sm:$0xff]  }
  0x2f   : > { %v4311_v31 = vld [vmem:[%s6019_s1 + $0x330] ss:$8 sps:$4 sm:$0xff]   ;;  %v4316_v32 = vld [vmem:[%s6019_s1 + $0x224] ss:$8 sps:$4 sm:$0xff]   ;;  %v4335_v49 = vld [vmem:[%s6019_s1 + $0x300] ss:$8 sps:$4 sm:$0xff]  }
  0x30   : > { %562 = vmatpush2.bf16.msra.mxu0 %v4222_v34  ;;  %v4319_v33 = vld [vmem:[%s6019_s1 + $0x324] ss:$8 sps:$4 sm:$0xff]   ;;  %v4320_v34 = vld [vmem:[%s4918_s20 + $0x34] ss:$8 sps:$4 sm:$0xff]   ;;  %s1011_s10 = sadd.s32 32, %s4869_s25  ;;  %s1452_s8 = sshra.s32 %s1451_s22, 3 }
  0x31   : > { %915 = vmatpush2.bf16.msra.mxu1 %v4223_v35  ;;  %563 = vmatprep.subr.bf16.mxu0 %v4224_v36  ;;  %v4322_v35 = vld [vmem:[%s4931_s26 + $0x34] ss:$8 sps:$4 sm:$0xff]   ;;  %v4314_v36 = vld [vmem:[%s6019_s1 + $0x220] ss:$8 sps:$4 sm:$0xff]   ;;  %s1012_s27 = sshra.s32 %s1011_s10, 3  ;;  %s4077_s24 = sshll.u32 %s1452_s8, 3 }
  0x32   : > { %916 = vmatprep.subr.bf16.mxu1 %v4226_v37  ;;  %v4317_v37 = vld [vmem:[%s6019_s1 + $0x320] ss:$8 sps:$4 sm:$0xff]   ;;  %v4349_v51 = vld [vmem:[%s6019_s1 + $0x3f4] ss:$8 sps:$4 sm:$0xff]   ;;  %s4076_s9 = sshll.u32 %s1012_s27, 3  ;;  %s5157_s8 = scalar_lea.vmem %s4906_s30, %s4077_s24 }
  0x33   : > { %s5146_s29 = scalar_lea.vmem %s4906_s30, %s4076_s9  ;;  %s1891_s6 = sadd.s32 64, %s4869_s25 }
  0x34   : > { %564 = vmatpush2.bf16.msra.mxu0 %v4228_v38  ;;  %v4328_v38 = vld [vmem:[%s6019_s1 + $0x214] ss:$8 sps:$4 sm:$0xff]   ;;  %s2331_s7 = sadd.s32 80, %s4869_s25  ;;  %s1892_s10 = sshra.s32 %s1891_s6, 3 }
  0x35   : > { %917 = vmatpush2.bf16.msra.mxu1 %v4229_v39  ;;  %565 = vmatprep.subr.bf16.mxu0 %v4230_v40  ;;  %v4331_v39 = vld [vmem:[%s6019_s1 + $0x314] ss:$8 sps:$4 sm:$0xff]   ;;  %v4324_v40 = vld [vmem:[%s4918_s20 + $0x30] ss:$8 sps:$4 sm:$0xff]   ;;  %s2332_s27 = sshra.s32 %s2331_s7, 3  ;;  %s4078_s4 = sshll.u32 %s1892_s10, 3 }
  0x36   : > { %918 = vmatprep.subr.bf16.mxu1 %v4232_v41  ;;  %v4325_v41 = vld [vmem:[%s4931_s26 + $0x30] ss:$8 sps:$4 sm:$0xff]   ;;  %s4079_s19 = sshll.u32 %s2332_s27, 3  ;;  %s5378_s21 = scalar_lea.vmem %s4906_s30, %s4078_s4 }
  0x37   : > { %s5389_s27 = scalar_lea.vmem %s4906_s30, %s4079_s19  ;;  %s2771_s4 = sadd.s32 96, %s4869_s25 }
  0x38   : > { %566 = vmatpush2.bf16.msra.mxu0 %v4234_v42  ;;  %v4326_v42 = vld [vmem:[%s6019_s1 + $0x210] ss:$8 sps:$4 sm:$0xff]   ;;  %s2772_s9 = sshra.s32 %s2771_s4, 3 }
  0x39   : > { %919 = vmatpush2.bf16.msra.mxu1 %v4235_v43  ;;  %567 = vmatprep.subr.bf16.mxu0 %v4236_v44  ;;  %v4329_v43 = vld [vmem:[%s6019_s1 + $0x310] ss:$8 sps:$4 sm:$0xff]   ;;  %v4334_v44 = vld [vmem:[%s6019_s1 + $0x204] ss:$8 sps:$4 sm:$0xff]   ;;  %s4080_s10 = sshll.u32 %s2772_s9, 3 }
  0x3a   : > { %920 = vmatprep.subr.bf16.mxu1 %v4238_v45  ;;  %v4337_v45 = vld [vmem:[%s6019_s1 + $0x304] ss:$8 sps:$4 sm:$0xff]   ;;  %s5497_s24 = scalar_lea.vmem %s4906_s30, %s4080_s10 }
  0x3c   : > { %568 = vmatpush2.bf16.msra.mxu0 %v4240_v46  ;;  %v4338_v46 = vld [vmem:[%s4918_s20 + $0x44] ss:$8 sps:$4 sm:$0xff]  }
  0x3d   : > { %921 = vmatpush2.bf16.msra.mxu1 %v4241_v47  ;;  %569 = vmatprep.subr.bf16.mxu0 %v4242_v48  ;;  %v4340_v47 = vld [vmem:[%s4931_s26 + $0x44] ss:$8 sps:$4 sm:$0xff]   ;;  %v4332_v48 = vld [vmem:[%s6019_s1 + $0x200] ss:$8 sps:$4 sm:$0xff]  }
  0x3e   : > { %922 = vmatprep.subr.bf16.mxu1 %v4244_v50  ;;  %v4346_v50 = vld [vmem:[%s6019_s1 + $0x2f4] ss:$8 sps:$4 sm:$0xff]  }
  0x40   : > { %570 = vmatpush2.bf16.msra.mxu0 %v4246_v52  ;;  %v4342_v52 = vld [vmem:[%s4918_s20 + $0x40] ss:$8 sps:$4 sm:$0xff]  }
  0x41   : > { %923 = vmatpush2.bf16.msra.mxu1 %v4247_v53  ;;  %571 = vmatprep.subr.bf16.mxu0 %v4248_v54  ;;  %v4343_v53 = vld [vmem:[%s4931_s26 + $0x40] ss:$8 sps:$4 sm:$0xff]   ;;  %v4344_v54 = vld [vmem:[%s6019_s1 + $0x2f0] ss:$8 sps:$4 sm:$0xff]  }
  0x42   : > { %924 = vmatprep.subr.bf16.mxu1 %v4250_v55  ;;  %v4347_v55 = vld [vmem:[%s6019_s1 + $0x3f0] ss:$8 sps:$4 sm:$0xff]  }
  0x44   : > { %572 = vmatpush2.bf16.msra.mxu0 %v4252_v56  ;;  %v4352_v56 = vld [vmem:[%s6019_s1 + $0x2e4] ss:$8 sps:$4 sm:$0xff]  }
  0x45   : > { %925 = vmatpush2.bf16.msra.mxu1 %v4253_v57  ;;  %573 = vmatprep.subr.bf16.mxu0 %v4254_v58  ;;  %v4355_v57 = vld [vmem:[%s6019_s1 + $0x3e4] ss:$8 sps:$4 sm:$0xff]   ;;  %v4356_v58 = vld [vmem:[%s4918_s20 + $0x54] ss:$8 sps:$4 sm:$0xff]  }
  0x46   : > { %926 = vmatprep.subr.bf16.mxu1 %v4256_v59  ;;  %v4358_v59 = vld [vmem:[%s4931_s26 + $0x54] ss:$8 sps:$4 sm:$0xff]  }
  0x48   : > { %574 = vmatpush2.bf16.msra.mxu0 %v4258_v60  ;;  %v4350_v60 = vld [vmem:[%s6019_s1 + $0x2e0] ss:$8 sps:$4 sm:$0xff]  }
  0x49   : > { %927 = vmatpush2.bf16.msra.mxu1 %v4259_v61  ;;  %575 = vmatprep.subr.bf16.mxu0 %v4260_v62  ;;  %v4353_v61 = vld [vmem:[%s6019_s1 + $0x3e0] ss:$8 sps:$4 sm:$0xff]   ;;  %v4364_v62 = vld [vmem:[%s6019_s1 + $0x2d4] ss:$8 sps:$4 sm:$0xff]  }
  0x4a   : > { %928 = vmatprep.subr.bf16.mxu1 %v4262_v63  ;;  %v4367_v63 = vld [vmem:[%s6019_s1 + $0x3d4] ss:$8 sps:$4 sm:$0xff]  }
  0x4c   : > { %576 = vmatpush2.bf16.msra.mxu0 %v4264_v0  ;;  %v4360_v0 = vld [vmem:[%s4918_s20 + $0x50] ss:$8 sps:$4 sm:$0xff]  }
  0x4d   : > { %929 = vmatpush2.bf16.msra.mxu1 %v4265_v1  ;;  %1306 = vmatprep.subr.bf16.mxu0 %v4274_v2  ;;  %v4361_v1 = vld [vmem:[%s4931_s26 + $0x50] ss:$8 sps:$4 sm:$0xff]  }
  0x4e   : > { %1746 = vmatprep.subr.bf16.mxu1 %v4277_v3  ;;  %v4362_v2 = vld [vmem:[%s6019_s1 + $0x2d0] ss:$8 sps:$4 sm:$0xff]  }
  0x4f   : > { %578 = vmatmul.mubr.bf16.vlgmr.msra.gmra.mxu0 %v4266_v4  ;;  %v4365_v3 = vld [vmem:[%s6019_s1 + $0x3d0] ss:$8 sps:$4 sm:$0xff]   ;;  %v4370_v4 = vld [vmem:[%s6019_s1 + $0x2c4] ss:$8 sps:$4 sm:$0xff]  }
  0x50   : > { %931 = vmatmul.mubr.bf16.vlgmr.msra.gmra.mxu1 %v4269_v5  ;;  %1307 = vmatpush1.bf16.msra.mxu0 %v4272_v6  ;;  %v4373_v5 = vld [vmem:[%s6019_s1 + $0x3c4] ss:$8 sps:$4 sm:$0xff]  }
  0x51   : > { %1747 = vmatpush1.bf16.msra.mxu1 %v4275_v7  ;;  %1308 = vmatprep.subr.bf16.mxu0 %v4280_v8  ;;  %v4374_v6 = vld [vmem:[%s4918_s20 + $0x64] ss:$8 sps:$4 sm:$0xff]   ;;  %v4368_v8 = vld [vmem:[%s6019_s1 + $0x2c0] ss:$8 sps:$4 sm:$0xff]  }
  0x52   : > { %1748 = vmatprep.subr.bf16.mxu1 %v4283_v9  ;;  %587 = vmatprep.mubr.bf16.mxu0 %v4284_v10  ;;  %v4376_v7 = vld [vmem:[%s4931_s26 + $0x64] ss:$8 sps:$4 sm:$0xff]   ;;  %v4371_v9 = vld [vmem:[%s6019_s1 + $0x3c0] ss:$8 sps:$4 sm:$0xff]   ;;  %v4382_v10 = vld [vmem:[%s6019_s1 + $0x2b4] ss:$8 sps:$4 sm:$0xff]  }
  0x53   : > { %940 = vmatprep.mubr.bf16.mxu1 %v4286_v11  ;;  %v4385_v11 = vld [vmem:[%s6019_s1 + $0x3b4] ss:$8 sps:$4 sm:$0xff]  }
  0x54   : > { %1309 = vmatpush1.bf16.msra.mxu0 %v4278_v12  ;;  %v4378_v12 = vld [vmem:[%s4918_s20 + $0x60] ss:$8 sps:$4 sm:$0xff]  }
  0x55   : > { %1749 = vmatpush1.bf16.msra.mxu1 %v4281_v13  ;;  %1310 = vmatprep.subr.bf16.mxu0 %v4292_v14  ;;  %v4379_v13 = vld [vmem:[%s4931_s26 + $0x60] ss:$8 sps:$4 sm:$0xff]   ;;  %v4380_v14 = vld [vmem:[%s6019_s1 + $0x2b0] ss:$8 sps:$4 sm:$0xff]  }
  0x56   : > { %1750 = vmatprep.subr.bf16.mxu1 %v4295_v15  ;;  %v4383_v15 = vld [vmem:[%s6019_s1 + $0x3b0] ss:$8 sps:$4 sm:$0xff]  }
  0x57   : > { %588 = vmatmul.mubr.bf16.gmra.mxu0 %v4288_v16  ;;  %v4388_v16 = vld [vmem:[%s6019_s1 + $0x2a4] ss:$8 sps:$4 sm:$0xff]  }
  0x58   : > { %941 = vmatmul.mubr.bf16.gmra.mxu1 %v4289_v17  ;;  %1311 = vmatpush1.bf16.msra.mxu0 %v4290_v18  ;;  %v4391_v17 = vld [vmem:[%s6019_s1 + $0x3a4] ss:$8 sps:$4 sm:$0xff]   ;;  %v4392_v18 = vld [vmem:[%s4918_s20 + $0x74] ss:$8 sps:$4 sm:$0xff]  }
  0x59   : > { %1751 = vmatpush1.bf16.msra.mxu1 %v4293_v19  ;;  %1312 = vmatprep.subr.bf16.mxu0 %v4298_v20  ;;  %v4394_v19 = vld [vmem:[%s4931_s26 + $0x74] ss:$8 sps:$4 sm:$0xff]   ;;  %v4386_v20 = vld [vmem:[%s6019_s1 + $0x2a0] ss:$8 sps:$4 sm:$0xff]  }
  0x5a   : > { %1752 = vmatprep.subr.bf16.mxu1 %v4301_v21  ;;  %597 = vmatprep.mubr.bf16.mxu0 %v4302_v22  ;;  %v4389_v21 = vld [vmem:[%s6019_s1 + $0x3a0] ss:$8 sps:$4 sm:$0xff]   ;;  %v4400_v22 = vld [vmem:[%s6019_s1 + $0x294] ss:$8 sps:$4 sm:$0xff]  }
  0x5b   : > { %950 = vmatprep.mubr.bf16.mxu1 %v4304_v23  ;;  %v4403_v23 = vld [vmem:[%s6019_s1 + $0x394] ss:$8 sps:$4 sm:$0xff]  }
  0x5c   : > { %1313 = vmatpush1.bf16.msra.mxu0 %v4296_v24  ;;  %v4396_v24 = vld [vmem:[%s4918_s20 + $0x70] ss:$8 sps:$4 sm:$0xff]   ;;  %s3511_s20 = sshll.u32 %s6074_s13, 6 }
  0x5d   : > { %1753 = vmatpush1.bf16.msra.mxu1 %v4299_v25  ;;  %1314 = vmatprep.subr.bf16.mxu0 %v4310_v26  ;;  %v4397_v25 = vld [vmem:[%s4931_s26 + $0x70] ss:$8 sps:$4 sm:$0xff]  }
  0x5e   : > { %1754 = vmatprep.subr.bf16.mxu1 %v4313_v27  ;;  %v4398_v26 = vld [vmem:[%s6019_s1 + $0x290] ss:$8 sps:$4 sm:$0xff]  }
  0x5f   : > { %598 = vmatmul.mubr.bf16.gmra.mxu0 %v4306_v28  ;;  %v4401_v27 = vld [vmem:[%s6019_s1 + $0x390] ss:$8 sps:$4 sm:$0xff]   ;;  %v4406_v28 = vld [vmem:[%s6019_s1 + $0x284] ss:$8 sps:$4 sm:$0xff]  }
  0x60   : > { %951 = vmatmul.mubr.bf16.gmra.mxu1 %v4307_v29  ;;  %1315 = vmatpush1.bf16.msra.mxu0 %v4308_v30  ;;  %v4409_v29 = vld [vmem:[%s6019_s1 + $0x384] ss:$8 sps:$4 sm:$0xff]  }
  0x61   : > { %1755 = vmatpush1.bf16.msra.mxu1 %v4311_v31  ;;  %1316 = vmatprep.subr.bf16.mxu0 %v4316_v32  ;;  %v4412_v30 = vld [vmem:[%s5146_s29 + $0x4] ss:$8 sps:$4 sm:$0xff]   ;;  %v4404_v32 = vld [vmem:[%s6019_s1 + $0x280] ss:$8 sps:$4 sm:$0xff]  }
  0x62   : > { %1756 = vmatprep.subr.bf16.mxu1 %v4319_v33  ;;  %607 = vmatprep.mubr.bf16.mxu0 %v4320_v34  ;;  %v4415_v31 = vld [vmem:[%s5157_s8 + $0x4] ss:$8 sps:$4 sm:$0xff]   ;;  %v4407_v33 = vld [vmem:[%s6019_s1 + $0x380] ss:$8 sps:$4 sm:$0xff]   ;;  %v4418_v34 = vld [vmem:[%s6019_s1 + $0x474] ss:$8 sps:$4 sm:$0xff]  }
  0x63   : > { %960 = vmatprep.mubr.bf16.mxu1 %v4322_v35  ;;  %v4421_v35 = vld [vmem:[%s6019_s1 + $0x574] ss:$8 sps:$4 sm:$0xff]  }
  0x64   : > { %1317 = vmatpush1.bf16.msra.mxu0 %v4314_v36  ;;  %v4410_v36 = vld [vmem:[%s5146_s29] ss:$8 sps:$4 sm:$0xff]  }
  0x65   : > { %1757 = vmatpush1.bf16.msra.mxu1 %v4317_v37  ;;  %1318 = vmatprep.subr.bf16.mxu0 %v4328_v38  ;;  %v4413_v37 = vld [vmem:[%s5157_s8] ss:$8 sps:$4 sm:$0xff]   ;;  %v4416_v38 = vld [vmem:[%s6019_s1 + $0x470] ss:$8 sps:$4 sm:$0xff]  }
  0x66   : > { %1758 = vmatprep.subr.bf16.mxu1 %v4331_v39  ;;  %v4419_v39 = vld [vmem:[%s6019_s1 + $0x570] ss:$8 sps:$4 sm:$0xff]  }
  0x67   : > { %608 = vmatmul.mubr.bf16.gmra.mxu0 %v4324_v40  ;;  %v4424_v40 = vld [vmem:[%s6019_s1 + $0x464] ss:$8 sps:$4 sm:$0xff]  }
  0x68   : > { %961 = vmatmul.mubr.bf16.gmra.mxu1 %v4325_v41  ;;  %1319 = vmatpush1.bf16.msra.mxu0 %v4326_v42  ;;  %v4427_v41 = vld [vmem:[%s6019_s1 + $0x564] ss:$8 sps:$4 sm:$0xff]   ;;  %v4428_v42 = vld [vmem:[%s5146_s29 + $0x14] ss:$8 sps:$4 sm:$0xff]  }
  0x69   : > { %1759 = vmatpush1.bf16.msra.mxu1 %v4329_v43  ;;  %1320 = vmatprep.subr.bf16.mxu0 %v4334_v44  ;;  %v4430_v43 = vld [vmem:[%s5157_s8 + $0x14] ss:$8 sps:$4 sm:$0xff]   ;;  %v4422_v44 = vld [vmem:[%s6019_s1 + $0x460] ss:$8 sps:$4 sm:$0xff]  }
  0x6a   : > { %1760 = vmatprep.subr.bf16.mxu1 %v4337_v45  ;;  %617 = vmatprep.mubr.bf16.mxu0 %v4338_v46  ;;  %v4425_v45 = vld [vmem:[%s6019_s1 + $0x560] ss:$8 sps:$4 sm:$0xff]   ;;  %v4436_v46 = vld [vmem:[%s6019_s1 + $0x454] ss:$8 sps:$4 sm:$0xff]  }
  0x6b   : > { %970 = vmatprep.mubr.bf16.mxu1 %v4340_v47  ;;  %v4439_v47 = vld [vmem:[%s6019_s1 + $0x554] ss:$8 sps:$4 sm:$0xff]  }
  0x6c   : > { %1321 = vmatpush1.bf16.msra.mxu0 %v4332_v48  ;;  %v4432_v48 = vld [vmem:[%s5146_s29 + $0x10] ss:$8 sps:$4 sm:$0xff]  }
  0x6d   : > { %1761 = vmatpush1.bf16.msra.mxu1 %v4335_v49  ;;  %1322 = vmatprep.subr.bf16.mxu0 %v4346_v50  ;;  %v4433_v49 = vld [vmem:[%s5157_s8 + $0x10] ss:$8 sps:$4 sm:$0xff]  }
  0x6e   : > { %1762 = vmatprep.subr.bf16.mxu1 %v4349_v51  ;;  %v4434_v50 = vld [vmem:[%s6019_s1 + $0x450] ss:$8 sps:$4 sm:$0xff]  }
  0x6f   : > { %618 = vmatmul.mubr.bf16.gmra.mxu0 %v4342_v52  ;;  %v4437_v51 = vld [vmem:[%s6019_s1 + $0x550] ss:$8 sps:$4 sm:$0xff]   ;;  %v4442_v52 = vld [vmem:[%s6019_s1 + $0x444] ss:$8 sps:$4 sm:$0xff]  }
  0x70   : > { %971 = vmatmul.mubr.bf16.gmra.mxu1 %v4343_v53  ;;  %1323 = vmatpush2.bf16.msra.mxu0 %v4344_v54  ;;  %v4445_v53 = vld [vmem:[%s6019_s1 + $0x544] ss:$8 sps:$4 sm:$0xff]  }
  0x71   : > { %1763 = vmatpush2.bf16.msra.mxu1 %v4347_v55  ;;  %1324 = vmatprep.subr.bf16.mxu0 %v4352_v56  ;;  %v4446_v54 = vld [vmem:[%s5146_s29 + $0x24] ss:$8 sps:$4 sm:$0xff]   ;;  %v4440_v56 = vld [vmem:[%s6019_s1 + $0x440] ss:$8 sps:$4 sm:$0xff]  }
  0x72   : > { %1764 = vmatprep.subr.bf16.mxu1 %v4355_v57  ;;  %627 = vmatprep.mubr.bf16.mxu0 %v4356_v58  ;;  %v4448_v55 = vld [vmem:[%s5157_s8 + $0x24] ss:$8 sps:$4 sm:$0xff]   ;;  %v4443_v57 = vld [vmem:[%s6019_s1 + $0x540] ss:$8 sps:$4 sm:$0xff]   ;;  %v4454_v58 = vld [vmem:[%s6019_s1 + $0x434] ss:$8 sps:$4 sm:$0xff]  }
  0x73   : > { %980 = vmatprep.mubr.bf16.mxu1 %v4358_v59  ;;  %v4457_v59 = vld [vmem:[%s6019_s1 + $0x534] ss:$8 sps:$4 sm:$0xff]  }
  0x74   : > { %1325 = vmatpush2.bf16.msra.mxu0 %v4350_v60  ;;  %v4450_v60 = vld [vmem:[%s5146_s29 + $0x20] ss:$8 sps:$4 sm:$0xff]  }
  0x75   : > { %1765 = vmatpush2.bf16.msra.mxu1 %v4353_v61  ;;  %1326 = vmatprep.subr.bf16.mxu0 %v4364_v62  ;;  %v4451_v61 = vld [vmem:[%s5157_s8 + $0x20] ss:$8 sps:$4 sm:$0xff]   ;;  %v4452_v62 = vld [vmem:[%s6019_s1 + $0x430] ss:$8 sps:$4 sm:$0xff]  }
  0x76   : > { %1766 = vmatprep.subr.bf16.mxu1 %v4367_v63  ;;  %v4455_v63 = vld [vmem:[%s6019_s1 + $0x530] ss:$8 sps:$4 sm:$0xff]  }
  0x77   : > { %628 = vmatmul.mubr.bf16.gmra.mxu0 %v4360_v0  ;;  %v4460_v0 = vld [vmem:[%s6019_s1 + $0x424] ss:$8 sps:$4 sm:$0xff]  }
  0x78   : > { %981 = vmatmul.mubr.bf16.gmra.mxu1 %v4361_v1  ;;  %1327 = vmatpush2.bf16.msra.mxu0 %v4362_v2  ;;  %v4463_v1 = vld [vmem:[%s6019_s1 + $0x524] ss:$8 sps:$4 sm:$0xff]   ;;  %v4464_v2 = vld [vmem:[%s5146_s29 + $0x34] ss:$8 sps:$4 sm:$0xff]  }
  0x79   : > { %1767 = vmatpush2.bf16.msra.mxu1 %v4365_v3  ;;  %1328 = vmatprep.subr.bf16.mxu0 %v4370_v4  ;;  %v4466_v3 = vld [vmem:[%s5157_s8 + $0x34] ss:$8 sps:$4 sm:$0xff]   ;;  %v4458_v4 = vld [vmem:[%s6019_s1 + $0x420] ss:$8 sps:$4 sm:$0xff]  }
  0x7a   : > { %1768 = vmatprep.subr.bf16.mxu1 %v4373_v5  ;;  %637 = vmatprep.mubr.bf16.mxu0 %v4374_v6  ;;  %v4461_v5 = vld [vmem:[%s6019_s1 + $0x520] ss:$8 sps:$4 sm:$0xff]   ;;  %v4472_v6 = vld [vmem:[%s6019_s1 + $0x414] ss:$8 sps:$4 sm:$0xff]  }
  0x7b   : > { %990 = vmatprep.mubr.bf16.mxu1 %v4376_v7  ;;  %v4475_v7 = vld [vmem:[%s6019_s1 + $0x514] ss:$8 sps:$4 sm:$0xff]  }
  0x7c   : > { %1329 = vmatpush2.bf16.msra.mxu0 %v4368_v8  ;;  %v4468_v8 = vld [vmem:[%s5146_s29 + $0x30] ss:$8 sps:$4 sm:$0xff]  }
  0x7d   : > { %1769 = vmatpush2.bf16.msra.mxu1 %v4371_v9  ;;  %1330 = vmatprep.subr.bf16.mxu0 %v4382_v10  ;;  %v4469_v9 = vld [vmem:[%s5157_s8 + $0x30] ss:$8 sps:$4 sm:$0xff]  }
  0x7e   : > { %1770 = vmatprep.subr.bf16.mxu1 %v4385_v11  ;;  %v4470_v10 = vld [vmem:[%s6019_s1 + $0x410] ss:$8 sps:$4 sm:$0xff]  }
  0x7f   : > { %638 = vmatmul.mubr.bf16.gmra.mxu0 %v4378_v12  ;;  %v4473_v11 = vld [vmem:[%s6019_s1 + $0x510] ss:$8 sps:$4 sm:$0xff]   ;;  %v4478_v12 = vld [vmem:[%s6019_s1 + $0x404] ss:$8 sps:$4 sm:$0xff]  }
  0x80   : > { %991 = vmatmul.mubr.bf16.gmra.mxu1 %v4379_v13  ;;  %1331 = vmatpush2.bf16.msra.mxu0 %v4380_v14  ;;  %v4481_v13 = vld [vmem:[%s6019_s1 + $0x504] ss:$8 sps:$4 sm:$0xff]  }
  0x81   : > { %1771 = vmatpush2.bf16.msra.mxu1 %v4383_v15  ;;  %1332 = vmatprep.subr.bf16.mxu0 %v4388_v16  ;;  %v4482_v14 = vld [vmem:[%s5146_s29 + $0x44] ss:$8 sps:$4 sm:$0xff]   ;;  %v4476_v16 = vld [vmem:[%s6019_s1 + $0x400] ss:$8 sps:$4 sm:$0xff]  }
  0x82   : > { %1772 = vmatprep.subr.bf16.mxu1 %v4391_v17  ;;  %647 = vmatprep.mubr.bf16.mxu0 %v4392_v18  ;;  %v4484_v15 = vld [vmem:[%s5157_s8 + $0x44] ss:$8 sps:$4 sm:$0xff]   ;;  %v4479_v17 = vld [vmem:[%s6019_s1 + $0x500] ss:$8 sps:$4 sm:$0xff]   ;;  %v4490_v18 = vld [vmem:[%s6019_s1 + $0x4f4] ss:$8 sps:$4 sm:$0xff]  }
  0x83   : > { %1000 = vmatprep.mubr.bf16.mxu1 %v4394_v19  ;;  %v4493_v19 = vld [vmem:[%s6019_s1 + $0x5f4] ss:$8 sps:$4 sm:$0xff]  }
  0x84   : > { %1333 = vmatpush2.bf16.msra.mxu0 %v4386_v20  ;;  %v4486_v20 = vld [vmem:[%s5146_s29 + $0x40] ss:$8 sps:$4 sm:$0xff]  }
  0x85   : > { %1773 = vmatpush2.bf16.msra.mxu1 %v4389_v21  ;;  %1334 = vmatprep.subr.bf16.mxu0 %v4400_v22  ;;  %v4487_v21 = vld [vmem:[%s5157_s8 + $0x40] ss:$8 sps:$4 sm:$0xff]   ;;  %v4488_v22 = vld [vmem:[%s6019_s1 + $0x4f0] ss:$8 sps:$4 sm:$0xff]  }
  0x86   : > { %1774 = vmatprep.subr.bf16.mxu1 %v4403_v23  ;;  %v4491_v23 = vld [vmem:[%s6019_s1 + $0x5f0] ss:$8 sps:$4 sm:$0xff]  }
  0x87   : > { %648 = vmatmul.mubr.bf16.gmra.mxu0 %v4396_v24  ;;  %v4496_v24 = vld [vmem:[%s6019_s1 + $0x4e4] ss:$8 sps:$4 sm:$0xff]  }
  0x88   : > { %1001 = vmatmul.mubr.bf16.gmra.mxu1 %v4397_v25  ;;  %1335 = vmatpush2.bf16.msra.mxu0 %v4398_v26  ;;  %v4499_v25 = vld [vmem:[%s6019_s1 + $0x5e4] ss:$8 sps:$4 sm:$0xff]   ;;  %v4500_v26 = vld [vmem:[%s5146_s29 + $0x54] ss:$8 sps:$4 sm:$0xff]  }
  0x89   : > { %1775 = vmatpush2.bf16.msra.mxu1 %v4401_v27  ;;  %1336 = vmatprep.subr.bf16.mxu0 %v4406_v28  ;;  %v4502_v27 = vld [vmem:[%s5157_s8 + $0x54] ss:$8 sps:$4 sm:$0xff]   ;;  %v4494_v28 = vld [vmem:[%s6019_s1 + $0x4e0] ss:$8 sps:$4 sm:$0xff]  }
  0x8a   : > { %1776 = vmatprep.subr.bf16.mxu1 %v4409_v29  ;;  %1338 = vmatprep.mubr.bf16.mxu0 %v4412_v30  ;;  %v4497_v29 = vld [vmem:[%s6019_s1 + $0x5e0] ss:$8 sps:$4 sm:$0xff]   ;;  %v4508_v30 = vld [vmem:[%s6019_s1 + $0x4d4] ss:$8 sps:$4 sm:$0xff]  }
  0x8b   : > { %1778 = vmatprep.mubr.bf16.mxu1 %v4415_v31  ;;  %v4511_v31 = vld [vmem:[%s6019_s1 + $0x5d4] ss:$8 sps:$4 sm:$0xff]  }
  0x8c   : > { %1337 = vmatpush2.bf16.msra.mxu0 %v4404_v32  ;;  %v4504_v32 = vld [vmem:[%s5146_s29 + $0x50] ss:$8 sps:$4 sm:$0xff]  }
  0x8d   : > { %1777 = vmatpush2.bf16.msra.mxu1 %v4407_v33  ;;  %2186 = vmatprep.subr.bf16.mxu0 %v4418_v34  ;;  %v4505_v33 = vld [vmem:[%s5157_s8 + $0x50] ss:$8 sps:$4 sm:$0xff]  }
  0x8e   : > { %2626 = vmatprep.subr.bf16.mxu1 %v4421_v35  ;;  %v4506_v34 = vld [vmem:[%s6019_s1 + $0x4d0] ss:$8 sps:$4 sm:$0xff]  }
  0x8f   : > { %1339 = vmatmul.mubr.bf16.vlgmr.msra.gmra.mxu0 %v4410_v36  ;;  %v4509_v35 = vld [vmem:[%s6019_s1 + $0x5d0] ss:$8 sps:$4 sm:$0xff]   ;;  %v4514_v36 = vld [vmem:[%s6019_s1 + $0x4c4] ss:$8 sps:$4 sm:$0xff]  }
  0x90   : > { %1779 = vmatmul.mubr.bf16.vlgmr.msra.gmra.mxu1 %v4413_v37  ;;  %2187 = vmatpush1.bf16.msra.mxu0 %v4416_v38  ;;  %v4517_v37 = vld [vmem:[%s6019_s1 + $0x5c4] ss:$8 sps:$4 sm:$0xff]  }
  0x91   : > { %2627 = vmatpush1.bf16.msra.mxu1 %v4419_v39  ;;  %2188 = vmatprep.subr.bf16.mxu0 %v4424_v40  ;;  %v4518_v38 = vld [vmem:[%s5146_s29 + $0x64] ss:$8 sps:$4 sm:$0xff]   ;;  %v4512_v40 = vld [vmem:[%s6019_s1 + $0x4c0] ss:$8 sps:$4 sm:$0xff]  }
  0x92   : > { %2628 = vmatprep.subr.bf16.mxu1 %v4427_v41  ;;  %1348 = vmatprep.mubr.bf16.mxu0 %v4428_v42  ;;  %v4520_v39 = vld [vmem:[%s5157_s8 + $0x64] ss:$8 sps:$4 sm:$0xff]   ;;  %v4515_v41 = vld [vmem:[%s6019_s1 + $0x5c0] ss:$8 sps:$4 sm:$0xff]   ;;  %v4526_v42 = vld [vmem:[%s6019_s1 + $0x4b4] ss:$8 sps:$4 sm:$0xff]  }
  0x93   : > { %1788 = vmatprep.mubr.bf16.mxu1 %v4430_v43  ;;  %v4529_v43 = vld [vmem:[%s6019_s1 + $0x5b4] ss:$8 sps:$4 sm:$0xff]  }
  0x94   : > { %2189 = vmatpush1.bf16.msra.mxu0 %v4422_v44  ;;  %v4522_v44 = vld [vmem:[%s5146_s29 + $0x60] ss:$8 sps:$4 sm:$0xff]  }
  0x95   : > { %2629 = vmatpush1.bf16.msra.mxu1 %v4425_v45  ;;  %2190 = vmatprep.subr.bf16.mxu0 %v4436_v46  ;;  %v4523_v45 = vld [vmem:[%s5157_s8 + $0x60] ss:$8 sps:$4 sm:$0xff]   ;;  %v4524_v46 = vld [vmem:[%s6019_s1 + $0x4b0] ss:$8 sps:$4 sm:$0xff]  }
  0x96   : > { %2630 = vmatprep.subr.bf16.mxu1 %v4439_v47  ;;  %v4527_v47 = vld [vmem:[%s6019_s1 + $0x5b0] ss:$8 sps:$4 sm:$0xff]  }
  0x97   : > { %1349 = vmatmul.mubr.bf16.gmra.mxu0 %v4432_v48  ;;  %v4532_v48 = vld [vmem:[%s6019_s1 + $0x4a4] ss:$8 sps:$4 sm:$0xff]  }
  0x98   : > { %1789 = vmatmul.mubr.bf16.gmra.mxu1 %v4433_v49  ;;  %2191 = vmatpush1.bf16.msra.mxu0 %v4434_v50  ;;  %v4535_v49 = vld [vmem:[%s6019_s1 + $0x5a4] ss:$8 sps:$4 sm:$0xff]   ;;  %v4536_v50 = vld [vmem:[%s5146_s29 + $0x74] ss:$8 sps:$4 sm:$0xff]  }
  0x99   : > { %2631 = vmatpush1.bf16.msra.mxu1 %v4437_v51  ;;  %2192 = vmatprep.subr.bf16.mxu0 %v4442_v52  ;;  %v4538_v51 = vld [vmem:[%s5157_s8 + $0x74] ss:$8 sps:$4 sm:$0xff]   ;;  %v4530_v52 = vld [vmem:[%s6019_s1 + $0x4a0] ss:$8 sps:$4 sm:$0xff]  }
  0x9a   : > { %2632 = vmatprep.subr.bf16.mxu1 %v4445_v53  ;;  %1358 = vmatprep.mubr.bf16.mxu0 %v4446_v54  ;;  %v4533_v53 = vld [vmem:[%s6019_s1 + $0x5a0] ss:$8 sps:$4 sm:$0xff]   ;;  %v4544_v54 = vld [vmem:[%s6019_s1 + $0x494] ss:$8 sps:$4 sm:$0xff]  }
  0x9b   : > { %1798 = vmatprep.mubr.bf16.mxu1 %v4448_v55  ;;  %v4547_v55 = vld [vmem:[%s6019_s1 + $0x594] ss:$8 sps:$4 sm:$0xff]  }
  0x9c   : > { %2193 = vmatpush1.bf16.msra.mxu0 %v4440_v56  ;;  %v4540_v56 = vld [vmem:[%s5146_s29 + $0x70] ss:$8 sps:$4 sm:$0xff]  }
  0x9d   : > { %2633 = vmatpush1.bf16.msra.mxu1 %v4443_v57  ;;  %2194 = vmatprep.subr.bf16.mxu0 %v4454_v58  ;;  %v4541_v57 = vld [vmem:[%s5157_s8 + $0x70] ss:$8 sps:$4 sm:$0xff]  }
  0x9e   : > { %2634 = vmatprep.subr.bf16.mxu1 %v4457_v59  ;;  %v4542_v58 = vld [vmem:[%s6019_s1 + $0x490] ss:$8 sps:$4 sm:$0xff]  }
  0x9f   : > { %1359 = vmatmul.mubr.bf16.gmra.mxu0 %v4450_v60  ;;  %v4545_v59 = vld [vmem:[%s6019_s1 + $0x590] ss:$8 sps:$4 sm:$0xff]   ;;  %v4550_v60 = vld [vmem:[%s6019_s1 + $0x484] ss:$8 sps:$4 sm:$0xff]  }
  0xa0   : > { %1799 = vmatmul.mubr.bf16.gmra.mxu1 %v4451_v61  ;;  %2195 = vmatpush1.bf16.msra.mxu0 %v4452_v62  ;;  %v4553_v61 = vld [vmem:[%s6019_s1 + $0x584] ss:$8 sps:$4 sm:$0xff]  }
  0xa1   : > { %2635 = vmatpush1.bf16.msra.mxu1 %v4455_v63  ;;  %2196 = vmatprep.subr.bf16.mxu0 %v4460_v0  ;;  %v4556_v62 = vld [vmem:[%s5378_s21 + $0x4] ss:$8 sps:$4 sm:$0xff]   ;;  %v4548_v0 = vld [vmem:[%s6019_s1 + $0x480] ss:$8 sps:$4 sm:$0xff]  }
  0xa2   : > { %2636 = vmatprep.subr.bf16.mxu1 %v4463_v1  ;;  %1368 = vmatprep.mubr.bf16.mxu0 %v4464_v2  ;;  %v4559_v63 = vld [vmem:[%s5389_s27 + $0x4] ss:$8 sps:$4 sm:$0xff]   ;;  %v4551_v1 = vld [vmem:[%s6019_s1 + $0x580] ss:$8 sps:$4 sm:$0xff]   ;;  %v4562_v2 = vld [vmem:[%s6019_s1 + $0x674] ss:$8 sps:$4 sm:$0xff]  }
  0xa3   : > { %1808 = vmatprep.mubr.bf16.mxu1 %v4466_v3  ;;  %v4554_v3 = vld [vmem:[%s5378_s21] ss:$8 sps:$4 sm:$0xff]  }
  0xa4   : > { %2197 = vmatpush1.bf16.msra.mxu0 %v4458_v4  ;;  %v4557_v4 = vld [vmem:[%s5389_s27] ss:$8 sps:$4 sm:$0xff]  }
  0xa5   : > { %2637 = vmatpush1.bf16.msra.mxu1 %v4461_v5  ;;  %2198 = vmatprep.subr.bf16.mxu0 %v4472_v6  ;;  %v4560_v5 = vld [vmem:[%s6019_s1 + $0x670] ss:$8 sps:$4 sm:$0xff]   ;;  %v4565_v6 = vld [vmem:[%s6019_s1 + $0x664] ss:$8 sps:$4 sm:$0xff]  }
  0xa6   : > { %2638 = vmatprep.subr.bf16.mxu1 %v4475_v7  ;;  %v4566_v7 = vld [vmem:[%s5378_s21 + $0x14] ss:$8 sps:$4 sm:$0xff]  }
  0xa7   : > { %1369 = vmatmul.mubr.bf16.gmra.mxu0 %v4468_v8  ;;  %v4568_v8 = vld [vmem:[%s5389_s27 + $0x14] ss:$8 sps:$4 sm:$0xff]  }
  0xa8   : > { %1809 = vmatmul.mubr.bf16.gmra.mxu1 %v4469_v9  ;;  %2199 = vmatpush1.bf16.msra.mxu0 %v4470_v10  ;;  %v4563_v9 = vld [vmem:[%s6019_s1 + $0x660] ss:$8 sps:$4 sm:$0xff]   ;;  %v4574_v10 = vld [vmem:[%s6019_s1 + $0x654] ss:$8 sps:$4 sm:$0xff]  }
  0xa9   : > { %2639 = vmatpush1.bf16.msra.mxu1 %v4473_v11  ;;  %2200 = vmatprep.subr.bf16.mxu0 %v4478_v12  ;;  %v4570_v11 = vld [vmem:[%s5378_s21 + $0x10] ss:$8 sps:$4 sm:$0xff]  }
  0xaa   : > { %2640 = vmatprep.subr.bf16.mxu1 %v4481_v13  ;;  %1378 = vmatprep.mubr.bf16.mxu0 %v4482_v14  ;;  %v4571_v12 = vld [vmem:[%s5389_s27 + $0x10] ss:$8 sps:$4 sm:$0xff]   ;;  %v4577_v14 = vld [vmem:[%s6019_s1 + $0x644] ss:$8 sps:$4 sm:$0xff]  }
  0xab   : > { %1818 = vmatprep.mubr.bf16.mxu1 %v4484_v15  ;;  %v4572_v13 = vld [vmem:[%s6019_s1 + $0x650] ss:$8 sps:$4 sm:$0xff]   ;;  %v4578_v15 = vld [vmem:[%s5378_s21 + $0x24] ss:$8 sps:$4 sm:$0xff]  }
  0xac   : > { %2201 = vmatpush1.bf16.msra.mxu0 %v4476_v16  ;;  %v4580_v16 = vld [vmem:[%s5389_s27 + $0x24] ss:$8 sps:$4 sm:$0xff]  }
  0xad   : > { %2641 = vmatpush1.bf16.msra.mxu1 %v4479_v17  ;;  %2202 = vmatprep.subr.bf16.mxu0 %v4490_v18  ;;  %v4575_v17 = vld [vmem:[%s6019_s1 + $0x640] ss:$8 sps:$4 sm:$0xff]   ;;  %v4586_v18 = vld [vmem:[%s6019_s1 + $0x634] ss:$8 sps:$4 sm:$0xff]  }
  0xae   : > { %2642 = vmatprep.subr.bf16.mxu1 %v4493_v19  ;;  %v4582_v19 = vld [vmem:[%s5378_s21 + $0x20] ss:$8 sps:$4 sm:$0xff]  }
  0xaf   : > { %1379 = vmatmul.mubr.bf16.gmra.mxu0 %v4486_v20  ;;  %v4583_v20 = vld [vmem:[%s5389_s27 + $0x20] ss:$8 sps:$4 sm:$0xff]  }
  0xb0   : > { %1819 = vmatmul.mubr.bf16.gmra.mxu1 %v4487_v21  ;;  %2203 = vmatpush2.bf16.msra.mxu0 %v4488_v22  ;;  %v4584_v21 = vld [vmem:[%s6019_s1 + $0x630] ss:$8 sps:$4 sm:$0xff]   ;;  %v4589_v22 = vld [vmem:[%s6019_s1 + $0x624] ss:$8 sps:$4 sm:$0xff]  }
  0xb1   : > { %2643 = vmatpush2.bf16.msra.mxu1 %v4491_v23  ;;  %2204 = vmatprep.subr.bf16.mxu0 %v4496_v24  ;;  %v4590_v23 = vld [vmem:[%s5378_s21 + $0x34] ss:$8 sps:$4 sm:$0xff]  }
  0xb2   : > { %2644 = vmatprep.subr.bf16.mxu1 %v4499_v25  ;;  %1388 = vmatprep.mubr.bf16.mxu0 %v4500_v26  ;;  %v4592_v24 = vld [vmem:[%s5389_s27 + $0x34] ss:$8 sps:$4 sm:$0xff]   ;;  %v4587_v25 = vld [vmem:[%s6019_s1 + $0x620] ss:$8 sps:$4 sm:$0xff]  }
  0xb3   : > { %1828 = vmatprep.mubr.bf16.mxu1 %v4502_v27  ;;  %v4598_v26 = vld [vmem:[%s6019_s1 + $0x614] ss:$8 sps:$4 sm:$0xff]   ;;  %v4594_v27 = vld [vmem:[%s5378_s21 + $0x30] ss:$8 sps:$4 sm:$0xff]  }
  0xb4   : > { %2205 = vmatpush2.bf16.msra.mxu0 %v4494_v28  ;;  %v4595_v28 = vld [vmem:[%s5389_s27 + $0x30] ss:$8 sps:$4 sm:$0xff]  }
  0xb5   : > { %2645 = vmatpush2.bf16.msra.mxu1 %v4497_v29  ;;  %2206 = vmatprep.subr.bf16.mxu0 %v4508_v30  ;;  %v4596_v29 = vld [vmem:[%s6019_s1 + $0x610] ss:$8 sps:$4 sm:$0xff]   ;;  %v4601_v30 = vld [vmem:[%s6019_s1 + $0x604] ss:$8 sps:$4 sm:$0xff]  }
  0xb6   : > { %2646 = vmatprep.subr.bf16.mxu1 %v4511_v31  ;;  %v4602_v31 = vld [vmem:[%s5378_s21 + $0x44] ss:$8 sps:$4 sm:$0xff]  }
  0xb7   : > { %1389 = vmatmul.mubr.bf16.gmra.mxu0 %v4504_v32  ;;  %v4604_v32 = vld [vmem:[%s5389_s27 + $0x44] ss:$8 sps:$4 sm:$0xff]  }
  0xb8   : > { %1829 = vmatmul.mubr.bf16.gmra.mxu1 %v4505_v33  ;;  %2207 = vmatpush2.bf16.msra.mxu0 %v4506_v34  ;;  %v4599_v33 = vld [vmem:[%s6019_s1 + $0x600] ss:$8 sps:$4 sm:$0xff]   ;;  %v4610_v34 = vld [vmem:[%s6019_s1 + $0x6f4] ss:$8 sps:$4 sm:$0xff]  }
  0xb9   : > { %2647 = vmatpush2.bf16.msra.mxu1 %v4509_v35  ;;  %2208 = vmatprep.subr.bf16.mxu0 %v4514_v36  ;;  %v4606_v35 = vld [vmem:[%s5378_s21 + $0x40] ss:$8 sps:$4 sm:$0xff]  }
  0xba   : > { %2648 = vmatprep.subr.bf16.mxu1 %v4517_v37  ;;  %1398 = vmatprep.mubr.bf16.mxu0 %v4518_v38  ;;  %v4607_v36 = vld [vmem:[%s5389_s27 + $0x40] ss:$8 sps:$4 sm:$0xff]   ;;  %v4608_v37 = vld [vmem:[%s6019_s1 + $0x6f0] ss:$8 sps:$4 sm:$0xff]   ;;  %v4613_v38 = vld [vmem:[%s6019_s1 + $0x6e4] ss:$8 sps:$4 sm:$0xff]  }
  0xbb   : > { %1838 = vmatprep.mubr.bf16.mxu1 %v4520_v39  ;;  %v4614_v39 = vld [vmem:[%s5378_s21 + $0x54] ss:$8 sps:$4 sm:$0xff]  }
  0xbc   : > { %2209 = vmatpush2.bf16.msra.mxu0 %v4512_v40  ;;  %v4616_v40 = vld [vmem:[%s5389_s27 + $0x54] ss:$8 sps:$4 sm:$0xff]  }
  0xbd   : > { %2649 = vmatpush2.bf16.msra.mxu1 %v4515_v41  ;;  %2210 = vmatprep.subr.bf16.mxu0 %v4526_v42  ;;  %v4611_v41 = vld [vmem:[%s6019_s1 + $0x6e0] ss:$8 sps:$4 sm:$0xff]   ;;  %v4622_v42 = vld [vmem:[%s6019_s1 + $0x6d4] ss:$8 sps:$4 sm:$0xff]  }
  0xbe   : > { %2650 = vmatprep.subr.bf16.mxu1 %v4529_v43  ;;  %v4618_v43 = vld [vmem:[%s5378_s21 + $0x50] ss:$8 sps:$4 sm:$0xff]  }
  0xbf   : > { %1399 = vmatmul.mubr.bf16.gmra.mxu0 %v4522_v44  ;;  %v4619_v44 = vld [vmem:[%s5389_s27 + $0x50] ss:$8 sps:$4 sm:$0xff]  }
  0xc0   : > { %1839 = vmatmul.mubr.bf16.gmra.mxu1 %v4523_v45  ;;  %2211 = vmatpush2.bf16.msra.mxu0 %v4524_v46  ;;  %v4620_v45 = vld [vmem:[%s6019_s1 + $0x6d0] ss:$8 sps:$4 sm:$0xff]   ;;  %v4625_v46 = vld [vmem:[%s6019_s1 + $0x6c4] ss:$8 sps:$4 sm:$0xff]  }
  0xc1   : > { %2651 = vmatpush2.bf16.msra.mxu1 %v4527_v47  ;;  %2212 = vmatprep.subr.bf16.mxu0 %v4532_v48  ;;  %v4626_v47 = vld [vmem:[%s5378_s21 + $0x64] ss:$8 sps:$4 sm:$0xff]  }
  0xc2   : > { %2652 = vmatprep.subr.bf16.mxu1 %v4535_v49  ;;  %1408 = vmatprep.mubr.bf16.mxu0 %v4536_v50  ;;  %v4628_v48 = vld [vmem:[%s5389_s27 + $0x64] ss:$8 sps:$4 sm:$0xff]   ;;  %v4623_v49 = vld [vmem:[%s6019_s1 + $0x6c0] ss:$8 sps:$4 sm:$0xff]   ;;  %v4634_v50 = vld [vmem:[%s6019_s1 + $0x6b4] ss:$8 sps:$4 sm:$0xff]  }
  0xc3   : > { %1848 = vmatprep.mubr.bf16.mxu1 %v4538_v51  ;;  %v4630_v51 = vld [vmem:[%s5378_s21 + $0x60] ss:$8 sps:$4 sm:$0xff]  }
  0xc4   : > { %2213 = vmatpush2.bf16.msra.mxu0 %v4530_v52  ;;  %v4631_v52 = vld [vmem:[%s5389_s27 + $0x60] ss:$8 sps:$4 sm:$0xff]  }
  0xc5   : > { %2653 = vmatpush2.bf16.msra.mxu1 %v4533_v53  ;;  %2214 = vmatprep.subr.bf16.mxu0 %v4544_v54  ;;  %v4632_v53 = vld [vmem:[%s6019_s1 + $0x6b0] ss:$8 sps:$4 sm:$0xff]   ;;  %v4637_v54 = vld [vmem:[%s6019_s1 + $0x6a4] ss:$8 sps:$4 sm:$0xff]  }
  0xc6   : > { %2654 = vmatprep.subr.bf16.mxu1 %v4547_v55  ;;  %v4638_v55 = vld [vmem:[%s5378_s21 + $0x74] ss:$8 sps:$4 sm:$0xff]  }
  0xc7   : > { %1409 = vmatmul.mubr.bf16.gmra.mxu0 %v4540_v56  ;;  %v4640_v56 = vld [vmem:[%s5389_s27 + $0x74] ss:$8 sps:$4 sm:$0xff]  }
  0xc8   : > { %1849 = vmatmul.mubr.bf16.gmra.mxu1 %v4541_v57  ;;  %2215 = vmatpush2.bf16.msra.mxu0 %v4542_v58  ;;  %v4635_v57 = vld [vmem:[%s6019_s1 + $0x6a0] ss:$8 sps:$4 sm:$0xff]   ;;  %v4646_v58 = vld [vmem:[%s6019_s1 + $0x694] ss:$8 sps:$4 sm:$0xff]  }
  0xc9   : > { %2655 = vmatpush2.bf16.msra.mxu1 %v4545_v59  ;;  %2216 = vmatprep.subr.bf16.mxu0 %v4550_v60  ;;  %v4642_v59 = vld [vmem:[%s5378_s21 + $0x70] ss:$8 sps:$4 sm:$0xff]  }
  0xca   : > { %2656 = vmatprep.subr.bf16.mxu1 %v4553_v61  ;;  %2218 = vmatprep.mubr.bf16.mxu0 %v4556_v62  ;;  %v4643_v60 = vld [vmem:[%s5389_s27 + $0x70] ss:$8 sps:$4 sm:$0xff]   ;;  %v4649_v62 = vld [vmem:[%s6019_s1 + $0x684] ss:$8 sps:$4 sm:$0xff]  }
  0xcb   : > { %2658 = vmatprep.mubr.bf16.mxu1 %v4559_v63  ;;  %v4644_v61 = vld [vmem:[%s6019_s1 + $0x690] ss:$8 sps:$4 sm:$0xff]   ;;  %v4652_v63 = vld [vmem:[%s5497_s24 + $0x4] ss:$8 sps:$4 sm:$0xff]  }
  0xcc   : > { %2217 = vmatpush2.bf16.msra.mxu0 %v4548_v0  ;;  %v4655_v0 = vld [vmem:[%s5497_s24 + $0x44] ss:$8 sps:$4 sm:$0xff]  }
  0xcd   : > { %2657 = vmatpush2.bf16.msra.mxu1 %v4551_v1  ;;  %3066 = vmatprep.subr.bf16.mxu0 %v4562_v2  ;;  %v4647_v1 = vld [vmem:[%s6019_s1 + $0x680] ss:$8 sps:$4 sm:$0xff]  }
  0xce   : > { %4097 = vmatprep.subr.bf16.mxu1 %v4562_v2  ;;  %v4650_v2 = vld [vmem:[%s5497_s24] ss:$8 sps:$4 sm:$0xff]  }
  0xcf   : > { %2219 = vmatmul.mubr.bf16.vlgmr.msra.gmra.mxu0 %v4554_v3  ;;  %v4653_v3 = vld [vmem:[%s5497_s24 + $0x40] ss:$8 sps:$4 sm:$0xff]  }
  0xd0   : > { %2659 = vmatmul.mubr.bf16.vlgmr.msra.gmra.mxu1 %v4557_v4  ;;  %3067 = vmatpush1.bf16.msra.mxu0 %v4560_v5  ;;  %v4656_v4 = vld [vmem:[%s5497_s24 + $0x14] ss:$8 sps:$4 sm:$0xff]  }
  0xd1   : > { %4113 = vmatpush1.bf16.msra.mxu1 %v4560_v5  ;;  %3068 = vmatprep.subr.bf16.mxu0 %v4565_v6  ;;  %v4658_v5 = vld [vmem:[%s5497_s24 + $0x54] ss:$8 sps:$4 sm:$0xff]  }
  0xd2   : > { %4098 = vmatprep.subr.bf16.mxu1 %v4565_v6  ;;  %2228 = vmatprep.mubr.bf16.mxu0 %v4566_v7 }
  0xd3   : > { %2668 = vmatprep.mubr.bf16.mxu1 %v4568_v8 }
  0xd4   : > { %3069 = vmatpush1.bf16.msra.mxu0 %v4563_v9 }
  0xd5   : > { %4114 = vmatpush1.bf16.msra.mxu1 %v4563_v9  ;;  %3070 = vmatprep.subr.bf16.mxu0 %v4574_v10 }
  0xd6   : > { %4099 = vmatprep.subr.bf16.mxu1 %v4574_v10 }
  0xd7   : > { %2229 = vmatmul.mubr.bf16.gmra.mxu0 %v4570_v11 }
  0xd8   : > { %2669 = vmatmul.mubr.bf16.gmra.mxu1 %v4571_v12  ;;  %3071 = vmatpush1.bf16.msra.mxu0 %v4572_v13 }
  0xd9   : > { %4115 = vmatpush1.bf16.msra.mxu1 %v4572_v13  ;;  %3072 = vmatprep.subr.bf16.mxu0 %v4577_v14 }
  0xda   : > { %4100 = vmatprep.subr.bf16.mxu1 %v4577_v14  ;;  %2238 = vmatprep.mubr.bf16.mxu0 %v4578_v15  ;;  %v4660_v14 = vld [vmem:[%s5497_s24 + $0x10] ss:$8 sps:$4 sm:$0xff]  }
  0xdb   : > { %2678 = vmatprep.mubr.bf16.mxu1 %v4580_v16  ;;  %v4661_v15 = vld [vmem:[%s5497_s24 + $0x50] ss:$8 sps:$4 sm:$0xff]  }
  0xdc   : > { %3073 = vmatpush1.bf16.msra.mxu0 %v4575_v17 }
  0xdd   : > { %4116 = vmatpush1.bf16.msra.mxu1 %v4575_v17  ;;  %3074 = vmatprep.subr.bf16.mxu0 %v4586_v18  ;;  %v4662_v17 = vld [vmem:[%s5497_s24 + $0x24] ss:$8 sps:$4 sm:$0xff]  }
  0xde   : > { %4101 = vmatprep.subr.bf16.mxu1 %v4586_v18  ;;  %v4664_v18 = vld [vmem:[%s5497_s24 + $0x64] ss:$8 sps:$4 sm:$0xff]  }
  0xdf   : > { %2239 = vmatmul.mubr.bf16.gmra.mxu0 %v4582_v19 }
  0xe0   : > { %2679 = vmatmul.mubr.bf16.gmra.mxu1 %v4583_v20  ;;  %3075 = vmatpush1.bf16.msra.mxu0 %v4584_v21 }
  0xe1   : > { %4117 = vmatpush1.bf16.msra.mxu1 %v4584_v21  ;;  %3076 = vmatprep.subr.bf16.mxu0 %v4589_v22 }
  0xe2   : > { %4102 = vmatprep.subr.bf16.mxu1 %v4589_v22  ;;  %2248 = vmatprep.mubr.bf16.mxu0 %v4590_v23 }
  0xe3   : > { %2688 = vmatprep.mubr.bf16.mxu1 %v4592_v24 }
  0xe4   : > { %3077 = vmatpush1.bf16.msra.mxu0 %v4587_v25 }
  0xe5   : > { %4118 = vmatpush1.bf16.msra.mxu1 %v4587_v25  ;;  %3078 = vmatprep.subr.bf16.mxu0 %v4598_v26 }
  0xe6   : > { %4103 = vmatprep.subr.bf16.mxu1 %v4598_v26 }
  0xe7   : > { %2249 = vmatmul.mubr.bf16.gmra.mxu0 %v4594_v27 }
  0xe8   : > { %2689 = vmatmul.mubr.bf16.gmra.mxu1 %v4595_v28  ;;  %3079 = vmatpush1.bf16.msra.mxu0 %v4596_v29 }
  0xe9   : > { %4119 = vmatpush1.bf16.msra.mxu1 %v4596_v29  ;;  %3080 = vmatprep.subr.bf16.mxu0 %v4601_v30 }
  0xea   : > { %4104 = vmatprep.subr.bf16.mxu1 %v4601_v30  ;;  %2258 = vmatprep.mubr.bf16.mxu0 %v4602_v31  ;;  %v4666_v30 = vld [vmem:[%s5497_s24 + $0x20] ss:$8 sps:$4 sm:$0xff]  }
  0xeb   : > { %2698 = vmatprep.mubr.bf16.mxu1 %v4604_v32  ;;  %v4667_v31 = vld [vmem:[%s5497_s24 + $0x60] ss:$8 sps:$4 sm:$0xff]  }
  0xec   : > { %3081 = vmatpush1.bf16.msra.mxu0 %v4599_v33 }
  0xed   : > { %4120 = vmatpush1.bf16.msra.mxu1 %v4599_v33  ;;  %3082 = vmatprep.subr.bf16.mxu0 %v4610_v34  ;;  %v4668_v33 = vld [vmem:[%s5497_s24 + $0x34] ss:$8 sps:$4 sm:$0xff]  }
  0xee   : > { %4105 = vmatprep.subr.bf16.mxu1 %v4610_v34  ;;  %v4670_v34 = vld [vmem:[%s5497_s24 + $0x74] ss:$8 sps:$4 sm:$0xff]  }
  0xef   : > { %2259 = vmatmul.mubr.bf16.gmra.mxu0 %v4606_v35 }
  0xf0   : > { %2699 = vmatmul.mubr.bf16.gmra.mxu1 %v4607_v36  ;;  %3083 = vmatpush2.bf16.msra.mxu0 %v4608_v37 }
  0xf1   : > { %4121 = vmatpush2.bf16.msra.mxu1 %v4608_v37  ;;  %3084 = vmatprep.subr.bf16.mxu0 %v4613_v38 }
  0xf2   : > { %4106 = vmatprep.subr.bf16.mxu1 %v4613_v38  ;;  %2268 = vmatprep.mubr.bf16.mxu0 %v4614_v39 }
  0xf3   : > { %2708 = vmatprep.mubr.bf16.mxu1 %v4616_v40 }
  0xf4   : > { %3085 = vmatpush2.bf16.msra.mxu0 %v4611_v41 }
  0xf5   : > { %4122 = vmatpush2.bf16.msra.mxu1 %v4611_v41  ;;  %3086 = vmatprep.subr.bf16.mxu0 %v4622_v42 }
  0xf6   : > { %4107 = vmatprep.subr.bf16.mxu1 %v4622_v42 }
  0xf7   : > { %2269 = vmatmul.mubr.bf16.gmra.mxu0 %v4618_v43 }
  0xf8   : > { %2709 = vmatmul.mubr.bf16.gmra.mxu1 %v4619_v44  ;;  %3087 = vmatpush2.bf16.msra.mxu0 %v4620_v45 }
  0xf9   : > { %4123 = vmatpush2.bf16.msra.mxu1 %v4620_v45  ;;  %3088 = vmatprep.subr.bf16.mxu0 %v4625_v46 }
  0xfa   : > { %4108 = vmatprep.subr.bf16.mxu1 %v4625_v46  ;;  %2278 = vmatprep.mubr.bf16.mxu0 %v4626_v47  ;;  %v4672_v46 = vld [vmem:[%s5497_s24 + $0x30] ss:$8 sps:$4 sm:$0xff]  }
  0xfb   : > { %2718 = vmatprep.mubr.bf16.mxu1 %v4628_v48  ;;  %v4673_v47 = vld [vmem:[%s5497_s24 + $0x70] ss:$8 sps:$4 sm:$0xff]   ;;  %s3509_s24 = sshll.u32 %s4696_s12, 4 }
  0xfc   : > { %3089 = vmatpush2.bf16.msra.mxu0 %v4623_v49  ;;  %p5824_p6 = scmp.lt.s32.totalorder %s3509_s24, 31 }
  0xfd   : > { %4124 = vmatpush2.bf16.msra.mxu1 %v4623_v49  ;;  %3090 = vmatprep.subr.bf16.mxu0 %v4634_v50 }
  0xfe   : > { %4109 = vmatprep.subr.bf16.mxu1 %v4634_v50  ;;  %s6076_s24 = smov (!%p5824_p6, %s3509_s24), 31 }
  0xff   : > { %2279 = vmatmul.mubr.bf16.gmra.mxu0 %v4630_v51  ;;  %s3510_s6 = sshll.u32 %s6076_s24, 1 }
 0x100   : > { %2719 = vmatmul.mubr.bf16.gmra.mxu1 %v4631_v52  ;;  %3091 = vmatpush2.bf16.msra.mxu0 %v4632_v53  ;;  %s5901_s13 = sadd.s32 %s3511_s20, %s3510_s6 }
 0x101   : > { %4125 = vmatpush2.bf16.msra.mxu1 %v4632_v53  ;;  %3092 = vmatprep.subr.bf16.mxu0 %v4637_v54  ;;  %s3512_s26 = sshll.u32 %s5901_s13, 2 }
 0x102   : > { %4110 = vmatprep.subr.bf16.mxu1 %v4637_v54  ;;  %2288 = vmatprep.mubr.bf16.mxu0 %v4638_v55  ;;  %s5926_s7 = scalar_lea.vmem %s6021_s3, %s3512_s26 }
 0x103   : > { %2728 = vmatprep.mubr.bf16.mxu1 %v4640_v56 }
 0x104   : > { %3093 = vmatpush2.bf16.msra.mxu0 %v4635_v57 }
 0x105   : > { %4126 = vmatpush2.bf16.msra.mxu1 %v4635_v57  ;;  %3094 = vmatprep.subr.bf16.mxu0 %v4646_v58 }
 0x106   : > { %4111 = vmatprep.subr.bf16.mxu1 %v4646_v58 }
 0x107   : > { %2289 = vmatmul.mubr.bf16.gmra.mxu0 %v4642_v59 }
 0x108   : > { %2729 = vmatmul.mubr.bf16.gmra.mxu1 %v4643_v60  ;;  %3095 = vmatpush2.bf16.msra.mxu0 %v4644_v61 }
 0x109   : > { %4127 = vmatpush2.bf16.msra.mxu1 %v4644_v61  ;;  %3096 = vmatprep.subr.bf16.mxu0 %v4649_v62 }
 0x10a   : > { %4112 = vmatprep.subr.bf16.mxu1 %v4649_v62  ;;  %3098 = vmatprep.mubr.bf16.mxu0 %v4652_v63 }
 0x10b   : > { %3138 = vmatprep.mubr.bf16.mxu1 %v4655_v0 }
 0x10c   : > { %3097 = vmatpush2.bf16.msra.mxu0 %v4647_v1 }
 0x10d   : > { %4128 = vmatpush2.bf16.msra.mxu1 %v4647_v1 }
 0x10f   : > { %v579_v6 = vpop.f32.mrf.mxu0  ;;  %3099 = vmatmul.mubr.bf16.vlgmr.msra.gmra.mxu0 %v4650_v2 }
 0x110   : > { %v932_v7 = vpop.f32.mrf.mxu1  ;;  %3139 = vmatmul.mubr.bf16.vlgmr.msra.gmra.mxu1 %v4653_v3  ;;  %3108 = vmatprep.mubr.bf16.mxu0 %v4656_v4 }
 0x111   : > { %v5583_v8 = vadd.f32 %v932_v7, %v579_v6  ;;  %3148 = vmatprep.mubr.bf16.mxu1 %v4658_v5  ;;  %v581_v9 = vpop.f32.mrf.mxu0 }
 0x112   : > { %v934_v10 = vpop.f32.mrf.mxu1 }
 0x113   : > { %v5585_v11 = vadd.f32 %v934_v10, %v581_v9  ;;  %v583_v12 = vpop.f32.mrf.mxu0 }
 0x114   : > { %v936_v13 = vpop.f32.mrf.mxu1 }
 0x115   : > { %v5589_v16 = vadd.f32 %v936_v13, %v583_v12  ;;  %v585_v19 = vpop.f32.mrf.mxu0 }
 0x116   : > { %v938_v20 = vpop.f32.mrf.mxu1 }
 0x117   : > { %v5593_v21 = vadd.f32 %v938_v20, %v585_v19  ;;  %v589_v22 = vpop.f32.mrf.mxu0  ;;  %3109 = vmatmul.mubr.bf16.gmra.mxu0 %v4660_v14 }
 0x118   : > { %v942_v23 = vpop.f32.mrf.mxu1  ;;  %3149 = vmatmul.mubr.bf16.gmra.mxu1 %v4661_v15  ;;  %3118 = vmatprep.mubr.bf16.mxu0 %v4662_v17 }
 0x119   : > { %v5595_v24 = vadd.f32 %v942_v23, %v589_v22  ;;  %3158 = vmatprep.mubr.bf16.mxu1 %v4664_v18  ;;  %v591_v25 = vpop.f32.mrf.mxu0 }
 0x11a   : > { %v944_v26 = vpop.f32.mrf.mxu1 }
 0x11b   : > { %v5597_v27 = vadd.f32 %v944_v26, %v591_v25  ;;  %v593_v28 = vpop.f32.mrf.mxu0 }
 0x11c   : > { %v946_v29 = vpop.f32.mrf.mxu1 }
 0x11d   : > { %v5601_v32 = vadd.f32 %v946_v29, %v593_v28  ;;  %v595_v35 = vpop.f32.mrf.mxu0 }
 0x11e   : > { %v948_v36 = vpop.f32.mrf.mxu1 }
 0x11f   : > { %v5605_v37 = vadd.f32 %v948_v36, %v595_v35  ;;  %v599_v38 = vpop.f32.mrf.mxu0  ;;  %3119 = vmatmul.mubr.bf16.gmra.mxu0 %v4666_v30 }
 0x120   : > { %v952_v39 = vpop.f32.mrf.mxu1  ;;  %3159 = vmatmul.mubr.bf16.gmra.mxu1 %v4667_v31  ;;  %3128 = vmatprep.mubr.bf16.mxu0 %v4668_v33 }
 0x121   : > { %v5607_v40 = vadd.f32 %v952_v39, %v599_v38  ;;  %3168 = vmatprep.mubr.bf16.mxu1 %v4670_v34  ;;  %v601_v41 = vpop.f32.mrf.mxu0 }
 0x122   : > { %v954_v42 = vpop.f32.mrf.mxu1 }
 0x123   : > { %v5609_v43 = vadd.f32 %v954_v42, %v601_v41  ;;  %v603_v44 = vpop.f32.mrf.mxu0 }
 0x124   : > { %v956_v45 = vpop.f32.mrf.mxu1 }
 0x125   : > { %v5613_v48 = vadd.f32 %v956_v45, %v603_v44  ;;  %v605_v49 = vpop.f32.mrf.mxu0 }
 0x126   : > { %v958_v50 = vpop.f32.mrf.mxu1 }
 0x127   : > { %v5615_v51 = vadd.f32 %v958_v50, %v605_v49  ;;  %v609_v52 = vpop.f32.mrf.mxu0  ;;  %3129 = vmatmul.mubr.bf16.gmra.mxu0 %v4672_v46 }
 0x128   : > { %v962_v53 = vpop.f32.mrf.mxu1  ;;  %3169 = vmatmul.mubr.bf16.gmra.mxu1 %v4673_v47 }
 0x129   : > { %v5617_v54 = vadd.f32 %v962_v53, %v609_v52  ;;  %v611_v55 = vpop.f32.mrf.mxu0 }
 0x12a   : > { %v964_v56 = vpop.f32.mrf.mxu1 }
 0x12b   : > { %v5619_v57 = vadd.f32 %v964_v56, %v611_v55  ;;  %v613_v58 = vpop.f32.mrf.mxu0 }
 0x12c   : > { %v966_v59 = vpop.f32.mrf.mxu1 }
 0x12d   : > { %v5621_v60 = vadd.f32 %v966_v59, %v613_v58  ;;  %v615_v61 = vpop.f32.mrf.mxu0 }
 0x12e   : > { %v968_v62 = vpop.f32.mrf.mxu1 }
 0x12f   : > { %v5623_v63 = vadd.f32 %v968_v62, %v615_v61  ;;  %v619_v0 = vpop.f32.mrf.mxu0 }
 0x130   : > { %v972_v1 = vpop.f32.mrf.mxu1 }
 0x131   : > { %v5625_v2 = vadd.f32 %v972_v1, %v619_v0  ;;  %v621_v3 = vpop.f32.mrf.mxu0 }
 0x132   : > { %v974_v4 = vpop.f32.mrf.mxu1 }
 0x133   : > { %v5627_v5 = vadd.f32 %v974_v4, %v621_v3  ;;  %v623_v6 = vpop.f32.mrf.mxu0 }
 0x134   : > { %v976_v7 = vpop.f32.mrf.mxu1 }
 0x135   : > { %v5629_v9 = vadd.f32 %v976_v7, %v623_v6  ;;  %v625_v10 = vpop.f32.mrf.mxu0 }
 0x136   : > { %v978_v12 = vpop.f32.mrf.mxu1 }
 0x137   : > { %v5631_v13 = vadd.f32 %v978_v12, %v625_v10  ;;  %v629_v14 = vpop.f32.mrf.mxu0 }
 0x138   : > { %v982_v15 = vpop.f32.mrf.mxu1 }
 0x139   : > { %v5633_v17 = vadd.f32 %v982_v15, %v629_v14  ;;  %v631_v18 = vpop.f32.mrf.mxu0 }
 0x13a   : > { %v984_v19 = vpop.f32.mrf.mxu1 }
 0x13b   : > { %v5635_v20 = vadd.f32 %v984_v19, %v631_v18  ;;  %v633_v22 = vpop.f32.mrf.mxu0 }
 0x13c   : > { %v986_v23 = vpop.f32.mrf.mxu1 }
 0x13d   : > { %v5637_v25 = vadd.f32 %v986_v23, %v633_v22  ;;  %v635_v26 = vpop.f32.mrf.mxu0 }
 0x13e   : > { %v988_v28 = vpop.f32.mrf.mxu1 }
 0x13f   : > { %v5639_v29 = vadd.f32 %v988_v28, %v635_v26  ;;  %v639_v30 = vpop.f32.mrf.mxu0 }
 0x140   : > { %v992_v31 = vpop.f32.mrf.mxu1 }
 0x141   : > { %v5641_v33 = vadd.f32 %v992_v31, %v639_v30  ;;  %v641_v34 = vpop.f32.mrf.mxu0 }
 0x142   : > { %v994_v35 = vpop.f32.mrf.mxu1 }
 0x143   : > { %v5643_v36 = vadd.f32 %v994_v35, %v641_v34  ;;  %v643_v38 = vpop.f32.mrf.mxu0 }
 0x144   : > { %v996_v39 = vpop.f32.mrf.mxu1 }
 0x145   : > { %v5645_v41 = vadd.f32 %v996_v39, %v643_v38  ;;  %v645_v42 = vpop.f32.mrf.mxu0 }
 0x146   : > { %v998_v44 = vpop.f32.mrf.mxu1 }
 0x147   : > { %v5647_v45 = vadd.f32 %v998_v44, %v645_v42  ;;  %v649_v46 = vpop.f32.mrf.mxu0 }
 0x148   : > { %v1002_v47 = vpop.f32.mrf.mxu1 }
 0x149   : > { %v5649_v49 = vadd.f32 %v1002_v47, %v649_v46  ;;  %v651_v50 = vpop.f32.mrf.mxu0 }
 0x14a   : > { %v1004_v52 = vpop.f32.mrf.mxu1 }
 0x14b   : > { %v5651_v53 = vadd.f32 %v1004_v52, %v651_v50  ;;  %v653_v55 = vpop.f32.mrf.mxu0 }
 0x14c   : > { %v1006_v56 = vpop.f32.mrf.mxu1 }
 0x14d   : > { %v5653_v58 = vadd.f32 %v1006_v56, %v653_v55  ;;  %v655_v59 = vpop.f32.mrf.mxu0 }
 0x14e   : > { %v1008_v61 = vpop.f32.mrf.mxu1 }
 0x14f   : > { %v5655_v62 = vadd.f32 %v1008_v61, %v655_v59  ;;  %v1340_v0 = vpop.f32.mrf.mxu0 }
 0x150   : > { %v1780_v1 = vpop.f32.mrf.mxu1  ;;  %v1419_v3 = vadd.f32 %v1340_v0, %v5583_v8 }
 0x151   : > { %v1342_v4 = vpop.f32.mrf.mxu0 }
 0x152   : > { %v1782_v6 = vpop.f32.mrf.mxu1  ;;  %v5658_v7 = vadd.f32 %v1780_v1, %v1419_v3  ;;  %v1420_v10 = vadd.f32 %v1342_v4, %v5585_v11 }
 0x153   : > { %v1344_v12 = vpop.f32.mrf.mxu0 }
 0x154   : > { %v1784_v14 = vpop.f32.mrf.mxu1  ;;  %v5661_v15 = vadd.f32 %v1782_v6, %v1420_v10  ;;  %v1421_v18 = vadd.f32 %v1344_v12, %v5589_v16 }
 0x155   : > { %v1346_v19 = vpop.f32.mrf.mxu0 }
 0x156   : > { %v1786_v22 = vpop.f32.mrf.mxu1  ;;  %v5664_v23 = vadd.f32 %v1784_v14, %v1421_v18  ;;  %v1422_v26 = vadd.f32 %v1346_v19, %v5593_v21 }
 0x157   : > { %v1350_v28 = vpop.f32.mrf.mxu0 }
 0x158   : > { %v1790_v8 = vpop.f32.mrf.mxu1  ;;  %v5667_v30 = vadd.f32 %v1786_v22, %v1422_v26  ;;  %v1423_v31 = vadd.f32 %v1350_v28, %v5595_v24 }
 0x159   : > { %v1352_v34 = vpop.f32.mrf.mxu0 }
 0x15a   : > { %v1792_v11 = vpop.f32.mrf.mxu1  ;;  %v5670_v35 = vadd.f32 %v1790_v8, %v1423_v31  ;;  %v1424_v38 = vadd.f32 %v1352_v34, %v5597_v27 }
 0x15b   : > { %v1354_v39 = vpop.f32.mrf.mxu0 }
 0x15c   : > { %v1794_v16 = vpop.f32.mrf.mxu1  ;;  %v5673_v42 = vadd.f32 %v1792_v11, %v1424_v38  ;;  %v1425_v44 = vadd.f32 %v1354_v39, %v5601_v32 }
 0x15d   : > { %v1356_v46 = vpop.f32.mrf.mxu0 }
 0x15e   : > { %v1796_v21 = vpop.f32.mrf.mxu1  ;;  %v5676_v47 = vadd.f32 %v1794_v16, %v1425_v44  ;;  %v1426_v50 = vadd.f32 %v1356_v46, %v5605_v37 }
 0x15f   : > { %v1360_v52 = vpop.f32.mrf.mxu0 }
 0x160   : > { %v1800_v24 = vpop.f32.mrf.mxu1  ;;  %v5679_v55 = vadd.f32 %v1796_v21, %v1426_v50  ;;  %v1427_v56 = vadd.f32 %v1360_v52, %v5607_v40 }
 0x161   : > { %v1362_v59 = vpop.f32.mrf.mxu0 }
 0x162   : > { %v1802_v27 = vpop.f32.mrf.mxu1  ;;  %v5682_v61 = vadd.f32 %v1800_v24, %v1427_v56  ;;  %v1428_v0 = vadd.f32 %v1362_v59, %v5609_v43 }
 0x163   : > { %v1364_v1 = vpop.f32.mrf.mxu0 }
 0x164   : > { %v1804_v32 = vpop.f32.mrf.mxu1  ;;  %v5685_v3 = vadd.f32 %v1802_v27, %v1428_v0  ;;  %v1429_v4 = vadd.f32 %v1364_v1, %v5613_v48 }
 0x165   : > { %v1366_v6 = vpop.f32.mrf.mxu0 }
 0x166   : > { %v1806_v37 = vpop.f32.mrf.mxu1  ;;  %v5688_v10 = vadd.f32 %v1804_v32, %v1429_v4  ;;  %v1430_v12 = vadd.f32 %v1366_v6, %v5615_v51 }
 0x167   : > { %v1370_v14 = vpop.f32.mrf.mxu0 }
 0x168   : > { %v1810_v40 = vpop.f32.mrf.mxu1  ;;  %v5691_v18 = vadd.f32 %v1806_v37, %v1430_v12  ;;  %v1431_v19 = vadd.f32 %v1370_v14, %v5617_v54 }
 0x169   : > { %v1372_v22 = vpop.f32.mrf.mxu0 }
 0x16a   : > { %v1812_v43 = vpop.f32.mrf.mxu1  ;;  %v5694_v26 = vadd.f32 %v1810_v40, %v1431_v19  ;;  %v1432_v28 = vadd.f32 %v1372_v22, %v5619_v57 }
 0x16b   : > { %v1374_v8 = vpop.f32.mrf.mxu0 }
 0x16c   : > { %v1814_v48 = vpop.f32.mrf.mxu1  ;;  %v5697_v31 = vadd.f32 %v1812_v43, %v1432_v28  ;;  %v1433_v34 = vadd.f32 %v1374_v8, %v5621_v60 }
 0x16d   : > { %v1376_v11 = vpop.f32.mrf.mxu0 }
 0x16e   : > { %v1816_v51 = vpop.f32.mrf.mxu1  ;;  %v5700_v38 = vadd.f32 %v1814_v48, %v1433_v34  ;;  %v1434_v39 = vadd.f32 %v1376_v11, %v5623_v63 }
 0x16f   : > { %v1380_v16 = vpop.f32.mrf.mxu0 }
 0x170   : > { %v1820_v54 = vpop.f32.mrf.mxu1  ;;  %v5703_v44 = vadd.f32 %v1816_v51, %v1434_v39  ;;  %v1435_v46 = vadd.f32 %v1380_v16, %v5625_v2 }
 0x171   : > { %v1382_v21 = vpop.f32.mrf.mxu0 }
 0x172   : > { %v1822_v57 = vpop.f32.mrf.mxu1  ;;  %v5706_v50 = vadd.f32 %v1820_v54, %v1435_v46  ;;  %v1436_v52 = vadd.f32 %v1382_v21, %v5627_v5 }
 0x173   : > { %v1384_v24 = vpop.f32.mrf.mxu0 }
 0x174   : > { %v1824_v60 = vpop.f32.mrf.mxu1  ;;  %v5709_v56 = vadd.f32 %v1822_v57, %v1436_v52  ;;  %v1437_v59 = vadd.f32 %v1384_v24, %v5629_v9 }
 0x175   : > { %v1386_v27 = vpop.f32.mrf.mxu0 }
 0x176   : > { %v1826_v63 = vpop.f32.mrf.mxu1  ;;  %v5712_v0 = vadd.f32 %v1824_v60, %v1437_v59  ;;  %v1438_v1 = vadd.f32 %v1386_v27, %v5631_v13 }
 0x177   : > { %v1390_v32 = vpop.f32.mrf.mxu0 }
 0x178   : > { %v1830_v2 = vpop.f32.mrf.mxu1  ;;  %v5715_v4 = vadd.f32 %v1826_v63, %v1438_v1  ;;  %v1439_v6 = vadd.f32 %v1390_v32, %v5633_v17 }
 0x179   : > { %v1392_v37 = vpop.f32.mrf.mxu0 }
 0x17a   : > { %v1832_v5 = vpop.f32.mrf.mxu1  ;;  %v5718_v12 = vadd.f32 %v1830_v2, %v1439_v6  ;;  %v1440_v14 = vadd.f32 %v1392_v37, %v5635_v20 }
 0x17b   : > { %v1394_v40 = vpop.f32.mrf.mxu0 }
 0x17c   : > { %v1834_v9 = vpop.f32.mrf.mxu1  ;;  %v5721_v19 = vadd.f32 %v1832_v5, %v1440_v14  ;;  %v1441_v22 = vadd.f32 %v1394_v40, %v5637_v25 }
 0x17d   : > { %v1396_v43 = vpop.f32.mrf.mxu0 }
 0x17e   : > { %v1836_v13 = vpop.f32.mrf.mxu1  ;;  %v5724_v28 = vadd.f32 %v1834_v9, %v1441_v22  ;;  %v1442_v8 = vadd.f32 %v1396_v43, %v5639_v29 }
 0x17f   : > { %v1400_v48 = vpop.f32.mrf.mxu0 }
 0x180   : > { %v1840_v17 = vpop.f32.mrf.mxu1  ;;  %v5727_v34 = vadd.f32 %v1836_v13, %v1442_v8  ;;  %v1443_v11 = vadd.f32 %v1400_v48, %v5641_v33 }
 0x181   : > { %v1402_v51 = vpop.f32.mrf.mxu0 }
 0x182   : > { %v1842_v20 = vpop.f32.mrf.mxu1  ;;  %v5730_v39 = vadd.f32 %v1840_v17, %v1443_v11  ;;  %v1444_v16 = vadd.f32 %v1402_v51, %v5643_v36 }
 0x183   : > { %v1404_v54 = vpop.f32.mrf.mxu0 }
 0x184   : > { %v1844_v25 = vpop.f32.mrf.mxu1  ;;  %v5733_v46 = vadd.f32 %v1842_v20, %v1444_v16  ;;  %v1445_v21 = vadd.f32 %v1404_v54, %v5645_v41 }
 0x185   : > { %v1406_v57 = vpop.f32.mrf.mxu0 }
 0x186   : > { %v1846_v29 = vpop.f32.mrf.mxu1  ;;  %v5736_v52 = vadd.f32 %v1844_v25, %v1445_v21  ;;  %v1446_v24 = vadd.f32 %v1406_v57, %v5647_v45 }
 0x187   : > { %v1410_v60 = vpop.f32.mrf.mxu0 }
 0x188   : > { %6022 = vst [vmem:[#allocation2_spill] sm:$0xff] %v5736_v52  ;;  %v1850_v33 = vpop.f32.mrf.mxu1  ;;  %v5739_v59 = vadd.f32 %v1846_v29, %v1446_v24  ;;  %v1447_v27 = vadd.f32 %v1410_v60, %v5649_v49 }
 0x189   : > { %v1412_v63 = vpop.f32.mrf.mxu0 }
 0x18a   : > { %6023 = vst [vmem:[#allocation3_spill] sm:$0xff] %v5739_v59  ;;  %v1852_v36 = vpop.f32.mrf.mxu1  ;;  %v5742_v1 = vadd.f32 %v1850_v33, %v1447_v27  ;;  %v1448_v32 = vadd.f32 %v1412_v63, %v5651_v53 }
 0x18b   : > { %v1414_v2 = vpop.f32.mrf.mxu0 }
 0x18c   : > { %6024 = vst [vmem:[#allocation4_spill] sm:$0xff] %v5742_v1  ;;  %v1854_v41 = vpop.f32.mrf.mxu1  ;;  %v5745_v6 = vadd.f32 %v1852_v36, %v1448_v32  ;;  %v1449_v37 = vadd.f32 %v1414_v2, %v5653_v58 }
 0x18d   : > { %v1416_v5 = vpop.f32.mrf.mxu0 }
 0x18e   : > { %6025 = vst [vmem:[#allocation5_spill] sm:$0xff] %v5745_v6  ;;  %v1856_v45 = vpop.f32.mrf.mxu1  ;;  %v5748_v14 = vadd.f32 %v1854_v41, %v1449_v37  ;;  %v1450_v40 = vadd.f32 %v1416_v5, %v5655_v62 }
 0x18f   : > { %v2220_v9 = vpop.f32.mrf.mxu0 }
 0x190   : > { %6026 = vst [vmem:[#allocation6_spill] sm:$0xff] %v5748_v14  ;;  %v2660_v49 = vpop.f32.mrf.mxu1  ;;  %v5751_v22 = vadd.f32 %v1856_v45, %v1450_v40  ;;  %v2299_v43 = vadd.f32 %v2220_v9, %v5658_v7 }
 0x191   : > { %v5754_v13 = vpop.f32.mrf.mxu0 }
 0x192   : > { %6027 = vst [vmem:[#allocation7_spill] sm:$0xff] %v5751_v22  ;;  %v5756_v53 = vpop.f32.mrf.mxu1  ;;  %v5758_v8 = vadd.f32 %v2660_v49, %v2299_v43  ;;  %v3213_v22 = vlaneseq }
 0x193   : > { %v2224_v48 = vpop.f32.mrf.mxu0 }
 0x194   : > { %v2664_v58 = vpop.f32.mrf.mxu1  ;;  %v2301_v17 = vadd.f32 %v2224_v48, %v5664_v23  ;;  %v3214_v1 = vshrl.u32 %v3213_v22, 7 }
 0x195   : > { %v5761_v11 = vpop.f32.mrf.mxu0 }
 0x196   : > { %v5763_v51 = vpop.f32.mrf.mxu1  ;;  %v5765_v62 = vadd.f32 %v2664_v58, %v2301_v17  ;;  %v2302_v22 = vadd.f32 %v5761_v11, %v5667_v30 }
 0x197   : > { %v2230_v20 = vpop.f32.mrf.mxu0 }
 0x198   : > { %6028 = vst [vmem:[#allocation8_spill] sm:$0xff] %v5765_v62  ;;  %v2670_v16 = vpop.f32.mrf.mxu1  ;;  %v2303_v7 = vadd.f32 %v2230_v20, %v5670_v35  ;;  %v3215_v62 = vsub.s32 0, %v3214_v1 }
 0x199   : > { %v5768_v54 = vpop.f32.mrf.mxu0 }
 0x19a   : > { %v5770_v25 = vpop.f32.mrf.mxu1  ;;  %v5772_v21 = vadd.f32 %v2670_v16, %v2303_v7 }
 0x19b   : > { %v2234_v57 = vpop.f32.mrf.mxu0 }
 0x19c   : > { %6029 = vst [vmem:[#allocation9_spill] sm:$0xff] %v5772_v21  ;;  %v2674_v29 = vpop.f32.mrf.mxu1  ;;  %v2305_v23 = vadd.f32 %v2234_v57, %v5676_v47 }
 0x19d   : > { %v2236_v24 = vpop.f32.mrf.mxu0 }
 0x19e   : > { %v5775_v60 = vpop.f32.mrf.mxu1  ;;  %v5777_v33 = vadd.f32 %v2674_v29, %v2305_v23 }
 0x19f   : > { %v2240_v27 = vpop.f32.mrf.mxu0 }
 0x1a0   : > { %6030 = vst [vmem:[#allocation10_spill] sm:$0xff] %v5777_v33  ;;  %v2680_v63 = vpop.f32.mrf.mxu1  ;;  %v2307_v36 = vadd.f32 %v2240_v27, %v5682_v61 }
 0x1a1   : > { %v2242_v35 = vpop.f32.mrf.mxu0 }
 0x1a2   : > { %v5780_v32 = vpop.f32.mrf.mxu1  ;;  %v5782_v2 = vadd.f32 %v2680_v63, %v2307_v36 }
 0x1a3   : > { %v2244_v41 = vpop.f32.mrf.mxu0 }
 0x1a4   : > { %6031 = vst [vmem:[#allocation11_spill] sm:$0xff] %v5782_v2  ;;  %v2684_v37 = vpop.f32.mrf.mxu1  ;;  %v2309_v5 = vadd.f32 %v2244_v41, %v5688_v10 }
 0x1a5   : > { %v2246_v45 = vpop.f32.mrf.mxu0 }
 0x1a6   : > { %v5785_v47 = vpop.f32.mrf.mxu1  ;;  %v5787_v40 = vadd.f32 %v2684_v37, %v2309_v5 }
 0x1a7   : > { %v2250_v9 = vpop.f32.mrf.mxu0 }
 0x1a8   : > { %6032 = vst [vmem:[#allocation12_spill] sm:$0xff] %v5787_v40  ;;  %v2690_v49 = vpop.f32.mrf.mxu1  ;;  %v2311_v43 = vadd.f32 %v2250_v9, %v5694_v26 }
 0x1a9   : > { %v2252_v48 = vpop.f32.mrf.mxu0 }
 0x1aa   : > { %v5790_v61 = vpop.f32.mrf.mxu1  ;;  %v5792_v58 = vadd.f32 %v2690_v49, %v2311_v43 }
 0x1ab   : > { %v2254_v17 = vpop.f32.mrf.mxu0 }
 0x1ac   : > { %6033 = vst [vmem:[#allocation13_spill] sm:$0xff] %v5792_v58  ;;  %v2694_v20 = vpop.f32.mrf.mxu1  ;;  %v2313_v16 = vadd.f32 %v2254_v17, %v5700_v38 }
 0x1ad   : > { %v2256_v7 = vpop.f32.mrf.mxu0 }
 0x1ae   : > { %v5795_v10 = vpop.f32.mrf.mxu1  ;;  %v5797_v57 = vadd.f32 %v2694_v20, %v2313_v16 }
 0x1af   : > { %v2260_v29 = vpop.f32.mrf.mxu0 }
 0x1b0   : > { %6034 = vst [vmem:[#allocation14_spill] sm:$0xff] %v5797_v57  ;;  %v2700_v23 = vpop.f32.mrf.mxu1 }
 0x1b1   : > { %v2262_v27 = vpop.f32.mrf.mxu0 }
 0x1b2   : > { %v2702_v63 = vpop.f32.mrf.mxu1  ;;  %v2316_v30 = vadd.f32 %v2262_v27, %v5709_v56 }
 0x1b3   : > { %v2264_v36 = vpop.f32.mrf.mxu0 }
 0x1b4   : > { %v5799_v26 = vpop.f32.mrf.mxu1 }
 0x1b5   : > { %v2266_v41 = vpop.f32.mrf.mxu0 }
 0x1b6   : > { %v5801_v37 = vpop.f32.mrf.mxu1 }
 0x1b7   : > { %v2270_v5 = vpop.f32.mrf.mxu0 }
 0x1b8   : > { %v5803_v9 = vpop.f32.mrf.mxu1 }
 0x1b9   : > { %v2272_v38 = vpop.f32.mrf.mxu0 }
 0x1ba   : > { %v5805_v49 = vpop.f32.mrf.mxu1 }
 0x1bb   : > { %v2274_v43 = vpop.f32.mrf.mxu0 }
 0x1bc   : > { %v5807_v17 = vpop.f32.mrf.mxu1 }
 0x1bd   : > { %v2276_v20 = vpop.f32.mrf.mxu0 }
 0x1be   : > { %v5809_v16 = vpop.f32.mrf.mxu1 }
 0x1bf   : > { %v2280_v57 = vpop.f32.mrf.mxu0 }
 0x1c0   : > { %v5811_v58 = vpop.f32.mrf.mxu1 }
 0x1c1   : > { %v2282_v14 = vpop.f32.mrf.mxu0 }
 0x1c2   : > { %v5813_v40 = vpop.f32.mrf.mxu1 }
 0x1c3   : > { %6035 = vst [vmem:[#allocation15_spill] sm:$0xff] %v5813_v40  ;;  %v5815_v2 = vpop.f32.mrf.mxu0  ;;  %v3219_v40 = vsub.s32 1, %v3214_v1  ;;  %v2308_v1 = vadd.f32 %v2242_v35, %v5685_v3  ;;  %v2314_v35 = vadd.f32 %v2256_v7, %v5703_v44  ;;  %v2320_v44 = vadd.f32 %v2272_v38, %v5721_v19 }
 0x1c4   : > { %6036 = vst [vmem:[#allocation16_spill] sm:$0xff] %v5815_v2  ;;  %v5817_v6 = vpop.f32.mrf.mxu1  ;;  %v3211_v2 = vld [vmem:[%s6020_s2] sm:$0x3] }
 0x1c5   : > { %6037 = vst [vmem:[#allocation17_spill] sm:$0xff] %v5817_v6  ;;  %v5820_v33 = vpop.f32.mrf.mxu0  ;;  %v2300_v6 = vadd.f32 %v5754_v13, %v5661_v15  ;;  %v2310_v15 = vadd.f32 %v2246_v45, %v5691_v18  ;;  %v2315_v13 = vadd.f32 %v2260_v29, %v5706_v50  ;;  %v5858_v11 = vrot.slane %v3211_v2, %v3215_v62 }
 0x1c6   : > { %6038 = vst [vmem:[#allocation18_spill] sm:$0xff] %v5820_v33  ;;  %v5822_v21 = vpop.f32.mrf.mxu1  ;;  %v2306_v33 = vadd.f32 %v2236_v24, %v5679_v55  ;;  %v2742_v18 = vadd.f32 %v5763_v51, %v2302_v22  ;;  %v2312_v24 = vadd.f32 %v2252_v48, %v5697_v31  ;;  %v2317_v62 = vadd.f32 %v2264_v36, %v5712_v0 }
 0x1c7   : > { %6039 = vst [vmem:[#allocation19_spill] sm:$0xff] %v5822_v21  ;;  %v5828_v59 = vpop.f32.mrf.mxu0  ;;  %v2304_v21 = vadd.f32 %v5768_v54, %v5673_v42  ;;  %v5860_v54 = vrot.slane %v3211_v2, %v3219_v40  ;;  %v2740_v3 = vadd.f32 %v5756_v53, %v2300_v6  ;;  %v2318_v2 = vadd.f32 %v2266_v41, %v5715_v4 }
 0x1c8   : > { %6041 = vst [vmem:[#allocation20_spill] sm:$0xff] %v5828_v59  ;;  %v5830_v52 = vpop.f32.mrf.mxu1  ;;  %v5868_v56 = vadd.f32 %v5775_v60, %v2306_v33  ;;  %v5879_v6 = vadd.f32 %v5780_v32, %v2308_v1  ;;  %v5882_v53 = vadd.f32 %v5785_v47, %v2310_v15  ;;  %v2755_v51 = vadd.f32 %v2700_v23, %v2315_v13  ;;  %v6045_v13 = vld [vmem:[#allocation2_spill] sm:$0xff] }
 0x1c9   : > { %6042 = vst [vmem:[#allocation21_spill] sm:$0xff] %v5830_v52  ;;  %v5842_v59 = vpop.f32.mrf.mxu0  ;;  %v5865_v50 = vadd.f32 %v5770_v25, %v2304_v21  ;;  %v2756_v25 = vadd.f32 %v2702_v63, %v2316_v30  ;;  %v2319_v31 = vadd.f32 %v2270_v5, %v5718_v12  ;;  %v2321_v0 = vadd.f32 %v2274_v43, %v5724_v28 }
 0x1ca   : > { %v5844_v52 = vpop.f32.mrf.mxu1  ;;  %v2322_v4 = vadd.f32 %v2276_v20, %v5727_v34  ;;  %v2323_v33 = vadd.f32 %v2280_v57, %v5730_v39  ;;  %v2324_v32 = vadd.f32 %v2282_v14, %v5733_v46  ;;  %v5894_v7 = vadd.f32 %v5790_v61, %v2312_v24  ;;  %v6047_v24 = vld [vmem:[#allocation3_spill] sm:$0xff] }
 0x1cb   : > { %v5854_v42 = vpop.f32.mrf.mxu0  ;;  %v5897_v12 = vadd.f32 %v5795_v10, %v2314_v35  ;;  %v2757_v19 = vadd.f32 %v5799_v26, %v2317_v62  ;;  %v2758_v28 = vadd.f32 %v5801_v37, %v2318_v2  ;;  %v2759_v61 = vadd.f32 %v5803_v9, %v2319_v31  ;;  %v6043_v26 = vld [vmem:[#allocation15_spill] sm:$0xff]  ;;  %v6046_v30 = vld [vmem:[#allocation16_spill] sm:$0xff] }
 0x1cc   : > { %v5856_v55 = vpop.f32.mrf.mxu1  ;;  %v2760_v10 = vadd.f32 %v5805_v49, %v2320_v44  ;;  %v2761_v29 = vadd.f32 %v5807_v17, %v2321_v0  ;;  %v2762_v23 = vadd.f32 %v5809_v16, %v2322_v4  ;;  %v5910_v36 = vadd.f32 %v5811_v58, %v2323_v33  ;;  %v6044_v49 = vld [vmem:[#allocation8_spill] sm:$0xff]  ;;  %v6049_v33 = vld [vmem:[#allocation9_spill] sm:$0xff] }
 0x1cd   : > { %v5874_v45 = vpop.f32.mrf.mxu0  ;;  %v5913_v41 = vadd.f32 %v6043_v26, %v2324_v32  ;;  %v6048_v35 = vld [vmem:[#allocation18_spill] sm:$0xff] }
 0x1ce   : > { %v5876_v40 = vpop.f32.mrf.mxu1  ;;  %v2326_v62 = vadd.f32 %v6048_v35, %v6047_v24  ;;  %v6055_v35 = vld [vmem:[#allocation5_spill] sm:$0xff] }
 0x1cf   : > { %v3100_v21 = vpop.f32.mrf.mxu0 }
 0x1d0   : > { %v3140_v60 = vpop.f32.mrf.mxu1  ;;  %v3179_v47 = vadd.f32 %v3100_v21, %v5758_v8 }
 0x1d1   : > { %v3195_v48 = vadd.f32 %v3140_v60, %v2755_v51  ;;  %v3102_v34 = vpop.f32.mrf.mxu0 }
 0x1d2   : > { %v3142_v39 = vpop.f32.mrf.mxu1  ;;  %v3223_v46 = vadd.f32 %v5858_v11, %v3179_v47  ;;  %v3180_v8 = vadd.f32 %v3102_v34, %v2740_v3  ;;  %v2325_v3 = vadd.f32 %v6046_v30, %v6045_v13  ;;  %v6053_v30 = vld [vmem:[#allocation4_spill] sm:$0xff] }
 0x1d3   : > { %v3239_v14 = vadd.f32 %v5858_v11, %v3195_v48  ;;  %v3196_v57 = vadd.f32 %v3142_v39, %v2756_v25  ;;  %v3104_v27 = vpop.f32.mrf.mxu0 }
 0x1d4   : > { %v3144_v63 = vpop.f32.mrf.mxu1  ;;  %v3224_v37 = vadd.f32 %v5860_v54, %v3180_v8  ;;  %v3255_v9 = vmax.f32 %v3223_v46, 0.0  ;;  %v3181_v43 = vadd.f32 %v3104_v27, %v6044_v49 }
 0x1d5   : > { %v3240_v5 = vadd.f32 %v5860_v54, %v3196_v57  ;;  %v3271_v38 = vmax.f32 %v3239_v14, 0.0  ;;  %v3197_v17 = vadd.f32 %v3144_v63, %v2757_v19  ;;  %v3106_v20 = vpop.f32.mrf.mxu0  ;;  %v6050_v14 = vld [vmem:[#allocation17_spill] sm:$0xff]  ;;  %v6051_v57 = vld [vmem:[#allocation19_spill] sm:$0xff] }
 0x1d6   : > { %v3146_v16 = vpop.f32.mrf.mxu1  ;;  %v3256_v22 = vmax.f32 %v3224_v37, 0.0  ;;  %v3182_v15 = vadd.f32 %v3106_v20, %v2742_v18  ;;  %v3225_v2 = vadd.f32 %v5858_v11, %v3181_v43  ;;  %v2765_v8 = vadd.f32 %v6050_v14, %v2325_v3  ;;  %v6052_v43 = vld [vmem:[#allocation10_spill] sm:$0xff]  ;;  %v6054_v3 = vld [vmem:[#allocation20_spill] sm:$0xff] }
 0x1d7   : > { %v3272_v1 = vmax.f32 %v3240_v5, 0.0  ;;  %v3198_v58 = vadd.f32 %v3146_v16, %v2758_v28  ;;  %v3241_v51 = vadd.f32 %v5858_v11, %v3197_v17  ;;  %v3110_v25 = vpop.f32.mrf.mxu0  ;;  %v5938_v27 = vadd.f32 %v6051_v57, %v2326_v62 }
 0x1d8   : > { %v3150_v18 = vpop.f32.mrf.mxu1  ;;  %v4081_v31 = vpack.c.bf16 %v3256_v22, %v3255_v9  ;;  %v3226_v0 = vadd.f32 %v5860_v54, %v3182_v15  ;;  %v3257_v21 = vmax.f32 %v3225_v2, 0.0  ;;  %v3183_v32 = vadd.f32 %v3110_v25, %v6049_v33 }
 0x1d9   : > { %v4089_v44 = vpack.c.bf16 %v3272_v1, %v3271_v38  ;;  %v3242_v4 = vadd.f32 %v5860_v54, %v3198_v58  ;;  %v3273_v60 = vmax.f32 %v3241_v51, 0.0  ;;  %v3199_v47 = vadd.f32 %v3150_v18, %v2759_v61  ;;  %v3112_v48 = vpop.f32.mrf.mxu0 }
 0x1da   : > { %v3152_v19 = vpop.f32.mrf.mxu1  ;;  %3383 = vst [vmem:[%s5926_s7] sm:$0xff] %v4081_v31  ;;  %v3258_v28 = vmax.f32 %v3226_v0, 0.0  ;;  %v3184_v39 = vadd.f32 %v3112_v48, %v5865_v50  ;;  %v3227_v63 = vadd.f32 %v5858_v11, %v3183_v32  ;;  %v2327_v24 = vadd.f32 %v6054_v3, %v6053_v30 }
 0x1db   : > { %3391 = vst [vmem:[%s5926_s7 + $0x40] sm:$0xff] %v4089_v44  ;;  %v3274_v34 = vmax.f32 %v3242_v4, 0.0  ;;  %v3200_v46 = vadd.f32 %v3152_v19, %v2760_v10  ;;  %v3243_v61 = vadd.f32 %v5858_v11, %v3199_v47  ;;  %v3114_v26 = vpop.f32.mrf.mxu0  ;;  %v2328_v62 = vadd.f32 %v5842_v59, %v6055_v35  ;;  %v6056_v4 = vld [vmem:[#allocation11_spill] sm:$0xff] }
 0x1dc   : > { %v3154_v37 = vpop.f32.mrf.mxu1  ;;  %v4082_v5 = vpack.c.bf16 %v3258_v28, %v3257_v21  ;;  %v3228_v38 = vadd.f32 %v5860_v54, %v3184_v39  ;;  %v3259_v10 = vmax.f32 %v3227_v63, 0.0  ;;  %v3185_v17 = vadd.f32 %v3114_v26, %v6052_v43  ;;  %v6057_v28 = vld [vmem:[#allocation21_spill] sm:$0xff] }
 0x1dd   : > { %v4090_v9 = vpack.c.bf16 %v3274_v34, %v3273_v60  ;;  %v3244_v50 = vadd.f32 %v5860_v54, %v3200_v46  ;;  %v3275_v49 = vmax.f32 %v3243_v61, 0.0  ;;  %v3201_v20 = vadd.f32 %v3154_v37, %v2761_v29  ;;  %v3116_v16 = vpop.f32.mrf.mxu0 }
 0x1de   : > { %v3156_v22 = vpop.f32.mrf.mxu1  ;;  %3384 = vst [vmem:[%s5926_s7 + $0x8] sm:$0xff] %v4082_v5  ;;  %v3260_v1 = vmax.f32 %v3228_v38, 0.0  ;;  %v3186_v58 = vadd.f32 %v3116_v16, %v5868_v56  ;;  %v3229_v2 = vadd.f32 %v5858_v11, %v3185_v17  ;;  %v2767_v34 = vadd.f32 %v6057_v28, %v2327_v24  ;;  %v6058_v5 = vld [vmem:[#allocation12_spill] sm:$0xff] }
 0x1df   : > { %3392 = vst [vmem:[%s5926_s7 + $0x48] sm:$0xff] %v4090_v9  ;;  %v3276_v15 = vmax.f32 %v3244_v50, 0.0  ;;  %v3202_v13 = vadd.f32 %v3156_v22, %v2762_v23  ;;  %v3245_v29 = vadd.f32 %v5858_v11, %v3201_v20  ;;  %v3120_v51 = vpop.f32.mrf.mxu0  ;;  %v2768_v39 = vadd.f32 %v5844_v52, %v2328_v62  ;;  %v6059_v20 = vld [vmem:[#allocation6_spill] sm:$0xff]  ;;  %v6060_v22 = vld [vmem:[#allocation7_spill] sm:$0xff] }
 0x1e0   : > { %v3160_v25 = vpop.f32.mrf.mxu1  ;;  %v4083_v18 = vpack.c.bf16 %v3260_v1, %v3259_v10  ;;  %v3230_v44 = vadd.f32 %v5860_v54, %v3186_v58  ;;  %v3261_v23 = vmax.f32 %v3229_v2, 0.0  ;;  %v3187_v21 = vadd.f32 %v3120_v51, %v6056_v4 }
 0x1e1   : > { %v4091_v31 = vpack.c.bf16 %v3276_v15, %v3275_v49  ;;  %v3246_v56 = vadd.f32 %v5860_v54, %v3202_v13  ;;  %v3277_v0 = vmax.f32 %v3245_v29, 0.0  ;;  %v3203_v60 = vadd.f32 %v3160_v25, %v5910_v36  ;;  %v3122_v59 = vpop.f32.mrf.mxu0 }
 0x1e2   : > { %v3162_v33 = vpop.f32.mrf.mxu1  ;;  %3385 = vst [vmem:[%s5926_s7 + $0x10] sm:$0xff] %v4083_v18  ;;  %v3262_v32 = vmax.f32 %v3230_v44, 0.0  ;;  %v3188_v48 = vadd.f32 %v3122_v59, %v5879_v6  ;;  %v3231_v46 = vadd.f32 %v5858_v11, %v3187_v21  ;;  %v2329_v16 = vadd.f32 %v5854_v42, %v6059_v20  ;;  %v6061_v42 = vld [vmem:[#allocation13_spill] sm:$0xff] }
 0x1e3   : > { %3393 = vst [vmem:[%s5926_s7 + $0x50] sm:$0xff] %v4091_v31  ;;  %v3278_v47 = vmax.f32 %v3246_v56, 0.0  ;;  %v3204_v19 = vadd.f32 %v3162_v33, %v5913_v41  ;;  %v3247_v36 = vadd.f32 %v5858_v11, %v3203_v60  ;;  %v3124_v14 = vpop.f32.mrf.mxu0  ;;  %v2330_v1 = vadd.f32 %v5874_v45, %v6060_v22 }
 0x1e4   : > { %v3164_v57 = vpop.f32.mrf.mxu1  ;;  %v4084_v63 = vpack.c.bf16 %v3262_v32, %v3261_v23  ;;  %v3232_v26 = vadd.f32 %v5860_v54, %v3188_v48  ;;  %v3263_v37 = vmax.f32 %v3231_v46, 0.0  ;;  %v3189_v9 = vadd.f32 %v3124_v14, %v6058_v5  ;;  %v6062_v48 = vld [vmem:[#allocation14_spill] sm:$0xff] }
 0x1e5   : > { %v4092_v61 = vpack.c.bf16 %v3278_v47, %v3277_v0  ;;  %v3248_v6 = vadd.f32 %v5860_v54, %v3204_v19  ;;  %v3279_v41 = vmax.f32 %v3247_v36, 0.0  ;;  %v3205_v38 = vadd.f32 %v3164_v57, %v2765_v8  ;;  %v3126_v50 = vpop.f32.mrf.mxu0 }
 0x1e6   : > { %v3166_v52 = vpop.f32.mrf.mxu1  ;;  %3386 = vst [vmem:[%s5926_s7 + $0x18] sm:$0xff] %v4084_v63  ;;  %v3264_v10 = vmax.f32 %v3232_v26, 0.0  ;;  %v3190_v43 = vadd.f32 %v3126_v50, %v5882_v53  ;;  %v3233_v8 = vadd.f32 %v5858_v11, %v3189_v9  ;;  %v2769_v44 = vadd.f32 %v5856_v55, %v2329_v16 }
 0x1e7   : > { %3394 = vst [vmem:[%s5926_s7 + $0x58] sm:$0xff] %v4092_v61  ;;  %v3280_v49 = vmax.f32 %v3248_v6, 0.0  ;;  %v3206_v17 = vadd.f32 %v3166_v52, %v5938_v27  ;;  %v3249_v15 = vadd.f32 %v5858_v11, %v3205_v38  ;;  %v3130_v58 = vpop.f32.mrf.mxu0  ;;  %v2770_v56 = vadd.f32 %v5876_v40, %v2330_v1 }
 0x1e8   : > { %v3170_v13 = vpop.f32.mrf.mxu1  ;;  %v4085_v30 = vpack.c.bf16 %v3264_v10, %v3263_v37  ;;  %v3234_v53 = vadd.f32 %v5860_v54, %v3190_v43  ;;  %v3265_v24 = vmax.f32 %v3233_v8, 0.0  ;;  %v3191_v62 = vadd.f32 %v3130_v58, %v6061_v42 }
 0x1e9   : > { %v4093_v3 = vpack.c.bf16 %v3280_v49, %v3279_v41  ;;  %v3250_v27 = vadd.f32 %v5860_v54, %v3206_v17  ;;  %v3281_v35 = vmax.f32 %v3249_v15, 0.0  ;;  %v3207_v2 = vadd.f32 %v3170_v13, %v2767_v34  ;;  %v3132_v29 = vpop.f32.mrf.mxu0 }
 0x1ea   : > { %v3172_v45 = vpop.f32.mrf.mxu1  ;;  %3387 = vst [vmem:[%s5926_s7 + $0x20] sm:$0xff] %v4085_v30  ;;  %v3266_v51 = vmax.f32 %v3234_v53, 0.0  ;;  %v3192_v18 = vadd.f32 %v3132_v29, %v5894_v7  ;;  %v3235_v23 = vadd.f32 %v5858_v11, %v3191_v62 }
 0x1eb   : > { %3395 = vst [vmem:[%s5926_s7 + $0x60] sm:$0xff] %v4093_v3  ;;  %v3282_v25 = vmax.f32 %v3250_v27, 0.0  ;;  %v3208_v31 = vadd.f32 %v3172_v45, %v2768_v39  ;;  %v3251_v0 = vadd.f32 %v5858_v11, %v3207_v2  ;;  %v3134_v4 = vpop.f32.mrf.mxu0 }
 0x1ec   : > { %v3174_v21 = vpop.f32.mrf.mxu1  ;;  %v4086_v60 = vpack.c.bf16 %v3266_v51, %v3265_v24  ;;  %v3236_v33 = vadd.f32 %v5860_v54, %v3192_v18  ;;  %v3267_v7 = vmax.f32 %v3235_v23, 0.0  ;;  %v3193_v55 = vadd.f32 %v3134_v4, %v6062_v48 }
 0x1ed   : > { %v4094_v59 = vpack.c.bf16 %v3282_v25, %v3281_v35  ;;  %v3252_v32 = vadd.f32 %v5860_v54, %v3208_v31  ;;  %v3283_v47 = vmax.f32 %v3251_v0, 0.0  ;;  %v3209_v19 = vadd.f32 %v3174_v21, %v2769_v44  ;;  %v3136_v40 = vpop.f32.mrf.mxu0 }
 0x1ee   : > { %v3176_v28 = vpop.f32.mrf.mxu1  ;;  %3388 = vst [vmem:[%s5926_s7 + $0x28] sm:$0xff] %v4086_v60  ;;  %v3268_v34 = vmax.f32 %v3236_v33, 0.0  ;;  %v3194_v46 = vadd.f32 %v3136_v40, %v5897_v12  ;;  %v3237_v14 = vadd.f32 %v5858_v11, %v3193_v55 }
 0x1ef   : > { %3396 = vst [vmem:[%s5926_s7 + $0x68] sm:$0xff] %v4094_v59  ;;  %v3284_v39 = vmax.f32 %v3252_v32, 0.0  ;;  %v3210_v36 = vadd.f32 %v3176_v28, %v2770_v56  ;;  %v3253_v57 = vadd.f32 %v5858_v11, %v3209_v19 }
 0x1f0   : > { %v4087_v63 = vpack.c.bf16 %v3268_v34, %v3267_v7  ;;  %v3238_v26 = vadd.f32 %v5860_v54, %v3194_v46  ;;  %v3269_v37 = vmax.f32 %v3237_v14, 0.0 }
 0x1f1   : > { %v4095_v61 = vpack.c.bf16 %v3284_v39, %v3283_v47  ;;  %v3254_v6 = vadd.f32 %v5860_v54, %v3210_v36  ;;  %v3285_v41 = vmax.f32 %v3253_v57, 0.0 }
 0x1f2   : > { %3389 = vst [vmem:[%s5926_s7 + $0x30] sm:$0xff] %v4087_v63  ;;  %v3270_v5 = vmax.f32 %v3238_v26, 0.0 }
 0x1f3   : > { %3397 = vst [vmem:[%s5926_s7 + $0x70] sm:$0xff] %v4095_v61  ;;  %v3286_v9 = vmax.f32 %v3254_v6, 0.0 }
 0x1f4   : > { %v4088_v12 = vpack.c.bf16 %v3270_v5, %v3269_v37 }
 0x1f5   : > { %v4096_v38 = vpack.c.bf16 %v3286_v9, %v3285_v41 }
 0x1f6   : > { %3390 = vst [vmem:[%s5926_s7 + $0x38] sm:$0xff] %v4088_v12 }
 0x1f7   : > { %3398 = vst [vmem:[%s5926_s7 + $0x78] sm:$0xff] %v4096_v38 }
 0x1f8 PF: > { %s13_s16 = sadd.s32 1, %s4712_s16   ;;  %s6063_s12 = smov %s4704_s14 }
 0x1f9   : > { %p10_p7 = scmp.ge.s32.totalorder %s13_s16, 6   ;;  %s6064_s13 = smov %s4708_s15 }
 0x1fa   : > { %s6065_s14 = smov %s6068_s17  ;;  %s6066_s15 = smov %s6072_s18 }
 0x1fb   :  { %12 = sbr.rel (!%p10_p7) target bundleno = 3 (0x3), region = 75 }

// kernel: inception_b.9
= control target key start
LH: loop header
LB: loop body
LE: loop exit
PB: predicated region body
PF: predicated region fallthrough
CT: control target
= control target key end

     0   :  { %s4622_s12 = smov 0   ;;  %s4624_s13 = smov 0   ;;  %s5985_s0 = inlined_call_operand.vmem [shape: bf16[2,352,256], index: 0, kind: input, shape index: {}]   ;;  %s5986_s1 = inlined_call_operand.vmem [shape: bf16[7,256,256], index: 1, kind: input, shape index: {}]   ;;  %s5987_s2 = inlined_call_operand.vmem [shape: f32[1,256], index: 2, kind: input, shape index: {}]   ;;  %s5988_s3 = inlined_call_operand.vmem [shape: f32[2,256,256], index: 3, kind: output, shape index: {}]  }
   0x1   :  { %s4626_s14 = smov 0   ;;  %s4628_s15 = smov 0  }
   0x2   :  { %s4630_s16 = smov 0  }
   0x3 LB: > { %s22_s17 = sadd.s32 1, %s4592_s14  ;;  %s25_s18 = sadd.s32 1, %s4596_s15  ;;  %s4600_s16 = sphi %s4630_s16, %s13_s16   ;;  %s4596_s15 = sphi %s4628_s15, %s6064_s15   ;;  %s4592_s14 = sphi %s4626_s14, %s6063_s14   ;;  %s4588_s13 = sphi %s4624_s13, %s6062_s13   ;;  %s4584_s12 = sphi %s4622_s12, %s6061_s12  }
   0x4   : > { %p23_p0 = scmp.ge.s32.totalorder %s22_s17, 2  ;;  %p3427_p1 = scmp.ge.s32.totalorder %s4600_s16, 1 }
   0x5   : > { %p151_p2 = scmp.lt.s32.totalorder %s4600_s16, 5 }
   0x6   : > { %s6066_s17 = smov (%p23_p0, %s22_s17), 0  ;;  %s6068_s18 = smov (!%p23_p0, %s25_s18), %s4596_s15 }
   0x7   : > { %p152_p3 = pnand %p3427_p1, %p151_p2  ;;  %p27_p4 = scmp.ge.s32.totalorder %s6068_s18, 2 }
   0x9   : > { %s6070_s18 = smov (%p27_p4, %s6068_s18), 0  ;;  %155 = sbr.rel (%p152_p3) target bundleno = 502 (0x1f6), region = 32 }
   0xe   : > { %v4058_v0 = vld [vmem:[%s5986_s1 + $0x174] ss:$8 sps:$4 sm:$0xff]   ;;  %v4062_v2 = vld [vmem:[%s5986_s1 + $0x170] ss:$8 sps:$4 sm:$0xff]   ;;  %v4064_v4 = vld [vmem:[%s5986_s1 + $0x164] ss:$8 sps:$4 sm:$0xff]  }
   0xf   : > { %v4060_v1 = vld [vmem:[%s5986_s1 + $0x74] ss:$8 sps:$4 sm:$0xff]   ;;  %545 = vmatprep.subr.bf16.mxu0 %v4058_v0  ;;  %v4063_v3 = vld [vmem:[%s5986_s1 + $0x70] ss:$8 sps:$4 sm:$0xff]   ;;  %v4066_v5 = vld [vmem:[%s5986_s1 + $0x64] ss:$8 sps:$4 sm:$0xff]  }
  0x10   : > { %898 = vmatprep.subr.bf16.mxu1 %v4060_v1  ;;  %546 = vmatpush1.bf16.msra.mxu0 %v4062_v2  ;;  %v4068_v6 = vld [vmem:[%s5986_s1 + $0x160] ss:$8 sps:$4 sm:$0xff]   ;;  %v4070_v8 = vld [vmem:[%s5986_s1 + $0x154] ss:$8 sps:$4 sm:$0xff]   ;;  %v4074_v10 = vld [vmem:[%s5986_s1 + $0x150] ss:$8 sps:$4 sm:$0xff]  }
  0x11   : > { %899 = vmatpush1.bf16.msra.mxu1 %v4063_v3  ;;  %547 = vmatprep.subr.bf16.mxu0 %v4064_v4  ;;  %v4069_v7 = vld [vmem:[%s5986_s1 + $0x60] ss:$8 sps:$4 sm:$0xff]   ;;  %v4072_v9 = vld [vmem:[%s5986_s1 + $0x54] ss:$8 sps:$4 sm:$0xff]   ;;  %v4075_v11 = vld [vmem:[%s5986_s1 + $0x50] ss:$8 sps:$4 sm:$0xff]  }
  0x12   : > { %900 = vmatprep.subr.bf16.mxu1 %v4066_v5  ;;  %v4076_v12 = vld [vmem:[%s5986_s1 + $0x144] ss:$8 sps:$4 sm:$0xff]   ;;  %v4080_v14 = vld [vmem:[%s5986_s1 + $0x140] ss:$8 sps:$4 sm:$0xff]   ;;  %v4082_v16 = vld [vmem:[%s5986_s1 + $0x134] ss:$8 sps:$4 sm:$0xff]  }
  0x13   : > { %v4078_v13 = vld [vmem:[%s5986_s1 + $0x44] ss:$8 sps:$4 sm:$0xff]   ;;  %v4081_v15 = vld [vmem:[%s5986_s1 + $0x40] ss:$8 sps:$4 sm:$0xff]   ;;  %v4084_v17 = vld [vmem:[%s5986_s1 + $0x34] ss:$8 sps:$4 sm:$0xff]  }
  0x14   : > { %548 = vmatpush1.bf16.msra.mxu0 %v4068_v6  ;;  %v4086_v18 = vld [vmem:[%s5986_s1 + $0x130] ss:$8 sps:$4 sm:$0xff]   ;;  %v4088_v20 = vld [vmem:[%s5986_s1 + $0x124] ss:$8 sps:$4 sm:$0xff]   ;;  %v4092_v22 = vld [vmem:[%s5986_s1 + $0x120] ss:$8 sps:$4 sm:$0xff]  }
  0x15   : > { %901 = vmatpush1.bf16.msra.mxu1 %v4069_v7  ;;  %549 = vmatprep.subr.bf16.mxu0 %v4070_v8  ;;  %v4087_v19 = vld [vmem:[%s5986_s1 + $0x30] ss:$8 sps:$4 sm:$0xff]   ;;  %v4090_v21 = vld [vmem:[%s5986_s1 + $0x24] ss:$8 sps:$4 sm:$0xff]   ;;  %v4093_v23 = vld [vmem:[%s5986_s1 + $0x20] ss:$8 sps:$4 sm:$0xff]  }
  0x16   : > { %902 = vmatprep.subr.bf16.mxu1 %v4072_v9  ;;  %v4094_v24 = vld [vmem:[%s5986_s1 + $0x114] ss:$8 sps:$4 sm:$0xff]   ;;  %v4098_v26 = vld [vmem:[%s5986_s1 + $0x110] ss:$8 sps:$4 sm:$0xff]   ;;  %v4100_v28 = vld [vmem:[%s5986_s1 + $0x104] ss:$8 sps:$4 sm:$0xff]  }
  0x17   : > { %v4096_v25 = vld [vmem:[%s5986_s1 + $0x14] ss:$8 sps:$4 sm:$0xff]   ;;  %v4099_v27 = vld [vmem:[%s5986_s1 + $0x10] ss:$8 sps:$4 sm:$0xff]   ;;  %v4102_v29 = vld [vmem:[%s5986_s1 + $0x4] ss:$8 sps:$4 sm:$0xff]  }
  0x18   : > { %550 = vmatpush1.bf16.msra.mxu0 %v4074_v10  ;;  %p180_p5 = scmp.lt.s32.totalorder %s4588_s13, 1  ;;  %v4104_v30 = vld [vmem:[%s5986_s1 + $0x100] ss:$8 sps:$4 sm:$0xff]   ;;  %v4106_v32 = vld [vmem:[%s5986_s1 + $0x1f4] ss:$8 sps:$4 sm:$0xff]   ;;  %s4757_s25 = sshll.u32 %s4584_s12, 7 }
  0x19   : > { %903 = vmatpush1.bf16.msra.mxu1 %v4075_v11  ;;  %551 = vmatprep.subr.bf16.mxu0 %v4076_v12  ;;  %v4105_v31 = vld [vmem:[%s5986_s1] ss:$8 sps:$4 sm:$0xff]   ;;  %v4108_v33 = vld [vmem:[%s5986_s1 + $0xf4] ss:$8 sps:$4 sm:$0xff]   ;;  %v4110_v34 = vld [vmem:[%s5986_s1 + $0x1f0] ss:$8 sps:$4 sm:$0xff]  }
  0x1a   : > { %904 = vmatprep.subr.bf16.mxu1 %v4078_v13  ;;  %s6072_s13 = smov (!%p180_p5, %s4588_s13), 1  ;;  %v4111_v35 = vld [vmem:[%s5986_s1 + $0xf0] ss:$8 sps:$4 sm:$0xff]   ;;  %s250_s5 = sadd.s32 16, %s4757_s25  ;;  %v4112_v36 = vld [vmem:[%s5986_s1 + $0x1e4] ss:$8 sps:$4 sm:$0xff]  }
  0x1b   : > { %v4114_v37 = vld [vmem:[%s5986_s1 + $0xe4] ss:$8 sps:$4 sm:$0xff]   ;;  %s4017_s10 = smul.u32 352, %s6072_s13  ;;  %s251_s11 = sshra.s32 %s250_s5, 3  ;;  %v4116_v38 = vld [vmem:[%s5986_s1 + $0x1e0] ss:$8 sps:$4 sm:$0xff]  }
  0x1c   : > { %552 = vmatpush1.bf16.msra.mxu0 %v4080_v14  ;;  %v4117_v39 = vld [vmem:[%s5986_s1 + $0xe0] ss:$8 sps:$4 sm:$0xff]   ;;  %v4118_v40 = vld [vmem:[%s5986_s1 + $0x1d4] ss:$8 sps:$4 sm:$0xff]   ;;  %s3979_s4 = sshll.u32 %s251_s11, 3  ;;  %s1451_s22 = sadd.s32 48, %s4757_s25 }
  0x1d   : > { %905 = vmatpush1.bf16.msra.mxu1 %v4081_v15  ;;  %553 = vmatprep.subr.bf16.mxu0 %v4082_v16  ;;  %v4120_v41 = vld [vmem:[%s5986_s1 + $0xd4] ss:$8 sps:$4 sm:$0xff]   ;;  %s4794_s30 = scalar_lea.vmem %s5985_s0, %s4017_s10  ;;  %v4122_v42 = vld [vmem:[%s5986_s1 + $0x1d0] ss:$8 sps:$4 sm:$0xff]   ;;  %v4124_v44 = vld [vmem:[%s5986_s1 + $0x1c4] ss:$8 sps:$4 sm:$0xff]  }
  0x1e   : > { %906 = vmatprep.subr.bf16.mxu1 %v4084_v17  ;;  %v4123_v43 = vld [vmem:[%s5986_s1 + $0xd0] ss:$8 sps:$4 sm:$0xff]   ;;  %s4806_s20 = scalar_lea.vmem %s4794_s30, %s3979_s4  ;;  %v4126_v45 = vld [vmem:[%s5986_s1 + $0xc4] ss:$8 sps:$4 sm:$0xff]   ;;  %v4128_v46 = vld [vmem:[%s5986_s1 + $0x1c0] ss:$8 sps:$4 sm:$0xff]   ;;  %s4819_s26 = scalar_lea.vmem %s4794_s30, %s4757_s25 }
  0x1f   : > { %v4129_v47 = vld [vmem:[%s5986_s1 + $0xc0] ss:$8 sps:$4 sm:$0xff]   ;;  %v4130_v48 = vld [vmem:[%s5986_s1 + $0x1b4] ss:$8 sps:$4 sm:$0xff]   ;;  %v4156_v49 = vld [vmem:[%s4806_s20 + $0x4] ss:$8 sps:$4 sm:$0xff]  }
  0x20   : > { %554 = vmatpush1.bf16.msra.mxu0 %v4086_v18  ;;  %v4132_v50 = vld [vmem:[%s5986_s1 + $0xb4] ss:$8 sps:$4 sm:$0xff]   ;;  %v4159_v51 = vld [vmem:[%s4819_s26 + $0x4] ss:$8 sps:$4 sm:$0xff]   ;;  %577 = vmatprep.mubr.bf16.mxu0 %v4156_v49  ;;  %v4134_v52 = vld [vmem:[%s5986_s1 + $0x1b0] ss:$8 sps:$4 sm:$0xff]  }
  0x21   : > { %907 = vmatpush1.bf16.msra.mxu1 %v4087_v19  ;;  %555 = vmatprep.subr.bf16.mxu0 %v4088_v20  ;;  %v4135_v53 = vld [vmem:[%s5986_s1 + $0xb0] ss:$8 sps:$4 sm:$0xff]   ;;  %v4136_v54 = vld [vmem:[%s5986_s1 + $0x1a4] ss:$8 sps:$4 sm:$0xff]   ;;  %v4140_v56 = vld [vmem:[%s5986_s1 + $0x1a0] ss:$8 sps:$4 sm:$0xff]  }
  0x22   : > { %908 = vmatprep.subr.bf16.mxu1 %v4090_v21  ;;  %930 = vmatprep.mubr.bf16.mxu1 %v4159_v51  ;;  %v4138_v55 = vld [vmem:[%s5986_s1 + $0xa4] ss:$8 sps:$4 sm:$0xff]   ;;  %v4141_v57 = vld [vmem:[%s5986_s1 + $0xa0] ss:$8 sps:$4 sm:$0xff]   ;;  %v4142_v58 = vld [vmem:[%s5986_s1 + $0x194] ss:$8 sps:$4 sm:$0xff]  }
  0x23   : > { %v4144_v59 = vld [vmem:[%s5986_s1 + $0x94] ss:$8 sps:$4 sm:$0xff]   ;;  %v4146_v60 = vld [vmem:[%s5986_s1 + $0x190] ss:$8 sps:$4 sm:$0xff]   ;;  %v4148_v62 = vld [vmem:[%s5986_s1 + $0x184] ss:$8 sps:$4 sm:$0xff]  }
  0x24   : > { %556 = vmatpush1.bf16.msra.mxu0 %v4092_v22  ;;  %v4147_v61 = vld [vmem:[%s5986_s1 + $0x90] ss:$8 sps:$4 sm:$0xff]   ;;  %v4150_v63 = vld [vmem:[%s5986_s1 + $0x84] ss:$8 sps:$4 sm:$0xff]   ;;  %v4152_v0 = vld [vmem:[%s5986_s1 + $0x180] ss:$8 sps:$4 sm:$0xff]  }
  0x25   : > { %909 = vmatpush1.bf16.msra.mxu1 %v4093_v23  ;;  %557 = vmatprep.subr.bf16.mxu0 %v4094_v24  ;;  %v4153_v1 = vld [vmem:[%s5986_s1 + $0x80] ss:$8 sps:$4 sm:$0xff]   ;;  %v4162_v2 = vld [vmem:[%s5986_s1 + $0x274] ss:$8 sps:$4 sm:$0xff]   ;;  %v4160_v6 = vld [vmem:[%s5986_s1 + $0x270] ss:$8 sps:$4 sm:$0xff]  }
  0x26   : > { %910 = vmatprep.subr.bf16.mxu1 %v4096_v25  ;;  %v4165_v3 = vld [vmem:[%s5986_s1 + $0x374] ss:$8 sps:$4 sm:$0xff]   ;;  %v4154_v4 = vld [vmem:[%s4806_s20] ss:$8 sps:$4 sm:$0xff]   ;;  %v4163_v7 = vld [vmem:[%s5986_s1 + $0x370] ss:$8 sps:$4 sm:$0xff]  }
  0x27   : > { %v4157_v5 = vld [vmem:[%s4819_s26] ss:$8 sps:$4 sm:$0xff]   ;;  %v4168_v8 = vld [vmem:[%s5986_s1 + $0x264] ss:$8 sps:$4 sm:$0xff]   ;;  %v4172_v10 = vld [vmem:[%s4806_s20 + $0x14] ss:$8 sps:$4 sm:$0xff]  }
  0x28   : > { %558 = vmatpush1.bf16.msra.mxu0 %v4098_v26  ;;  %v4171_v9 = vld [vmem:[%s5986_s1 + $0x364] ss:$8 sps:$4 sm:$0xff]   ;;  %v4174_v11 = vld [vmem:[%s4819_s26 + $0x14] ss:$8 sps:$4 sm:$0xff]   ;;  %v4166_v12 = vld [vmem:[%s5986_s1 + $0x260] ss:$8 sps:$4 sm:$0xff]  }
  0x29   : > { %911 = vmatpush1.bf16.msra.mxu1 %v4099_v27  ;;  %559 = vmatprep.subr.bf16.mxu0 %v4100_v28  ;;  %v4169_v13 = vld [vmem:[%s5986_s1 + $0x360] ss:$8 sps:$4 sm:$0xff]   ;;  %v4180_v14 = vld [vmem:[%s5986_s1 + $0x254] ss:$8 sps:$4 sm:$0xff]   ;;  %v4176_v16 = vld [vmem:[%s4806_s20 + $0x10] ss:$8 sps:$4 sm:$0xff]  }
  0x2a   : > { %912 = vmatprep.subr.bf16.mxu1 %v4102_v29  ;;  %v4183_v15 = vld [vmem:[%s5986_s1 + $0x354] ss:$8 sps:$4 sm:$0xff]   ;;  %v4177_v17 = vld [vmem:[%s4819_s26 + $0x10] ss:$8 sps:$4 sm:$0xff]   ;;  %v4186_v20 = vld [vmem:[%s5986_s1 + $0x244] ss:$8 sps:$4 sm:$0xff]  }
  0x2b   : > { %v4178_v18 = vld [vmem:[%s5986_s1 + $0x250] ss:$8 sps:$4 sm:$0xff]   ;;  %v4189_v21 = vld [vmem:[%s5986_s1 + $0x344] ss:$8 sps:$4 sm:$0xff]   ;;  %v4184_v24 = vld [vmem:[%s5986_s1 + $0x240] ss:$8 sps:$4 sm:$0xff]  }
  0x2c   : > { %560 = vmatpush1.bf16.msra.mxu0 %v4104_v30  ;;  %v4181_v19 = vld [vmem:[%s5986_s1 + $0x350] ss:$8 sps:$4 sm:$0xff]   ;;  %v4190_v22 = vld [vmem:[%s4806_s20 + $0x24] ss:$8 sps:$4 sm:$0xff]   ;;  %v4187_v25 = vld [vmem:[%s5986_s1 + $0x340] ss:$8 sps:$4 sm:$0xff]  }
  0x2d   : > { %913 = vmatpush1.bf16.msra.mxu1 %v4105_v31  ;;  %561 = vmatprep.subr.bf16.mxu0 %v4106_v32  ;;  %v4192_v23 = vld [vmem:[%s4819_s26 + $0x24] ss:$8 sps:$4 sm:$0xff]   ;;  %v4198_v26 = vld [vmem:[%s5986_s1 + $0x234] ss:$8 sps:$4 sm:$0xff]   ;;  %v4194_v28 = vld [vmem:[%s4806_s20 + $0x20] ss:$8 sps:$4 sm:$0xff]  }
  0x2e   : > { %914 = vmatprep.subr.bf16.mxu1 %v4108_v33  ;;  %v4201_v27 = vld [vmem:[%s5986_s1 + $0x334] ss:$8 sps:$4 sm:$0xff]   ;;  %v4195_v29 = vld [vmem:[%s4819_s26 + $0x20] ss:$8 sps:$4 sm:$0xff]   ;;  %v4196_v30 = vld [vmem:[%s5986_s1 + $0x230] ss:$8 sps:$4 sm:$0xff]  }
  0x2f   : > { %v4199_v31 = vld [vmem:[%s5986_s1 + $0x330] ss:$8 sps:$4 sm:$0xff]   ;;  %v4204_v32 = vld [vmem:[%s5986_s1 + $0x224] ss:$8 sps:$4 sm:$0xff]   ;;  %v4223_v49 = vld [vmem:[%s5986_s1 + $0x300] ss:$8 sps:$4 sm:$0xff]  }
  0x30   : > { %562 = vmatpush2.bf16.msra.mxu0 %v4110_v34  ;;  %v4207_v33 = vld [vmem:[%s5986_s1 + $0x324] ss:$8 sps:$4 sm:$0xff]   ;;  %v4208_v34 = vld [vmem:[%s4806_s20 + $0x34] ss:$8 sps:$4 sm:$0xff]   ;;  %s1011_s10 = sadd.s32 32, %s4757_s25  ;;  %s1452_s8 = sshra.s32 %s1451_s22, 3 }
  0x31   : > { %915 = vmatpush2.bf16.msra.mxu1 %v4111_v35  ;;  %563 = vmatprep.subr.bf16.mxu0 %v4112_v36  ;;  %v4210_v35 = vld [vmem:[%s4819_s26 + $0x34] ss:$8 sps:$4 sm:$0xff]   ;;  %v4202_v36 = vld [vmem:[%s5986_s1 + $0x220] ss:$8 sps:$4 sm:$0xff]   ;;  %s1012_s27 = sshra.s32 %s1011_s10, 3  ;;  %s3981_s24 = sshll.u32 %s1452_s8, 3 }
  0x32   : > { %916 = vmatprep.subr.bf16.mxu1 %v4114_v37  ;;  %v4205_v37 = vld [vmem:[%s5986_s1 + $0x320] ss:$8 sps:$4 sm:$0xff]   ;;  %v4237_v51 = vld [vmem:[%s5986_s1 + $0x3f4] ss:$8 sps:$4 sm:$0xff]   ;;  %s3980_s9 = sshll.u32 %s1012_s27, 3  ;;  %s5045_s8 = scalar_lea.vmem %s4794_s30, %s3981_s24 }
  0x33   : > { %s5034_s29 = scalar_lea.vmem %s4794_s30, %s3980_s9  ;;  %s1891_s6 = sadd.s32 64, %s4757_s25 }
  0x34   : > { %564 = vmatpush2.bf16.msra.mxu0 %v4116_v38  ;;  %v4216_v38 = vld [vmem:[%s5986_s1 + $0x214] ss:$8 sps:$4 sm:$0xff]   ;;  %s2331_s7 = sadd.s32 80, %s4757_s25  ;;  %s1892_s10 = sshra.s32 %s1891_s6, 3 }
  0x35   : > { %917 = vmatpush2.bf16.msra.mxu1 %v4117_v39  ;;  %565 = vmatprep.subr.bf16.mxu0 %v4118_v40  ;;  %v4219_v39 = vld [vmem:[%s5986_s1 + $0x314] ss:$8 sps:$4 sm:$0xff]   ;;  %v4212_v40 = vld [vmem:[%s4806_s20 + $0x30] ss:$8 sps:$4 sm:$0xff]   ;;  %s2332_s27 = sshra.s32 %s2331_s7, 3  ;;  %s3982_s4 = sshll.u32 %s1892_s10, 3 }
  0x36   : > { %918 = vmatprep.subr.bf16.mxu1 %v4120_v41  ;;  %v4213_v41 = vld [vmem:[%s4819_s26 + $0x30] ss:$8 sps:$4 sm:$0xff]   ;;  %s3983_s19 = sshll.u32 %s2332_s27, 3  ;;  %s5266_s21 = scalar_lea.vmem %s4794_s30, %s3982_s4 }
  0x37   : > { %s5277_s27 = scalar_lea.vmem %s4794_s30, %s3983_s19  ;;  %s2771_s4 = sadd.s32 96, %s4757_s25 }
  0x38   : > { %566 = vmatpush2.bf16.msra.mxu0 %v4122_v42  ;;  %v4214_v42 = vld [vmem:[%s5986_s1 + $0x210] ss:$8 sps:$4 sm:$0xff]   ;;  %s2772_s9 = sshra.s32 %s2771_s4, 3  ;;  %s3431_s6 = sshll.u32 %s6072_s13, 6 }
  0x39   : > { %919 = vmatpush2.bf16.msra.mxu1 %v4123_v43  ;;  %567 = vmatprep.subr.bf16.mxu0 %v4124_v44  ;;  %v4217_v43 = vld [vmem:[%s5986_s1 + $0x310] ss:$8 sps:$4 sm:$0xff]   ;;  %v4222_v44 = vld [vmem:[%s5986_s1 + $0x204] ss:$8 sps:$4 sm:$0xff]   ;;  %s3984_s10 = sshll.u32 %s2772_s9, 3 }
  0x3a   : > { %920 = vmatprep.subr.bf16.mxu1 %v4126_v45  ;;  %v4225_v45 = vld [vmem:[%s5986_s1 + $0x304] ss:$8 sps:$4 sm:$0xff]   ;;  %s5385_s24 = scalar_lea.vmem %s4794_s30, %s3984_s10 }
  0x3c   : > { %568 = vmatpush2.bf16.msra.mxu0 %v4128_v46  ;;  %v4226_v46 = vld [vmem:[%s4806_s20 + $0x44] ss:$8 sps:$4 sm:$0xff]  }
  0x3d   : > { %921 = vmatpush2.bf16.msra.mxu1 %v4129_v47  ;;  %569 = vmatprep.subr.bf16.mxu0 %v4130_v48  ;;  %v4228_v47 = vld [vmem:[%s4819_s26 + $0x44] ss:$8 sps:$4 sm:$0xff]   ;;  %v4220_v48 = vld [vmem:[%s5986_s1 + $0x200] ss:$8 sps:$4 sm:$0xff]  }
  0x3e   : > { %922 = vmatprep.subr.bf16.mxu1 %v4132_v50  ;;  %v4234_v50 = vld [vmem:[%s5986_s1 + $0x2f4] ss:$8 sps:$4 sm:$0xff]  }
  0x40   : > { %570 = vmatpush2.bf16.msra.mxu0 %v4134_v52  ;;  %v4230_v52 = vld [vmem:[%s4806_s20 + $0x40] ss:$8 sps:$4 sm:$0xff]  }
  0x41   : > { %923 = vmatpush2.bf16.msra.mxu1 %v4135_v53  ;;  %571 = vmatprep.subr.bf16.mxu0 %v4136_v54  ;;  %v4231_v53 = vld [vmem:[%s4819_s26 + $0x40] ss:$8 sps:$4 sm:$0xff]   ;;  %v4232_v54 = vld [vmem:[%s5986_s1 + $0x2f0] ss:$8 sps:$4 sm:$0xff]  }
  0x42   : > { %924 = vmatprep.subr.bf16.mxu1 %v4138_v55  ;;  %v4235_v55 = vld [vmem:[%s5986_s1 + $0x3f0] ss:$8 sps:$4 sm:$0xff]  }
  0x44   : > { %572 = vmatpush2.bf16.msra.mxu0 %v4140_v56  ;;  %v4240_v56 = vld [vmem:[%s5986_s1 + $0x2e4] ss:$8 sps:$4 sm:$0xff]  }
  0x45   : > { %925 = vmatpush2.bf16.msra.mxu1 %v4141_v57  ;;  %573 = vmatprep.subr.bf16.mxu0 %v4142_v58  ;;  %v4243_v57 = vld [vmem:[%s5986_s1 + $0x3e4] ss:$8 sps:$4 sm:$0xff]   ;;  %v4244_v58 = vld [vmem:[%s4806_s20 + $0x54] ss:$8 sps:$4 sm:$0xff]  }
  0x46   : > { %926 = vmatprep.subr.bf16.mxu1 %v4144_v59  ;;  %v4246_v59 = vld [vmem:[%s4819_s26 + $0x54] ss:$8 sps:$4 sm:$0xff]  }
  0x48   : > { %574 = vmatpush2.bf16.msra.mxu0 %v4146_v60  ;;  %v4238_v60 = vld [vmem:[%s5986_s1 + $0x2e0] ss:$8 sps:$4 sm:$0xff]  }
  0x49   : > { %927 = vmatpush2.bf16.msra.mxu1 %v4147_v61  ;;  %575 = vmatprep.subr.bf16.mxu0 %v4148_v62  ;;  %v4241_v61 = vld [vmem:[%s5986_s1 + $0x3e0] ss:$8 sps:$4 sm:$0xff]   ;;  %v4252_v62 = vld [vmem:[%s5986_s1 + $0x2d4] ss:$8 sps:$4 sm:$0xff]  }
  0x4a   : > { %928 = vmatprep.subr.bf16.mxu1 %v4150_v63  ;;  %v4255_v63 = vld [vmem:[%s5986_s1 + $0x3d4] ss:$8 sps:$4 sm:$0xff]  }
  0x4c   : > { %576 = vmatpush2.bf16.msra.mxu0 %v4152_v0  ;;  %v4248_v0 = vld [vmem:[%s4806_s20 + $0x50] ss:$8 sps:$4 sm:$0xff]  }
  0x4d   : > { %929 = vmatpush2.bf16.msra.mxu1 %v4153_v1  ;;  %1306 = vmatprep.subr.bf16.mxu0 %v4162_v2  ;;  %v4249_v1 = vld [vmem:[%s4819_s26 + $0x50] ss:$8 sps:$4 sm:$0xff]  }
  0x4e   : > { %1746 = vmatprep.subr.bf16.mxu1 %v4165_v3  ;;  %v4250_v2 = vld [vmem:[%s5986_s1 + $0x2d0] ss:$8 sps:$4 sm:$0xff]  }
  0x4f   : > { %578 = vmatmul.mubr.bf16.vlgmr.msra.gmra.mxu0 %v4154_v4  ;;  %v4253_v3 = vld [vmem:[%s5986_s1 + $0x3d0] ss:$8 sps:$4 sm:$0xff]   ;;  %v4258_v4 = vld [vmem:[%s5986_s1 + $0x2c4] ss:$8 sps:$4 sm:$0xff]  }
  0x50   : > { %931 = vmatmul.mubr.bf16.vlgmr.msra.gmra.mxu1 %v4157_v5  ;;  %1307 = vmatpush1.bf16.msra.mxu0 %v4160_v6  ;;  %v4261_v5 = vld [vmem:[%s5986_s1 + $0x3c4] ss:$8 sps:$4 sm:$0xff]  }
  0x51   : > { %1747 = vmatpush1.bf16.msra.mxu1 %v4163_v7  ;;  %1308 = vmatprep.subr.bf16.mxu0 %v4168_v8  ;;  %v4262_v6 = vld [vmem:[%s4806_s20 + $0x64] ss:$8 sps:$4 sm:$0xff]   ;;  %v4256_v8 = vld [vmem:[%s5986_s1 + $0x2c0] ss:$8 sps:$4 sm:$0xff]  }
  0x52   : > { %1748 = vmatprep.subr.bf16.mxu1 %v4171_v9  ;;  %587 = vmatprep.mubr.bf16.mxu0 %v4172_v10  ;;  %v4264_v7 = vld [vmem:[%s4819_s26 + $0x64] ss:$8 sps:$4 sm:$0xff]   ;;  %v4259_v9 = vld [vmem:[%s5986_s1 + $0x3c0] ss:$8 sps:$4 sm:$0xff]   ;;  %v4270_v10 = vld [vmem:[%s5986_s1 + $0x2b4] ss:$8 sps:$4 sm:$0xff]  }
  0x53   : > { %940 = vmatprep.mubr.bf16.mxu1 %v4174_v11  ;;  %v4273_v11 = vld [vmem:[%s5986_s1 + $0x3b4] ss:$8 sps:$4 sm:$0xff]  }
  0x54   : > { %1309 = vmatpush1.bf16.msra.mxu0 %v4166_v12  ;;  %v4266_v12 = vld [vmem:[%s4806_s20 + $0x60] ss:$8 sps:$4 sm:$0xff]  }
  0x55   : > { %1749 = vmatpush1.bf16.msra.mxu1 %v4169_v13  ;;  %1310 = vmatprep.subr.bf16.mxu0 %v4180_v14  ;;  %v4267_v13 = vld [vmem:[%s4819_s26 + $0x60] ss:$8 sps:$4 sm:$0xff]   ;;  %v4268_v14 = vld [vmem:[%s5986_s1 + $0x2b0] ss:$8 sps:$4 sm:$0xff]  }
  0x56   : > { %1750 = vmatprep.subr.bf16.mxu1 %v4183_v15  ;;  %v4271_v15 = vld [vmem:[%s5986_s1 + $0x3b0] ss:$8 sps:$4 sm:$0xff]  }
  0x57   : > { %588 = vmatmul.mubr.bf16.gmra.mxu0 %v4176_v16  ;;  %v4276_v16 = vld [vmem:[%s5986_s1 + $0x2a4] ss:$8 sps:$4 sm:$0xff]  }
  0x58   : > { %941 = vmatmul.mubr.bf16.gmra.mxu1 %v4177_v17  ;;  %1311 = vmatpush1.bf16.msra.mxu0 %v4178_v18  ;;  %v4279_v17 = vld [vmem:[%s5986_s1 + $0x3a4] ss:$8 sps:$4 sm:$0xff]   ;;  %v4280_v18 = vld [vmem:[%s4806_s20 + $0x74] ss:$8 sps:$4 sm:$0xff]  }
  0x59   : > { %1751 = vmatpush1.bf16.msra.mxu1 %v4181_v19  ;;  %1312 = vmatprep.subr.bf16.mxu0 %v4186_v20  ;;  %v4282_v19 = vld [vmem:[%s4819_s26 + $0x74] ss:$8 sps:$4 sm:$0xff]   ;;  %v4274_v20 = vld [vmem:[%s5986_s1 + $0x2a0] ss:$8 sps:$4 sm:$0xff]  }
  0x5a   : > { %1752 = vmatprep.subr.bf16.mxu1 %v4189_v21  ;;  %597 = vmatprep.mubr.bf16.mxu0 %v4190_v22  ;;  %v4277_v21 = vld [vmem:[%s5986_s1 + $0x3a0] ss:$8 sps:$4 sm:$0xff]   ;;  %v4288_v22 = vld [vmem:[%s5986_s1 + $0x294] ss:$8 sps:$4 sm:$0xff]  }
  0x5b   : > { %950 = vmatprep.mubr.bf16.mxu1 %v4192_v23  ;;  %v4291_v23 = vld [vmem:[%s5986_s1 + $0x394] ss:$8 sps:$4 sm:$0xff]  }
  0x5c   : > { %1313 = vmatpush1.bf16.msra.mxu0 %v4184_v24  ;;  %v4284_v24 = vld [vmem:[%s4806_s20 + $0x70] ss:$8 sps:$4 sm:$0xff]  }
  0x5d   : > { %1753 = vmatpush1.bf16.msra.mxu1 %v4187_v25  ;;  %1314 = vmatprep.subr.bf16.mxu0 %v4198_v26  ;;  %v4285_v25 = vld [vmem:[%s4819_s26 + $0x70] ss:$8 sps:$4 sm:$0xff]  }
  0x5e   : > { %1754 = vmatprep.subr.bf16.mxu1 %v4201_v27  ;;  %v4286_v26 = vld [vmem:[%s5986_s1 + $0x290] ss:$8 sps:$4 sm:$0xff]  }
  0x5f   : > { %598 = vmatmul.mubr.bf16.gmra.mxu0 %v4194_v28  ;;  %v4289_v27 = vld [vmem:[%s5986_s1 + $0x390] ss:$8 sps:$4 sm:$0xff]   ;;  %v4294_v28 = vld [vmem:[%s5986_s1 + $0x284] ss:$8 sps:$4 sm:$0xff]  }
  0x60   : > { %951 = vmatmul.mubr.bf16.gmra.mxu1 %v4195_v29  ;;  %1315 = vmatpush1.bf16.msra.mxu0 %v4196_v30  ;;  %v4297_v29 = vld [vmem:[%s5986_s1 + $0x384] ss:$8 sps:$4 sm:$0xff]  }
  0x61   : > { %1755 = vmatpush1.bf16.msra.mxu1 %v4199_v31  ;;  %1316 = vmatprep.subr.bf16.mxu0 %v4204_v32  ;;  %v4300_v30 = vld [vmem:[%s5034_s29 + $0x4] ss:$8 sps:$4 sm:$0xff]   ;;  %v4292_v32 = vld [vmem:[%s5986_s1 + $0x280] ss:$8 sps:$4 sm:$0xff]  }
  0x62   : > { %1756 = vmatprep.subr.bf16.mxu1 %v4207_v33  ;;  %607 = vmatprep.mubr.bf16.mxu0 %v4208_v34  ;;  %v4303_v31 = vld [vmem:[%s5045_s8 + $0x4] ss:$8 sps:$4 sm:$0xff]   ;;  %v4295_v33 = vld [vmem:[%s5986_s1 + $0x380] ss:$8 sps:$4 sm:$0xff]   ;;  %v4306_v34 = vld [vmem:[%s5986_s1 + $0x474] ss:$8 sps:$4 sm:$0xff]  }
  0x63   : > { %960 = vmatprep.mubr.bf16.mxu1 %v4210_v35  ;;  %v4309_v35 = vld [vmem:[%s5986_s1 + $0x574] ss:$8 sps:$4 sm:$0xff]  }
  0x64   : > { %1317 = vmatpush1.bf16.msra.mxu0 %v4202_v36  ;;  %v4298_v36 = vld [vmem:[%s5034_s29] ss:$8 sps:$4 sm:$0xff]  }
  0x65   : > { %1757 = vmatpush1.bf16.msra.mxu1 %v4205_v37  ;;  %1318 = vmatprep.subr.bf16.mxu0 %v4216_v38  ;;  %v4301_v37 = vld [vmem:[%s5045_s8] ss:$8 sps:$4 sm:$0xff]   ;;  %v4304_v38 = vld [vmem:[%s5986_s1 + $0x470] ss:$8 sps:$4 sm:$0xff]  }
  0x66   : > { %1758 = vmatprep.subr.bf16.mxu1 %v4219_v39  ;;  %v4307_v39 = vld [vmem:[%s5986_s1 + $0x570] ss:$8 sps:$4 sm:$0xff]  }
  0x67   : > { %608 = vmatmul.mubr.bf16.gmra.mxu0 %v4212_v40  ;;  %v4312_v40 = vld [vmem:[%s5986_s1 + $0x464] ss:$8 sps:$4 sm:$0xff]  }
  0x68   : > { %961 = vmatmul.mubr.bf16.gmra.mxu1 %v4213_v41  ;;  %1319 = vmatpush1.bf16.msra.mxu0 %v4214_v42  ;;  %v4315_v41 = vld [vmem:[%s5986_s1 + $0x564] ss:$8 sps:$4 sm:$0xff]   ;;  %v4316_v42 = vld [vmem:[%s5034_s29 + $0x14] ss:$8 sps:$4 sm:$0xff]  }
  0x69   : > { %1759 = vmatpush1.bf16.msra.mxu1 %v4217_v43  ;;  %1320 = vmatprep.subr.bf16.mxu0 %v4222_v44  ;;  %v4318_v43 = vld [vmem:[%s5045_s8 + $0x14] ss:$8 sps:$4 sm:$0xff]   ;;  %v4310_v44 = vld [vmem:[%s5986_s1 + $0x460] ss:$8 sps:$4 sm:$0xff]  }
  0x6a   : > { %1760 = vmatprep.subr.bf16.mxu1 %v4225_v45  ;;  %617 = vmatprep.mubr.bf16.mxu0 %v4226_v46  ;;  %v4313_v45 = vld [vmem:[%s5986_s1 + $0x560] ss:$8 sps:$4 sm:$0xff]   ;;  %v4324_v46 = vld [vmem:[%s5986_s1 + $0x454] ss:$8 sps:$4 sm:$0xff]  }
  0x6b   : > { %970 = vmatprep.mubr.bf16.mxu1 %v4228_v47  ;;  %v4327_v47 = vld [vmem:[%s5986_s1 + $0x554] ss:$8 sps:$4 sm:$0xff]  }
  0x6c   : > { %1321 = vmatpush1.bf16.msra.mxu0 %v4220_v48  ;;  %v4320_v48 = vld [vmem:[%s5034_s29 + $0x10] ss:$8 sps:$4 sm:$0xff]  }
  0x6d   : > { %1761 = vmatpush1.bf16.msra.mxu1 %v4223_v49  ;;  %1322 = vmatprep.subr.bf16.mxu0 %v4234_v50  ;;  %v4321_v49 = vld [vmem:[%s5045_s8 + $0x10] ss:$8 sps:$4 sm:$0xff]  }
  0x6e   : > { %1762 = vmatprep.subr.bf16.mxu1 %v4237_v51  ;;  %v4322_v50 = vld [vmem:[%s5986_s1 + $0x450] ss:$8 sps:$4 sm:$0xff]  }
  0x6f   : > { %618 = vmatmul.mubr.bf16.gmra.mxu0 %v4230_v52  ;;  %v4325_v51 = vld [vmem:[%s5986_s1 + $0x550] ss:$8 sps:$4 sm:$0xff]   ;;  %v4330_v52 = vld [vmem:[%s5986_s1 + $0x444] ss:$8 sps:$4 sm:$0xff]  }
  0x70   : > { %971 = vmatmul.mubr.bf16.gmra.mxu1 %v4231_v53  ;;  %1323 = vmatpush2.bf16.msra.mxu0 %v4232_v54  ;;  %v4333_v53 = vld [vmem:[%s5986_s1 + $0x544] ss:$8 sps:$4 sm:$0xff]  }
  0x71   : > { %1763 = vmatpush2.bf16.msra.mxu1 %v4235_v55  ;;  %1324 = vmatprep.subr.bf16.mxu0 %v4240_v56  ;;  %v4334_v54 = vld [vmem:[%s5034_s29 + $0x24] ss:$8 sps:$4 sm:$0xff]   ;;  %v4328_v56 = vld [vmem:[%s5986_s1 + $0x440] ss:$8 sps:$4 sm:$0xff]  }
  0x72   : > { %1764 = vmatprep.subr.bf16.mxu1 %v4243_v57  ;;  %627 = vmatprep.mubr.bf16.mxu0 %v4244_v58  ;;  %v4336_v55 = vld [vmem:[%s5045_s8 + $0x24] ss:$8 sps:$4 sm:$0xff]   ;;  %v4331_v57 = vld [vmem:[%s5986_s1 + $0x540] ss:$8 sps:$4 sm:$0xff]   ;;  %v4342_v58 = vld [vmem:[%s5986_s1 + $0x434] ss:$8 sps:$4 sm:$0xff]  }
  0x73   : > { %980 = vmatprep.mubr.bf16.mxu1 %v4246_v59  ;;  %v4345_v59 = vld [vmem:[%s5986_s1 + $0x534] ss:$8 sps:$4 sm:$0xff]  }
  0x74   : > { %1325 = vmatpush2.bf16.msra.mxu0 %v4238_v60  ;;  %v4338_v60 = vld [vmem:[%s5034_s29 + $0x20] ss:$8 sps:$4 sm:$0xff]  }
  0x75   : > { %1765 = vmatpush2.bf16.msra.mxu1 %v4241_v61  ;;  %1326 = vmatprep.subr.bf16.mxu0 %v4252_v62  ;;  %v4339_v61 = vld [vmem:[%s5045_s8 + $0x20] ss:$8 sps:$4 sm:$0xff]   ;;  %v4340_v62 = vld [vmem:[%s5986_s1 + $0x430] ss:$8 sps:$4 sm:$0xff]  }
  0x76   : > { %1766 = vmatprep.subr.bf16.mxu1 %v4255_v63  ;;  %v4343_v63 = vld [vmem:[%s5986_s1 + $0x530] ss:$8 sps:$4 sm:$0xff]  }
  0x77   : > { %628 = vmatmul.mubr.bf16.gmra.mxu0 %v4248_v0  ;;  %v4348_v0 = vld [vmem:[%s5986_s1 + $0x424] ss:$8 sps:$4 sm:$0xff]  }
  0x78   : > { %981 = vmatmul.mubr.bf16.gmra.mxu1 %v4249_v1  ;;  %1327 = vmatpush2.bf16.msra.mxu0 %v4250_v2  ;;  %v4351_v1 = vld [vmem:[%s5986_s1 + $0x524] ss:$8 sps:$4 sm:$0xff]   ;;  %v4352_v2 = vld [vmem:[%s5034_s29 + $0x34] ss:$8 sps:$4 sm:$0xff]  }
  0x79   : > { %1767 = vmatpush2.bf16.msra.mxu1 %v4253_v3  ;;  %1328 = vmatprep.subr.bf16.mxu0 %v4258_v4  ;;  %v4354_v3 = vld [vmem:[%s5045_s8 + $0x34] ss:$8 sps:$4 sm:$0xff]   ;;  %v4346_v4 = vld [vmem:[%s5986_s1 + $0x420] ss:$8 sps:$4 sm:$0xff]  }
  0x7a   : > { %1768 = vmatprep.subr.bf16.mxu1 %v4261_v5  ;;  %637 = vmatprep.mubr.bf16.mxu0 %v4262_v6  ;;  %v4349_v5 = vld [vmem:[%s5986_s1 + $0x520] ss:$8 sps:$4 sm:$0xff]   ;;  %v4360_v6 = vld [vmem:[%s5986_s1 + $0x414] ss:$8 sps:$4 sm:$0xff]  }
  0x7b   : > { %990 = vmatprep.mubr.bf16.mxu1 %v4264_v7  ;;  %v4363_v7 = vld [vmem:[%s5986_s1 + $0x514] ss:$8 sps:$4 sm:$0xff]  }
  0x7c   : > { %1329 = vmatpush2.bf16.msra.mxu0 %v4256_v8  ;;  %v4356_v8 = vld [vmem:[%s5034_s29 + $0x30] ss:$8 sps:$4 sm:$0xff]  }
  0x7d   : > { %1769 = vmatpush2.bf16.msra.mxu1 %v4259_v9  ;;  %1330 = vmatprep.subr.bf16.mxu0 %v4270_v10  ;;  %v4357_v9 = vld [vmem:[%s5045_s8 + $0x30] ss:$8 sps:$4 sm:$0xff]  }
  0x7e   : > { %1770 = vmatprep.subr.bf16.mxu1 %v4273_v11  ;;  %v4358_v10 = vld [vmem:[%s5986_s1 + $0x410] ss:$8 sps:$4 sm:$0xff]  }
  0x7f   : > { %638 = vmatmul.mubr.bf16.gmra.mxu0 %v4266_v12  ;;  %v4361_v11 = vld [vmem:[%s5986_s1 + $0x510] ss:$8 sps:$4 sm:$0xff]   ;;  %v4366_v12 = vld [vmem:[%s5986_s1 + $0x404] ss:$8 sps:$4 sm:$0xff]  }
  0x80   : > { %991 = vmatmul.mubr.bf16.gmra.mxu1 %v4267_v13  ;;  %1331 = vmatpush2.bf16.msra.mxu0 %v4268_v14  ;;  %v4369_v13 = vld [vmem:[%s5986_s1 + $0x504] ss:$8 sps:$4 sm:$0xff]  }
  0x81   : > { %1771 = vmatpush2.bf16.msra.mxu1 %v4271_v15  ;;  %1332 = vmatprep.subr.bf16.mxu0 %v4276_v16  ;;  %v4370_v14 = vld [vmem:[%s5034_s29 + $0x44] ss:$8 sps:$4 sm:$0xff]   ;;  %v4364_v16 = vld [vmem:[%s5986_s1 + $0x400] ss:$8 sps:$4 sm:$0xff]  }
  0x82   : > { %1772 = vmatprep.subr.bf16.mxu1 %v4279_v17  ;;  %647 = vmatprep.mubr.bf16.mxu0 %v4280_v18  ;;  %v4372_v15 = vld [vmem:[%s5045_s8 + $0x44] ss:$8 sps:$4 sm:$0xff]   ;;  %v4367_v17 = vld [vmem:[%s5986_s1 + $0x500] ss:$8 sps:$4 sm:$0xff]   ;;  %v4378_v18 = vld [vmem:[%s5986_s1 + $0x4f4] ss:$8 sps:$4 sm:$0xff]  }
  0x83   : > { %1000 = vmatprep.mubr.bf16.mxu1 %v4282_v19  ;;  %v4381_v19 = vld [vmem:[%s5986_s1 + $0x5f4] ss:$8 sps:$4 sm:$0xff]  }
  0x84   : > { %1333 = vmatpush2.bf16.msra.mxu0 %v4274_v20  ;;  %v4374_v20 = vld [vmem:[%s5034_s29 + $0x40] ss:$8 sps:$4 sm:$0xff]  }
  0x85   : > { %1773 = vmatpush2.bf16.msra.mxu1 %v4277_v21  ;;  %1334 = vmatprep.subr.bf16.mxu0 %v4288_v22  ;;  %v4375_v21 = vld [vmem:[%s5045_s8 + $0x40] ss:$8 sps:$4 sm:$0xff]   ;;  %v4376_v22 = vld [vmem:[%s5986_s1 + $0x4f0] ss:$8 sps:$4 sm:$0xff]  }
  0x86   : > { %1774 = vmatprep.subr.bf16.mxu1 %v4291_v23  ;;  %v4379_v23 = vld [vmem:[%s5986_s1 + $0x5f0] ss:$8 sps:$4 sm:$0xff]  }
  0x87   : > { %648 = vmatmul.mubr.bf16.gmra.mxu0 %v4284_v24  ;;  %v4384_v24 = vld [vmem:[%s5986_s1 + $0x4e4] ss:$8 sps:$4 sm:$0xff]  }
  0x88   : > { %1001 = vmatmul.mubr.bf16.gmra.mxu1 %v4285_v25  ;;  %1335 = vmatpush2.bf16.msra.mxu0 %v4286_v26  ;;  %v4387_v25 = vld [vmem:[%s5986_s1 + $0x5e4] ss:$8 sps:$4 sm:$0xff]   ;;  %v4388_v26 = vld [vmem:[%s5034_s29 + $0x54] ss:$8 sps:$4 sm:$0xff]  }
  0x89   : > { %1775 = vmatpush2.bf16.msra.mxu1 %v4289_v27  ;;  %1336 = vmatprep.subr.bf16.mxu0 %v4294_v28  ;;  %v4390_v27 = vld [vmem:[%s5045_s8 + $0x54] ss:$8 sps:$4 sm:$0xff]   ;;  %v4382_v28 = vld [vmem:[%s5986_s1 + $0x4e0] ss:$8 sps:$4 sm:$0xff]  }
  0x8a   : > { %1776 = vmatprep.subr.bf16.mxu1 %v4297_v29  ;;  %1338 = vmatprep.mubr.bf16.mxu0 %v4300_v30  ;;  %v4385_v29 = vld [vmem:[%s5986_s1 + $0x5e0] ss:$8 sps:$4 sm:$0xff]   ;;  %v4396_v30 = vld [vmem:[%s5986_s1 + $0x4d4] ss:$8 sps:$4 sm:$0xff]  }
  0x8b   : > { %1778 = vmatprep.mubr.bf16.mxu1 %v4303_v31  ;;  %v4399_v31 = vld [vmem:[%s5986_s1 + $0x5d4] ss:$8 sps:$4 sm:$0xff]  }
  0x8c   : > { %1337 = vmatpush2.bf16.msra.mxu0 %v4292_v32  ;;  %v4392_v32 = vld [vmem:[%s5034_s29 + $0x50] ss:$8 sps:$4 sm:$0xff]  }
  0x8d   : > { %1777 = vmatpush2.bf16.msra.mxu1 %v4295_v33  ;;  %2186 = vmatprep.subr.bf16.mxu0 %v4306_v34  ;;  %v4393_v33 = vld [vmem:[%s5045_s8 + $0x50] ss:$8 sps:$4 sm:$0xff]  }
  0x8e   : > { %2626 = vmatprep.subr.bf16.mxu1 %v4309_v35  ;;  %v4394_v34 = vld [vmem:[%s5986_s1 + $0x4d0] ss:$8 sps:$4 sm:$0xff]  }
  0x8f   : > { %1339 = vmatmul.mubr.bf16.vlgmr.msra.gmra.mxu0 %v4298_v36  ;;  %v4397_v35 = vld [vmem:[%s5986_s1 + $0x5d0] ss:$8 sps:$4 sm:$0xff]   ;;  %v4402_v36 = vld [vmem:[%s5986_s1 + $0x4c4] ss:$8 sps:$4 sm:$0xff]  }
  0x90   : > { %1779 = vmatmul.mubr.bf16.vlgmr.msra.gmra.mxu1 %v4301_v37  ;;  %2187 = vmatpush1.bf16.msra.mxu0 %v4304_v38  ;;  %v4405_v37 = vld [vmem:[%s5986_s1 + $0x5c4] ss:$8 sps:$4 sm:$0xff]  }
  0x91   : > { %2627 = vmatpush1.bf16.msra.mxu1 %v4307_v39  ;;  %2188 = vmatprep.subr.bf16.mxu0 %v4312_v40  ;;  %v4406_v38 = vld [vmem:[%s5034_s29 + $0x64] ss:$8 sps:$4 sm:$0xff]   ;;  %v4400_v40 = vld [vmem:[%s5986_s1 + $0x4c0] ss:$8 sps:$4 sm:$0xff]  }
  0x92   : > { %2628 = vmatprep.subr.bf16.mxu1 %v4315_v41  ;;  %1348 = vmatprep.mubr.bf16.mxu0 %v4316_v42  ;;  %v4408_v39 = vld [vmem:[%s5045_s8 + $0x64] ss:$8 sps:$4 sm:$0xff]   ;;  %v4403_v41 = vld [vmem:[%s5986_s1 + $0x5c0] ss:$8 sps:$4 sm:$0xff]   ;;  %v4414_v42 = vld [vmem:[%s5986_s1 + $0x4b4] ss:$8 sps:$4 sm:$0xff]  }
  0x93   : > { %1788 = vmatprep.mubr.bf16.mxu1 %v4318_v43  ;;  %v4417_v43 = vld [vmem:[%s5986_s1 + $0x5b4] ss:$8 sps:$4 sm:$0xff]  }
  0x94   : > { %2189 = vmatpush1.bf16.msra.mxu0 %v4310_v44  ;;  %v4410_v44 = vld [vmem:[%s5034_s29 + $0x60] ss:$8 sps:$4 sm:$0xff]  }
  0x95   : > { %2629 = vmatpush1.bf16.msra.mxu1 %v4313_v45  ;;  %2190 = vmatprep.subr.bf16.mxu0 %v4324_v46  ;;  %v4411_v45 = vld [vmem:[%s5045_s8 + $0x60] ss:$8 sps:$4 sm:$0xff]   ;;  %v4412_v46 = vld [vmem:[%s5986_s1 + $0x4b0] ss:$8 sps:$4 sm:$0xff]  }
  0x96   : > { %2630 = vmatprep.subr.bf16.mxu1 %v4327_v47  ;;  %v4415_v47 = vld [vmem:[%s5986_s1 + $0x5b0] ss:$8 sps:$4 sm:$0xff]  }
  0x97   : > { %1349 = vmatmul.mubr.bf16.gmra.mxu0 %v4320_v48  ;;  %v4420_v48 = vld [vmem:[%s5986_s1 + $0x4a4] ss:$8 sps:$4 sm:$0xff]  }
  0x98   : > { %1789 = vmatmul.mubr.bf16.gmra.mxu1 %v4321_v49  ;;  %2191 = vmatpush1.bf16.msra.mxu0 %v4322_v50  ;;  %v4423_v49 = vld [vmem:[%s5986_s1 + $0x5a4] ss:$8 sps:$4 sm:$0xff]   ;;  %v4424_v50 = vld [vmem:[%s5034_s29 + $0x74] ss:$8 sps:$4 sm:$0xff]  }
  0x99   : > { %2631 = vmatpush1.bf16.msra.mxu1 %v4325_v51  ;;  %2192 = vmatprep.subr.bf16.mxu0 %v4330_v52  ;;  %v4426_v51 = vld [vmem:[%s5045_s8 + $0x74] ss:$8 sps:$4 sm:$0xff]   ;;  %v4418_v52 = vld [vmem:[%s5986_s1 + $0x4a0] ss:$8 sps:$4 sm:$0xff]  }
  0x9a   : > { %2632 = vmatprep.subr.bf16.mxu1 %v4333_v53  ;;  %1358 = vmatprep.mubr.bf16.mxu0 %v4334_v54  ;;  %v4421_v53 = vld [vmem:[%s5986_s1 + $0x5a0] ss:$8 sps:$4 sm:$0xff]   ;;  %v4432_v54 = vld [vmem:[%s5986_s1 + $0x494] ss:$8 sps:$4 sm:$0xff]  }
  0x9b   : > { %1798 = vmatprep.mubr.bf16.mxu1 %v4336_v55  ;;  %v4435_v55 = vld [vmem:[%s5986_s1 + $0x594] ss:$8 sps:$4 sm:$0xff]  }
  0x9c   : > { %2193 = vmatpush1.bf16.msra.mxu0 %v4328_v56  ;;  %v4428_v56 = vld [vmem:[%s5034_s29 + $0x70] ss:$8 sps:$4 sm:$0xff]  }
  0x9d   : > { %2633 = vmatpush1.bf16.msra.mxu1 %v4331_v57  ;;  %2194 = vmatprep.subr.bf16.mxu0 %v4342_v58  ;;  %v4429_v57 = vld [vmem:[%s5045_s8 + $0x70] ss:$8 sps:$4 sm:$0xff]  }
  0x9e   : > { %2634 = vmatprep.subr.bf16.mxu1 %v4345_v59  ;;  %v4430_v58 = vld [vmem:[%s5986_s1 + $0x490] ss:$8 sps:$4 sm:$0xff]  }
  0x9f   : > { %1359 = vmatmul.mubr.bf16.gmra.mxu0 %v4338_v60  ;;  %v4433_v59 = vld [vmem:[%s5986_s1 + $0x590] ss:$8 sps:$4 sm:$0xff]   ;;  %v4438_v60 = vld [vmem:[%s5986_s1 + $0x484] ss:$8 sps:$4 sm:$0xff]  }
  0xa0   : > { %1799 = vmatmul.mubr.bf16.gmra.mxu1 %v4339_v61  ;;  %2195 = vmatpush1.bf16.msra.mxu0 %v4340_v62  ;;  %v4441_v61 = vld [vmem:[%s5986_s1 + $0x584] ss:$8 sps:$4 sm:$0xff]  }
  0xa1   : > { %2635 = vmatpush1.bf16.msra.mxu1 %v4343_v63  ;;  %2196 = vmatprep.subr.bf16.mxu0 %v4348_v0  ;;  %v4444_v62 = vld [vmem:[%s5266_s21 + $0x4] ss:$8 sps:$4 sm:$0xff]   ;;  %v4436_v0 = vld [vmem:[%s5986_s1 + $0x480] ss:$8 sps:$4 sm:$0xff]  }
  0xa2   : > { %2636 = vmatprep.subr.bf16.mxu1 %v4351_v1  ;;  %1368 = vmatprep.mubr.bf16.mxu0 %v4352_v2  ;;  %v4447_v63 = vld [vmem:[%s5277_s27 + $0x4] ss:$8 sps:$4 sm:$0xff]   ;;  %v4439_v1 = vld [vmem:[%s5986_s1 + $0x580] ss:$8 sps:$4 sm:$0xff]   ;;  %v4450_v2 = vld [vmem:[%s5986_s1 + $0x674] ss:$8 sps:$4 sm:$0xff]  }
  0xa3   : > { %1808 = vmatprep.mubr.bf16.mxu1 %v4354_v3  ;;  %v4442_v3 = vld [vmem:[%s5266_s21] ss:$8 sps:$4 sm:$0xff]  }
  0xa4   : > { %2197 = vmatpush1.bf16.msra.mxu0 %v4346_v4  ;;  %v4445_v4 = vld [vmem:[%s5277_s27] ss:$8 sps:$4 sm:$0xff]  }
  0xa5   : > { %2637 = vmatpush1.bf16.msra.mxu1 %v4349_v5  ;;  %2198 = vmatprep.subr.bf16.mxu0 %v4360_v6  ;;  %v4448_v5 = vld [vmem:[%s5986_s1 + $0x670] ss:$8 sps:$4 sm:$0xff]   ;;  %v4453_v6 = vld [vmem:[%s5986_s1 + $0x664] ss:$8 sps:$4 sm:$0xff]  }
  0xa6   : > { %2638 = vmatprep.subr.bf16.mxu1 %v4363_v7  ;;  %v4454_v7 = vld [vmem:[%s5266_s21 + $0x14] ss:$8 sps:$4 sm:$0xff]  }
  0xa7   : > { %1369 = vmatmul.mubr.bf16.gmra.mxu0 %v4356_v8  ;;  %v4456_v8 = vld [vmem:[%s5277_s27 + $0x14] ss:$8 sps:$4 sm:$0xff]  }
  0xa8   : > { %1809 = vmatmul.mubr.bf16.gmra.mxu1 %v4357_v9  ;;  %2199 = vmatpush1.bf16.msra.mxu0 %v4358_v10  ;;  %v4451_v9 = vld [vmem:[%s5986_s1 + $0x660] ss:$8 sps:$4 sm:$0xff]   ;;  %v4462_v10 = vld [vmem:[%s5986_s1 + $0x654] ss:$8 sps:$4 sm:$0xff]  }
  0xa9   : > { %2639 = vmatpush1.bf16.msra.mxu1 %v4361_v11  ;;  %2200 = vmatprep.subr.bf16.mxu0 %v4366_v12  ;;  %v4458_v11 = vld [vmem:[%s5266_s21 + $0x10] ss:$8 sps:$4 sm:$0xff]  }
  0xaa   : > { %2640 = vmatprep.subr.bf16.mxu1 %v4369_v13  ;;  %1378 = vmatprep.mubr.bf16.mxu0 %v4370_v14  ;;  %v4459_v12 = vld [vmem:[%s5277_s27 + $0x10] ss:$8 sps:$4 sm:$0xff]   ;;  %v4465_v14 = vld [vmem:[%s5986_s1 + $0x644] ss:$8 sps:$4 sm:$0xff]  }
  0xab   : > { %1818 = vmatprep.mubr.bf16.mxu1 %v4372_v15  ;;  %v4460_v13 = vld [vmem:[%s5986_s1 + $0x650] ss:$8 sps:$4 sm:$0xff]   ;;  %v4466_v15 = vld [vmem:[%s5266_s21 + $0x24] ss:$8 sps:$4 sm:$0xff]  }
  0xac   : > { %2201 = vmatpush1.bf16.msra.mxu0 %v4364_v16  ;;  %v4468_v16 = vld [vmem:[%s5277_s27 + $0x24] ss:$8 sps:$4 sm:$0xff]  }
  0xad   : > { %2641 = vmatpush1.bf16.msra.mxu1 %v4367_v17  ;;  %2202 = vmatprep.subr.bf16.mxu0 %v4378_v18  ;;  %v4463_v17 = vld [vmem:[%s5986_s1 + $0x640] ss:$8 sps:$4 sm:$0xff]   ;;  %v4474_v18 = vld [vmem:[%s5986_s1 + $0x634] ss:$8 sps:$4 sm:$0xff]  }
  0xae   : > { %2642 = vmatprep.subr.bf16.mxu1 %v4381_v19  ;;  %v4470_v19 = vld [vmem:[%s5266_s21 + $0x20] ss:$8 sps:$4 sm:$0xff]  }
  0xaf   : > { %1379 = vmatmul.mubr.bf16.gmra.mxu0 %v4374_v20  ;;  %v4471_v20 = vld [vmem:[%s5277_s27 + $0x20] ss:$8 sps:$4 sm:$0xff]  }
  0xb0   : > { %1819 = vmatmul.mubr.bf16.gmra.mxu1 %v4375_v21  ;;  %2203 = vmatpush2.bf16.msra.mxu0 %v4376_v22  ;;  %v4472_v21 = vld [vmem:[%s5986_s1 + $0x630] ss:$8 sps:$4 sm:$0xff]   ;;  %v4477_v22 = vld [vmem:[%s5986_s1 + $0x624] ss:$8 sps:$4 sm:$0xff]  }
  0xb1   : > { %2643 = vmatpush2.bf16.msra.mxu1 %v4379_v23  ;;  %2204 = vmatprep.subr.bf16.mxu0 %v4384_v24  ;;  %v4478_v23 = vld [vmem:[%s5266_s21 + $0x34] ss:$8 sps:$4 sm:$0xff]  }
  0xb2   : > { %2644 = vmatprep.subr.bf16.mxu1 %v4387_v25  ;;  %1388 = vmatprep.mubr.bf16.mxu0 %v4388_v26  ;;  %v4480_v24 = vld [vmem:[%s5277_s27 + $0x34] ss:$8 sps:$4 sm:$0xff]   ;;  %v4475_v25 = vld [vmem:[%s5986_s1 + $0x620] ss:$8 sps:$4 sm:$0xff]  }
  0xb3   : > { %1828 = vmatprep.mubr.bf16.mxu1 %v4390_v27  ;;  %v4486_v26 = vld [vmem:[%s5986_s1 + $0x614] ss:$8 sps:$4 sm:$0xff]   ;;  %v4482_v27 = vld [vmem:[%s5266_s21 + $0x30] ss:$8 sps:$4 sm:$0xff]  }
  0xb4   : > { %2205 = vmatpush2.bf16.msra.mxu0 %v4382_v28  ;;  %v4483_v28 = vld [vmem:[%s5277_s27 + $0x30] ss:$8 sps:$4 sm:$0xff]  }
  0xb5   : > { %2645 = vmatpush2.bf16.msra.mxu1 %v4385_v29  ;;  %2206 = vmatprep.subr.bf16.mxu0 %v4396_v30  ;;  %v4484_v29 = vld [vmem:[%s5986_s1 + $0x610] ss:$8 sps:$4 sm:$0xff]   ;;  %v4489_v30 = vld [vmem:[%s5986_s1 + $0x604] ss:$8 sps:$4 sm:$0xff]  }
  0xb6   : > { %2646 = vmatprep.subr.bf16.mxu1 %v4399_v31  ;;  %v4490_v31 = vld [vmem:[%s5266_s21 + $0x44] ss:$8 sps:$4 sm:$0xff]  }
  0xb7   : > { %1389 = vmatmul.mubr.bf16.gmra.mxu0 %v4392_v32  ;;  %v4492_v32 = vld [vmem:[%s5277_s27 + $0x44] ss:$8 sps:$4 sm:$0xff]  }
  0xb8   : > { %1829 = vmatmul.mubr.bf16.gmra.mxu1 %v4393_v33  ;;  %2207 = vmatpush2.bf16.msra.mxu0 %v4394_v34  ;;  %v4487_v33 = vld [vmem:[%s5986_s1 + $0x600] ss:$8 sps:$4 sm:$0xff]   ;;  %v4498_v34 = vld [vmem:[%s5986_s1 + $0x6f4] ss:$8 sps:$4 sm:$0xff]  }
  0xb9   : > { %2647 = vmatpush2.bf16.msra.mxu1 %v4397_v35  ;;  %2208 = vmatprep.subr.bf16.mxu0 %v4402_v36  ;;  %v4494_v35 = vld [vmem:[%s5266_s21 + $0x40] ss:$8 sps:$4 sm:$0xff]  }
  0xba   : > { %2648 = vmatprep.subr.bf16.mxu1 %v4405_v37  ;;  %1398 = vmatprep.mubr.bf16.mxu0 %v4406_v38  ;;  %v4495_v36 = vld [vmem:[%s5277_s27 + $0x40] ss:$8 sps:$4 sm:$0xff]   ;;  %v4496_v37 = vld [vmem:[%s5986_s1 + $0x6f0] ss:$8 sps:$4 sm:$0xff]   ;;  %v4501_v38 = vld [vmem:[%s5986_s1 + $0x6e4] ss:$8 sps:$4 sm:$0xff]  }
  0xbb   : > { %1838 = vmatprep.mubr.bf16.mxu1 %v4408_v39  ;;  %v4502_v39 = vld [vmem:[%s5266_s21 + $0x54] ss:$8 sps:$4 sm:$0xff]  }
  0xbc   : > { %2209 = vmatpush2.bf16.msra.mxu0 %v4400_v40  ;;  %v4504_v40 = vld [vmem:[%s5277_s27 + $0x54] ss:$8 sps:$4 sm:$0xff]  }
  0xbd   : > { %2649 = vmatpush2.bf16.msra.mxu1 %v4403_v41  ;;  %2210 = vmatprep.subr.bf16.mxu0 %v4414_v42  ;;  %v4499_v41 = vld [vmem:[%s5986_s1 + $0x6e0] ss:$8 sps:$4 sm:$0xff]   ;;  %v4510_v42 = vld [vmem:[%s5986_s1 + $0x6d4] ss:$8 sps:$4 sm:$0xff]  }
  0xbe   : > { %2650 = vmatprep.subr.bf16.mxu1 %v4417_v43  ;;  %v4506_v43 = vld [vmem:[%s5266_s21 + $0x50] ss:$8 sps:$4 sm:$0xff]  }
  0xbf   : > { %1399 = vmatmul.mubr.bf16.gmra.mxu0 %v4410_v44  ;;  %v4507_v44 = vld [vmem:[%s5277_s27 + $0x50] ss:$8 sps:$4 sm:$0xff]  }
  0xc0   : > { %1839 = vmatmul.mubr.bf16.gmra.mxu1 %v4411_v45  ;;  %2211 = vmatpush2.bf16.msra.mxu0 %v4412_v46  ;;  %v4508_v45 = vld [vmem:[%s5986_s1 + $0x6d0] ss:$8 sps:$4 sm:$0xff]   ;;  %v4513_v46 = vld [vmem:[%s5986_s1 + $0x6c4] ss:$8 sps:$4 sm:$0xff]  }
  0xc1   : > { %2651 = vmatpush2.bf16.msra.mxu1 %v4415_v47  ;;  %2212 = vmatprep.subr.bf16.mxu0 %v4420_v48  ;;  %v4514_v47 = vld [vmem:[%s5266_s21 + $0x64] ss:$8 sps:$4 sm:$0xff]  }
  0xc2   : > { %2652 = vmatprep.subr.bf16.mxu1 %v4423_v49  ;;  %1408 = vmatprep.mubr.bf16.mxu0 %v4424_v50  ;;  %v4516_v48 = vld [vmem:[%s5277_s27 + $0x64] ss:$8 sps:$4 sm:$0xff]   ;;  %v4511_v49 = vld [vmem:[%s5986_s1 + $0x6c0] ss:$8 sps:$4 sm:$0xff]   ;;  %v4522_v50 = vld [vmem:[%s5986_s1 + $0x6b4] ss:$8 sps:$4 sm:$0xff]  }
  0xc3   : > { %1848 = vmatprep.mubr.bf16.mxu1 %v4426_v51  ;;  %v4518_v51 = vld [vmem:[%s5266_s21 + $0x60] ss:$8 sps:$4 sm:$0xff]  }
  0xc4   : > { %2213 = vmatpush2.bf16.msra.mxu0 %v4418_v52  ;;  %v4519_v52 = vld [vmem:[%s5277_s27 + $0x60] ss:$8 sps:$4 sm:$0xff]  }
  0xc5   : > { %2653 = vmatpush2.bf16.msra.mxu1 %v4421_v53  ;;  %2214 = vmatprep.subr.bf16.mxu0 %v4432_v54  ;;  %v4520_v53 = vld [vmem:[%s5986_s1 + $0x6b0] ss:$8 sps:$4 sm:$0xff]   ;;  %v4525_v54 = vld [vmem:[%s5986_s1 + $0x6a4] ss:$8 sps:$4 sm:$0xff]  }
  0xc6   : > { %2654 = vmatprep.subr.bf16.mxu1 %v4435_v55  ;;  %v4526_v55 = vld [vmem:[%s5266_s21 + $0x74] ss:$8 sps:$4 sm:$0xff]  }
  0xc7   : > { %1409 = vmatmul.mubr.bf16.gmra.mxu0 %v4428_v56  ;;  %v4528_v56 = vld [vmem:[%s5277_s27 + $0x74] ss:$8 sps:$4 sm:$0xff]  }
  0xc8   : > { %1849 = vmatmul.mubr.bf16.gmra.mxu1 %v4429_v57  ;;  %2215 = vmatpush2.bf16.msra.mxu0 %v4430_v58  ;;  %v4523_v57 = vld [vmem:[%s5986_s1 + $0x6a0] ss:$8 sps:$4 sm:$0xff]   ;;  %v4534_v58 = vld [vmem:[%s5986_s1 + $0x694] ss:$8 sps:$4 sm:$0xff]  }
  0xc9   : > { %2655 = vmatpush2.bf16.msra.mxu1 %v4433_v59  ;;  %2216 = vmatprep.subr.bf16.mxu0 %v4438_v60  ;;  %v4530_v59 = vld [vmem:[%s5266_s21 + $0x70] ss:$8 sps:$4 sm:$0xff]  }
  0xca   : > { %2656 = vmatprep.subr.bf16.mxu1 %v4441_v61  ;;  %2218 = vmatprep.mubr.bf16.mxu0 %v4444_v62  ;;  %v4531_v60 = vld [vmem:[%s5277_s27 + $0x70] ss:$8 sps:$4 sm:$0xff]   ;;  %v4537_v62 = vld [vmem:[%s5986_s1 + $0x684] ss:$8 sps:$4 sm:$0xff]  }
  0xcb   : > { %2658 = vmatprep.mubr.bf16.mxu1 %v4447_v63  ;;  %v4532_v61 = vld [vmem:[%s5986_s1 + $0x690] ss:$8 sps:$4 sm:$0xff]   ;;  %v4540_v63 = vld [vmem:[%s5385_s24 + $0x4] ss:$8 sps:$4 sm:$0xff]  }
  0xcc   : > { %2217 = vmatpush2.bf16.msra.mxu0 %v4436_v0  ;;  %v4543_v0 = vld [vmem:[%s5385_s24 + $0x44] ss:$8 sps:$4 sm:$0xff]  }
  0xcd   : > { %2657 = vmatpush2.bf16.msra.mxu1 %v4439_v1  ;;  %3066 = vmatprep.subr.bf16.mxu0 %v4450_v2  ;;  %v4535_v1 = vld [vmem:[%s5986_s1 + $0x680] ss:$8 sps:$4 sm:$0xff]  }
  0xce   : > { %3985 = vmatprep.subr.bf16.mxu1 %v4450_v2  ;;  %v4538_v2 = vld [vmem:[%s5385_s24] ss:$8 sps:$4 sm:$0xff]  }
  0xcf   : > { %2219 = vmatmul.mubr.bf16.vlgmr.msra.gmra.mxu0 %v4442_v3  ;;  %v4541_v3 = vld [vmem:[%s5385_s24 + $0x40] ss:$8 sps:$4 sm:$0xff]  }
  0xd0   : > { %2659 = vmatmul.mubr.bf16.vlgmr.msra.gmra.mxu1 %v4445_v4  ;;  %3067 = vmatpush1.bf16.msra.mxu0 %v4448_v5  ;;  %v4544_v4 = vld [vmem:[%s5385_s24 + $0x14] ss:$8 sps:$4 sm:$0xff]  }
  0xd1   : > { %4001 = vmatpush1.bf16.msra.mxu1 %v4448_v5  ;;  %3068 = vmatprep.subr.bf16.mxu0 %v4453_v6  ;;  %v4546_v5 = vld [vmem:[%s5385_s24 + $0x54] ss:$8 sps:$4 sm:$0xff]  }
  0xd2   : > { %3986 = vmatprep.subr.bf16.mxu1 %v4453_v6  ;;  %2228 = vmatprep.mubr.bf16.mxu0 %v4454_v7 }
  0xd3   : > { %2668 = vmatprep.mubr.bf16.mxu1 %v4456_v8 }
  0xd4   : > { %3069 = vmatpush1.bf16.msra.mxu0 %v4451_v9 }
  0xd5   : > { %4002 = vmatpush1.bf16.msra.mxu1 %v4451_v9  ;;  %3070 = vmatprep.subr.bf16.mxu0 %v4462_v10 }
  0xd6   : > { %3987 = vmatprep.subr.bf16.mxu1 %v4462_v10 }
  0xd7   : > { %2229 = vmatmul.mubr.bf16.gmra.mxu0 %v4458_v11 }
  0xd8   : > { %2669 = vmatmul.mubr.bf16.gmra.mxu1 %v4459_v12  ;;  %3071 = vmatpush1.bf16.msra.mxu0 %v4460_v13 }
  0xd9   : > { %4003 = vmatpush1.bf16.msra.mxu1 %v4460_v13  ;;  %3072 = vmatprep.subr.bf16.mxu0 %v4465_v14 }
  0xda   : > { %3988 = vmatprep.subr.bf16.mxu1 %v4465_v14  ;;  %2238 = vmatprep.mubr.bf16.mxu0 %v4466_v15  ;;  %v4548_v14 = vld [vmem:[%s5385_s24 + $0x10] ss:$8 sps:$4 sm:$0xff]  }
  0xdb   : > { %2678 = vmatprep.mubr.bf16.mxu1 %v4468_v16  ;;  %v4549_v15 = vld [vmem:[%s5385_s24 + $0x50] ss:$8 sps:$4 sm:$0xff]  }
  0xdc   : > { %3073 = vmatpush1.bf16.msra.mxu0 %v4463_v17 }
  0xdd   : > { %4004 = vmatpush1.bf16.msra.mxu1 %v4463_v17  ;;  %3074 = vmatprep.subr.bf16.mxu0 %v4474_v18  ;;  %v4550_v17 = vld [vmem:[%s5385_s24 + $0x24] ss:$8 sps:$4 sm:$0xff]  }
  0xde   : > { %3989 = vmatprep.subr.bf16.mxu1 %v4474_v18  ;;  %v4552_v18 = vld [vmem:[%s5385_s24 + $0x64] ss:$8 sps:$4 sm:$0xff]  }
  0xdf   : > { %2239 = vmatmul.mubr.bf16.gmra.mxu0 %v4470_v19 }
  0xe0   : > { %2679 = vmatmul.mubr.bf16.gmra.mxu1 %v4471_v20  ;;  %3075 = vmatpush1.bf16.msra.mxu0 %v4472_v21 }
  0xe1   : > { %4005 = vmatpush1.bf16.msra.mxu1 %v4472_v21  ;;  %3076 = vmatprep.subr.bf16.mxu0 %v4477_v22 }
  0xe2   : > { %3990 = vmatprep.subr.bf16.mxu1 %v4477_v22  ;;  %2248 = vmatprep.mubr.bf16.mxu0 %v4478_v23 }
  0xe3   : > { %2688 = vmatprep.mubr.bf16.mxu1 %v4480_v24 }
  0xe4   : > { %3077 = vmatpush1.bf16.msra.mxu0 %v4475_v25 }
  0xe5   : > { %4006 = vmatpush1.bf16.msra.mxu1 %v4475_v25  ;;  %3078 = vmatprep.subr.bf16.mxu0 %v4486_v26 }
  0xe6   : > { %3991 = vmatprep.subr.bf16.mxu1 %v4486_v26 }
  0xe7   : > { %2249 = vmatmul.mubr.bf16.gmra.mxu0 %v4482_v27 }
  0xe8   : > { %2689 = vmatmul.mubr.bf16.gmra.mxu1 %v4483_v28  ;;  %3079 = vmatpush1.bf16.msra.mxu0 %v4484_v29 }
  0xe9   : > { %4007 = vmatpush1.bf16.msra.mxu1 %v4484_v29  ;;  %3080 = vmatprep.subr.bf16.mxu0 %v4489_v30 }
  0xea   : > { %3992 = vmatprep.subr.bf16.mxu1 %v4489_v30  ;;  %2258 = vmatprep.mubr.bf16.mxu0 %v4490_v31  ;;  %v4554_v30 = vld [vmem:[%s5385_s24 + $0x20] ss:$8 sps:$4 sm:$0xff]  }
  0xeb   : > { %2698 = vmatprep.mubr.bf16.mxu1 %v4492_v32  ;;  %v4555_v31 = vld [vmem:[%s5385_s24 + $0x60] ss:$8 sps:$4 sm:$0xff]  }
  0xec   : > { %3081 = vmatpush1.bf16.msra.mxu0 %v4487_v33 }
  0xed   : > { %4008 = vmatpush1.bf16.msra.mxu1 %v4487_v33  ;;  %3082 = vmatprep.subr.bf16.mxu0 %v4498_v34  ;;  %v4556_v33 = vld [vmem:[%s5385_s24 + $0x34] ss:$8 sps:$4 sm:$0xff]  }
  0xee   : > { %3993 = vmatprep.subr.bf16.mxu1 %v4498_v34  ;;  %v4558_v34 = vld [vmem:[%s5385_s24 + $0x74] ss:$8 sps:$4 sm:$0xff]  }
  0xef   : > { %2259 = vmatmul.mubr.bf16.gmra.mxu0 %v4494_v35 }
  0xf0   : > { %2699 = vmatmul.mubr.bf16.gmra.mxu1 %v4495_v36  ;;  %3083 = vmatpush2.bf16.msra.mxu0 %v4496_v37 }
  0xf1   : > { %4009 = vmatpush2.bf16.msra.mxu1 %v4496_v37  ;;  %3084 = vmatprep.subr.bf16.mxu0 %v4501_v38 }
  0xf2   : > { %3994 = vmatprep.subr.bf16.mxu1 %v4501_v38  ;;  %2268 = vmatprep.mubr.bf16.mxu0 %v4502_v39 }
  0xf3   : > { %2708 = vmatprep.mubr.bf16.mxu1 %v4504_v40 }
  0xf4   : > { %3085 = vmatpush2.bf16.msra.mxu0 %v4499_v41 }
  0xf5   : > { %4010 = vmatpush2.bf16.msra.mxu1 %v4499_v41  ;;  %3086 = vmatprep.subr.bf16.mxu0 %v4510_v42 }
  0xf6   : > { %3995 = vmatprep.subr.bf16.mxu1 %v4510_v42 }
  0xf7   : > { %2269 = vmatmul.mubr.bf16.gmra.mxu0 %v4506_v43 }
  0xf8   : > { %2709 = vmatmul.mubr.bf16.gmra.mxu1 %v4507_v44  ;;  %3087 = vmatpush2.bf16.msra.mxu0 %v4508_v45 }
  0xf9   : > { %4011 = vmatpush2.bf16.msra.mxu1 %v4508_v45  ;;  %3088 = vmatprep.subr.bf16.mxu0 %v4513_v46 }
  0xfa   : > { %3996 = vmatprep.subr.bf16.mxu1 %v4513_v46  ;;  %2278 = vmatprep.mubr.bf16.mxu0 %v4514_v47  ;;  %v4560_v46 = vld [vmem:[%s5385_s24 + $0x30] ss:$8 sps:$4 sm:$0xff]  }
  0xfb   : > { %2718 = vmatprep.mubr.bf16.mxu1 %v4516_v48  ;;  %v4561_v47 = vld [vmem:[%s5385_s24 + $0x70] ss:$8 sps:$4 sm:$0xff]   ;;  %s3429_s24 = sshll.u32 %s4584_s12, 4 }
  0xfc   : > { %3089 = vmatpush2.bf16.msra.mxu0 %v4511_v49  ;;  %p188_p6 = scmp.lt.s32.totalorder %s3429_s24, 31 }
  0xfd   : > { %4012 = vmatpush2.bf16.msra.mxu1 %v4511_v49  ;;  %3090 = vmatprep.subr.bf16.mxu0 %v4522_v50 }
  0xfe   : > { %3997 = vmatprep.subr.bf16.mxu1 %v4522_v50  ;;  %s6074_s24 = smov (!%p188_p6, %s3429_s24), 31 }
  0xff   : > { %2279 = vmatmul.mubr.bf16.gmra.mxu0 %v4518_v51  ;;  %s3430_s5 = sshll.u32 %s6074_s24, 1 }
 0x100   : > { %2719 = vmatmul.mubr.bf16.gmra.mxu1 %v4519_v52  ;;  %3091 = vmatpush2.bf16.msra.mxu0 %v4520_v53  ;;  %s5797_s13 = sadd.s32 %s3431_s6, %s3430_s5 }
 0x101   : > { %4013 = vmatpush2.bf16.msra.mxu1 %v4520_v53  ;;  %3092 = vmatprep.subr.bf16.mxu0 %v4525_v54  ;;  %s3432_s20 = sshll.u32 %s5797_s13, 3 }
 0x102   : > { %3998 = vmatprep.subr.bf16.mxu1 %v4525_v54  ;;  %2288 = vmatprep.mubr.bf16.mxu0 %v4526_v55  ;;  %s5853_s25 = scalar_lea.vmem %s5988_s3, %s3432_s20 }
 0x103   : > { %2728 = vmatprep.mubr.bf16.mxu1 %v4528_v56 }
 0x104   : > { %3093 = vmatpush2.bf16.msra.mxu0 %v4523_v57 }
 0x105   : > { %4014 = vmatpush2.bf16.msra.mxu1 %v4523_v57  ;;  %3094 = vmatprep.subr.bf16.mxu0 %v4534_v58 }
 0x106   : > { %3999 = vmatprep.subr.bf16.mxu1 %v4534_v58 }
 0x107   : > { %2289 = vmatmul.mubr.bf16.gmra.mxu0 %v4530_v59 }
 0x108   : > { %2729 = vmatmul.mubr.bf16.gmra.mxu1 %v4531_v60  ;;  %3095 = vmatpush2.bf16.msra.mxu0 %v4532_v61 }
 0x109   : > { %4015 = vmatpush2.bf16.msra.mxu1 %v4532_v61  ;;  %3096 = vmatprep.subr.bf16.mxu0 %v4537_v62 }
 0x10a   : > { %4000 = vmatprep.subr.bf16.mxu1 %v4537_v62  ;;  %3098 = vmatprep.mubr.bf16.mxu0 %v4540_v63 }
 0x10b   : > { %3138 = vmatprep.mubr.bf16.mxu1 %v4543_v0 }
 0x10c   : > { %3097 = vmatpush2.bf16.msra.mxu0 %v4535_v1 }
 0x10d   : > { %4016 = vmatpush2.bf16.msra.mxu1 %v4535_v1 }
 0x10f   : > { %v579_v6 = vpop.f32.mrf.mxu0  ;;  %3099 = vmatmul.mubr.bf16.vlgmr.msra.gmra.mxu0 %v4538_v2 }
 0x110   : > { %v932_v7 = vpop.f32.mrf.mxu1  ;;  %3139 = vmatmul.mubr.bf16.vlgmr.msra.gmra.mxu1 %v4541_v3  ;;  %3108 = vmatprep.mubr.bf16.mxu0 %v4544_v4 }
 0x111   : > { %v5471_v8 = vadd.f32 %v932_v7, %v579_v6  ;;  %3148 = vmatprep.mubr.bf16.mxu1 %v4546_v5  ;;  %v581_v9 = vpop.f32.mrf.mxu0 }
 0x112   : > { %v934_v10 = vpop.f32.mrf.mxu1 }
 0x113   : > { %v5473_v11 = vadd.f32 %v934_v10, %v581_v9  ;;  %v583_v12 = vpop.f32.mrf.mxu0 }
 0x114   : > { %v936_v13 = vpop.f32.mrf.mxu1 }
 0x115   : > { %v5477_v16 = vadd.f32 %v936_v13, %v583_v12  ;;  %v585_v19 = vpop.f32.mrf.mxu0 }
 0x116   : > { %v938_v20 = vpop.f32.mrf.mxu1 }
 0x117   : > { %v5481_v21 = vadd.f32 %v938_v20, %v585_v19  ;;  %v589_v22 = vpop.f32.mrf.mxu0  ;;  %3109 = vmatmul.mubr.bf16.gmra.mxu0 %v4548_v14 }
 0x118   : > { %v942_v23 = vpop.f32.mrf.mxu1  ;;  %3149 = vmatmul.mubr.bf16.gmra.mxu1 %v4549_v15  ;;  %3118 = vmatprep.mubr.bf16.mxu0 %v4550_v17 }
 0x119   : > { %v5483_v24 = vadd.f32 %v942_v23, %v589_v22  ;;  %3158 = vmatprep.mubr.bf16.mxu1 %v4552_v18  ;;  %v591_v25 = vpop.f32.mrf.mxu0 }
 0x11a   : > { %v944_v26 = vpop.f32.mrf.mxu1 }
 0x11b   : > { %v5485_v27 = vadd.f32 %v944_v26, %v591_v25  ;;  %v593_v28 = vpop.f32.mrf.mxu0 }
 0x11c   : > { %v946_v29 = vpop.f32.mrf.mxu1 }
 0x11d   : > { %v5489_v32 = vadd.f32 %v946_v29, %v593_v28  ;;  %v595_v35 = vpop.f32.mrf.mxu0 }
 0x11e   : > { %v948_v36 = vpop.f32.mrf.mxu1 }
 0x11f   : > { %v5493_v37 = vadd.f32 %v948_v36, %v595_v35  ;;  %v599_v38 = vpop.f32.mrf.mxu0  ;;  %3119 = vmatmul.mubr.bf16.gmra.mxu0 %v4554_v30 }
 0x120   : > { %v952_v39 = vpop.f32.mrf.mxu1  ;;  %3159 = vmatmul.mubr.bf16.gmra.mxu1 %v4555_v31  ;;  %3128 = vmatprep.mubr.bf16.mxu0 %v4556_v33 }
 0x121   : > { %v5495_v40 = vadd.f32 %v952_v39, %v599_v38  ;;  %3168 = vmatprep.mubr.bf16.mxu1 %v4558_v34  ;;  %v601_v41 = vpop.f32.mrf.mxu0 }
 0x122   : > { %v954_v42 = vpop.f32.mrf.mxu1 }
 0x123   : > { %v5497_v43 = vadd.f32 %v954_v42, %v601_v41  ;;  %v603_v44 = vpop.f32.mrf.mxu0 }
 0x124   : > { %v956_v45 = vpop.f32.mrf.mxu1 }
 0x125   : > { %v5501_v48 = vadd.f32 %v956_v45, %v603_v44  ;;  %v605_v49 = vpop.f32.mrf.mxu0 }
 0x126   : > { %v958_v50 = vpop.f32.mrf.mxu1 }
 0x127   : > { %v5503_v51 = vadd.f32 %v958_v50, %v605_v49  ;;  %v609_v52 = vpop.f32.mrf.mxu0  ;;  %3129 = vmatmul.mubr.bf16.gmra.mxu0 %v4560_v46 }
 0x128   : > { %v962_v53 = vpop.f32.mrf.mxu1  ;;  %3169 = vmatmul.mubr.bf16.gmra.mxu1 %v4561_v47 }
 0x129   : > { %v5505_v54 = vadd.f32 %v962_v53, %v609_v52  ;;  %v611_v55 = vpop.f32.mrf.mxu0 }
 0x12a   : > { %v964_v56 = vpop.f32.mrf.mxu1 }
 0x12b   : > { %v5507_v57 = vadd.f32 %v964_v56, %v611_v55  ;;  %v613_v58 = vpop.f32.mrf.mxu0 }
 0x12c   : > { %v966_v59 = vpop.f32.mrf.mxu1 }
 0x12d   : > { %v5509_v60 = vadd.f32 %v966_v59, %v613_v58  ;;  %v615_v61 = vpop.f32.mrf.mxu0 }
 0x12e   : > { %v968_v62 = vpop.f32.mrf.mxu1 }
 0x12f   : > { %v5511_v63 = vadd.f32 %v968_v62, %v615_v61  ;;  %v619_v0 = vpop.f32.mrf.mxu0 }
 0x130   : > { %v972_v1 = vpop.f32.mrf.mxu1 }
 0x131   : > { %v5513_v2 = vadd.f32 %v972_v1, %v619_v0  ;;  %v621_v3 = vpop.f32.mrf.mxu0 }
 0x132   : > { %v974_v4 = vpop.f32.mrf.mxu1 }
 0x133   : > { %v5515_v5 = vadd.f32 %v974_v4, %v621_v3  ;;  %v623_v6 = vpop.f32.mrf.mxu0 }
 0x134   : > { %v976_v7 = vpop.f32.mrf.mxu1 }
 0x135   : > { %v5517_v9 = vadd.f32 %v976_v7, %v623_v6  ;;  %v625_v10 = vpop.f32.mrf.mxu0 }
 0x136   : > { %v978_v12 = vpop.f32.mrf.mxu1 }
 0x137   : > { %v5519_v13 = vadd.f32 %v978_v12, %v625_v10  ;;  %v629_v14 = vpop.f32.mrf.mxu0 }
 0x138   : > { %v982_v15 = vpop.f32.mrf.mxu1 }
 0x139   : > { %v5521_v17 = vadd.f32 %v982_v15, %v629_v14  ;;  %v631_v18 = vpop.f32.mrf.mxu0 }
 0x13a   : > { %v984_v19 = vpop.f32.mrf.mxu1 }
 0x13b   : > { %v5523_v20 = vadd.f32 %v984_v19, %v631_v18  ;;  %v633_v22 = vpop.f32.mrf.mxu0 }
 0x13c   : > { %v986_v23 = vpop.f32.mrf.mxu1 }
 0x13d   : > { %v5525_v25 = vadd.f32 %v986_v23, %v633_v22  ;;  %v635_v26 = vpop.f32.mrf.mxu0 }
 0x13e   : > { %v988_v28 = vpop.f32.mrf.mxu1 }
 0x13f   : > { %v5527_v29 = vadd.f32 %v988_v28, %v635_v26  ;;  %v639_v30 = vpop.f32.mrf.mxu0 }
 0x140   : > { %v992_v31 = vpop.f32.mrf.mxu1 }
 0x141   : > { %v5529_v33 = vadd.f32 %v992_v31, %v639_v30  ;;  %v641_v34 = vpop.f32.mrf.mxu0 }
 0x142   : > { %v994_v35 = vpop.f32.mrf.mxu1 }
 0x143   : > { %v5531_v36 = vadd.f32 %v994_v35, %v641_v34  ;;  %v643_v38 = vpop.f32.mrf.mxu0 }
 0x144   : > { %v996_v39 = vpop.f32.mrf.mxu1 }
 0x145   : > { %v5533_v41 = vadd.f32 %v996_v39, %v643_v38  ;;  %v645_v42 = vpop.f32.mrf.mxu0 }
 0x146   : > { %v998_v44 = vpop.f32.mrf.mxu1 }
 0x147   : > { %v5535_v45 = vadd.f32 %v998_v44, %v645_v42  ;;  %v649_v46 = vpop.f32.mrf.mxu0 }
 0x148   : > { %v1002_v47 = vpop.f32.mrf.mxu1 }
 0x149   : > { %v5537_v49 = vadd.f32 %v1002_v47, %v649_v46  ;;  %v651_v50 = vpop.f32.mrf.mxu0 }
 0x14a   : > { %v1004_v52 = vpop.f32.mrf.mxu1 }
 0x14b   : > { %v5539_v53 = vadd.f32 %v1004_v52, %v651_v50  ;;  %v653_v55 = vpop.f32.mrf.mxu0 }
 0x14c   : > { %v1006_v56 = vpop.f32.mrf.mxu1 }
 0x14d   : > { %v5541_v58 = vadd.f32 %v1006_v56, %v653_v55  ;;  %v655_v59 = vpop.f32.mrf.mxu0 }
 0x14e   : > { %v1008_v61 = vpop.f32.mrf.mxu1 }
 0x14f   : > { %v5543_v62 = vadd.f32 %v1008_v61, %v655_v59  ;;  %v1340_v0 = vpop.f32.mrf.mxu0 }
 0x150   : > { %v1780_v1 = vpop.f32.mrf.mxu1  ;;  %v1419_v3 = vadd.f32 %v1340_v0, %v5471_v8 }
 0x151   : > { %v1342_v4 = vpop.f32.mrf.mxu0 }
 0x152   : > { %v1782_v6 = vpop.f32.mrf.mxu1  ;;  %v5546_v7 = vadd.f32 %v1780_v1, %v1419_v3  ;;  %v1420_v10 = vadd.f32 %v1342_v4, %v5473_v11 }
 0x153   : > { %v1344_v12 = vpop.f32.mrf.mxu0 }
 0x154   : > { %v1784_v14 = vpop.f32.mrf.mxu1  ;;  %v5549_v15 = vadd.f32 %v1782_v6, %v1420_v10  ;;  %v1421_v18 = vadd.f32 %v1344_v12, %v5477_v16 }
 0x155   : > { %v1346_v19 = vpop.f32.mrf.mxu0 }
 0x156   : > { %v1786_v22 = vpop.f32.mrf.mxu1  ;;  %v5552_v23 = vadd.f32 %v1784_v14, %v1421_v18  ;;  %v1422_v26 = vadd.f32 %v1346_v19, %v5481_v21 }
 0x157   : > { %v1350_v28 = vpop.f32.mrf.mxu0 }
 0x158   : > { %v1790_v8 = vpop.f32.mrf.mxu1  ;;  %v5555_v30 = vadd.f32 %v1786_v22, %v1422_v26  ;;  %v1423_v31 = vadd.f32 %v1350_v28, %v5483_v24 }
 0x159   : > { %v1352_v34 = vpop.f32.mrf.mxu0 }
 0x15a   : > { %v1792_v11 = vpop.f32.mrf.mxu1  ;;  %v5558_v35 = vadd.f32 %v1790_v8, %v1423_v31  ;;  %v1424_v38 = vadd.f32 %v1352_v34, %v5485_v27 }
 0x15b   : > { %v1354_v39 = vpop.f32.mrf.mxu0 }
 0x15c   : > { %v1794_v16 = vpop.f32.mrf.mxu1  ;;  %v5561_v42 = vadd.f32 %v1792_v11, %v1424_v38  ;;  %v1425_v44 = vadd.f32 %v1354_v39, %v5489_v32 }
 0x15d   : > { %v1356_v46 = vpop.f32.mrf.mxu0 }
 0x15e   : > { %v1796_v21 = vpop.f32.mrf.mxu1  ;;  %v5564_v47 = vadd.f32 %v1794_v16, %v1425_v44  ;;  %v1426_v50 = vadd.f32 %v1356_v46, %v5493_v37 }
 0x15f   : > { %v1360_v52 = vpop.f32.mrf.mxu0 }
 0x160   : > { %v1800_v24 = vpop.f32.mrf.mxu1  ;;  %v5567_v55 = vadd.f32 %v1796_v21, %v1426_v50  ;;  %v1427_v56 = vadd.f32 %v1360_v52, %v5495_v40 }
 0x161   : > { %v1362_v59 = vpop.f32.mrf.mxu0 }
 0x162   : > { %v1802_v27 = vpop.f32.mrf.mxu1  ;;  %v5570_v61 = vadd.f32 %v1800_v24, %v1427_v56  ;;  %v1428_v0 = vadd.f32 %v1362_v59, %v5497_v43 }
 0x163   : > { %v1364_v1 = vpop.f32.mrf.mxu0 }
 0x164   : > { %v1804_v32 = vpop.f32.mrf.mxu1  ;;  %v5573_v3 = vadd.f32 %v1802_v27, %v1428_v0  ;;  %v1429_v4 = vadd.f32 %v1364_v1, %v5501_v48 }
 0x165   : > { %v1366_v6 = vpop.f32.mrf.mxu0 }
 0x166   : > { %v1806_v37 = vpop.f32.mrf.mxu1  ;;  %v5576_v10 = vadd.f32 %v1804_v32, %v1429_v4  ;;  %v1430_v12 = vadd.f32 %v1366_v6, %v5503_v51 }
 0x167   : > { %v1370_v14 = vpop.f32.mrf.mxu0 }
 0x168   : > { %v1810_v40 = vpop.f32.mrf.mxu1  ;;  %v5579_v18 = vadd.f32 %v1806_v37, %v1430_v12  ;;  %v1431_v19 = vadd.f32 %v1370_v14, %v5505_v54 }
 0x169   : > { %v1372_v22 = vpop.f32.mrf.mxu0 }
 0x16a   : > { %v1812_v43 = vpop.f32.mrf.mxu1  ;;  %v5582_v26 = vadd.f32 %v1810_v40, %v1431_v19  ;;  %v1432_v28 = vadd.f32 %v1372_v22, %v5507_v57 }
 0x16b   : > { %v1374_v8 = vpop.f32.mrf.mxu0 }
 0x16c   : > { %v1814_v48 = vpop.f32.mrf.mxu1  ;;  %v5585_v31 = vadd.f32 %v1812_v43, %v1432_v28  ;;  %v1433_v34 = vadd.f32 %v1374_v8, %v5509_v60 }
 0x16d   : > { %v1376_v11 = vpop.f32.mrf.mxu0 }
 0x16e   : > { %v1816_v51 = vpop.f32.mrf.mxu1  ;;  %v5588_v38 = vadd.f32 %v1814_v48, %v1433_v34  ;;  %v1434_v39 = vadd.f32 %v1376_v11, %v5511_v63 }
 0x16f   : > { %v1380_v16 = vpop.f32.mrf.mxu0 }
 0x170   : > { %5989 = vst [vmem:[#allocation2_spill] sm:$0xff] %v5588_v38  ;;  %v1820_v54 = vpop.f32.mrf.mxu1  ;;  %v5591_v44 = vadd.f32 %v1816_v51, %v1434_v39  ;;  %v1435_v46 = vadd.f32 %v1380_v16, %v5513_v2 }
 0x171   : > { %v1382_v21 = vpop.f32.mrf.mxu0 }
 0x172   : > { %5990 = vst [vmem:[#allocation3_spill] sm:$0xff] %v5591_v44  ;;  %v1822_v57 = vpop.f32.mrf.mxu1  ;;  %v5594_v50 = vadd.f32 %v1820_v54, %v1435_v46  ;;  %v1436_v52 = vadd.f32 %v1382_v21, %v5515_v5 }
 0x173   : > { %v1384_v24 = vpop.f32.mrf.mxu0 }
 0x174   : > { %v1824_v60 = vpop.f32.mrf.mxu1  ;;  %v5597_v56 = vadd.f32 %v1822_v57, %v1436_v52  ;;  %v1437_v59 = vadd.f32 %v1384_v24, %v5517_v9 }
 0x175   : > { %v1386_v27 = vpop.f32.mrf.mxu0 }
 0x176   : > { %v1826_v63 = vpop.f32.mrf.mxu1  ;;  %v5600_v0 = vadd.f32 %v1824_v60, %v1437_v59  ;;  %v1438_v1 = vadd.f32 %v1386_v27, %v5519_v13 }
 0x177   : > { %v1390_v32 = vpop.f32.mrf.mxu0 }
 0x178   : > { %v1830_v2 = vpop.f32.mrf.mxu1  ;;  %v5603_v4 = vadd.f32 %v1826_v63, %v1438_v1  ;;  %v1439_v6 = vadd.f32 %v1390_v32, %v5521_v17 }
 0x179   : > { %v1392_v37 = vpop.f32.mrf.mxu0 }
 0x17a   : > { %v1832_v5 = vpop.f32.mrf.mxu1  ;;  %v5606_v12 = vadd.f32 %v1830_v2, %v1439_v6  ;;  %v1440_v14 = vadd.f32 %v1392_v37, %v5523_v20 }
 0x17b   : > { %v1394_v40 = vpop.f32.mrf.mxu0 }
 0x17c   : > { %5991 = vst [vmem:[#allocation4_spill] sm:$0xff] %v5606_v12  ;;  %v1834_v9 = vpop.f32.mrf.mxu1  ;;  %v5609_v19 = vadd.f32 %v1832_v5, %v1440_v14  ;;  %v1441_v22 = vadd.f32 %v1394_v40, %v5525_v25 }
 0x17d   : > { %v1396_v43 = vpop.f32.mrf.mxu0 }
 0x17e   : > { %5992 = vst [vmem:[#allocation5_spill] sm:$0xff] %v5609_v19  ;;  %v1836_v13 = vpop.f32.mrf.mxu1  ;;  %v5612_v28 = vadd.f32 %v1834_v9, %v1441_v22  ;;  %v1442_v8 = vadd.f32 %v1396_v43, %v5527_v29 }
 0x17f   : > { %v1400_v48 = vpop.f32.mrf.mxu0 }
 0x180   : > { %5993 = vst [vmem:[#allocation6_spill] sm:$0xff] %v5612_v28  ;;  %v1840_v17 = vpop.f32.mrf.mxu1  ;;  %v5615_v34 = vadd.f32 %v1836_v13, %v1442_v8  ;;  %v1443_v11 = vadd.f32 %v1400_v48, %v5529_v33 }
 0x181   : > { %v1402_v51 = vpop.f32.mrf.mxu0 }
 0x182   : > { %5994 = vst [vmem:[#allocation7_spill] sm:$0xff] %v5615_v34  ;;  %v1842_v20 = vpop.f32.mrf.mxu1  ;;  %v5618_v39 = vadd.f32 %v1840_v17, %v1443_v11  ;;  %v1444_v16 = vadd.f32 %v1402_v51, %v5531_v36 }
 0x183   : > { %v1404_v54 = vpop.f32.mrf.mxu0 }
 0x184   : > { %5995 = vst [vmem:[#allocation8_spill] sm:$0xff] %v5618_v39  ;;  %v1844_v25 = vpop.f32.mrf.mxu1  ;;  %v5621_v46 = vadd.f32 %v1842_v20, %v1444_v16  ;;  %v1445_v21 = vadd.f32 %v1404_v54, %v5533_v41 }
 0x185   : > { %v1406_v57 = vpop.f32.mrf.mxu0 }
 0x186   : > { %5996 = vst [vmem:[#allocation9_spill] sm:$0xff] %v5621_v46  ;;  %v1846_v29 = vpop.f32.mrf.mxu1  ;;  %v5624_v52 = vadd.f32 %v1844_v25, %v1445_v21  ;;  %v1446_v24 = vadd.f32 %v1406_v57, %v5535_v45 }
 0x187   : > { %v1410_v60 = vpop.f32.mrf.mxu0 }
 0x188   : > { %5997 = vst [vmem:[#allocation10_spill] sm:$0xff] %v5624_v52  ;;  %v1850_v33 = vpop.f32.mrf.mxu1  ;;  %v5627_v59 = vadd.f32 %v1846_v29, %v1446_v24  ;;  %v1447_v27 = vadd.f32 %v1410_v60, %v5537_v49 }
 0x189   : > { %v1412_v63 = vpop.f32.mrf.mxu0 }
 0x18a   : > { %5998 = vst [vmem:[#allocation11_spill] sm:$0xff] %v5627_v59  ;;  %v1852_v36 = vpop.f32.mrf.mxu1  ;;  %v5630_v1 = vadd.f32 %v1850_v33, %v1447_v27  ;;  %v1448_v32 = vadd.f32 %v1412_v63, %v5539_v53 }
 0x18b   : > { %v1414_v2 = vpop.f32.mrf.mxu0 }
 0x18c   : > { %5999 = vst [vmem:[#allocation12_spill] sm:$0xff] %v5630_v1  ;;  %v1854_v41 = vpop.f32.mrf.mxu1  ;;  %v5633_v6 = vadd.f32 %v1852_v36, %v1448_v32  ;;  %v1449_v37 = vadd.f32 %v1414_v2, %v5541_v58 }
 0x18d   : > { %v1416_v5 = vpop.f32.mrf.mxu0 }
 0x18e   : > { %6000 = vst [vmem:[#allocation13_spill] sm:$0xff] %v5633_v6  ;;  %v1856_v45 = vpop.f32.mrf.mxu1  ;;  %v5636_v14 = vadd.f32 %v1854_v41, %v1449_v37  ;;  %v1450_v40 = vadd.f32 %v1416_v5, %v5543_v62 }
 0x18f   : > { %v5639_v9 = vpop.f32.mrf.mxu0 }
 0x190   : > { %6001 = vst [vmem:[#allocation14_spill] sm:$0xff] %v5636_v14  ;;  %v5641_v49 = vpop.f32.mrf.mxu1  ;;  %v5643_v22 = vadd.f32 %v1856_v45, %v1450_v40 }
 0x191   : > { %v5645_v43 = vpop.f32.mrf.mxu0 }
 0x192   : > { %6002 = vst [vmem:[#allocation15_spill] sm:$0xff] %v5643_v22  ;;  %v5647_v53 = vpop.f32.mrf.mxu1 }
 0x193   : > { %v5649_v13 = vpop.f32.mrf.mxu0 }
 0x194   : > { %v5651_v8 = vpop.f32.mrf.mxu1 }
 0x195   : > { %v5653_v58 = vpop.f32.mrf.mxu0 }
 0x196   : > { %v5655_v48 = vpop.f32.mrf.mxu1 }
 0x197   : > { %v2230_v17 = vpop.f32.mrf.mxu0 }
 0x198   : > { %v5657_v62 = vpop.f32.mrf.mxu1 }
 0x199   : > { %v2232_v11 = vpop.f32.mrf.mxu0 }
 0x19a   : > { %v5659_v51 = vpop.f32.mrf.mxu1 }
 0x19b   : > { %v5661_v20 = vpop.f32.mrf.mxu0 }
 0x19c   : > { %v5663_v16 = vpop.f32.mrf.mxu1 }
 0x19d   : > { %v5665_v54 = vpop.f32.mrf.mxu0 }
 0x19e   : > { %v5667_v25 = vpop.f32.mrf.mxu1 }
 0x19f   : > { %v5669_v21 = vpop.f32.mrf.mxu0 }
 0x1a0   : > { %v5671_v57 = vpop.f32.mrf.mxu1 }
 0x1a1   : > { %v5673_v29 = vpop.f32.mrf.mxu0 }
 0x1a2   : > { %v5675_v24 = vpop.f32.mrf.mxu1 }
 0x1a3   : > { %v5677_v60 = vpop.f32.mrf.mxu0 }
 0x1a4   : > { %v5679_v33 = vpop.f32.mrf.mxu1 }
 0x1a5   : > { %v5681_v27 = vpop.f32.mrf.mxu0 }
 0x1a6   : > { %v5683_v63 = vpop.f32.mrf.mxu1 }
 0x1a7   : > { %v5685_v36 = vpop.f32.mrf.mxu0 }
 0x1a8   : > { %v5687_v32 = vpop.f32.mrf.mxu1 }
 0x1a9   : > { %v5689_v2 = vpop.f32.mrf.mxu0 }
 0x1aa   : > { %v5691_v41 = vpop.f32.mrf.mxu1 }
 0x1ab   : > { %v5693_v37 = vpop.f32.mrf.mxu0 }
 0x1ac   : > { %6003 = vst [vmem:[#allocation16_spill] sm:$0xff] %v5693_v37  ;;  %v5695_v5 = vpop.f32.mrf.mxu1 }
 0x1ad   : > { %6004 = vst [vmem:[#allocation17_spill] sm:$0xff] %v5695_v5  ;;  %v5697_v45 = vpop.f32.mrf.mxu0 }
 0x1ae   : > { %6005 = vst [vmem:[#allocation18_spill] sm:$0xff] %v5697_v45  ;;  %v5699_v40 = vpop.f32.mrf.mxu1 }
 0x1af   : > { %6006 = vst [vmem:[#allocation19_spill] sm:$0xff] %v5699_v40  ;;  %v2260_v22 = vpop.f32.mrf.mxu0 }
 0x1b0   : > { %v5701_v14 = vpop.f32.mrf.mxu1 }
 0x1b1   : > { %v2262_v44 = vpop.f32.mrf.mxu0 }
 0x1b2   : > { %v5703_v6 = vpop.f32.mrf.mxu1 }
 0x1b3   : > { %v5705_v1 = vpop.f32.mrf.mxu0 }
 0x1b4   : > { %v5707_v59 = vpop.f32.mrf.mxu1 }
 0x1b5   : > { %6007 = vst [vmem:[#allocation20_spill] sm:$0xff] %v5707_v59  ;;  %v5709_v52 = vpop.f32.mrf.mxu0  ;;  %v3213_v59 = vlaneseq }
 0x1b6   : > { %v5711_v46 = vpop.f32.mrf.mxu1 }
 0x1b7   : > { %6008 = vst [vmem:[#allocation21_spill] sm:$0xff] %v5711_v46  ;;  %v5713_v5 = vpop.f32.mrf.mxu0 }
 0x1b8   : > { %6009 = vst [vmem:[#allocation22_spill] sm:$0xff] %v5713_v5  ;;  %v5715_v45 = vpop.f32.mrf.mxu1 }
 0x1b9   : > { %6010 = vst [vmem:[#allocation23_spill] sm:$0xff] %v5715_v45  ;;  %v5717_v40 = vpop.f32.mrf.mxu0 }
 0x1ba   : > { %6011 = vst [vmem:[#allocation24_spill] sm:$0xff] %v5717_v40  ;;  %v5719_v39 = vpop.f32.mrf.mxu1  ;;  %v3214_v40 = vshrl.u32 %v3213_v59, 7  ;;  %v2299_v59 = vadd.f32 %v5639_v9, %v5546_v7 }
 0x1bb   : > { %6012 = vst [vmem:[#allocation25_spill] sm:$0xff] %v5719_v39  ;;  %v5721_v34 = vpop.f32.mrf.mxu0 }
 0x1bc   : > { %6013 = vst [vmem:[#allocation26_spill] sm:$0xff] %v5721_v34  ;;  %v5723_v28 = vpop.f32.mrf.mxu1  ;;  %v3219_v12 = vsub.s32 1, %v3214_v40 }
 0x1bd   : > { %6014 = vst [vmem:[#allocation27_spill] sm:$0xff] %v5723_v28  ;;  %v5725_v37 = vpop.f32.mrf.mxu0 }
 0x1be   : > { %6015 = vst [vmem:[#allocation28_spill] sm:$0xff] %v5725_v37  ;;  %v5727_v38 = vpop.f32.mrf.mxu1 }
 0x1bf   : > { %6016 = vst [vmem:[#allocation29_spill] sm:$0xff] %v5727_v38  ;;  %v5730_v19 = vpop.f32.mrf.mxu0  ;;  %v3215_v38 = vsub.s32 0, %v3214_v40  ;;  %v2301_v40 = vadd.f32 %v5649_v13, %v5552_v23  ;;  %v2305_v23 = vadd.f32 %v5661_v20, %v5564_v47  ;;  %v2309_v13 = vadd.f32 %v5677_v60, %v5576_v10 }
 0x1c0   : > { %6017 = vst [vmem:[#allocation30_spill] sm:$0xff] %v5730_v19  ;;  %v5732_v46 = vpop.f32.mrf.mxu1 }
 0x1c1   : > { %6018 = vst [vmem:[#allocation31_spill] sm:$0xff] %v5732_v46  ;;  %v5734_v5 = vpop.f32.mrf.mxu0 }
 0x1c2   : > { %6019 = vst [vmem:[#allocation32_spill] sm:$0xff] %v5734_v5  ;;  %v5736_v45 = vpop.f32.mrf.mxu1  ;;  %v2304_v5 = vadd.f32 %v2232_v11, %v5561_v42  ;;  %v2315_v42 = vadd.f32 %v2260_v22, %v5594_v50  ;;  %v2310_v50 = vadd.f32 %v5681_v27, %v5579_v18  ;;  %v2312_v22 = vadd.f32 %v5689_v2, %v5585_v31  ;;  %v6031_v2 = vld [vmem:[#allocation20_spill] sm:$0xff] }
 0x1c3   : > { %6020 = vst [vmem:[#allocation33_spill] sm:$0xff] %v5736_v45  ;;  %v5738_v39 = vpop.f32.mrf.mxu0  ;;  %v3211_v45 = vld [vmem:[%s5987_s2] sm:$0x3]  ;;  %v5827_v31 = vadd.f32 %v5679_v33, %v2309_v13 }
 0x1c4   : > { %6021 = vst [vmem:[#allocation34_spill] sm:$0xff] %v5738_v39  ;;  %v5740_v34 = vpop.f32.mrf.mxu1  ;;  %v2303_v39 = vadd.f32 %v2230_v17, %v5558_v35  ;;  %v5769_v9 = vrot.slane %v3211_v45, %v3215_v38  ;;  %v2307_v35 = vadd.f32 %v5669_v21, %v5570_v61  ;;  %v5803_v10 = vadd.f32 %v5659_v51, %v2304_v5 }
 0x1c5   : > { %6022 = vst [vmem:[#allocation35_spill] sm:$0xff] %v5740_v34  ;;  %v5742_v28 = vpop.f32.mrf.mxu0  ;;  %v2300_v34 = vadd.f32 %v5645_v43, %v5549_v15  ;;  %v5771_v15 = vrot.slane %v3211_v45, %v3219_v12  ;;  %v2739_v43 = vadd.f32 %v5641_v49, %v2299_v59  ;;  %v2308_v12 = vadd.f32 %v5673_v29, %v5573_v3  ;;  %v6033_v45 = vld [vmem:[#allocation6_spill] sm:$0xff] }
 0x1c6   : > { %6023 = vst [vmem:[#allocation36_spill] sm:$0xff] %v5742_v28  ;;  %v5744_v37 = vpop.f32.mrf.mxu1  ;;  %v2316_v49 = vadd.f32 %v2262_v44, %v5597_v56  ;;  %v5800_v3 = vadd.f32 %v5657_v62, %v2303_v39  ;;  %v5814_v44 = vadd.f32 %v5663_v16, %v2305_v23  ;;  %v5820_v39 = vadd.f32 %v5671_v57, %v2307_v35  ;;  %v6034_v59 = vld [vmem:[#allocation26_spill] sm:$0xff] }
 0x1c7   : > { %6024 = vst [vmem:[#allocation37_spill] sm:$0xff] %v5744_v37  ;;  %v5755_v46 = vpop.f32.mrf.mxu0  ;;  %v2302_v37 = vadd.f32 %v5653_v58, %v5555_v30  ;;  %v2306_v30 = vadd.f32 %v5665_v54, %v5567_v55  ;;  %v2740_v38 = vadd.f32 %v5647_v53, %v2300_v34  ;;  %v2741_v55 = vadd.f32 %v5651_v8, %v2301_v40 }
 0x1c8   : > { %v5757_v28 = vpop.f32.mrf.mxu1  ;;  %v2311_v34 = vadd.f32 %v5685_v36, %v5582_v26  ;;  %v2755_v8 = vadd.f32 %v5701_v14, %v2315_v42  ;;  %v5824_v26 = vadd.f32 %v5675_v24, %v2308_v12  ;;  %v2318_v17 = vadd.f32 %v5709_v52, %v5603_v4  ;;  %v6027_v4 = vld [vmem:[#allocation5_spill] sm:$0xff]  ;;  %v6028_v52 = vld [vmem:[#allocation24_spill] sm:$0xff]  ;;  %v6035_v12 = vld [vmem:[#allocation23_spill] sm:$0xff] }
 0x1c9   : > { %v5765_v19 = vpop.f32.mrf.mxu0  ;;  %v2742_v61 = vadd.f32 %v5655_v48, %v2302_v37  ;;  %v5817_v56 = vadd.f32 %v5667_v25, %v2306_v30  ;;  %v2317_v48 = vadd.f32 %v5705_v1, %v5600_v0  ;;  %v5835_v51 = vadd.f32 %v5683_v63, %v2310_v50  ;;  %v6025_v0 = vld [vmem:[#allocation4_spill] sm:$0xff]  ;;  %v6026_v1 = vld [vmem:[#allocation22_spill] sm:$0xff]  ;;  %v6032_v37 = vld [vmem:[#allocation21_spill] sm:$0xff] }
 0x1ca   : > { %v5767_v7 = vpop.f32.mrf.mxu1  ;;  %v2756_v14 = vadd.f32 %v5703_v6, %v2316_v49  ;;  %v5839_v54 = vadd.f32 %v5687_v32, %v2311_v34  ;;  %v5842_v25 = vadd.f32 %v5691_v41, %v2312_v22  ;;  %v2319_v21 = vadd.f32 %v6026_v1, %v6025_v0  ;;  %v6029_v63 = vld [vmem:[#allocation2_spill] sm:$0xff]  ;;  %v6030_v36 = vld [vmem:[#allocation16_spill] sm:$0xff]  ;;  %v6036_v50 = vld [vmem:[#allocation25_spill] sm:$0xff] }
 0x1cb   : > { %v5788_v58 = vpop.f32.mrf.mxu0  ;;  %v2320_v57 = vadd.f32 %v6028_v52, %v6027_v4  ;;  %v5857_v32 = vadd.f32 %v6030_v36, %v6029_v63  ;;  %v2757_v41 = vadd.f32 %v6031_v2, %v2317_v48  ;;  %v2758_v5 = vadd.f32 %v6032_v37, %v2318_v17  ;;  %v6038_v0 = vld [vmem:[#allocation7_spill] sm:$0xff]  ;;  %v6039_v1 = vld [vmem:[#allocation28_spill] sm:$0xff]  ;;  %v6042_v63 = vld [vmem:[#allocation9_spill] sm:$0xff] }
 0x1cc   : > { %v5790_v47 = vpop.f32.mrf.mxu1  ;;  %v2321_v40 = vadd.f32 %v6034_v59, %v6033_v45  ;;  %v2759_v13 = vadd.f32 %v6035_v12, %v2319_v21  ;;  %v2322_v4 = vadd.f32 %v6039_v1, %v6038_v0  ;;  %v6043_v36 = vld [vmem:[#allocation32_spill] sm:$0xff] }
 0x1cd   : > { %v5809_v53 = vpop.f32.mrf.mxu0  ;;  %v2760_v49 = vadd.f32 %v6036_v50, %v2320_v57  ;;  %v2324_v2 = vadd.f32 %v6043_v36, %v6042_v63 }
 0x1ce   : > { %v5811_v18 = vpop.f32.mrf.mxu1 }
 0x1cf   : > { %v3100_v62 = vpop.f32.mrf.mxu0 }
 0x1d0   : > { %v3140_v11 = vpop.f32.mrf.mxu1  ;;  %v3179_v20 = vadd.f32 %v3100_v62, %v2739_v43 }
 0x1d1   : > { %v3195_v16 = vadd.f32 %v3140_v11, %v2755_v8  ;;  %v3102_v29 = vpop.f32.mrf.mxu0 }
 0x1d2   : > { %v3142_v24 = vpop.f32.mrf.mxu1  ;;  %v3223_v60 = vadd.f32 %v5769_v9, %v3179_v20  ;;  %v3180_v33 = vadd.f32 %v3102_v29, %v2740_v38  ;;  %v6037_v20 = vld [vmem:[#allocation27_spill] sm:$0xff] }
 0x1d3   : > { %v3239_v6 = vadd.f32 %v5769_v9, %v3195_v16  ;;  %v3196_v27 = vadd.f32 %v3142_v24, %v2756_v14  ;;  %v3104_v23 = vpop.f32.mrf.mxu0  ;;  %v2761_v16 = vadd.f32 %v6037_v20, %v2321_v40 }
 0x1d4   : > { %v3144_v30 = vpop.f32.mrf.mxu1  ;;  %v3255_v35 = vmax.f32 %v3223_v60, 0.0  ;;  %v3224_v43 = vadd.f32 %v5771_v15, %v3180_v33  ;;  %v3181_v34 = vadd.f32 %v3104_v23, %v2741_v55  ;;  %v6041_v33 = vld [vmem:[#allocation30_spill] sm:$0xff] }
 0x1d5   : > { %v3271_v42 = vmax.f32 %v3239_v6, 0.0  ;;  %v3240_v38 = vadd.f32 %v5771_v15, %v3196_v27  ;;  %v3197_v22 = vadd.f32 %v3144_v30, %v2757_v41  ;;  %v3106_v8 = vpop.f32.mrf.mxu0  ;;  %v6040_v6 = vld [vmem:[#allocation8_spill] sm:$0xff] }
 0x1d6   : > { %v3146_v48 = vpop.f32.mrf.mxu1  ;;  %3287 = vst [vmem:[%s5853_s25] sm:$0xff] %v3255_v35  ;;  %v3256_v17 = vmax.f32 %v3224_v43, 0.0  ;;  %v3182_v11 = vadd.f32 %v3106_v8, %v2742_v61  ;;  %v3225_v21 = vadd.f32 %v5769_v9, %v3181_v34  ;;  %v2323_v27 = vadd.f32 %v6041_v33, %v6040_v6  ;;  %v6046_v43 = vld [vmem:[#allocation34_spill] sm:$0xff] }
 0x1d7   : > { %3303 = vst [vmem:[%s5853_s25 + $0x80] sm:$0xff] %v3271_v42  ;;  %v3272_v62 = vmax.f32 %v3240_v38, 0.0  ;;  %v3198_v14 = vadd.f32 %v3146_v48, %v2758_v5  ;;  %v3241_v55 = vadd.f32 %v5769_v9, %v3197_v22  ;;  %v3110_v52 = vpop.f32.mrf.mxu0  ;;  %v6045_v42 = vld [vmem:[#allocation10_spill] sm:$0xff] }
 0x1d8   : > { %v3150_v57 = vpop.f32.mrf.mxu1  ;;  %3288 = vst [vmem:[%s5853_s25 + $0x8] sm:$0xff] %v3256_v17  ;;  %v3226_v29 = vadd.f32 %v5771_v15, %v3182_v11  ;;  %v3183_v61 = vadd.f32 %v3110_v52, %v5800_v3  ;;  %v3257_v41 = vmax.f32 %v3225_v21, 0.0  ;;  %v6044_v3 = vld [vmem:[#allocation29_spill] sm:$0xff]  ;;  %v2325_v38 = vadd.f32 %v6046_v43, %v6045_v42  ;;  %v6055_v43 = vld [vmem:[#allocation18_spill] sm:$0xff] }
 0x1d9   : > { %3304 = vst [vmem:[%s5853_s25 + $0x88] sm:$0xff] %v3272_v62  ;;  %v3242_v24 = vadd.f32 %v5771_v15, %v3198_v14  ;;  %v3199_v60 = vadd.f32 %v3150_v57, %v2759_v13  ;;  %v3273_v37 = vmax.f32 %v3241_v55, 0.0  ;;  %v3112_v5 = vpop.f32.mrf.mxu0  ;;  %v2762_v35 = vadd.f32 %v6044_v3, %v2322_v4  ;;  %v6047_v62 = vld [vmem:[#allocation31_spill] sm:$0xff]  ;;  %v6048_v14 = vld [vmem:[#allocation33_spill] sm:$0xff] }
 0x1da   : > { %v3152_v45 = vpop.f32.mrf.mxu1  ;;  %v3258_v59 = vmax.f32 %v3226_v29, 0.0  ;;  %v3227_v23 = vadd.f32 %v5769_v9, %v3183_v61  ;;  %3289 = vst [vmem:[%s5853_s25 + $0x10] sm:$0xff] %v3257_v41  ;;  %v3184_v12 = vadd.f32 %v3112_v5, %v5803_v10  ;;  %v2763_v11 = vadd.f32 %v6047_v62, %v2323_v27  ;;  %v6049_v55 = vld [vmem:[#allocation35_spill] sm:$0xff]  ;;  %v6051_v29 = vld [vmem:[#allocation36_spill] sm:$0xff] }
 0x1db   : > { %v3274_v40 = vmax.f32 %v3242_v24, 0.0  ;;  %v3243_v30 = vadd.f32 %v5769_v9, %v3199_v60  ;;  %3305 = vst [vmem:[%s5853_s25 + $0x90] sm:$0xff] %v3273_v37  ;;  %v3200_v13 = vadd.f32 %v3152_v45, %v2760_v49  ;;  %v3114_v50 = vpop.f32.mrf.mxu0  ;;  %v2764_v20 = vadd.f32 %v6048_v14, %v2324_v2  ;;  %v6050_v57 = vld [vmem:[#allocation11_spill] sm:$0xff]  ;;  %v6052_v41 = vld [vmem:[#allocation12_spill] sm:$0xff]  ;;  %v6053_v37 = vld [vmem:[#allocation13_spill] sm:$0xff] }
 0x1dc   : > { %v3154_v34 = vpop.f32.mrf.mxu1  ;;  %3290 = vst [vmem:[%s5853_s25 + $0x18] sm:$0xff] %v3258_v59  ;;  %v3259_v22 = vmax.f32 %v3227_v23, 0.0  ;;  %v3185_v48 = vadd.f32 %v3114_v50, %v5814_v44  ;;  %v3228_v0 = vadd.f32 %v5771_v15, %v3184_v12  ;;  %v2765_v52 = vadd.f32 %v6049_v55, %v2325_v38 }
 0x1dd   : > { %3306 = vst [vmem:[%s5853_s25 + $0x98] sm:$0xff] %v3274_v40  ;;  %v3275_v8 = vmax.f32 %v3243_v30, 0.0  ;;  %v3201_v17 = vadd.f32 %v3154_v34, %v2761_v16  ;;  %v3244_v10 = vadd.f32 %v5771_v15, %v3200_v13  ;;  %v3116_v1 = vpop.f32.mrf.mxu0  ;;  %v2326_v24 = vadd.f32 %v6051_v29, %v6050_v57 }
 0x1de   : > { %v3156_v49 = vpop.f32.mrf.mxu1  ;;  %3291 = vst [vmem:[%s5853_s25 + $0x20] sm:$0xff] %v3259_v22  ;;  %v3229_v4 = vadd.f32 %v5769_v9, %v3185_v48  ;;  %v3186_v44 = vadd.f32 %v3116_v1, %v5817_v56  ;;  %v3260_v61 = vmax.f32 %v3228_v0, 0.0  ;;  %v2327_v56 = vadd.f32 %v5755_v46, %v6052_v41  ;;  %v6054_v46 = vld [vmem:[#allocation3_spill] sm:$0xff] }
 0x1df   : > { %3307 = vst [vmem:[%s5853_s25 + $0xa0] sm:$0xff] %v3275_v8  ;;  %v3245_v21 = vadd.f32 %v5769_v9, %v3201_v17  ;;  %v3202_v16 = vadd.f32 %v3156_v49, %v2762_v35  ;;  %v3276_v60 = vmax.f32 %v3244_v10, 0.0  ;;  %v3120_v6 = vpop.f32.mrf.mxu0  ;;  %v2328_v5 = vadd.f32 %v5765_v19, %v6053_v37  ;;  %v6056_v19 = vld [vmem:[#allocation37_spill] sm:$0xff] }
 0x1e0   : > { %v3160_v33 = vpop.f32.mrf.mxu1  ;;  %v3261_v27 = vmax.f32 %v3229_v4, 0.0  ;;  %v3230_v36 = vadd.f32 %v5771_v15, %v3186_v44  ;;  %3292 = vst [vmem:[%s5853_s25 + $0x28] sm:$0xff] %v3260_v61  ;;  %v3187_v45 = vadd.f32 %v3120_v6, %v5820_v39  ;;  %v2314_v38 = vadd.f32 %v6055_v43, %v6054_v46  ;;  %v6058_v44 = vld [vmem:[#allocation15_spill] sm:$0xff] }
 0x1e1   : > { %v3277_v63 = vmax.f32 %v3245_v21, 0.0  ;;  %v3246_v2 = vadd.f32 %v5771_v15, %v3202_v16  ;;  %3308 = vst [vmem:[%s5853_s25 + $0xa8] sm:$0xff] %v3276_v60  ;;  %v3203_v59 = vadd.f32 %v3160_v33, %v2763_v11  ;;  %v3122_v40 = vpop.f32.mrf.mxu0  ;;  %v2766_v12 = vadd.f32 %v6056_v19, %v2326_v24  ;;  %v6057_v21 = vld [vmem:[#allocation14_spill] sm:$0xff] }
 0x1e2   : > { %v3162_v23 = vpop.f32.mrf.mxu1  ;;  %3293 = vst [vmem:[%s5853_s25 + $0x30] sm:$0xff] %v3261_v27  ;;  %v3262_v30 = vmax.f32 %v3230_v36, 0.0  ;;  %v3188_v35 = vadd.f32 %v3122_v40, %v5824_v26  ;;  %v3231_v13 = vadd.f32 %v5769_v9, %v3187_v45  ;;  %v2767_v17 = vadd.f32 %v5757_v28, %v2327_v56 }
 0x1e3   : > { %3309 = vst [vmem:[%s5853_s25 + $0xb0] sm:$0xff] %v3277_v63  ;;  %v3278_v3 = vmax.f32 %v3246_v2, 0.0  ;;  %v3204_v42 = vadd.f32 %v3162_v23, %v2764_v20  ;;  %v3247_v39 = vadd.f32 %v5769_v9, %v3203_v59  ;;  %v3124_v50 = vpop.f32.mrf.mxu0  ;;  %v2768_v62 = vadd.f32 %v5767_v7, %v2328_v5 }
 0x1e4   : > { %v3164_v34 = vpop.f32.mrf.mxu1  ;;  %3294 = vst [vmem:[%s5853_s25 + $0x38] sm:$0xff] %v3262_v30  ;;  %v3232_v22 = vadd.f32 %v5771_v15, %v3188_v35  ;;  %v3189_v26 = vadd.f32 %v3124_v50, %v5827_v31  ;;  %v3263_v11 = vmax.f32 %v3231_v13, 0.0  ;;  %v2329_v31 = vadd.f32 %v5788_v58, %v6057_v21  ;;  %v6059_v58 = vld [vmem:[#allocation17_spill] sm:$0xff] }
 0x1e5   : > { %3310 = vst [vmem:[%s5853_s25 + $0xb8] sm:$0xff] %v3278_v3  ;;  %v3248_v8 = vadd.f32 %v5771_v15, %v3204_v42  ;;  %v3205_v48 = vadd.f32 %v3164_v34, %v2765_v52  ;;  %v3279_v14 = vmax.f32 %v3247_v39, 0.0  ;;  %v3126_v20 = vpop.f32.mrf.mxu0  ;;  %v2330_v28 = vadd.f32 %v5809_v53, %v6058_v44  ;;  %v6060_v53 = vld [vmem:[#allocation19_spill] sm:$0xff] }
 0x1e6   : > { %v3166_v0 = vpop.f32.mrf.mxu1  ;;  %v3264_v10 = vmax.f32 %v3232_v22, 0.0  ;;  %v3233_v49 = vadd.f32 %v5769_v9, %v3189_v26  ;;  %3295 = vst [vmem:[%s5853_s25 + $0x40] sm:$0xff] %v3263_v11  ;;  %v3190_v7 = vadd.f32 %v3126_v20, %v5835_v51  ;;  %v2753_v60 = vadd.f32 %v6059_v58, %v5857_v32 }
 0x1e7   : > { %v3280_v1 = vmax.f32 %v3248_v8, 0.0  ;;  %v3249_v4 = vadd.f32 %v5769_v9, %v3205_v48  ;;  %3311 = vst [vmem:[%s5853_s25 + $0xc0] sm:$0xff] %v3279_v14  ;;  %v3206_v16 = vadd.f32 %v3166_v0, %v2766_v12  ;;  %v3130_v55 = vpop.f32.mrf.mxu0  ;;  %v2754_v6 = vadd.f32 %v6060_v53, %v2314_v38 }
 0x1e8   : > { %v3170_v52 = vpop.f32.mrf.mxu1  ;;  %3296 = vst [vmem:[%s5853_s25 + $0x48] sm:$0xff] %v3264_v10  ;;  %v3265_v57 = vmax.f32 %v3233_v49, 0.0  ;;  %v3191_v24 = vadd.f32 %v3130_v55, %v5839_v54  ;;  %v3234_v33 = vadd.f32 %v5771_v15, %v3190_v7  ;;  %v2769_v32 = vadd.f32 %v5790_v47, %v2329_v31 }
 0x1e9   : > { %3312 = vst [vmem:[%s5853_s25 + $0xc8] sm:$0xff] %v3280_v1  ;;  %v3281_v29 = vmax.f32 %v3249_v4, 0.0  ;;  %v3207_v61 = vadd.f32 %v3170_v52, %v2767_v17  ;;  %v3250_v51 = vadd.f32 %v5771_v15, %v3206_v16  ;;  %v3132_v27 = vpop.f32.mrf.mxu0  ;;  %v2770_v56 = vadd.f32 %v5811_v18, %v2330_v28 }
 0x1ea   : > { %v3172_v63 = vpop.f32.mrf.mxu1  ;;  %3297 = vst [vmem:[%s5853_s25 + $0x50] sm:$0xff] %v3265_v57  ;;  %v3235_v36 = vadd.f32 %v5769_v9, %v3191_v24  ;;  %v3192_v2 = vadd.f32 %v3132_v27, %v5842_v25  ;;  %v3266_v37 = vmax.f32 %v3234_v33, 0.0 }
 0x1eb   : > { %3313 = vst [vmem:[%s5853_s25 + $0xd0] sm:$0xff] %v3281_v29  ;;  %v3251_v54 = vadd.f32 %v5769_v9, %v3207_v61  ;;  %v3208_v41 = vadd.f32 %v3172_v63, %v2768_v62  ;;  %v3282_v5 = vmax.f32 %v3250_v51, 0.0  ;;  %v3134_v45 = vpop.f32.mrf.mxu0 }
 0x1ec   : > { %v3174_v59 = vpop.f32.mrf.mxu1  ;;  %v3267_v40 = vmax.f32 %v3235_v36, 0.0  ;;  %v3236_v30 = vadd.f32 %v5771_v15, %v3192_v2  ;;  %3298 = vst [vmem:[%s5853_s25 + $0x58] sm:$0xff] %v3266_v37  ;;  %v3193_v25 = vadd.f32 %v3134_v45, %v2753_v60 }
 0x1ed   : > { %v3283_v23 = vmax.f32 %v3251_v54, 0.0  ;;  %v3252_v3 = vadd.f32 %v5771_v15, %v3208_v41  ;;  %3314 = vst [vmem:[%s5853_s25 + $0xd8] sm:$0xff] %v3282_v5  ;;  %v3209_v47 = vadd.f32 %v3174_v59, %v2769_v32  ;;  %v3136_v35 = vpop.f32.mrf.mxu0 }
 0x1ee   : > { %v3176_v42 = vpop.f32.mrf.mxu1  ;;  %3299 = vst [vmem:[%s5853_s25 + $0x60] sm:$0xff] %v3267_v40  ;;  %v3268_v18 = vmax.f32 %v3236_v30, 0.0  ;;  %v3194_v43 = vadd.f32 %v3136_v35, %v2754_v6  ;;  %v3237_v19 = vadd.f32 %v5769_v9, %v3193_v25 }
 0x1ef   : > { %3315 = vst [vmem:[%s5853_s25 + $0xe0] sm:$0xff] %v3283_v23  ;;  %v3284_v46 = vmax.f32 %v3252_v3, 0.0  ;;  %v3210_v38 = vadd.f32 %v3176_v42, %v2770_v56  ;;  %v3253_v12 = vadd.f32 %v5769_v9, %v3209_v47 }
 0x1f0   : > { %3300 = vst [vmem:[%s5853_s25 + $0x68] sm:$0xff] %v3268_v18  ;;  %v3238_v13 = vadd.f32 %v5771_v15, %v3194_v43  ;;  %v3269_v50 = vmax.f32 %v3237_v19, 0.0 }
 0x1f1   : > { %3316 = vst [vmem:[%s5853_s25 + $0xe8] sm:$0xff] %v3284_v46  ;;  %v3254_v39 = vadd.f32 %v5771_v15, %v3210_v38  ;;  %v3285_v34 = vmax.f32 %v3253_v12, 0.0 }
 0x1f2   : > { %v3270_v22 = vmax.f32 %v3238_v13, 0.0  ;;  %3301 = vst [vmem:[%s5853_s25 + $0x70] sm:$0xff] %v3269_v50 }
 0x1f3   : > { %v3286_v8 = vmax.f32 %v3254_v39, 0.0  ;;  %3317 = vst [vmem:[%s5853_s25 + $0xf0] sm:$0xff] %v3285_v34 }
 0x1f4   : > { %3302 = vst [vmem:[%s5853_s25 + $0x78] sm:$0xff] %v3270_v22 }
 0x1f5   : > { %3318 = vst [vmem:[%s5853_s25 + $0xf8] sm:$0xff] %v3286_v8 }
 0x1f6 PF: > { %s13_s16 = sadd.s32 1, %s4600_s16   ;;  %s6061_s12 = smov %s4592_s14 }
 0x1f7   : > { %p10_p7 = scmp.ge.s32.totalorder %s13_s16, 6   ;;  %s6062_s13 = smov %s4596_s15 }
 0x1f8   : > { %s6063_s14 = smov %s6066_s17  ;;  %s6064_s15 = smov %s6070_s18 }
 0x1f9   :  { %12 = sbr.rel (!%p10_p7) target bundleno = 3 (0x3), region = 75 }

// kernel: inception_b.13
= control target key start
LH: loop header
LB: loop body
LE: loop exit
PB: predicated region body
PF: predicated region fallthrough
CT: control target
= control target key end

     0   :  { %s6027_s27 = smov 0   ;;  %s6029_s28 = smov 0   ;;  %s7992_s0 = inlined_call_operand.vmem [shape: bf16[2,18,18,4], index: 0, kind: input, shape index: {}]   ;;  %s7993_s1 = inlined_call_operand.vmem [shape: bf16[2,352,256], index: 1, kind: input, shape index: {}]   ;;  %s7994_s2 = inlined_call_operand.vmem [shape: bf16[4,128], index: 2, kind: input, shape index: {}]   ;;  %s7995_s3 = inlined_call_operand.vmem [shape: bf16[4,384], index: 3, kind: input, shape index: {}]   ;;  %s7996_s4 = inlined_call_operand.vmem [shape: bf16[7,256,256], index: 4, kind: input, shape index: {}]   ;;  %s7997_s5 = inlined_call_operand.vmem [shape: f32[1,128], index: 5, kind: input, shape index: {}]   ;;  %s7998_s6 = inlined_call_operand.vmem [shape: f32[1,384], index: 6, kind: input, shape index: {}]   ;;  %s7999_s7 = inlined_call_operand.vmem [shape: f32[1,256], index: 7, kind: input, shape index: {}]   ;;  %s8000_s8 = inlined_call_operand.vmem [shape: f32[2,256,768], index: 8, kind: output, shape index: {}]  }
   0x1   :  { %s6031_s29 = smov 0   ;;  %s6033_s30 = smov 0  }
   0x2   :  { %s6035_s9 = smov 0  }
   0x3 LB: > { %s27_s10 = sadd.s32 1, %s5970_s29  ;;  %s30_s11 = sadd.s32 1, %s5974_s30  ;;  %s5978_s9 = sphi %s6035_s9, %s18_s9   ;;  %s5974_s30 = sphi %s6033_s30, %s8054_s30   ;;  %s5970_s29 = sphi %s6031_s29, %s8053_s29   ;;  %s5966_s28 = sphi %s6029_s28, %s8052_s28   ;;  %s5962_s27 = sphi %s6027_s27, %s8051_s27  }
   0x4   : > { %p28_p0 = scmp.ge.s32.totalorder %s27_s10, 2  ;;  %p4678_p1 = scmp.ge.s32.totalorder %s5978_s9, 1 }
   0x5   : > { %p286_p2 = scmp.lt.s32.totalorder %s5978_s9, 5 }
   0x6   : > { %s8056_s10 = smov (%p28_p0, %s27_s10), 0  ;;  %s8058_s11 = smov (!%p28_p0, %s30_s11), %s5974_s30 }
   0x7   : > { %p287_p3 = pnand %p4678_p1, %p286_p2  ;;  %p32_p4 = scmp.ge.s32.totalorder %s8058_s11, 2 }
   0x9   : > { %s8060_s11 = smov (%p32_p4, %s8058_s11), 0  ;;  %290 = sbr.rel (%p287_p3) target bundleno = 577 (0x241), region = 52 }
   0xe   : > { %v1032_v0 = vlaneseq  ;;  %v5980_v1 = vmov 1983009808   ;;  %v5981_v3 = vmov 0   ;;  %p330_p5 = scmp.lt.s32.totalorder %s5966_s28, 1  ;;  %v1029_v4 = vld [vmem:[%s7995_s3] sm:$0x3f] }
   0xf   : > { %v1074_v2 = vunpack.c.l.s4 %v5980_v1  ;;  %1153 = vmatprep.mubr.bf16.mxu1 %v5981_v3  ;;  %v1072_v6 = vcombine.high %v1029_v4, %v1029_v4  ;;  %vm701_vm0 = vcmask 1041408   ;;  %s5271_s14 = smul.u32 96, %s5962_s27  ;;  %v668_v8 = vld [vmem:[%s7994_s2] sm:$0x3]  ;;  %vm834_vm1 = vsmask.f32 3328 }
  0x10   : > { %v6063_v5 = vshrl.u32 %v1032_v0, 7  ;;  %s8062_s28 = smov (!%p330_p5, %s5966_s28), 1  ;;  %5387 = vmatprep.subr.msk.bf16.mxu0 %vm701_vm0, %v668_v8  ;;  %v703_v10 = vsel %vm701_vm0, %v668_v8, 0  ;;  %vm835_vm2 = vsmask.f32 7440  ;;  %vm446_vm3 = vcmask 1046528  }
  0x11   : > { %v1075_v7 = vunpack.c.0.s8 %v1074_v2  ;;  %s5389_s17 = smul.u32 216, %s8062_s28  ;;  %5320 = vmatpush3.bf16.msra.mxu0 %v703_v10  ;;  %v5438_v13 = vld [vmem:[%s7996_s4 + $0x174] ss:$8 sps:$4 sm:$0xff]   ;;  %vm676_vm4 = vcmask 31744   ;;  %vm537_vm5 = vcmask 1045504   ;;  %vm6122_vm6 = vmor %vm834_vm1, %vm835_vm2  ;;  %s6239_s13 = sshll.u32 %s5962_s27, 7 }
  0x12   : > { %v5436_v62 = vld [vmem:[%s7996_s4 + $0x170] ss:$8 sps:$4 sm:$0xff]   ;;  %v5441_v8 = vld [vmem:[%s7996_s4 + $0x164] ss:$8 sps:$4 sm:$0xff]   ;;  %s5274_s23 = sadd.s32 16, %s6239_s13  ;;  %s5390_s24 = smul.u32 352, %s8062_s28 }
  0x13   : > { %v1078_v9 = vsub.s32 %v1075_v7, %v6063_v5  ;;  %s334_s20 = scalar_lea.vmem %s7992_s0, %s5389_s17  ;;  %s6291_s12 = sshra.s32 %s5274_s23, 3  ;;  %v5504_v44 = vld [vmem:[%s7996_s4 + $0x14] ss:$8 sps:$4 sm:$0xff]  }
  0x14   : > { %s6080_s21 = scalar_lea.vmem %s334_s20, %s5271_s14  ;;  %s6322_s18 = scalar_lea.vmem %s7993_s1, %s5390_s24 }
  0x15   : > { %v1079_v11 = vrot.slane %v1029_v4, %v1078_v9  ;;  %v6078_v12 = vrot.slane %v1072_v6, %v1078_v9  ;;  %v359_v16 = vld [vmem:[%s6080_s21 + $0xc] sm:$0xf]  ;;  %v360_v17 = vld [vmem:[%s6080_s21 + $0x10] sm:$0xf]  ;;  %v5292_v18 = vld [vmem:[%s6080_s21] sm:$0xff]   ;;  %s5275_s19 = sshll.u32 %s6291_s12, 3  ;;  %s6488_s23 = scalar_lea.vmem %s6322_s18, %s6239_s13 }
  0x16   : > { %v6092_v19 = vld [vmem:[%s6080_s21 + $0x14] sm:$0x1]  ;;  %v838_v20 = vshrl.u32 %v359_v16, 16  ;;  %v841_v21 = vshll.u32 %v359_v16, 16  ;;  %v847_v22 = vshll.u32 %v360_v17, 16  ;;  %v6094_v23 = vunpack.c.l.bf16 %v5292_v18  ;;  %s6339_s25 = scalar_lea.vmem %s6322_s18, %s5275_s19  ;;  %s5277_s15 = sadd.s32 32, %s6239_s13 }
  0x17   : > { %v1087_v14 = vcombine.high %v1079_v11, %v1079_v11  ;;  %v1113_v15 = vsel %vm701_vm0, %v1079_v11, 0  ;;  %5388 = vmatprep.subr.msk.bf16.mxu0 %vm701_vm0, %v6078_v12  ;;  %v851_v24 = vshrl.u32 %v360_v17, 16  ;;  %v857_v25 = vshll.u32 %v6092_v19, 16  ;;  %v358_v27 = vld [vmem:[%s6080_s21 + $0x8] sm:$0x1]  ;;  %s2245_s22 = sshra.s32 %s5277_s15, 3 }
  0x18   : > { %v6098_v26 = vunpack.c.h.bf16 %v5292_v18  ;;  %v6102_v28 = vld [vmem:[%s6080_s21 + $0x18] sm:$0xf]  ;;  %v6104_v29 = vunpack.c.l.bf16 %v359_v16  ;;  %v840_v30 = vrot.slane %v838_v20, 4  ;;  %v843_v31 = vrot.slane %v841_v21, 5  ;;  %v6107_v33 = vld [vmem:[%s6080_s21 + $0x1c] sm:$0xf] }
  0x19   : > { %4703 = vmatprep.subr.msk.bf16.mxu1 %vm701_vm0, %v1087_v14  ;;  %v849_v32 = vrot.slane %v847_v22, 5  ;;  %v6109_v34 = vunpack.c.l.bf16 %v360_v17  ;;  %v853_v35 = vrot.slane %v851_v24, 4  ;;  %v859_v36 = vrot.slane %v857_v25, 5  ;;  %v6112_v37 = vld [vmem:[%s6080_s21 + $0x20] sm:$0x1]  ;;  %s5278_s14 = sshll.u32 %s2245_s22, 3 }
  0x1a   : > { %1136 = vmatpush1.bf16.msra.mxu1 %v1113_v15  ;;  %v390_v38 = vunpack.c.l.bf16 %v6102_v28  ;;  %v6116_v39 = vunpack.c.l.bf16 %v6107_v33  ;;  %v844_v40 = vor.u32 %v843_v31, %v840_v30  ;;  %v406_v41 = vunpack.c.l.bf16 %v358_v27  ;;  %v5439_v14 = vld [vmem:[%s7996_s4 + $0x160] ss:$8 sps:$4 sm:$0xff]   ;;  %v6169_v24 = vld [vmem:[%s6080_s21 + $0x24] sm:$0xf]  ;;  %v6178_v31 = vld [vmem:[%s6080_s21 + $0x2c] sm:$0x1]  ;;  %s6575_s17 = scalar_lea.vmem %s6322_s18, %s5278_s14 }
  0x1b   : > { %1777 = vmatprep.subr.bf16.mxu1 %v5438_v13  ;;  %v407_v42 = vunpack.c.l.bf16 %v6092_v19  ;;  %v408_v43 = vunpack.c.l.bf16 %v6112_v37  ;;  %v854_v45 = vor.u32 %v853_v35, %v849_v32  ;;  %v447_v46 = vrot.slane %v6094_v23, 1  ;;  %v5444_v19 = vld [vmem:[%s7996_s4 + $0x154] ss:$8 sps:$4 sm:$0xff]   ;;  %v6175_v30 = vld [vmem:[%s6080_s21 + $0x28] sm:$0xf]  ;;  %s5280_s24 = sadd.s32 48, %s6239_s13 }
  0x1c   : > { %v448_v47 = vrot.slane %v6098_v26, 1  ;;  %v452_v48 = vrot.slane %v6104_v29, 1  ;;  %v845_v49 = vrot.slane %v844_v40, 4  ;;  %v450_v50 = vrot.slane %v406_v41, 1  ;;  %s2686_s16 = sshra.s32 %s5280_s24, 3  ;;  %s4681_s22 = sshll.u32 %s5962_s27, 4 }
  0x1d   : > { %v453_v51 = vrot.slane %v6109_v34, 1  ;;  %v455_v52 = vrot.slane %v407_v42, 1  ;;  %v855_v53 = vrot.slane %v854_v45, 4  ;;  %v457_v55 = vrot.slane %v390_v38, 1  ;;  %s5281_s15 = sshll.u32 %s2686_s16, 3  ;;  %s5283_s16 = sadd.s32 64, %s6239_s13 }
  0x1e   : > { %v449_v54 = vsel %vm446_vm3, %v447_v46, %v448_v47  ;;  %v458_v56 = vrot.slane %v6116_v39, 1  ;;  %v850_v57 = vsel %vm6122_vm6, %v845_v49, %v849_v32  ;;  %v451_v58 = vsel %vm446_vm3, %v448_v47, %v450_v50  ;;  %v5442_v47 = vld [vmem:[%s7996_s4 + $0x150] ss:$8 sps:$4 sm:$0xff]   ;;  %s6694_s26 = scalar_lea.vmem %s6322_s18, %s5281_s15  ;;  %s3127_s12 = sshra.s32 %s5283_s16, 3 }
  0x1f   : > { %v454_v59 = vsel %vm446_vm3, %v452_v48, %v453_v51  ;;  %v456_v60 = vsel %vm446_vm3, %v453_v51, %v455_v52  ;;  %v860_v61 = vsel %vm6122_vm6, %v855_v53, %v859_v36  ;;  %v460_v0 = vrot.slane %v408_v43, 1  ;;  %v5447_v52 = vld [vmem:[%s7996_s4 + $0x144] ss:$8 sps:$4 sm:$0xff]   ;;  %p343_p6 = scmp.lt.s32.totalorder %s4681_s22, 31  ;;  %s5392_s20 = smul.u32 192, %s8062_s28 }
  0x20   : > { %v459_v63 = vsel %vm446_vm3, %v457_v55, %v458_v56  ;;  %v517_v1 = vadd.f32 %v6094_v23, %v449_v54  ;;  %v6144_v2 = vcombine.low %v850_v57, %v860_v61  ;;  %v518_v4 = vadd.f32 %v6098_v26, %v451_v58  ;;  %v5445_v61 = vld [vmem:[%s7996_s4 + $0x140] ss:$8 sps:$4 sm:$0xff]   ;;  %s5286_s27 = sadd.s32 80, %s6239_s13 }
  0x21   : > { %v519_v6 = vadd.f32 %v454_v59, %v6104_v29  ;;  %v520_v7 = vadd.f32 %v456_v60, %v6109_v34  ;;  %v461_v9 = vsel %vm446_vm3, %v458_v56, %v460_v0  ;;  %v521_v10 = vadd.f32 %v459_v63, %v390_v38  ;;  %s8064_s22 = smov (!%p343_p6, %s4681_s22), 31  ;;  %s6920_s24 = sshra.s32 %s5286_s27, 3 }
  0x22   : > { %v538_v11 = vrot.slane %v6094_v23, 2  ;;  %v539_v13 = vrot.slane %v6098_v26, 2  ;;  %4704 = vmatmul.mubr.msk.bf16.vlgmr.msra.gmra.mxu1 %vm676_vm4, %v6144_v2  ;;  %v522_v15 = vadd.f32 %v461_v9, %v6116_v39  ;;  %v541_v16 = vrot.slane %v406_v41, 2  ;;  %v6216_v9 = vld [vmem:[%s6080_s21 + $0x34] sm:$0xf]  ;;  %s5391_s14 = smul.u32 6, %s8064_s22 }
  0x23   : > { %v543_v17 = vrot.slane %v6104_v29, 2  ;;  %v544_v18 = vrot.slane %v6109_v34, 2  ;;  %1778 = vmatpush1.bf16.msra.mxu1 %v5436_v62  ;;  %v546_v21 = vrot.slane %v407_v42, 2  ;;  %v548_v22 = vrot.slane %v390_v38, 2  ;;  %1163 = vmatprep.mubr.bf16.mxu1 %v5981_v3  ;;  %s5287_s27 = sshll.u32 %s6920_s24, 3 }
  0x24   : > { %v540_v20 = vsel %vm537_vm5, %v538_v11, %v539_v13  ;;  %v549_v23 = vrot.slane %v6116_v39, 2  ;;  %v542_v25 = vsel %vm537_vm5, %v539_v13, %v541_v16  ;;  %v551_v27 = vrot.slane %v408_v43, 2  ;;  %1779 = vmatprep.subr.bf16.mxu1 %v5441_v8  ;;  %s347_s16 = sadd.s32 %s5392_s20, %s5391_s14  ;;  %s6963_s22 = scalar_lea.vmem %s6322_s18, %s5287_s27 }
  0x25   : > { %v545_v26 = vsel %vm537_vm5, %v543_v17, %v544_v18  ;;  %v608_v29 = vadd.f32 %v540_v20, %v517_v1  ;;  %v547_v32 = vsel %vm537_vm5, %v544_v18, %v546_v21  ;;  %v609_v35 = vadd.f32 %v542_v25, %v518_v4  ;;  %v6212_v4 = vld [vmem:[%s6080_s21 + $0x30] sm:$0xf]  ;;  %s4682_s20 = sshll.u32 %s347_s16, 3  ;;  %s5289_s14 = sadd.s32 96, %s6239_s13 }
  0x26   : > { %v550_v34 = vsel %vm537_vm5, %v548_v22, %v549_v23  ;;  %v610_v36 = vadd.f32 %v545_v26, %v519_v6  ;;  %v552_v38 = vsel %vm537_vm5, %v549_v23, %v551_v27  ;;  %v611_v39 = vadd.f32 %v547_v32, %v520_v7  ;;  %v5448_v25 = vld [vmem:[%s7996_s4 + $0x130] ss:$8 sps:$4 sm:$0xff]   ;;  %v5453_v32 = vld [vmem:[%s7996_s4 + $0x124] ss:$8 sps:$4 sm:$0xff]   ;;  %s4009_s13 = sshra.s32 %s5289_s14, 3 }
  0x27   : > { %v6183_v40 = vadd.f32 %v550_v34, %v521_v10  ;;  %v392_v41 = vunpack.c.l.bf16 %v6169_v24  ;;  %v6186_v42 = vadd.f32 %v552_v38, %v522_v15  ;;  %v393_v45 = vunpack.c.l.bf16 %v6175_v30  ;;  %1780 = vmatpush1.bf16.msra.mxu1 %v5439_v14  ;;  %v5450_v10 = vld [vmem:[%s7996_s4 + $0x134] ss:$8 sps:$4 sm:$0xff]  }
  0x28   : > { %v628_v43 = vadd.f32 %v610_v36, %v608_v29  ;;  %v409_v46 = vunpack.c.l.bf16 %v6178_v31  ;;  %v629_v48 = vadd.f32 %v611_v39, %v609_v35  ;;  %1781 = vmatprep.subr.bf16.mxu1 %v5444_v19  ;;  %v6202_v60 = vsel %vm701_vm0, %v6078_v12, 0  ;;  %v6231_v19 = vld [vmem:[%s6080_s21 + $0x38] sm:$0x1]  ;;  %v6244_v29 = vld [vmem:[%s6080_s21 + $0x3c] sm:$0xf] }
  0x29   : > { %v630_v49 = vadd.f32 %v6183_v40, %v610_v36  ;;  %v462_v50 = vrot.slane %v392_v41, 1  ;;  %v553_v51 = vrot.slane %v392_v41, 2  ;;  %v631_v53 = vadd.f32 %v6186_v42, %v611_v39  ;;  %v6251_v39 = vld [vmem:[%s6080_s21 + $0x40] sm:$0xf] }
  0x2a   : > { %v644_v54 = vadd.f32 %v628_v43, %v6183_v40  ;;  %v463_v55 = vrot.slane %v393_v45, 1  ;;  %v465_v56 = vrot.slane %v409_v46, 1  ;;  %v645_v57 = vadd.f32 %v629_v48, %v6186_v42 }
  0x2b   : > { %v554_v58 = vrot.slane %v393_v45, 2  ;;  %v556_v59 = vrot.slane %v409_v46, 2  ;;  %v862_v0 = vshrl.u32 %v6102_v28, 16  ;;  %v865_v1 = vshll.u32 %v6102_v28, 16  ;;  %1782 = vmatpush1.bf16.msra.mxu1 %v5442_v47  ;;  %v5468_v47 = vld [vmem:[%s7996_s4 + $0x74] ss:$8 sps:$4 sm:$0xff]  }
  0x2c   : > { %v464_v62 = vsel %vm446_vm3, %v462_v50, %v463_v55  ;;  %v466_v63 = vsel %vm446_vm3, %v463_v55, %v465_v56  ;;  %v660_v6 = vpack.c.bf16 %v645_v57, %v644_v54  ;;  %1783 = vmatprep.subr.bf16.mxu1 %v5447_v52  ;;  %v871_v14 = vshll.u32 %v6107_v33, 16  ;;  %v6260_v52 = vld [vmem:[%s6080_s21 + $0x44] sm:$0x1] }
  0x2d   : > { %v523_v7 = vadd.f32 %v464_v62, %v392_v41  ;;  %v524_v12 = vadd.f32 %v466_v63, %v393_v45  ;;  %v555_v8 = vsel %vm537_vm5, %v553_v51, %v554_v58  ;;  %v557_v11 = vsel %vm537_vm5, %v554_v58, %v556_v59  ;;  %v5456_v58 = vld [vmem:[%s7996_s4 + $0x114] ss:$8 sps:$4 sm:$0xff]  }
  0x2e   : > { %v864_v28 = vrot.slane %v862_v0, 4  ;;  %v867_v13 = vrot.slane %v865_v1, 5  ;;  %5321 = vmatprep.mubr.msk.bf16.mxu0 %vm676_vm4, %v660_v6  ;;  %v875_v17 = vshrl.u32 %v6107_v33, 16  ;;  %v881_v18 = vshll.u32 %v6112_v37, 16 }
  0x2f   : > { %v6224_v15 = vadd.f32 %v555_v8, %v523_v7  ;;  %v6226_v16 = vadd.f32 %v557_v11, %v524_v12  ;;  %v873_v21 = vrot.slane %v871_v14, 5  ;;  %v394_v22 = vunpack.c.l.bf16 %v6212_v4  ;;  %1784 = vmatpush1.bf16.msra.mxu1 %v5445_v61  ;;  %v5459_v14 = vld [vmem:[%s7996_s4 + $0x104] ss:$8 sps:$4 sm:$0xff]  }
  0x30   : > { %v868_v20 = vor.u32 %v867_v13, %v864_v28  ;;  %v395_v23 = vunpack.c.l.bf16 %v6216_v9  ;;  %v877_v26 = vrot.slane %v875_v17, 4  ;;  %v883_v27 = vrot.slane %v881_v18, 5  ;;  %1785 = vmatprep.subr.bf16.mxu1 %v5450_v10 }
  0x31   : > { %v646_v33 = vadd.f32 %v630_v49, %v6224_v15  ;;  %v647_v37 = vadd.f32 %v631_v53, %v6226_v16  ;;  %v410_v35 = vunpack.c.l.bf16 %v6231_v19  ;;  %v467_v36 = vrot.slane %v394_v22, 1  ;;  %v5451_v53 = vld [vmem:[%s7996_s4 + $0x120] ss:$8 sps:$4 sm:$0xff]  }
  0x32   : > { %v869_v34 = vrot.slane %v868_v20, 4  ;;  %v468_v38 = vrot.slane %v395_v23, 1  ;;  %v878_v43 = vor.u32 %v877_v26, %v873_v21  ;;  %v558_v45 = vrot.slane %v394_v22, 2  ;;  %v6314_v26 = vld [vmem:[%s6080_s21 + $0x4c] sm:$0xf] }
  0x33   : > { %v661_v41 = vpack.c.bf16 %v647_v37, %v646_v33  ;;  %v559_v46 = vrot.slane %v395_v23, 2  ;;  %v470_v50 = vrot.slane %v410_v35, 1  ;;  %v561_v51 = vrot.slane %v410_v35, 2  ;;  %1786 = vmatpush1.bf16.msra.mxu1 %v5448_v25 }
  0x34   : > { %v874_v48 = vsel %vm6122_vm6, %v869_v34, %v873_v21  ;;  %v469_v49 = vsel %vm446_vm3, %v467_v36, %v468_v38  ;;  %v879_v54 = vrot.slane %v878_v43, 4  ;;  %v632_v57 = vadd.f32 %v6224_v15, %v6183_v40  ;;  %1787 = vmatprep.subr.bf16.mxu1 %v5453_v32 }
  0x35   : > { %5322 = vmatmul.mubr.msk.bf16.vlgmr.msra.gmra.mxu0 %vm676_vm4, %v661_v41  ;;  %v525_v55 = vadd.f32 %v469_v49, %v394_v22  ;;  %v560_v56 = vsel %vm537_vm5, %v558_v45, %v559_v46  ;;  %v471_v59 = vsel %vm446_vm3, %v468_v38, %v470_v50  ;;  %v562_v61 = vsel %vm537_vm5, %v559_v46, %v561_v51  ;;  %v6305_v22 = vld [vmem:[%s6080_s21 + $0x48] sm:$0xf]  ;;  %v5462_v45 = vld [vmem:[%s7996_s4 + $0x1f4] ss:$8 sps:$4 sm:$0xff]  }
  0x36   : > { %5338 = vmatpush3.bf16.msra.mxu0 %v6202_v60  ;;  %v633_v62 = vadd.f32 %v6226_v16, %v6186_v42  ;;  %v396_v63 = vunpack.c.l.bf16 %v6244_v29  ;;  %v884_v40 = vsel %vm6122_vm6, %v879_v54, %v883_v27  ;;  %v526_v0 = vadd.f32 %v471_v59, %v395_v23  ;;  %v5454_v42 = vld [vmem:[%s7996_s4 + $0x110] ss:$8 sps:$4 sm:$0xff]  }
  0x37   : > { %v6281_v1 = vadd.f32 %v560_v56, %v525_v55  ;;  %v397_v6 = vunpack.c.l.bf16 %v6251_v39  ;;  %2130 = vmatprep.subr.bf16.mxu0 %v5468_v47  ;;  %v6285_v60 = vcombine.low %v874_v48, %v884_v40  ;;  %v411_v7 = vunpack.c.l.bf16 %v6260_v52  ;;  %1788 = vmatpush1.bf16.msra.mxu1 %v5451_v53  ;;  %v6317_v27 = vld [vmem:[%s6080_s21 + $0x50] sm:$0x1] }
  0x38   : > { %v472_v12 = vrot.slane %v396_v63, 1  ;;  %v563_v8 = vrot.slane %v396_v63, 2  ;;  %v6293_v10 = vadd.f32 %v562_v61, %v526_v0  ;;  %1789 = vmatprep.subr.bf16.mxu1 %v5456_v58  ;;  %v886_v21 = vshrl.u32 %v6169_v24, 16 }
  0x39   : > { %v648_v11 = vadd.f32 %v632_v57, %v6281_v1  ;;  %v473_v28 = vrot.slane %v397_v6, 1  ;;  %v564_v13 = vrot.slane %v397_v6, 2  ;;  %4705 = vmatmul.mubr.msk.bf16.gmra.mxu1 %vm676_vm4, %v6285_v60  ;;  %v475_v17 = vrot.slane %v411_v7, 1 }
  0x3a   : > { %v566_v18 = vrot.slane %v411_v7, 2  ;;  %v634_v20 = vadd.f32 %v6281_v1, %v6224_v15  ;;  %v649_v23 = vadd.f32 %v633_v62, %v6293_v10  ;;  %v635_v37 = vadd.f32 %v6293_v10, %v6226_v16  ;;  %1173 = vmatprep.mubr.bf16.mxu1 %v5981_v3  ;;  %v5457_v16 = vld [vmem:[%s7996_s4 + $0x100] ss:$8 sps:$4 sm:$0xff]   ;;  %v5465_v62 = vld [vmem:[%s7996_s4 + $0x1e4] ss:$8 sps:$4 sm:$0xff]  }
  0x3b   : > { %v474_v25 = vsel %vm446_vm3, %v472_v12, %v473_v28  ;;  %v565_v33 = vsel %vm537_vm5, %v563_v8, %v564_v13  ;;  %v476_v15 = vsel %vm446_vm3, %v473_v28, %v475_v17  ;;  %v888_v35 = vrot.slane %v886_v21, 4  ;;  %1790 = vmatpush1.bf16.msra.mxu1 %v5454_v42  ;;  %v6355_v28 = vld [vmem:[%s6080_s21 + $0x58] sm:$0xf]  ;;  %v5463_v21 = vld [vmem:[%s7996_s4 + $0x1e0] ss:$8 sps:$4 sm:$0xff]  }
  0x3c   : > { %v527_v32 = vadd.f32 %v474_v25, %v396_v63  ;;  %v567_v34 = vsel %vm537_vm5, %v564_v13, %v566_v18  ;;  %v662_v36 = vpack.c.bf16 %v649_v23, %v648_v11  ;;  %v528_v38 = vadd.f32 %v476_v15, %v397_v6  ;;  %1791 = vmatprep.subr.bf16.mxu1 %v5459_v14  ;;  %v6352_v11 = vld [vmem:[%s6080_s21 + $0x54] sm:$0xf] }
  0x3d   : > { %v889_v41 = vshll.u32 %v6169_v24, 16  ;;  %v895_v43 = vshll.u32 %v6175_v30, 16  ;;  %v899_v47 = vshrl.u32 %v6175_v30, 16  ;;  %v905_v48 = vshll.u32 %v6178_v31, 16  ;;  %v5460_v30 = vld [vmem:[%s7996_s4 + $0x1f0] ss:$8 sps:$4 sm:$0xff]  }
  0x3e   : > { %v618_v46 = vadd.f32 %v565_v33, %v527_v32  ;;  %v398_v49 = vunpack.c.l.bf16 %v6305_v22  ;;  %5325 = vmatprep.mubr.msk.bf16.mxu0 %vm676_vm4, %v662_v36  ;;  %v619_v50 = vadd.f32 %v567_v34, %v528_v38  ;;  %v399_v53 = vunpack.c.l.bf16 %v6314_v26  ;;  %v5471_v15 = vld [vmem:[%s7996_s4 + $0x1d4] ss:$8 sps:$4 sm:$0xff]  }
  0x3f   : > { %v891_v24 = vrot.slane %v889_v41, 5  ;;  %v897_v51 = vrot.slane %v895_v43, 5  ;;  %v901_v55 = vrot.slane %v899_v47, 4  ;;  %v907_v56 = vrot.slane %v905_v48, 5  ;;  %1792 = vmatpush1.bf16.msra.mxu1 %v5457_v16 }
  0x40   : > { %v650_v54 = vadd.f32 %v634_v20, %v618_v46  ;;  %v412_v57 = vunpack.c.l.bf16 %v6317_v27  ;;  %v651_v31 = vadd.f32 %v635_v37, %v619_v50  ;;  %v477_v59 = vrot.slane %v398_v49, 1  ;;  %1793 = vmatprep.subr.bf16.mxu1 %v5462_v45  ;;  %v6360_v20 = vld [vmem:[%s6080_s21 + $0x5c] sm:$0x1] }
  0x41   : > { %v892_v58 = vor.u32 %v891_v24, %v888_v35  ;;  %v478_v61 = vrot.slane %v399_v53, 1  ;;  %v902_v63 = vor.u32 %v901_v55, %v897_v51  ;;  %v568_v0 = vrot.slane %v398_v49, 2 }
  0x42   : > { %v480_v40 = vrot.slane %v412_v57, 1  ;;  %v569_v6 = vrot.slane %v399_v53, 2  ;;  %v663_v7 = vpack.c.bf16 %v651_v31, %v650_v54  ;;  %v571_v42 = vrot.slane %v412_v57, 2 }
  0x43   : > { %v893_v12 = vrot.slane %v892_v58, 4  ;;  %v479_v8 = vsel %vm446_vm3, %v477_v59, %v478_v61  ;;  %v903_v13 = vrot.slane %v902_v63, 4  ;;  %1794 = vmatpush2.bf16.msra.mxu1 %v5460_v30  ;;  %v636_v37 = vadd.f32 %v618_v46, %v6281_v1  ;;  %v6401_v30 = vld [vmem:[%s6080_s21 + $0x60] sm:$0xf]  ;;  %v6410_v63 = vld [vmem:[%s6080_s21 + $0x68] sm:$0x1] }
  0x44   : > { %v481_v14 = vsel %vm446_vm3, %v478_v61, %v480_v40  ;;  %v529_v17 = vadd.f32 %v479_v8, %v398_v49  ;;  %v570_v18 = vsel %vm537_vm5, %v568_v0, %v569_v6  ;;  %5326 = vmatmul.mubr.msk.bf16.gmra.mxu0 %vm676_vm4, %v663_v7  ;;  %v572_v33 = vsel %vm537_vm5, %v569_v6, %v571_v42 }
  0x45   : > { %v898_v23 = vsel %vm6122_vm6, %v893_v12, %v897_v51  ;;  %v530_v25 = vadd.f32 %v481_v14, %v399_v53  ;;  %v908_v32 = vsel %vm6122_vm6, %v903_v13, %v907_v56  ;;  %v637_v35 = vadd.f32 %v619_v50, %v6293_v10  ;;  %1795 = vmatprep.subr.bf16.mxu1 %v5465_v62  ;;  %v5469_v10 = vld [vmem:[%s7996_s4 + $0x1d0] ss:$8 sps:$4 sm:$0xff]   ;;  %v6407_v62 = vld [vmem:[%s6080_s21 + $0x64] sm:$0xf]  ;;  %v5483_v13 = vld [vmem:[%s7996_s4 + $0x1b4] ss:$8 sps:$4 sm:$0xff]  }
  0x46   : > { %v6375_v34 = vadd.f32 %v570_v18, %v529_v17  ;;  %v400_v16 = vunpack.c.l.bf16 %v6352_v11  ;;  %v6379_v36 = vcombine.low %v898_v23, %v908_v32  ;;  %v401_v1 = vunpack.c.l.bf16 %v6355_v28 }
  0x47   : > { %v6381_v38 = vadd.f32 %v572_v33, %v530_v25  ;;  %v413_v41 = vunpack.c.l.bf16 %v6360_v20  ;;  %1796 = vmatpush2.bf16.msra.mxu1 %v5463_v21  ;;  %v910_v56 = vshrl.u32 %v6212_v4, 16  ;;  %v913_v57 = vshll.u32 %v6212_v4, 16  ;;  %v5475_v4 = vld [vmem:[%s7996_s4 + $0x1c0] ss:$8 sps:$4 sm:$0xff]  }
  0x48   : > { %v652_v43 = vadd.f32 %v636_v37, %v6375_v34  ;;  %v482_v45 = vrot.slane %v400_v16, 1  ;;  %v573_v47 = vrot.slane %v400_v16, 2  ;;  %v638_v48 = vadd.f32 %v6375_v34, %v618_v46  ;;  %4706 = vmatmul.mubr.msk.bf16.gmra.mxu1 %vm676_vm4, %v6379_v36  ;;  %1797 = vmatprep.subr.bf16.mxu1 %v5471_v15  ;;  %v5477_v46 = vld [vmem:[%s7996_s4 + $0x1c4] ss:$8 sps:$4 sm:$0xff]  }
  0x49   : > { %v653_v49 = vadd.f32 %v637_v35, %v6381_v38  ;;  %v483_v24 = vrot.slane %v401_v1, 1  ;;  %v485_v51 = vrot.slane %v413_v41, 1  ;;  %v574_v53 = vrot.slane %v401_v1, 2  ;;  %1183 = vmatprep.mubr.bf16.mxu1 %v5981_v3  ;;  %v383_v35 = vld [vmem:[%s6080_s21 + $0x6c] sm:$0xff]  }
  0x4a   : > { %v576_v54 = vrot.slane %v413_v41, 2  ;;  %v639_v55 = vadd.f32 %v6381_v38, %v619_v50  ;;  %v912_v6 = vrot.slane %v910_v56, 4  ;;  %v915_v7 = vrot.slane %v913_v57, 5 }
  0x4b   : > { %v664_v31 = vpack.c.bf16 %v653_v49, %v652_v43  ;;  %v484_v58 = vsel %vm446_vm3, %v482_v45, %v483_v24  ;;  %v486_v59 = vsel %vm446_vm3, %v483_v24, %v485_v51  ;;  %v575_v61 = vsel %vm537_vm5, %v573_v47, %v574_v53  ;;  %1798 = vmatpush2.bf16.msra.mxu1 %v5469_v10  ;;  %v5481_v45 = vld [vmem:[%s7996_s4 + $0x1b0] ss:$8 sps:$4 sm:$0xff]   ;;  %v5489_v24 = vld [vmem:[%s7996_s4 + $0x1a4] ss:$8 sps:$4 sm:$0xff]  }
  0x4c   : > { %v531_v50 = vadd.f32 %v484_v58, %v400_v16  ;;  %v532_v40 = vadd.f32 %v486_v59, %v401_v1  ;;  %v577_v0 = vsel %vm537_vm5, %v574_v53, %v576_v54  ;;  %v919_v12 = vshll.u32 %v6216_v9, 16  ;;  %1799 = vmatprep.subr.bf16.mxu1 %v5477_v46 }
  0x4d   : > { %5329 = vmatprep.mubr.msk.bf16.mxu0 %vm676_vm4, %v664_v31  ;;  %v923_v8 = vshrl.u32 %v6216_v9, 16  ;;  %v929_v42 = vshll.u32 %v6231_v19, 16  ;;  %v402_v18 = vunpack.c.l.bf16 %v6401_v30  ;;  %v403_v21 = vunpack.c.l.bf16 %v6407_v62 }
  0x4e   : > { %v622_v14 = vadd.f32 %v575_v61, %v531_v50  ;;  %v623_v17 = vadd.f32 %v577_v0, %v532_v40  ;;  %v916_v23 = vor.u32 %v915_v7, %v912_v6  ;;  %v921_v25 = vrot.slane %v919_v12, 5  ;;  %v5495_v12 = vld [vmem:[%s7996_s4 + $0x194] ss:$8 sps:$4 sm:$0xff]  }
  0x4f   : > { %v925_v33 = vrot.slane %v923_v8, 4  ;;  %v931_v37 = vrot.slane %v929_v42, 5  ;;  %v414_v32 = vunpack.c.l.bf16 %v6410_v63  ;;  %v487_v19 = vrot.slane %v402_v18, 1  ;;  %1800 = vmatpush2.bf16.msra.mxu1 %v5475_v4 }
  0x50   : > { %v654_v15 = vadd.f32 %v638_v48, %v622_v14  ;;  %v655_v9 = vadd.f32 %v639_v55, %v623_v17  ;;  %v917_v16 = vrot.slane %v916_v23, 4  ;;  %v488_v41 = vrot.slane %v403_v21, 1  ;;  %1801 = vmatprep.subr.bf16.mxu1 %v5483_v13  ;;  %v385_v55 = vld [vmem:[%s6080_s21 + $0x74] sm:$0x1]  ;;  %s5284_s21 = sshll.u32 %s3127_s12, 3  ;;  %s5290_s12 = sshll.u32 %s4009_s13, 3 }
  0x51   : > { %v926_v1 = vor.u32 %v925_v33, %v921_v25  ;;  %v578_v43 = vrot.slane %v402_v18, 2  ;;  %v490_v10 = vrot.slane %v414_v32, 1  ;;  %v579_v49 = vrot.slane %v403_v21, 2  ;;  %s6796_s15 = scalar_lea.vmem %s6322_s18, %s5284_s21  ;;  %s7048_s28 = scalar_lea.vmem %s6322_s18, %s5290_s12 }
  0x52   : > { %v665_v47 = vpack.c.bf16 %v655_v9, %v654_v15  ;;  %v581_v48 = vrot.slane %v414_v32, 2  ;;  %v922_v51 = vsel %vm6122_vm6, %v917_v16, %v921_v25  ;;  %v489_v46 = vsel %vm446_vm3, %v487_v19, %v488_v41  ;;  %v5493_v32 = vld [vmem:[%s7996_s4 + $0x190] ss:$8 sps:$4 sm:$0xff]  }
  0x53   : > { %v927_v53 = vrot.slane %v926_v1, 4  ;;  %v640_v54 = vadd.f32 %v622_v14, %v6375_v34  ;;  %v491_v56 = vsel %vm446_vm3, %v488_v41, %v490_v10  ;;  %v533_v57 = vadd.f32 %v489_v46, %v402_v18  ;;  %1802 = vmatpush2.bf16.msra.mxu1 %v5481_v45  ;;  %v5487_v34 = vld [vmem:[%s7996_s4 + $0x1a0] ss:$8 sps:$4 sm:$0xff]  }
  0x54   : > { %5330 = vmatmul.mubr.msk.bf16.gmra.mxu0 %vm676_vm4, %v665_v47  ;;  %v580_v31 = vsel %vm537_vm5, %v578_v43, %v579_v49  ;;  %v582_v58 = vsel %vm537_vm5, %v579_v49, %v581_v48  ;;  %v534_v61 = vadd.f32 %v491_v56, %v403_v21  ;;  %v641_v50 = vadd.f32 %v623_v17, %v6381_v38 }
  0x55   : > { %v932_v59 = vsel %vm6122_vm6, %v927_v53, %v931_v37  ;;  %v404_v40 = vunpack.c.l.bf16 %v383_v35  ;;  %v624_v6 = vadd.f32 %v580_v31, %v533_v57  ;;  %v405_v4 = vunpack.c.h.bf16 %v383_v35  ;;  %1803 = vmatprep.subr.bf16.mxu1 %v5489_v24 }
  0x56   : > { %v6448_v0 = vcombine.low %v922_v51, %v932_v59  ;;  %v415_v7 = vunpack.c.l.bf16 %v385_v55  ;;  %v625_v8 = vadd.f32 %v582_v58, %v534_v61  ;;  %v934_v38 = vshrl.u32 %v6244_v29, 16 }
  0x57   : > { %v492_v42 = vrot.slane %v404_v40, 1  ;;  %v583_v13 = vrot.slane %v404_v40, 2  ;;  %v656_v18 = vadd.f32 %v640_v54, %v624_v6  ;;  %v493_v21 = vrot.slane %v405_v4, 1  ;;  %1804 = vmatpush2.bf16.msra.mxu1 %v5487_v34  ;;  %v5499_v54 = vld [vmem:[%s7996_s4 + $0x180] ss:$8 sps:$4 sm:$0xff]  }
  0x58   : > { %4707 = vmatmul.mubr.msk.bf16.gmra.mxu1 %vm676_vm4, %v6448_v0  ;;  %v495_v23 = vrot.slane %v415_v7, 1  ;;  %v584_v25 = vrot.slane %v405_v4, 2  ;;  %v657_v33 = vadd.f32 %v641_v50, %v625_v8  ;;  %v586_v37 = vrot.slane %v415_v7, 2  ;;  %1805 = vmatprep.subr.bf16.mxu1 %v5495_v12 }
  0x59   : > { %v642_v15 = vadd.f32 %v624_v6, %v622_v14  ;;  %v643_v9 = vadd.f32 %v625_v8, %v623_v17  ;;  %1193 = vmatprep.mubr.bf16.mxu1 %v5981_v3  ;;  %v494_v19 = vsel %vm446_vm3, %v492_v42, %v493_v21  ;;  %v936_v1 = vrot.slane %v934_v38, 4  ;;  %v5501_v14 = vld [vmem:[%s7996_s4 + $0x184] ss:$8 sps:$4 sm:$0xff]  }
  0x5a   : > { %v496_v35 = vsel %vm446_vm3, %v493_v21, %v495_v23  ;;  %v585_v16 = vsel %vm537_vm5, %v583_v13, %v584_v25  ;;  %v666_v17 = vpack.c.bf16 %v657_v33, %v656_v18  ;;  %v535_v41 = vadd.f32 %v494_v19, %v404_v40 }
  0x5b   : > { %v536_v43 = vadd.f32 %v496_v35, %v405_v4  ;;  %v587_v45 = vsel %vm537_vm5, %v584_v25, %v586_v37  ;;  %v937_v47 = vshll.u32 %v6244_v29, 16  ;;  %v943_v10 = vshll.u32 %v6251_v39, 16  ;;  %1806 = vmatpush2.bf16.msra.mxu1 %v5493_v32  ;;  %v5513_v29 = vld [vmem:[%s7996_s4 + $0x274] ss:$8 sps:$4 sm:$0xff]  }
  0x5c   : > { %v947_v49 = vshrl.u32 %v6251_v39, 16  ;;  %v953_v48 = vshll.u32 %v6260_v52, 16  ;;  %5333 = vmatprep.mubr.msk.bf16.mxu0 %vm676_vm4, %v666_v17  ;;  %v626_v24 = vadd.f32 %v585_v16, %v535_v41  ;;  %v958_v53 = vshrl.u32 %v6305_v22, 16  ;;  %1807 = vmatprep.subr.bf16.mxu1 %v5501_v14  ;;  %v5466_v14 = vld [vmem:[%s7996_s4 + $0x70] ss:$8 sps:$4 sm:$0xff]  }
  0x5d   : > { %v627_v51 = vadd.f32 %v587_v45, %v536_v43  ;;  %v961_v46 = vshll.u32 %v6305_v22, 16  ;;  %v939_v39 = vrot.slane %v937_v47, 5  ;;  %v945_v55 = vrot.slane %v943_v10, 5  ;;  %v5472_v10 = vld [vmem:[%s7996_s4 + $0x60] ss:$8 sps:$4 sm:$0xff]  }
  0x5e   : > { %v949_v52 = vrot.slane %v947_v49, 4  ;;  %v955_v56 = vrot.slane %v953_v48, 5  ;;  %v658_v57 = vadd.f32 %v642_v15, %v626_v24  ;;  %v960_v58 = vrot.slane %v958_v53, 4 }
  0x5f   : > { %v659_v31 = vadd.f32 %v643_v9, %v627_v51  ;;  %v963_v59 = vrot.slane %v961_v46, 5  ;;  %v940_v61 = vor.u32 %v939_v39, %v936_v1  ;;  %v967_v50 = vshll.u32 %v6314_v26, 16  ;;  %1808 = vmatpush2.bf16.msra.mxu1 %v5499_v54  ;;  %v5478_v54 = vld [vmem:[%s7996_s4 + $0x50] ss:$8 sps:$4 sm:$0xff]  }
  0x60   : > { %v950_v22 = vor.u32 %v949_v52, %v945_v55  ;;  %v971_v40 = vshrl.u32 %v6314_v26, 16  ;;  %v977_v4 = vshll.u32 %v6317_v27, 16  ;;  %v982_v7 = vshrl.u32 %v6352_v11, 16  ;;  %2539 = vmatprep.subr.bf16.mxu1 %v5513_v29  ;;  %v5486_v52 = vld [vmem:[%s7996_s4 + $0x44] ss:$8 sps:$4 sm:$0xff]  }
  0x61   : > { %v667_v34 = vpack.c.bf16 %v659_v31, %v658_v57  ;;  %v964_v6 = vor.u32 %v963_v59, %v960_v58  ;;  %v941_v12 = vrot.slane %v940_v61, 4  ;;  %v969_v42 = vrot.slane %v967_v50, 5  ;;  %v5484_v57 = vld [vmem:[%s7996_s4 + $0x40] ss:$8 sps:$4 sm:$0xff]   ;;  %v5498_v50 = vld [vmem:[%s7996_s4 + $0x24] ss:$8 sps:$4 sm:$0xff]  }
  0x62   : > { %v951_v8 = vrot.slane %v950_v22, 4  ;;  %v973_v13 = vrot.slane %v971_v40, 4  ;;  %v979_v18 = vrot.slane %v977_v4, 5  ;;  %v984_v21 = vrot.slane %v982_v7, 4  ;;  %v5576_v4 = vld [vmem:[%s6488_s23 + $0x4] ss:$8 sps:$4 sm:$0xff]  }
  0x63   : > { %5334 = vmatmul.mubr.msk.bf16.gmra.mxu0 %vm676_vm4, %v667_v34  ;;  %v965_v38 = vrot.slane %v964_v6, 4  ;;  %v985_v26 = vshll.u32 %v6352_v11, 16  ;;  %v946_v27 = vsel %vm6122_vm6, %v941_v12, %v945_v55  ;;  %v991_v33 = vshll.u32 %v6355_v28, 16  ;;  %v5496_v34 = vld [vmem:[%s7996_s4 + $0x20] ss:$8 sps:$4 sm:$0xff]  }
  0x64   : > { %v956_v23 = vsel %vm6122_vm6, %v951_v8, %v955_v56  ;;  %5339 = vmatprep.mubr.msk.bf16.mxu0 %vm676_vm4, %v6144_v2  ;;  %v974_v25 = vor.u32 %v973_v13, %v969_v42  ;;  %v995_v9 = vshrl.u32 %v6355_v28, 16  ;;  %v1001_v1 = vshll.u32 %v6360_v20, 16  ;;  %v5474_v20 = vld [vmem:[%s7996_s4 + $0x64] ss:$8 sps:$4 sm:$0xff]   ;;  %v5502_v6 = vld [vmem:[%s7996_s4 + $0x10] ss:$8 sps:$4 sm:$0xff]  }
  0x65   : > { %v4699_v37 = vcombine.low %v946_v27, %v956_v23  ;;  %v987_v15 = vrot.slane %v985_v26, 5  ;;  %v970_v11 = vsel %vm6122_vm6, %v965_v38, %v969_v42  ;;  %v993_v19 = vrot.slane %v991_v33, 5  ;;  %v5510_v7 = vld [vmem:[%s7996_s4 + $0x4] ss:$8 sps:$4 sm:$0xff]   ;;  %v5505_v12 = vld [vmem:[%s6339_s25] ss:$8 sps:$4 sm:$0xff]  }
  0x66   : > { %v975_v32 = vrot.slane %v974_v25, 4  ;;  %v997_v16 = vrot.slane %v995_v9, 4  ;;  %v1006_v2 = vshrl.u32 %v6401_v30, 16  ;;  %v1009_v17 = vshll.u32 %v6401_v30, 16  ;;  %v5508_v8 = vld [vmem:[%s7996_s4] ss:$8 sps:$4 sm:$0xff]  }
  0x67   : > { %4708 = vmatmul.mubr.msk.bf16.gmra.mxu1 %vm676_vm4, %v4699_v37  ;;  %v988_v35 = vor.u32 %v987_v15, %v984_v21  ;;  %v1015_v41 = vshll.u32 %v6407_v62, 16  ;;  %v1019_v43 = vshrl.u32 %v6407_v62, 16  ;;  %v1003_v48 = vrot.slane %v1001_v1, 5  ;;  %v5511_v42 = vld [vmem:[%s7996_s4 + $0x270] ss:$8 sps:$4 sm:$0xff]  }
  0x68   : > { %1203 = vmatprep.mubr.bf16.mxu1 %v5981_v3  ;;  %v980_v28 = vsel %vm6122_vm6, %v975_v32, %v979_v18  ;;  %v998_v45 = vor.u32 %v997_v16, %v993_v19  ;;  %v1008_v30 = vrot.slane %v1006_v2, 4  ;;  %v1011_v51 = vrot.slane %v1009_v17, 5  ;;  %v5516_v13 = vld [vmem:[%s7996_s4 + $0xf4] ss:$8 sps:$4 sm:$0xff]   ;;  %v5519_v38 = vld [vmem:[%s7996_s4 + $0x264] ss:$8 sps:$4 sm:$0xff]  }
  0x69   : > { %v4700_v47 = vcombine.low %v970_v11, %v980_v28  ;;  %v989_v49 = vrot.slane %v988_v35, 4  ;;  %v1017_v62 = vrot.slane %v1015_v41, 5  ;;  %v1021_v53 = vrot.slane %v1019_v43, 4  ;;  %v5520_v18 = vld [vmem:[%s6339_s25 + $0x14] ss:$8 sps:$4 sm:$0xff]  }
  0x6a   : > { %v999_v24 = vrot.slane %v998_v45, 4  ;;  %v1012_v29 = vor.u32 %v1011_v51, %v1008_v30  ;;  %v1025_v55 = vshll.u32 %v6410_v63, 16  ;;  %v5492_v63 = vld [vmem:[%s7996_s4 + $0x34] ss:$8 sps:$4 sm:$0xff]   ;;  %v5514_v21 = vld [vmem:[%s7996_s4 + $0xf0] ss:$8 sps:$4 sm:$0xff]  }
  0x6b   : > { %5340 = vmatmul.mubr.msk.bf16.vlgmr.msra.gmra.mxu0 %vm676_vm4, %v6285_v60  ;;  %v5480_v60 = vld [vmem:[%s7996_s4 + $0x54] ss:$8 sps:$4 sm:$0xff]   ;;  %v994_v46 = vsel %vm6122_vm6, %v989_v49, %v993_v19  ;;  %v1022_v39 = vor.u32 %v1021_v53, %v1017_v62  ;;  %v5517_v26 = vld [vmem:[%s7996_s4 + $0x260] ss:$8 sps:$4 sm:$0xff]   ;;  %v5525_v27 = vld [vmem:[%s7996_s4 + $0xe4] ss:$8 sps:$4 sm:$0xff]  }
  0x6c   : > { %2131 = vmatpush1.bf16.msra.mxu0 %v5466_v14  ;;  %5343 = vmatprep.mubr.msk.bf16.mxu0 %vm676_vm4, %v6379_v36  ;;  %v1004_v36 = vsel %vm6122_vm6, %v999_v24, %v1003_v48  ;;  %v1013_v31 = vrot.slane %v1012_v29, 4  ;;  %v1027_v59 = vrot.slane %v1025_v55, 5  ;;  %v5528_v23 = vld [vmem:[%s7996_s4 + $0x254] ss:$8 sps:$4 sm:$0xff]   ;;  %v5522_v25 = vld [vmem:[%s6339_s25 + $0x10] ss:$8 sps:$4 sm:$0xff]  }
  0x6d   : > { %2132 = vmatprep.subr.bf16.mxu0 %v5474_v20  ;;  %v4701_v56 = vcombine.low %v994_v46, %v1004_v36  ;;  %v1023_v58 = vrot.slane %v1022_v39, 4  ;;  %v5523_v33 = vld [vmem:[%s7996_s4 + $0xe0] ss:$8 sps:$4 sm:$0xff]   ;;  %v5531_v15 = vld [vmem:[%s7996_s4 + $0xd4] ss:$8 sps:$4 sm:$0xff]  }
  0x6e   : > { %v1018_v61 = vsel %vm6122_vm6, %v1013_v31, %v1017_v62  ;;  %v5534_v9 = vld [vmem:[%s7996_s4 + $0x244] ss:$8 sps:$4 sm:$0xff]   ;;  %v5529_v32 = vld [vmem:[%s7996_s4 + $0xd0] ss:$8 sps:$4 sm:$0xff]   ;;  %v5532_v19 = vld [vmem:[%s7996_s4 + $0x240] ss:$8 sps:$4 sm:$0xff]  }
  0x6f   : > { %4709 = vmatmul.mubr.msk.bf16.gmra.mxu1 %vm676_vm4, %v4700_v47  ;;  %v1028_v22 = vsel %vm6122_vm6, %v1023_v58, %v1027_v59  ;;  %v5535_v11 = vld [vmem:[%s6339_s25 + $0x24] ss:$8 sps:$4 sm:$0xff]   ;;  %v5543_v16 = vld [vmem:[%s7996_s4 + $0x234] ss:$8 sps:$4 sm:$0xff]   ;;  %v5537_v1 = vld [vmem:[%s6339_s25 + $0x20] ss:$8 sps:$4 sm:$0xff]  }
  0x70   : > { %2133 = vmatpush1.bf16.msra.mxu0 %v5472_v10  ;;  %1213 = vmatprep.mubr.bf16.mxu1 %v5981_v3  ;;  %v4702_v40 = vcombine.low %v1018_v61, %v1028_v22  ;;  %v5540_v35 = vld [vmem:[%s7996_s4 + $0xc4] ss:$8 sps:$4 sm:$0xff]   ;;  %v5538_v2 = vld [vmem:[%s7996_s4 + $0xc0] ss:$8 sps:$4 sm:$0xff]   ;;  %v5541_v14 = vld [vmem:[%s7996_s4 + $0x230] ss:$8 sps:$4 sm:$0xff]  }
  0x71   : > { %2134 = vmatprep.subr.bf16.mxu0 %v5480_v60  ;;  %v5546_v28 = vld [vmem:[%s7996_s4 + $0xb4] ss:$8 sps:$4 sm:$0xff]   ;;  %v5549_v17 = vld [vmem:[%s7996_s4 + $0x224] ss:$8 sps:$4 sm:$0xff]   ;;  %v5544_v43 = vld [vmem:[%s7996_s4 + $0xb0] ss:$8 sps:$4 sm:$0xff]  }
  0x72   : > { %v5550_v41 = vld [vmem:[%s6339_s25 + $0x34] ss:$8 sps:$4 sm:$0xff]   ;;  %v5547_v20 = vld [vmem:[%s7996_s4 + $0x220] ss:$8 sps:$4 sm:$0xff]   ;;  %v5555_v45 = vld [vmem:[%s7996_s4 + $0xa4] ss:$8 sps:$4 sm:$0xff]  }
  0x73   : > { %5344 = vmatmul.mubr.msk.bf16.gmra.mxu0 %vm676_vm4, %v6448_v0  ;;  %v5490_v0 = vld [vmem:[%s7996_s4 + $0x30] ss:$8 sps:$4 sm:$0xff]   ;;  %v5553_v49 = vld [vmem:[%s7996_s4 + $0xa0] ss:$8 sps:$4 sm:$0xff]   ;;  %v5561_v30 = vld [vmem:[%s7996_s4 + $0x94] ss:$8 sps:$4 sm:$0xff]  }
  0x74   : > { %2135 = vmatpush1.bf16.msra.mxu0 %v5478_v54  ;;  %5347 = vmatprep.mubr.msk.bf16.mxu0 %vm676_vm4, %v4699_v37  ;;  %v5526_v37 = vld [vmem:[%s7996_s4 + $0x250] ss:$8 sps:$4 sm:$0xff]   ;;  %v5564_v24 = vld [vmem:[%s7996_s4 + $0x204] ss:$8 sps:$4 sm:$0xff]   ;;  %v5562_v53 = vld [vmem:[%s7996_s4 + $0x200] ss:$8 sps:$4 sm:$0xff]  }
  0x75   : > { %2136 = vmatprep.subr.bf16.mxu0 %v5486_v52  ;;  %v5552_v10 = vld [vmem:[%s6339_s25 + $0x30] ss:$8 sps:$4 sm:$0xff]   ;;  %v5565_v51 = vld [vmem:[%s6339_s25 + $0x44] ss:$8 sps:$4 sm:$0xff]   ;;  %v5573_v46 = vld [vmem:[%s7996_s4 + $0x2f4] ss:$8 sps:$4 sm:$0xff]  }
  0x76   : > { %v5556_v48 = vld [vmem:[%s7996_s4 + $0x210] ss:$8 sps:$4 sm:$0xff]   ;;  %v5570_v60 = vld [vmem:[%s7996_s4 + $0x84] ss:$8 sps:$4 sm:$0xff]   ;;  %v5567_v54 = vld [vmem:[%s6339_s25 + $0x40] ss:$8 sps:$4 sm:$0xff]  }
  0x77   : > { %4710 = vmatmul.mubr.msk.bf16.gmra.mxu1 %vm676_vm4, %v4701_v56  ;;  %v5559_v62 = vld [vmem:[%s7996_s4 + $0x90] ss:$8 sps:$4 sm:$0xff]   ;;  %v5568_v36 = vld [vmem:[%s7996_s4 + $0x80] ss:$8 sps:$4 sm:$0xff]   ;;  %v5579_v39 = vld [vmem:[%s7996_s4 + $0x2e4] ss:$8 sps:$4 sm:$0xff]  }
  0x78   : > { %2137 = vmatpush1.bf16.msra.mxu0 %v5484_v57  ;;  %1223 = vmatprep.mubr.bf16.mxu1 %v5981_v3  ;;  %v5507_v3 = vld [vmem:[%s6339_s25 + $0x4] ss:$8 sps:$4 sm:$0xff]   ;;  %v5571_v29 = vld [vmem:[%s7996_s4 + $0x2f0] ss:$8 sps:$4 sm:$0xff]   ;;  %v5582_v55 = vld [vmem:[%s7996_s4 + $0x374] ss:$8 sps:$4 sm:$0xff]  }
  0x79   : > { %2138 = vmatprep.subr.bf16.mxu0 %v5492_v63  ;;  %v5574_v52 = vld [vmem:[%s6488_s23] ss:$8 sps:$4 sm:$0xff]   ;;  %v5580_v31 = vld [vmem:[%s7996_s4 + $0x370] ss:$8 sps:$4 sm:$0xff]   ;;  %v5588_v58 = vld [vmem:[%s7996_s4 + $0x2d4] ss:$8 sps:$4 sm:$0xff]  }
  0x7a   : > { %v5577_v57 = vld [vmem:[%s7996_s4 + $0x2e0] ss:$8 sps:$4 sm:$0xff]   ;;  %v5591_v59 = vld [vmem:[%s7996_s4 + $0x364] ss:$8 sps:$4 sm:$0xff]   ;;  %v5585_v63 = vld [vmem:[%s6339_s25 + $0x50] ss:$8 sps:$4 sm:$0xff]  }
  0x7b   : > { %5348 = vmatmul.mubr.msk.bf16.gmra.mxu0 %vm676_vm4, %v4700_v47  ;;  %v5558_v47 = vld [vmem:[%s7996_s4 + $0x214] ss:$8 sps:$4 sm:$0xff]   ;;  %v5586_v61 = vld [vmem:[%s7996_s4 + $0x2d0] ss:$8 sps:$4 sm:$0xff]   ;;  %v5589_v22 = vld [vmem:[%s7996_s4 + $0x360] ss:$8 sps:$4 sm:$0xff]  }
  0x7c   : > { %2139 = vmatpush1.bf16.msra.mxu0 %v5490_v0  ;;  %5351 = vmatprep.mubr.msk.bf16.mxu0 %vm676_vm4, %v4701_v56  ;;  %v5583_v56 = vld [vmem:[%s6339_s25 + $0x54] ss:$8 sps:$4 sm:$0xff]  }
  0x7d   : > { %2140 = vmatprep.subr.bf16.mxu0 %v5498_v50  ;;  %v5592_v0 = vld [vmem:[%s6488_s23 + $0x14] ss:$8 sps:$4 sm:$0xff]   ;;  %v5597_v50 = vld [vmem:[%s7996_s4 + $0x2c4] ss:$8 sps:$4 sm:$0xff]  }
  0x7f   : > { %4711 = vmatmul.mubr.msk.bf16.gmra.mxu1 %vm676_vm4, %v4702_v40 }
  0x80   : > { %2141 = vmatpush1.bf16.msra.mxu0 %v5496_v34  ;;  %1809 = vmatprep.mubr.bf16.mxu1 %v5507_v3  ;;  %v5594_v34 = vld [vmem:[%s6488_s23 + $0x10] ss:$8 sps:$4 sm:$0xff]   ;;  %v5601_v3 = vld [vmem:[%s6339_s25 + $0x64] ss:$8 sps:$4 sm:$0xff]  }
  0x81   : > { %2142 = vmatprep.subr.bf16.mxu0 %v5504_v44  ;;  %v5595_v44 = vld [vmem:[%s7996_s4 + $0x2c0] ss:$8 sps:$4 sm:$0xff]  }
  0x83   : > { %5352 = vmatmul.mubr.msk.bf16.gmra.mxu0 %vm676_vm4, %v4702_v40  ;;  %v5600_v40 = vld [vmem:[%s7996_s4 + $0x354] ss:$8 sps:$4 sm:$0xff]  }
  0x84   : > { %2143 = vmatpush1.bf16.msra.mxu0 %v5502_v6  ;;  %2162 = vmatprep.mubr.bf16.mxu0 %v5576_v4  ;;  %v5598_v6 = vld [vmem:[%s7996_s4 + $0x350] ss:$8 sps:$4 sm:$0xff]   ;;  %v5606_v4 = vld [vmem:[%s7996_s4 + $0x2b4] ss:$8 sps:$4 sm:$0xff]  }
  0x85   : > { %2144 = vmatprep.subr.bf16.mxu0 %v5510_v7  ;;  %v5609_v7 = vld [vmem:[%s7996_s4 + $0x344] ss:$8 sps:$4 sm:$0xff]  }
  0x87   : > { %1810 = vmatmul.mubr.bf16.vlgmr.msra.gmra.mxu1 %v5505_v12  ;;  %v5603_v12 = vld [vmem:[%s6339_s25 + $0x60] ss:$8 sps:$4 sm:$0xff]  }
  0x88   : > { %2145 = vmatpush1.bf16.msra.mxu0 %v5508_v8  ;;  %2540 = vmatpush1.bf16.msra.mxu1 %v5511_v42  ;;  %v5610_v8 = vld [vmem:[%s6488_s23 + $0x24] ss:$8 sps:$4 sm:$0xff]   ;;  %v5604_v42 = vld [vmem:[%s7996_s4 + $0x2b0] ss:$8 sps:$4 sm:$0xff]  }
  0x89   : > { %2146 = vmatprep.subr.bf16.mxu0 %v5516_v13  ;;  %2541 = vmatprep.subr.bf16.mxu1 %v5519_v38  ;;  %v5607_v13 = vld [vmem:[%s7996_s4 + $0x340] ss:$8 sps:$4 sm:$0xff]   ;;  %v5615_v38 = vld [vmem:[%s7996_s4 + $0x2a4] ss:$8 sps:$4 sm:$0xff]  }
  0x8a   : > { %1819 = vmatprep.mubr.bf16.mxu1 %v5520_v18  ;;  %v5618_v18 = vld [vmem:[%s7996_s4 + $0x334] ss:$8 sps:$4 sm:$0xff]  }
  0x8c   : > { %2147 = vmatpush2.bf16.msra.mxu0 %v5514_v21  ;;  %2542 = vmatpush1.bf16.msra.mxu1 %v5517_v26  ;;  %v5612_v21 = vld [vmem:[%s6488_s23 + $0x20] ss:$8 sps:$4 sm:$0xff]   ;;  %v5619_v26 = vld [vmem:[%s6339_s25 + $0x74] ss:$8 sps:$4 sm:$0xff]  }
  0x8d   : > { %2148 = vmatprep.subr.bf16.mxu0 %v5525_v27  ;;  %2543 = vmatprep.subr.bf16.mxu1 %v5528_v23  ;;  %v5613_v27 = vld [vmem:[%s7996_s4 + $0x2a0] ss:$8 sps:$4 sm:$0xff]   ;;  %v5616_v23 = vld [vmem:[%s7996_s4 + $0x330] ss:$8 sps:$4 sm:$0xff]  }
  0x8f   : > { %1820 = vmatmul.mubr.bf16.gmra.mxu1 %v5522_v25  ;;  %v5624_v25 = vld [vmem:[%s7996_s4 + $0x294] ss:$8 sps:$4 sm:$0xff]  }
  0x90   : > { %2149 = vmatpush2.bf16.msra.mxu0 %v5523_v33  ;;  %2544 = vmatpush1.bf16.msra.mxu1 %v5526_v37  ;;  %v5627_v33 = vld [vmem:[%s7996_s4 + $0x324] ss:$8 sps:$4 sm:$0xff]   ;;  %v5621_v37 = vld [vmem:[%s6339_s25 + $0x70] ss:$8 sps:$4 sm:$0xff]  }
  0x91   : > { %2150 = vmatprep.subr.bf16.mxu0 %v5531_v15  ;;  %2545 = vmatprep.subr.bf16.mxu1 %v5534_v9  ;;  %v5628_v15 = vld [vmem:[%s6488_s23 + $0x34] ss:$8 sps:$4 sm:$0xff]   ;;  %v5622_v9 = vld [vmem:[%s7996_s4 + $0x290] ss:$8 sps:$4 sm:$0xff]  }
  0x92   : > { %1829 = vmatprep.mubr.bf16.mxu1 %v5535_v11  ;;  %v5625_v11 = vld [vmem:[%s7996_s4 + $0x320] ss:$8 sps:$4 sm:$0xff]  }
  0x94   : > { %2151 = vmatpush2.bf16.msra.mxu0 %v5529_v32  ;;  %2546 = vmatpush1.bf16.msra.mxu1 %v5532_v19  ;;  %v5633_v32 = vld [vmem:[%s7996_s4 + $0x284] ss:$8 sps:$4 sm:$0xff]   ;;  %v5636_v19 = vld [vmem:[%s7996_s4 + $0x314] ss:$8 sps:$4 sm:$0xff]  }
  0x95   : > { %2152 = vmatprep.subr.bf16.mxu0 %v5540_v35  ;;  %2547 = vmatprep.subr.bf16.mxu1 %v5543_v16  ;;  %v5630_v35 = vld [vmem:[%s6488_s23 + $0x30] ss:$8 sps:$4 sm:$0xff]   ;;  %v5639_v16 = vld [vmem:[%s6575_s17 + $0x4] ss:$8 sps:$4 sm:$0xff]  }
  0x97   : > { %1830 = vmatmul.mubr.bf16.gmra.mxu1 %v5537_v1  ;;  %v5631_v1 = vld [vmem:[%s7996_s4 + $0x280] ss:$8 sps:$4 sm:$0xff]  }
  0x98   : > { %2153 = vmatpush2.bf16.msra.mxu0 %v5538_v2  ;;  %2548 = vmatpush1.bf16.msra.mxu1 %v5541_v14  ;;  %v5634_v2 = vld [vmem:[%s7996_s4 + $0x310] ss:$8 sps:$4 sm:$0xff]   ;;  %v5642_v14 = vld [vmem:[%s7996_s4 + $0x304] ss:$8 sps:$4 sm:$0xff]  }
  0x99   : > { %2154 = vmatprep.subr.bf16.mxu0 %v5546_v28  ;;  %2549 = vmatprep.subr.bf16.mxu1 %v5549_v17  ;;  %v5645_v28 = vld [vmem:[%s7996_s4 + $0x474] ss:$8 sps:$4 sm:$0xff]   ;;  %v5646_v17 = vld [vmem:[%s6488_s23 + $0x44] ss:$8 sps:$4 sm:$0xff]  }
  0x9a   : > { %1839 = vmatprep.mubr.bf16.mxu1 %v5550_v41  ;;  %v5637_v41 = vld [vmem:[%s6575_s17] ss:$8 sps:$4 sm:$0xff]  }
  0x9c   : > { %2155 = vmatpush2.bf16.msra.mxu0 %v5544_v43  ;;  %2550 = vmatpush1.bf16.msra.mxu1 %v5547_v20  ;;  %v5640_v43 = vld [vmem:[%s7996_s4 + $0x300] ss:$8 sps:$4 sm:$0xff]   ;;  %v5643_v20 = vld [vmem:[%s7996_s4 + $0x470] ss:$8 sps:$4 sm:$0xff]  }
  0x9d   : > { %2156 = vmatprep.subr.bf16.mxu0 %v5555_v45  ;;  %2551 = vmatprep.subr.bf16.mxu1 %v5558_v47  ;;  %v5651_v45 = vld [vmem:[%s7996_s4 + $0x3f4] ss:$8 sps:$4 sm:$0xff]   ;;  %v5654_v47 = vld [vmem:[%s7996_s4 + $0x464] ss:$8 sps:$4 sm:$0xff]  }
  0x9f   : > { %1840 = vmatmul.mubr.bf16.gmra.mxu1 %v5552_v10  ;;  %v5655_v10 = vld [vmem:[%s6575_s17 + $0x14] ss:$8 sps:$4 sm:$0xff]  }
  0xa0   : > { %2157 = vmatpush2.bf16.msra.mxu0 %v5553_v49  ;;  %2552 = vmatpush1.bf16.msra.mxu1 %v5556_v48  ;;  %v5648_v49 = vld [vmem:[%s6488_s23 + $0x40] ss:$8 sps:$4 sm:$0xff]   ;;  %v5649_v48 = vld [vmem:[%s7996_s4 + $0x3f0] ss:$8 sps:$4 sm:$0xff]  }
  0xa1   : > { %2158 = vmatprep.subr.bf16.mxu0 %v5561_v30  ;;  %2553 = vmatprep.subr.bf16.mxu1 %v5564_v24  ;;  %v5652_v30 = vld [vmem:[%s7996_s4 + $0x460] ss:$8 sps:$4 sm:$0xff]   ;;  %v5660_v24 = vld [vmem:[%s7996_s4 + $0x3e4] ss:$8 sps:$4 sm:$0xff]  }
  0xa2   : > { %1849 = vmatprep.mubr.bf16.mxu1 %v5565_v51  ;;  %v5663_v51 = vld [vmem:[%s7996_s4 + $0x454] ss:$8 sps:$4 sm:$0xff]  }
  0xa4   : > { %2159 = vmatpush2.bf16.msra.mxu0 %v5559_v62  ;;  %2554 = vmatpush1.bf16.msra.mxu1 %v5562_v53  ;;  %v5664_v62 = vld [vmem:[%s6488_s23 + $0x54] ss:$8 sps:$4 sm:$0xff]   ;;  %v5657_v53 = vld [vmem:[%s6575_s17 + $0x10] ss:$8 sps:$4 sm:$0xff]  }
  0xa5   : > { %2160 = vmatprep.subr.bf16.mxu0 %v5570_v60  ;;  %2555 = vmatprep.subr.bf16.mxu1 %v5573_v46  ;;  %v5658_v60 = vld [vmem:[%s7996_s4 + $0x3e0] ss:$8 sps:$4 sm:$0xff]   ;;  %v5661_v46 = vld [vmem:[%s7996_s4 + $0x450] ss:$8 sps:$4 sm:$0xff]  }
  0xa7   : > { %1850 = vmatmul.mubr.bf16.gmra.mxu1 %v5567_v54  ;;  %v5669_v54 = vld [vmem:[%s7996_s4 + $0x3d4] ss:$8 sps:$4 sm:$0xff]  }
  0xa8   : > { %2161 = vmatpush2.bf16.msra.mxu0 %v5568_v36  ;;  %2556 = vmatpush2.bf16.msra.mxu1 %v5571_v29  ;;  %v5672_v36 = vld [vmem:[%s7996_s4 + $0x444] ss:$8 sps:$4 sm:$0xff]  }
  0xa9   : > { %2557 = vmatprep.subr.bf16.mxu1 %v5579_v39  ;;  %2980 = vmatprep.subr.bf16.mxu0 %v5582_v55  ;;  %v5673_v29 = vld [vmem:[%s6575_s17 + $0x24] ss:$8 sps:$4 sm:$0xff]   ;;  %v5666_v39 = vld [vmem:[%s6488_s23 + $0x50] ss:$8 sps:$4 sm:$0xff]  }
  0xaa   : > { %1859 = vmatprep.mubr.bf16.mxu1 %v5583_v56  ;;  %v5667_v55 = vld [vmem:[%s7996_s4 + $0x3d0] ss:$8 sps:$4 sm:$0xff]   ;;  %v5678_v56 = vld [vmem:[%s7996_s4 + $0x3c4] ss:$8 sps:$4 sm:$0xff]  }
  0xab   : > { %2163 = vmatmul.mubr.bf16.vlgmr.msra.gmra.mxu0 %v5574_v52  ;;  %v5670_v52 = vld [vmem:[%s7996_s4 + $0x440] ss:$8 sps:$4 sm:$0xff]  }
  0xac   : > { %2558 = vmatpush2.bf16.msra.mxu1 %v5577_v57  ;;  %2981 = vmatpush1.bf16.msra.mxu0 %v5580_v31  ;;  %v5681_v57 = vld [vmem:[%s7996_s4 + $0x434] ss:$8 sps:$4 sm:$0xff]   ;;  %v5682_v31 = vld [vmem:[%s6488_s23 + $0x64] ss:$8 sps:$4 sm:$0xff]  }
  0xad   : > { %2559 = vmatprep.subr.bf16.mxu1 %v5588_v58  ;;  %2982 = vmatprep.subr.bf16.mxu0 %v5591_v59  ;;  %v5675_v58 = vld [vmem:[%s6575_s17 + $0x20] ss:$8 sps:$4 sm:$0xff]  }
  0xae   : > { %2172 = vmatprep.mubr.bf16.mxu0 %v5592_v0  ;;  %v5676_v59 = vld [vmem:[%s7996_s4 + $0x3c0] ss:$8 sps:$4 sm:$0xff]   ;;  %v5687_v0 = vld [vmem:[%s7996_s4 + $0x3b4] ss:$8 sps:$4 sm:$0xff]  }
  0xaf   : > { %1860 = vmatmul.mubr.bf16.gmra.mxu1 %v5585_v63  ;;  %v5679_v63 = vld [vmem:[%s7996_s4 + $0x430] ss:$8 sps:$4 sm:$0xff]  }
  0xb0   : > { %2560 = vmatpush2.bf16.msra.mxu1 %v5586_v61  ;;  %2983 = vmatpush1.bf16.msra.mxu0 %v5589_v22  ;;  %v5690_v61 = vld [vmem:[%s7996_s4 + $0x424] ss:$8 sps:$4 sm:$0xff]   ;;  %v5691_v22 = vld [vmem:[%s6575_s17 + $0x34] ss:$8 sps:$4 sm:$0xff]  }
  0xb1   : > { %2561 = vmatprep.subr.bf16.mxu1 %v5597_v50  ;;  %2984 = vmatprep.subr.bf16.mxu0 %v5600_v40  ;;  %v5684_v50 = vld [vmem:[%s6488_s23 + $0x60] ss:$8 sps:$4 sm:$0xff]   ;;  %v5685_v40 = vld [vmem:[%s7996_s4 + $0x3b0] ss:$8 sps:$4 sm:$0xff]  }
  0xb2   : > { %1869 = vmatprep.mubr.bf16.mxu1 %v5601_v3  ;;  %v5696_v3 = vld [vmem:[%s7996_s4 + $0x3a4] ss:$8 sps:$4 sm:$0xff]  }
  0xb3   : > { %2173 = vmatmul.mubr.bf16.gmra.mxu0 %v5594_v34  ;;  %v5688_v34 = vld [vmem:[%s7996_s4 + $0x420] ss:$8 sps:$4 sm:$0xff]  }
  0xb4   : > { %2562 = vmatpush2.bf16.msra.mxu1 %v5595_v44  ;;  %2985 = vmatpush1.bf16.msra.mxu0 %v5598_v6  ;;  %v5693_v44 = vld [vmem:[%s6575_s17 + $0x30] ss:$8 sps:$4 sm:$0xff]   ;;  %v5699_v6 = vld [vmem:[%s7996_s4 + $0x414] ss:$8 sps:$4 sm:$0xff]  }
  0xb5   : > { %2563 = vmatprep.subr.bf16.mxu1 %v5606_v4  ;;  %2986 = vmatprep.subr.bf16.mxu0 %v5609_v7  ;;  %v5700_v4 = vld [vmem:[%s6488_s23 + $0x74] ss:$8 sps:$4 sm:$0xff]   ;;  %v5694_v7 = vld [vmem:[%s7996_s4 + $0x3a0] ss:$8 sps:$4 sm:$0xff]  }
  0xb6   : > { %2182 = vmatprep.mubr.bf16.mxu0 %v5610_v8  ;;  %v8002_v8 = vsub.s32 0, %v6063_v5 }
  0xb7   : > { %1870 = vmatmul.mubr.bf16.gmra.mxu1 %v5603_v12  ;;  %v5697_v12 = vld [vmem:[%s7996_s4 + $0x410] ss:$8 sps:$4 sm:$0xff]  }
  0xb8   : > { %2564 = vmatpush2.bf16.msra.mxu1 %v5604_v42  ;;  %2987 = vmatpush1.bf16.msra.mxu0 %v5607_v13  ;;  %v5705_v42 = vld [vmem:[%s7996_s4 + $0x394] ss:$8 sps:$4 sm:$0xff]   ;;  %v5708_v13 = vld [vmem:[%s7996_s4 + $0x404] ss:$8 sps:$4 sm:$0xff]  }
  0xb9   : > { %2565 = vmatprep.subr.bf16.mxu1 %v5615_v38  ;;  %2988 = vmatprep.subr.bf16.mxu0 %v5618_v18  ;;  %v6912_v38 = vld [vmem:[%s7998_s6] sm:$0x7]  ;;  %v5709_v18 = vld [vmem:[%s6575_s17 + $0x44] ss:$8 sps:$4 sm:$0xff]  }
  0xba   : > { %1879 = vmatprep.mubr.bf16.mxu1 %v5619_v26  ;;  %v5702_v26 = vld [vmem:[%s6488_s23 + $0x70] ss:$8 sps:$4 sm:$0xff]   ;;  %s6957_s23 = scalar_lea.vmem %s8000_s8, %s4682_s20 }
  0xbb   : > { %2183 = vmatmul.mubr.bf16.gmra.mxu0 %v5612_v21  ;;  %v8001_v21 = vsub.s32 1, %v6063_v5 }
  0xbc   : > { %2566 = vmatpush2.bf16.msra.mxu1 %v5613_v27  ;;  %2989 = vmatpush1.bf16.msra.mxu0 %v5616_v23  ;;  %v5703_v27 = vld [vmem:[%s7996_s4 + $0x390] ss:$8 sps:$4 sm:$0xff]   ;;  %v5706_v23 = vld [vmem:[%s7996_s4 + $0x400] ss:$8 sps:$4 sm:$0xff]  }
  0xbd   : > { %2567 = vmatprep.subr.bf16.mxu1 %v5624_v25  ;;  %2990 = vmatprep.subr.bf16.mxu0 %v5627_v33  ;;  %v5714_v25 = vld [vmem:[%s7996_s4 + $0x384] ss:$8 sps:$4 sm:$0xff]   ;;  %v6931_v33 = vrot.slane %v6912_v38, %v8002_v8 }
  0xbe   : > { %2192 = vmatprep.mubr.bf16.mxu0 %v5628_v15  ;;  %v5720_v15 = vld [vmem:[%s6694_s26 + $0x4] ss:$8 sps:$4 sm:$0xff]  }
  0xbf   : > { %1880 = vmatmul.mubr.bf16.gmra.mxu1 %v5621_v37  ;;  %v5717_v37 = vld [vmem:[%s7996_s4 + $0x4f4] ss:$8 sps:$4 sm:$0xff]  }
  0xc0   : > { %2568 = vmatpush2.bf16.msra.mxu1 %v5622_v9  ;;  %2991 = vmatpush1.bf16.msra.mxu0 %v5625_v11  ;;  %v6940_v9 = vrot.slane %v6912_v38, %v8001_v21  ;;  %v5711_v11 = vld [vmem:[%s6575_s17 + $0x40] ss:$8 sps:$4 sm:$0xff]  }
  0xc1   : > { %2569 = vmatprep.subr.bf16.mxu1 %v5633_v32  ;;  %2992 = vmatprep.subr.bf16.mxu0 %v5636_v19  ;;  %v5712_v32 = vld [vmem:[%s7996_s4 + $0x380] ss:$8 sps:$4 sm:$0xff]  }
  0xc2   : > { %2571 = vmatprep.mubr.bf16.mxu1 %v5639_v16  ;;  %v5723_v16 = vld [vmem:[%s7996_s4 + $0x4e4] ss:$8 sps:$4 sm:$0xff]  }
  0xc3   : > { %2193 = vmatmul.mubr.bf16.gmra.mxu0 %v5630_v35  ;;  %v5715_v35 = vld [vmem:[%s7996_s4 + $0x4f0] ss:$8 sps:$4 sm:$0xff]  }
  0xc4   : > { %2570 = vmatpush2.bf16.msra.mxu1 %v5631_v1  ;;  %2993 = vmatpush1.bf16.msra.mxu0 %v5634_v2  ;;  %v5726_v2 = vld [vmem:[%s7996_s4 + $0x574] ss:$8 sps:$4 sm:$0xff]  }
  0xc5   : > { %2994 = vmatprep.subr.bf16.mxu0 %v5642_v14  ;;  %3421 = vmatprep.subr.bf16.mxu1 %v5645_v28  ;;  %v5727_v28 = vld [vmem:[%s6575_s17 + $0x54] ss:$8 sps:$4 sm:$0xff]  }
  0xc6   : > { %2202 = vmatprep.mubr.bf16.mxu0 %v5646_v17 }
  0xc7   : > { %2572 = vmatmul.mubr.bf16.vlgmr.msra.gmra.mxu1 %v5637_v41 }
  0xc8   : > { %2995 = vmatpush1.bf16.msra.mxu0 %v5640_v43  ;;  %3422 = vmatpush1.bf16.msra.mxu1 %v5643_v20  ;;  %v5718_v43 = vld [vmem:[%s6694_s26] ss:$8 sps:$4 sm:$0xff]  }
  0xc9   : > { %2996 = vmatprep.subr.bf16.mxu0 %v5651_v45  ;;  %3423 = vmatprep.subr.bf16.mxu1 %v5654_v47  ;;  %v5721_v20 = vld [vmem:[%s7996_s4 + $0x4e0] ss:$8 sps:$4 sm:$0xff]   ;;  %v5724_v47 = vld [vmem:[%s7996_s4 + $0x570] ss:$8 sps:$4 sm:$0xff]  }
  0xca   : > { %2581 = vmatprep.mubr.bf16.mxu1 %v5655_v10  ;;  %v5732_v10 = vld [vmem:[%s7996_s4 + $0x4d4] ss:$8 sps:$4 sm:$0xff]  }
  0xcb   : > { %2203 = vmatmul.mubr.bf16.gmra.mxu0 %v5648_v49 }
  0xcc   : > { %2997 = vmatpush2.bf16.msra.mxu0 %v5649_v48  ;;  %3424 = vmatpush1.bf16.msra.mxu1 %v5652_v30  ;;  %v5735_v30 = vld [vmem:[%s7996_s4 + $0x564] ss:$8 sps:$4 sm:$0xff]  }
  0xcd   : > { %2998 = vmatprep.subr.bf16.mxu0 %v5660_v24  ;;  %3425 = vmatprep.subr.bf16.mxu1 %v5663_v51  ;;  %v5736_v51 = vld [vmem:[%s6694_s26 + $0x14] ss:$8 sps:$4 sm:$0xff]  }
  0xce   : > { %2212 = vmatprep.mubr.bf16.mxu0 %v5664_v62 }
  0xcf   : > { %2582 = vmatmul.mubr.bf16.gmra.mxu1 %v5657_v53 }
  0xd0   : > { %2999 = vmatpush2.bf16.msra.mxu0 %v5658_v60  ;;  %3426 = vmatpush1.bf16.msra.mxu1 %v5661_v46  ;;  %v5729_v60 = vld [vmem:[%s6575_s17 + $0x50] ss:$8 sps:$4 sm:$0xff]  }
  0xd1   : > { %3000 = vmatprep.subr.bf16.mxu0 %v5669_v54  ;;  %3427 = vmatprep.subr.bf16.mxu1 %v5672_v36  ;;  %v5730_v46 = vld [vmem:[%s7996_s4 + $0x4d0] ss:$8 sps:$4 sm:$0xff]   ;;  %v5733_v54 = vld [vmem:[%s7996_s4 + $0x560] ss:$8 sps:$4 sm:$0xff]   ;;  %v5741_v36 = vld [vmem:[%s7996_s4 + $0x4c4] ss:$8 sps:$4 sm:$0xff]  }
  0xd2   : > { %2591 = vmatprep.mubr.bf16.mxu1 %v5673_v29 }
  0xd3   : > { %2213 = vmatmul.mubr.bf16.gmra.mxu0 %v5666_v39  ;;  %v5744_v39 = vld [vmem:[%s7996_s4 + $0x554] ss:$8 sps:$4 sm:$0xff]  }
  0xd4   : > { %3001 = vmatpush2.bf16.msra.mxu0 %v5667_v55  ;;  %3428 = vmatpush1.bf16.msra.mxu1 %v5670_v52  ;;  %v5745_v55 = vld [vmem:[%s6575_s17 + $0x64] ss:$8 sps:$4 sm:$0xff]   ;;  %v5738_v52 = vld [vmem:[%s6694_s26 + $0x10] ss:$8 sps:$4 sm:$0xff]  }
  0xd5   : > { %3002 = vmatprep.subr.bf16.mxu0 %v5678_v56  ;;  %3429 = vmatprep.subr.bf16.mxu1 %v5681_v57  ;;  %v5739_v56 = vld [vmem:[%s7996_s4 + $0x4c0] ss:$8 sps:$4 sm:$0xff]   ;;  %v5742_v57 = vld [vmem:[%s7996_s4 + $0x550] ss:$8 sps:$4 sm:$0xff]  }
  0xd6   : > { %2222 = vmatprep.mubr.bf16.mxu0 %v5682_v31  ;;  %v5750_v31 = vld [vmem:[%s7996_s4 + $0x4b4] ss:$8 sps:$4 sm:$0xff]  }
  0xd7   : > { %2592 = vmatmul.mubr.bf16.gmra.mxu1 %v5675_v58  ;;  %v5747_v58 = vld [vmem:[%s6575_s17 + $0x60] ss:$8 sps:$4 sm:$0xff]  }
  0xd8   : > { %3003 = vmatpush2.bf16.msra.mxu0 %v5676_v59  ;;  %3430 = vmatpush1.bf16.msra.mxu1 %v5679_v63  ;;  %v5753_v59 = vld [vmem:[%s7996_s4 + $0x544] ss:$8 sps:$4 sm:$0xff]  }
  0xd9   : > { %3004 = vmatprep.subr.bf16.mxu0 %v5687_v0  ;;  %3431 = vmatprep.subr.bf16.mxu1 %v5690_v61  ;;  %v5754_v63 = vld [vmem:[%s6694_s26 + $0x24] ss:$8 sps:$4 sm:$0xff]   ;;  %v5748_v0 = vld [vmem:[%s7996_s4 + $0x4b0] ss:$8 sps:$4 sm:$0xff]   ;;  %v7023_v61 = vld [vmem:[%s7997_s5] ss:$0 sm:$0xff] }
  0xda   : > { %2601 = vmatprep.mubr.bf16.mxu1 %v5691_v22  ;;  %v5751_v22 = vld [vmem:[%s7996_s4 + $0x540] ss:$8 sps:$4 sm:$0xff]  }
  0xdb   : > { %2223 = vmatmul.mubr.bf16.gmra.mxu0 %v5684_v50  ;;  %v5759_v50 = vld [vmem:[%s7996_s4 + $0x4a4] ss:$8 sps:$4 sm:$0xff]  }
  0xdc   : > { %3005 = vmatpush2.bf16.msra.mxu0 %v5685_v40  ;;  %3432 = vmatpush1.bf16.msra.mxu1 %v5688_v34  ;;  %v5762_v40 = vld [vmem:[%s7996_s4 + $0x534] ss:$8 sps:$4 sm:$0xff]  }
  0xdd   : > { %3006 = vmatprep.subr.bf16.mxu0 %v5696_v3  ;;  %3433 = vmatprep.subr.bf16.mxu1 %v5699_v6  ;;  %v5763_v3 = vld [vmem:[%s6575_s17 + $0x74] ss:$8 sps:$4 sm:$0xff]   ;;  %v5756_v6 = vld [vmem:[%s6694_s26 + $0x20] ss:$8 sps:$4 sm:$0xff]  }
  0xde   : > { %2232 = vmatprep.mubr.bf16.mxu0 %v5700_v4  ;;  %v5757_v4 = vld [vmem:[%s7996_s4 + $0x4a0] ss:$8 sps:$4 sm:$0xff]  }
  0xdf   : > { %2602 = vmatmul.mubr.bf16.gmra.mxu1 %v5693_v44 }
  0xe0   : > { %3007 = vmatpush2.bf16.msra.mxu0 %v5694_v7  ;;  %3434 = vmatpush1.bf16.msra.mxu1 %v5697_v12  ;;  %v5760_v12 = vld [vmem:[%s7996_s4 + $0x530] ss:$8 sps:$4 sm:$0xff]  }
  0xe1   : > { %3008 = vmatprep.subr.bf16.mxu0 %v5705_v42  ;;  %3435 = vmatprep.subr.bf16.mxu1 %v5708_v13  ;;  %v5768_v42 = vld [vmem:[%s7996_s4 + $0x494] ss:$8 sps:$4 sm:$0xff]  }
  0xe2   : > { %2611 = vmatprep.mubr.bf16.mxu1 %v5709_v18  ;;  %v1155_v19 = vpop.f32.mrf.mxu1 }
  0xe3   : > { %2233 = vmatmul.mubr.bf16.gmra.mxu0 %v5702_v26  ;;  %v1156_v1 = vadd.f32 %v1155_v19, %v6931_v33  ;;  %v5771_v26 = vld [vmem:[%s7996_s4 + $0x524] ss:$8 sps:$4 sm:$0xff]  }
  0xe4   : > { %3009 = vmatpush2.bf16.msra.mxu0 %v5703_v27  ;;  %3436 = vmatpush1.bf16.msra.mxu1 %v5706_v23  ;;  %v1157_v14 = vpop.f32.mrf.mxu1  ;;  %v5772_v23 = vld [vmem:[%s6694_s26 + $0x34] ss:$8 sps:$4 sm:$0xff]  }
  0xe5   : > { %3010 = vmatprep.subr.bf16.mxu0 %v5714_v25  ;;  %3437 = vmatprep.subr.bf16.mxu1 %v5717_v37  ;;  %v1331_v17 = vmax.f32 %v1156_v1, 0.0  ;;  %v1158_v41 = vadd.f32 %v1157_v14, %v6940_v9  ;;  %v5777_v1 = vld [vmem:[%s7996_s4 + $0x484] ss:$8 sps:$4 sm:$0xff]  }
  0xe6   : > { %3012 = vmatprep.mubr.bf16.mxu0 %v5720_v15  ;;  %v1159_v45 = vpop.f32.mrf.mxu1 }
  0xe7   : > { %2612 = vmatmul.mubr.bf16.gmra.mxu1 %v5711_v11  ;;  %1379 = vst [vmem:[%s6957_s23 + $0x8] sm:$0xff] %v1331_v17  ;;  %v1332_v49 = vmax.f32 %v1158_v41, 0.0  ;;  %v1160_v48 = vadd.f32 %v1159_v45, %v6931_v33  ;;  %v5765_v11 = vld [vmem:[%s6575_s17 + $0x70] ss:$8 sps:$4 sm:$0xff]   ;;  %v5780_v17 = vld [vmem:[%s7996_s4 + $0x514] ss:$8 sps:$4 sm:$0xff]  }
  0xe8   : > { %3011 = vmatpush2.bf16.msra.mxu0 %v5712_v32  ;;  %3438 = vmatpush2.bf16.msra.mxu1 %v5715_v35  ;;  %v1161_v24 = vpop.f32.mrf.mxu1  ;;  %v5766_v32 = vld [vmem:[%s7996_s4 + $0x490] ss:$8 sps:$4 sm:$0xff]  }
  0xe9   : > { %3439 = vmatprep.subr.bf16.mxu1 %v5723_v16  ;;  %3862 = vmatprep.subr.bf16.mxu0 %v5726_v2  ;;  %1380 = vst [vmem:[%s6957_s23 + $0x10] sm:$0xff] %v1332_v49  ;;  %v1334_v62 = vmax.f32 %v1160_v48, 0.0  ;;  %v1162_v53 = vadd.f32 %v1161_v24, %v6940_v9  ;;  %v5769_v16 = vld [vmem:[%s7996_s4 + $0x520] ss:$8 sps:$4 sm:$0xff]   ;;  %v5778_v24 = vld [vmem:[%s7996_s4 + $0x510] ss:$8 sps:$4 sm:$0xff]  }
  0xea   : > { %2621 = vmatprep.mubr.bf16.mxu1 %v5727_v28  ;;  %v5775_v49 = vld [vmem:[%s7996_s4 + $0x480] ss:$8 sps:$4 sm:$0xff]  }
  0xeb   : > { %3013 = vmatmul.mubr.bf16.vlgmr.msra.gmra.mxu0 %v5718_v43  ;;  %1382 = vst [vmem:[%s6957_s23 + $0x38] sm:$0xff] %v1334_v62  ;;  %v1335_v29 = vmax.f32 %v1162_v53, 0.0  ;;  %v7091_v53 = vld [vmem:[%s7996_s4 + $0x674] ss:$8 sps:$4 sm:$0xff]  }
  0xec   : > { %3440 = vmatpush2.bf16.msra.mxu1 %v5721_v20  ;;  %3863 = vmatpush1.bf16.msra.mxu0 %v5724_v47  ;;  %v5783_v20 = vld [vmem:[%s6796_s15 + $0x4] ss:$8 sps:$4 sm:$0xff]  }
  0xed   : > { %3441 = vmatprep.subr.bf16.mxu1 %v5732_v10  ;;  %3864 = vmatprep.subr.bf16.mxu0 %v5735_v30  ;;  %1383 = vst [vmem:[%s6957_s23 + $0x40] sm:$0xff] %v1335_v29  ;;  %v5774_v10 = vld [vmem:[%s6694_s26 + $0x30] ss:$8 sps:$4 sm:$0xff]   ;;  %v5784_v29 = vld [vmem:[%s7996_s4 + $0x500] ss:$8 sps:$4 sm:$0xff]  }
  0xee   : > { %3022 = vmatprep.mubr.bf16.mxu0 %v5736_v51  ;;  %v5786_v51 = vld [vmem:[%s7996_s4 + $0x504] ss:$8 sps:$4 sm:$0xff]  }
  0xef   : > { %2622 = vmatmul.mubr.bf16.gmra.mxu1 %v5729_v60 }
  0xf0   : > { %3442 = vmatpush2.bf16.msra.mxu1 %v5730_v46  ;;  %3865 = vmatpush1.bf16.msra.mxu0 %v5733_v54  ;;  %v5790_v54 = vld [vmem:[%s6694_s26 + $0x44] ss:$8 sps:$4 sm:$0xff]  }
  0xf1   : > { %3443 = vmatprep.subr.bf16.mxu1 %v5741_v36  ;;  %3866 = vmatprep.subr.bf16.mxu0 %v5744_v39  ;;  %v5781_v36 = vld [vmem:[%s6796_s15] ss:$8 sps:$4 sm:$0xff]  }
  0xf2   : > { %2631 = vmatprep.mubr.bf16.mxu1 %v5745_v55  ;;  %v7104_v55 = vld [vmem:[%s7996_s4 + $0x670] ss:$8 sps:$4 sm:$0xff]  }
  0xf3   : > { %3023 = vmatmul.mubr.bf16.gmra.mxu0 %v5738_v52  ;;  %v5795_v52 = vld [vmem:[%s7996_s4 + $0x5f4] ss:$8 sps:$4 sm:$0xff]  }
  0xf4   : > { %3444 = vmatpush2.bf16.msra.mxu1 %v5739_v56  ;;  %3867 = vmatpush1.bf16.msra.mxu0 %v5742_v57  ;;  %v7113_v56 = vld [vmem:[%s7996_s4 + $0x664] ss:$8 sps:$4 sm:$0xff]  }
  0xf5   : > { %3445 = vmatprep.subr.bf16.mxu1 %v5750_v31  ;;  %3868 = vmatprep.subr.bf16.mxu0 %v5753_v59  ;;  %v5323_v34 = vpop.f32.mrf.mxu0  ;;  %v5799_v31 = vld [vmem:[%s6796_s15 + $0x14] ss:$8 sps:$4 sm:$0xff]   ;;  %v5792_v59 = vld [vmem:[%s6694_s26 + $0x40] ss:$8 sps:$4 sm:$0xff]  }
  0xf6   : > { %3032 = vmatprep.mubr.bf16.mxu0 %v5754_v63  ;;  %v748_v44 = vadd.f32 %v5323_v34, %v7023_v61  ;;  %v5804_v34 = vld [vmem:[%s7996_s4 + $0x5e4] ss:$8 sps:$4 sm:$0xff]  }
  0xf7   : > { %2632 = vmatmul.mubr.bf16.gmra.mxu1 %v5747_v58  ;;  %v739_v7 = vpop.f32.mrf.mxu0 }
  0xf8   : > { %3446 = vmatpush2.bf16.msra.mxu1 %v5748_v0  ;;  %3869 = vmatpush1.bf16.msra.mxu0 %v5751_v22  ;;  %v804_v13 = vmax.f32 %v748_v44, 0.0  ;;  %v740_v18 = vadd.f32 %v7023_v61, %v739_v7  ;;  %v5793_v0 = vld [vmem:[%s7996_s4 + $0x5f0] ss:$8 sps:$4 sm:$0xff]   ;;  %v7126_v22 = vld [vmem:[%s7996_s4 + $0x660] ss:$8 sps:$4 sm:$0xff]  }
  0xf9   : > { %3447 = vmatprep.subr.bf16.mxu1 %v5759_v50  ;;  %3870 = vmatprep.subr.bf16.mxu0 %v5762_v40  ;;  %v5324_v27 = vpop.f32.mrf.mxu0  ;;  %v1165_v37 = vpop.f32.mrf.mxu1 }
  0xfa   : > { %2641 = vmatprep.mubr.bf16.mxu1 %v5763_v3  ;;  %820 = vst [vmem:[%s6957_s23 + $0x60] sm:$0xff] %v804_v13  ;;  %v802_v25 = vmax.f32 %v740_v18, 0.0  ;;  %v751_v15 = vadd.f32 %v5324_v27, %v7023_v61  ;;  %v1166_v19 = vadd.f32 %v1165_v37, %v6931_v33  ;;  %v7136_v3 = vld [vmem:[%s7996_s4 + $0x654] ss:$8 sps:$4 sm:$0xff]   ;;  %v5801_v13 = vld [vmem:[%s6796_s15 + $0x10] ss:$8 sps:$4 sm:$0xff]  }
  0xfb   : > { %3033 = vmatmul.mubr.bf16.gmra.mxu0 %v5756_v6  ;;  %v742_v35 = vpop.f32.mrf.mxu0  ;;  %v1167_v14 = vpop.f32.mrf.mxu1  ;;  %v5802_v27 = vld [vmem:[%s7996_s4 + $0x5e0] ss:$8 sps:$4 sm:$0xff]  }
  0xfc   : > { %3448 = vmatpush2.bf16.msra.mxu1 %v5757_v4  ;;  %3871 = vmatpush1.bf16.msra.mxu0 %v5760_v12  ;;  %818 = vst [vmem:[%s6957_s23] sm:$0xff] %v802_v25  ;;  %v805_v2 = vmax.f32 %v751_v15, 0.0  ;;  %v743_v28 = vadd.f32 %v7023_v61, %v742_v35  ;;  %v1337_v41 = vmax.f32 %v1166_v19, 0.0  ;;  %v1168_v43 = vadd.f32 %v1167_v14, %v6940_v9  ;;  %v5808_v4 = vld [vmem:[%s6694_s26 + $0x54] ss:$8 sps:$4 sm:$0xff]   ;;  %v7162_v19 = vld [vmem:[%s7996_s4 + $0x644] ss:$8 sps:$4 sm:$0xff]  }
  0xfd   : > { %3449 = vmatprep.subr.bf16.mxu1 %v5768_v42  ;;  %3872 = vmatprep.subr.bf16.mxu0 %v5771_v26  ;;  %v1169_v47 = vpop.f32.mrf.mxu1 }
  0xfe   : > { %3042 = vmatprep.mubr.bf16.mxu0 %v5772_v23  ;;  %821 = vst [vmem:[%s6957_s23 + $0x90] sm:$0xff] %v805_v2  ;;  %v803_v45 = vmax.f32 %v743_v28, 0.0  ;;  %1385 = vst [vmem:[%s6957_s23 + $0x68] sm:$0xff] %v1337_v41  ;;  %v1338_v48 = vmax.f32 %v1168_v43, 0.0  ;;  %v1170_v30 = vadd.f32 %v1169_v47, %v6931_v33  ;;  %v7150_v23 = vld [vmem:[%s7996_s4 + $0x650] ss:$8 sps:$4 sm:$0xff]  }
  0xff   : > { %2642 = vmatmul.mubr.bf16.gmra.mxu1 %v5765_v11  ;;  %v1171_v62 = vpop.f32.mrf.mxu1  ;;  %v5810_v28 = vld [vmem:[%s6694_s26 + $0x50] ss:$8 sps:$4 sm:$0xff]   ;;  %v7176_v43 = vld [vmem:[%s7996_s4 + $0x640] ss:$8 sps:$4 sm:$0xff]   ;;  %v5822_v47 = vld [vmem:[%s7996_s4 + $0x5c4] ss:$8 sps:$4 sm:$0xff]  }
 0x100   : > { %3450 = vmatpush2.bf16.msra.mxu1 %v5766_v32  ;;  %3873 = vmatpush1.bf16.msra.mxu0 %v5769_v16  ;;  %819 = vst [vmem:[%s6957_s23 + $0x30] sm:$0xff] %v803_v45  ;;  %1386 = vst [vmem:[%s6957_s23 + $0x70] sm:$0xff] %v1338_v48  ;;  %v1340_v60 = vmax.f32 %v1170_v30, 0.0  ;;  %v1172_v46 = vadd.f32 %v1171_v62, %v6940_v9  ;;  %v5813_v32 = vld [vmem:[%s7996_s4 + $0x5d4] ss:$8 sps:$4 sm:$0xff]  }
 0x101   : > { %3451 = vmatprep.subr.bf16.mxu1 %v5777_v1  ;;  %3874 = vmatprep.subr.bf16.mxu0 %v5780_v17  ;;  %v5817_v16 = vld [vmem:[%s6796_s15 + $0x24] ss:$8 sps:$4 sm:$0xff]   ;;  %v5811_v41 = vld [vmem:[%s7996_s4 + $0x5d0] ss:$8 sps:$4 sm:$0xff]   ;;  %v5819_v30 = vld [vmem:[%s6796_s15 + $0x20] ss:$8 sps:$4 sm:$0xff]  }
 0x102   : > { %3453 = vmatprep.mubr.bf16.mxu1 %v5783_v20  ;;  %1388 = vst [vmem:[%s6957_s23 + $0x98] sm:$0xff] %v1340_v60  ;;  %v1341_v39 = vmax.f32 %v1172_v46, 0.0  ;;  %v5831_v60 = vld [vmem:[%s7996_s4 + $0x5b4] ss:$8 sps:$4 sm:$0xff]   ;;  %v7210_v46 = vld [vmem:[%s7996_s4 + $0x624] ss:$8 sps:$4 sm:$0xff]  }
 0x103   : > { %3043 = vmatmul.mubr.bf16.gmra.mxu0 %v5774_v10  ;;  %v7188_v10 = vld [vmem:[%s7996_s4 + $0x634] ss:$8 sps:$4 sm:$0xff]  }
 0x104   : > { %3452 = vmatpush2.bf16.msra.mxu1 %v5775_v49  ;;  %3875 = vmatpush1.bf16.msra.mxu0 %v5778_v24  ;;  %v5327_v57 = vpop.f32.mrf.mxu0  ;;  %1389 = vst [vmem:[%s6957_s23 + $0xa0] sm:$0xff] %v1341_v39  ;;  %v5826_v49 = vld [vmem:[%s6694_s26 + $0x64] ss:$8 sps:$4 sm:$0xff]   ;;  %v5820_v24 = vld [vmem:[%s7996_s4 + $0x5c0] ss:$8 sps:$4 sm:$0xff]  }
 0x105   : > { %3876 = vmatprep.subr.bf16.mxu0 %v5786_v51  ;;  %5355 = vmatprep.subr.bf16.mxu1 %v7091_v53  ;;  %v764_v58 = vadd.f32 %v5327_v57, %v7023_v61  ;;  %v7200_v51 = vld [vmem:[%s7996_s4 + $0x630] ss:$8 sps:$4 sm:$0xff]   ;;  %v5828_v39 = vld [vmem:[%s6694_s26 + $0x60] ss:$8 sps:$4 sm:$0xff]  }
 0x106   : > { %3052 = vmatprep.mubr.bf16.mxu0 %v5790_v54  ;;  %v755_v63 = vpop.f32.mrf.mxu0 }
 0x107   : > { %3454 = vmatmul.mubr.bf16.vlgmr.msra.gmra.mxu1 %v5781_v36  ;;  %v808_v50 = vmax.f32 %v764_v58, 0.0  ;;  %v756_v40 = vadd.f32 %v7023_v61, %v755_v63  ;;  %v7223_v58 = vld [vmem:[%s7996_s4 + $0x620] ss:$8 sps:$4 sm:$0xff]  }
 0x108   : > { %3877 = vmatpush1.bf16.msra.mxu0 %v5784_v29  ;;  %5371 = vmatpush1.bf16.msra.mxu1 %v7104_v55  ;;  %v1175_v44 = vpop.f32.mrf.mxu1  ;;  %v5328_v6 = vpop.f32.mrf.mxu0  ;;  %v5835_v29 = vld [vmem:[%s6796_s15 + $0x34] ss:$8 sps:$4 sm:$0xff]  }
 0x109   : > { %3878 = vmatprep.subr.bf16.mxu0 %v5795_v52  ;;  %5356 = vmatprep.subr.bf16.mxu1 %v7113_v56  ;;  %824 = vst [vmem:[%s6957_s23 + $0x120] sm:$0xff] %v808_v50  ;;  %v806_v7 = vmax.f32 %v756_v40, 0.0  ;;  %v1176_v12 = vadd.f32 %v1175_v44, %v6931_v33  ;;  %v767_v42 = vadd.f32 %v5328_v6, %v7023_v61  ;;  %v5840_v40 = vld [vmem:[%s7996_s4 + $0x5a4] ss:$8 sps:$4 sm:$0xff]  }
 0x10a   : > { %3463 = vmatprep.mubr.bf16.mxu1 %v5799_v31  ;;  %v1177_v18 = vpop.f32.mrf.mxu1  ;;  %v758_v26 = vpop.f32.mrf.mxu0  ;;  %v5829_v31 = vld [vmem:[%s7996_s4 + $0x5b0] ss:$8 sps:$4 sm:$0xff]  }
 0x10b   : > { %3053 = vmatmul.mubr.bf16.gmra.mxu0 %v5792_v59  ;;  %822 = vst [vmem:[%s6957_s23 + $0xc0] sm:$0xff] %v806_v7  ;;  %v1343_v25 = vmax.f32 %v1176_v12, 0.0  ;;  %v809_v37 = vmax.f32 %v767_v42, 0.0  ;;  %v1178_v15 = vadd.f32 %v1177_v18, %v6940_v9  ;;  %v759_v11 = vadd.f32 %v7023_v61, %v758_v26  ;;  %v5844_v7 = vld [vmem:[%s6694_s26 + $0x74] ss:$8 sps:$4 sm:$0xff]  }
 0x10c   : > { %3879 = vmatpush2.bf16.msra.mxu0 %v5793_v0  ;;  %5372 = vmatpush1.bf16.msra.mxu1 %v7126_v22  ;;  %v1179_v35 = vpop.f32.mrf.mxu1  ;;  %v5837_v42 = vld [vmem:[%s6796_s15 + $0x30] ss:$8 sps:$4 sm:$0xff]  }
 0x10d   : > { %3880 = vmatprep.subr.bf16.mxu0 %v5804_v34  ;;  %5357 = vmatprep.subr.bf16.mxu1 %v7136_v3  ;;  %1391 = vst [vmem:[%s6957_s23 + $0xc8] sm:$0xff] %v1343_v25  ;;  %825 = vst [vmem:[%s6957_s23 + $0x150] sm:$0xff] %v809_v37  ;;  %v1344_v1 = vmax.f32 %v1178_v15, 0.0  ;;  %v807_v2 = vmax.f32 %v759_v11, 0.0  ;;  %v1180_v14 = vadd.f32 %v1179_v35, %v6931_v33  ;;  %v7234_v34 = vld [vmem:[%s7996_s4 + $0x614] ss:$8 sps:$4 sm:$0xff]  }
 0x10e   : > { %3062 = vmatprep.mubr.bf16.mxu0 %v5808_v4  ;;  %v1181_v17 = vpop.f32.mrf.mxu1  ;;  %v7249_v25 = vld [vmem:[%s7996_s4 + $0x610] ss:$8 sps:$4 sm:$0xff]   ;;  %v5849_v35 = vld [vmem:[%s7996_s4 + $0x594] ss:$8 sps:$4 sm:$0xff]  }
 0x10f   : > { %3464 = vmatmul.mubr.bf16.gmra.mxu1 %v5801_v13  ;;  %1392 = vst [vmem:[%s6957_s23 + $0xd0] sm:$0xff] %v1344_v1  ;;  %823 = vst [vmem:[%s6957_s23 + $0xf0] sm:$0xff] %v807_v2  ;;  %v1346_v20 = vmax.f32 %v1180_v14, 0.0  ;;  %v1182_v45 = vadd.f32 %v1181_v17, %v6940_v9  ;;  %v5855_v2 = vld [vmem:[%s6796_s15 + $0x44] ss:$8 sps:$4 sm:$0xff]  }
 0x110   : > { %3881 = vmatpush2.bf16.msra.mxu0 %v5802_v27  ;;  %5373 = vmatpush1.bf16.msra.mxu1 %v7150_v23  ;;  %v5838_v27 = vld [vmem:[%s7996_s4 + $0x5a0] ss:$8 sps:$4 sm:$0xff]  }
 0x111   : > { %3882 = vmatprep.subr.bf16.mxu0 %v5813_v32  ;;  %5358 = vmatprep.subr.bf16.mxu1 %v7162_v19  ;;  %1394 = vst [vmem:[%s6957_s23 + $0xf8] sm:$0xff] %v1346_v20  ;;  %v1347_v48 = vmax.f32 %v1182_v45, 0.0  ;;  %v7275_v20 = vld [vmem:[%s7996_s4 + $0x600] ss:$8 sps:$4 sm:$0xff]  }
 0x112   : > { %3473 = vmatprep.mubr.bf16.mxu1 %v5817_v16  ;;  %v7261_v16 = vld [vmem:[%s7996_s4 + $0x604] ss:$8 sps:$4 sm:$0xff]  }
 0x113   : > { %3063 = vmatmul.mubr.bf16.gmra.mxu0 %v5810_v28  ;;  %1395 = vst [vmem:[%s6957_s23 + $0x100] sm:$0xff] %v1347_v48  ;;  %v5846_v28 = vld [vmem:[%s6694_s26 + $0x70] ss:$8 sps:$4 sm:$0xff]   ;;  %v5864_v48 = vld [vmem:[%s6963_s22 + $0x4] ss:$8 sps:$4 sm:$0xff]  }
 0x114   : > { %3883 = vmatpush2.bf16.msra.mxu0 %v5811_v41  ;;  %5374 = vmatpush1.bf16.msra.mxu1 %v7176_v43  ;;  %v5331_v62 = vpop.f32.mrf.mxu0  ;;  %v5847_v41 = vld [vmem:[%s7996_s4 + $0x590] ss:$8 sps:$4 sm:$0xff]  }
 0x115   : > { %3884 = vmatprep.subr.bf16.mxu0 %v5822_v47  ;;  %5359 = vmatprep.subr.bf16.mxu1 %v7188_v10  ;;  %v780_v54 = vadd.f32 %v5331_v62, %v7023_v61  ;;  %v5858_v47 = vld [vmem:[%s7996_s4 + $0x584] ss:$8 sps:$4 sm:$0xff]  }
 0x116   : > { %3072 = vmatprep.mubr.bf16.mxu0 %v5826_v49  ;;  %v771_v36 = vpop.f32.mrf.mxu0  ;;  %v7285_v49 = vld [vmem:[%s7996_s4 + $0x6f4] ss:$8 sps:$4 sm:$0xff]  }
 0x117   : > { %3474 = vmatmul.mubr.bf16.gmra.mxu1 %v5819_v30  ;;  %v812_v52 = vmax.f32 %v780_v54, 0.0  ;;  %v772_v57 = vadd.f32 %v7023_v61, %v771_v36  ;;  %v7298_v54 = vld [vmem:[%s7996_s4 + $0x6f0] ss:$8 sps:$4 sm:$0xff]   ;;  %v1042_v36 = vsub.s32 2, %v6063_v5 }
 0x118   : > { %3885 = vmatpush2.bf16.msra.mxu0 %v5820_v24  ;;  %5375 = vmatpush1.bf16.msra.mxu1 %v7200_v51  ;;  %v1185_v59 = vpop.f32.mrf.mxu1  ;;  %v5332_v63 = vpop.f32.mrf.mxu0  ;;  %v5853_v24 = vld [vmem:[%s6796_s15 + $0x40] ss:$8 sps:$4 sm:$0xff]  }
 0x119   : > { %3886 = vmatprep.subr.bf16.mxu0 %v5831_v60  ;;  %5360 = vmatprep.subr.bf16.mxu1 %v7210_v46  ;;  %828 = vst [vmem:[%s6957_s23 + $0x1e0] sm:$0xff] %v812_v52  ;;  %v810_v0 = vmax.f32 %v772_v57, 0.0  ;;  %v1186_v50 = vadd.f32 %v1185_v59, %v6931_v33  ;;  %v783_v44 = vadd.f32 %v5332_v63, %v7023_v61  ;;  %v5856_v60 = vld [vmem:[%s7996_s4 + $0x580] ss:$8 sps:$4 sm:$0xff]  }
 0x11a   : > { %3483 = vmatprep.mubr.bf16.mxu1 %v5835_v29  ;;  %v1187_v6 = vpop.f32.mrf.mxu1  ;;  %v774_v4 = vpop.f32.mrf.mxu0 }
 0x11b   : > { %3073 = vmatmul.mubr.bf16.gmra.mxu0 %v5828_v39  ;;  %826 = vst [vmem:[%s6957_s23 + $0x180] sm:$0xff] %v810_v0  ;;  %v1349_v12 = vmax.f32 %v1186_v50, 0.0  ;;  %v813_v13 = vmax.f32 %v783_v44, 0.0  ;;  %v1188_v18 = vadd.f32 %v1187_v6, %v6940_v9  ;;  %v775_v26 = vadd.f32 %v7023_v61, %v774_v4  ;;  %v7305_v39 = vld [vmem:[%s7996_s4 + $0x6e4] ss:$8 sps:$4 sm:$0xff]  }
 0x11c   : > { %3887 = vmatpush2.bf16.msra.mxu0 %v5829_v31  ;;  %5376 = vmatpush1.bf16.msra.mxu1 %v7223_v58  ;;  %v1189_v37 = vpop.f32.mrf.mxu1  ;;  %v5870_v31 = vld [vmem:[%s6796_s15 + $0x54] ss:$8 sps:$4 sm:$0xff]   ;;  %v5862_v0 = vld [vmem:[%s6963_s22] ss:$8 sps:$4 sm:$0xff]   ;;  %v7320_v4 = vrot.slane %v6912_v38, %v1042_v36 }
 0x11d   : > { %1397 = vst [vmem:[%s6957_s23 + $0x128] sm:$0xff] %v1349_v12  ;;  %3888 = vmatprep.subr.bf16.mxu0 %v5840_v40  ;;  %5361 = vmatprep.subr.bf16.mxu1 %v7234_v34  ;;  %829 = vst [vmem:[%s6957_s23 + $0x210] sm:$0xff] %v813_v13  ;;  %v1350_v15 = vmax.f32 %v1188_v18, 0.0  ;;  %v811_v11 = vmax.f32 %v775_v26, 0.0  ;;  %v1190_v32 = vadd.f32 %v1189_v37, %v6931_v33  ;;  %v7317_v6 = vld [vmem:[%s7996_s4 + $0x6e0] ss:$8 sps:$4 sm:$0xff]  }
 0x11e   : > { %3082 = vmatprep.mubr.bf16.mxu0 %v5844_v7  ;;  %v1191_v1 = vpop.f32.mrf.mxu1 }
 0x11f   : > { %3484 = vmatmul.mubr.bf16.gmra.mxu1 %v5837_v42  ;;  %1398 = vst [vmem:[%s6957_s23 + $0x130] sm:$0xff] %v1350_v15  ;;  %827 = vst [vmem:[%s6957_s23 + $0x1b0] sm:$0xff] %v811_v11  ;;  %v1352_v14 = vmax.f32 %v1190_v32, 0.0  ;;  %v1192_v17 = vadd.f32 %v1191_v1, %v6940_v9  ;;  %v7327_v42 = vld [vmem:[%s7996_s4 + $0x6d4] ss:$8 sps:$4 sm:$0xff]  }
 0x120   : > { %3889 = vmatpush2.bf16.msra.mxu0 %v5838_v27  ;;  %5377 = vmatpush1.bf16.msra.mxu1 %v7249_v25  ;;  %v5874_v27 = vld [vmem:[%s6963_s22 + $0x14] ss:$8 sps:$4 sm:$0xff]  }
 0x121   : > { %1400 = vst [vmem:[%s6957_s23 + $0x158] sm:$0xff] %v1352_v14  ;;  %3890 = vmatprep.subr.bf16.mxu0 %v5849_v35  ;;  %5362 = vmatprep.subr.bf16.mxu1 %v7261_v16  ;;  %v1353_v45 = vmax.f32 %v1192_v17, 0.0 }
 0x122   : > { %3493 = vmatprep.mubr.bf16.mxu1 %v5855_v2 }
 0x123   : > { %3083 = vmatmul.mubr.bf16.gmra.mxu0 %v5846_v28  ;;  %v5335_v30 = vpop.f32.mrf.mxu0  ;;  %1401 = vst [vmem:[%s6957_s23 + $0x160] sm:$0xff] %v1353_v45 }
 0x124   : > { %v796_v62 = vadd.f32 %v5335_v30, %v7023_v61  ;;  %3891 = vmatpush2.bf16.msra.mxu0 %v5847_v41  ;;  %5378 = vmatpush1.bf16.msra.mxu1 %v7275_v20  ;;  %v5876_v30 = vld [vmem:[%s6963_s22 + $0x10] ss:$8 sps:$4 sm:$0xff]  }
 0x125   : > { %v787_v29 = vpop.f32.mrf.mxu0  ;;  %3892 = vmatprep.subr.bf16.mxu0 %v5858_v47  ;;  %5363 = vmatprep.subr.bf16.mxu1 %v7285_v49  ;;  %v5882_v47 = vld [vmem:[%s6796_s15 + $0x64] ss:$8 sps:$4 sm:$0xff]  }
 0x126   : > { %v816_v52 = vmax.f32 %v796_v62, 0.0  ;;  %v788_v57 = vadd.f32 %v7023_v61, %v787_v29  ;;  %3894 = vmatprep.mubr.bf16.mxu0 %v5864_v48  ;;  %v7367_v29 = vld [vmem:[%s7996_s4 + $0x6c0] ss:$8 sps:$4 sm:$0xff]  }
 0x127   : > { %v1195_v59 = vpop.f32.mrf.mxu1  ;;  %3494 = vmatmul.mubr.bf16.gmra.mxu1 %v5853_v24  ;;  %v5336_v63 = vpop.f32.mrf.mxu0 }
 0x128   : > { %832 = vst [vmem:[%s6957_s23 + $0x2a0] sm:$0xff] %v816_v52  ;;  %v814_v50 = vmax.f32 %v788_v57, 0.0  ;;  %v1196_v40 = vadd.f32 %v1195_v59, %v6931_v33  ;;  %v799_v44 = vadd.f32 %v5336_v63, %v7023_v61  ;;  %3893 = vmatpush2.bf16.msra.mxu0 %v5856_v60  ;;  %5379 = vmatpush2.bf16.msra.mxu1 %v7298_v54 }
 0x129   : > { %v1197_v7 = vpop.f32.mrf.mxu1  ;;  %v790_v12 = vpop.f32.mrf.mxu0  ;;  %4303 = vmatprep.subr.bf16.mxu0 %v7091_v53  ;;  %5364 = vmatprep.subr.bf16.mxu1 %v7305_v39  ;;  %v5868_v53 = vld [vmem:[%s6796_s15 + $0x50] ss:$8 sps:$4 sm:$0xff]  }
 0x12a   : > { %830 = vst [vmem:[%s6957_s23 + $0x240] sm:$0xff] %v814_v50  ;;  %v1355_v13 = vmax.f32 %v1196_v40, 0.0  ;;  %v817_v18 = vmax.f32 %v799_v44, 0.0  ;;  %v1198_v38 = vadd.f32 %v1197_v7, %v6940_v9  ;;  %v791_v26 = vadd.f32 %v7023_v61, %v790_v12  ;;  %3503 = vmatprep.mubr.bf16.mxu1 %v5870_v31  ;;  %v7343_v61 = vld [vmem:[%s7996_s4 + $0x6d0] ss:$8 sps:$4 sm:$0xff]  }
 0x12b   : > { %v1199_v37 = vpop.f32.mrf.mxu1  ;;  %3895 = vmatmul.mubr.bf16.vlgmr.msra.gmra.mxu0 %v5862_v0  ;;  %v5341_v15 = vpop.f32.mrf.mxu0  ;;  %v5886_v50 = vld [vmem:[%s6963_s22 + $0x24] ss:$8 sps:$4 sm:$0xff]  }
 0x12c   : > { %1403 = vst [vmem:[%s6957_s23 + $0x188] sm:$0xff] %v1355_v13  ;;  %833 = vst [vmem:[%s6957_s23 + $0x2d0] sm:$0xff] %v817_v18  ;;  %v1356_v11 = vmax.f32 %v1198_v38, 0.0  ;;  %v815_v32 = vmax.f32 %v791_v26, 0.0  ;;  %v1200_v35 = vadd.f32 %v1199_v37, %v6931_v33  ;;  %v1277_v1 = vadd.f32 %v5341_v15, %v7320_v4  ;;  %4304 = vmatpush1.bf16.msra.mxu0 %v7104_v55  ;;  %v7350_v55 = vld [vmem:[%s7996_s4 + $0x6c4] ss:$8 sps:$4 sm:$0xff]  }
 0x12d   : > { %5380 = vmatpush2.bf16.msra.mxu1 %v7317_v6  ;;  %v1201_v2 = vpop.f32.mrf.mxu1  ;;  %v1268_v14 = vpop.f32.mrf.mxu0  ;;  %4305 = vmatprep.subr.bf16.mxu0 %v7113_v56  ;;  %v7390_v18 = vld [vmem:[%s7996_s4 + $0x6b0] ss:$8 sps:$4 sm:$0xff]  }
 0x12e   : > { %5365 = vmatprep.subr.bf16.mxu1 %v7327_v42  ;;  %1404 = vst [vmem:[%s6957_s23 + $0x190] sm:$0xff] %v1356_v11  ;;  %831 = vst [vmem:[%s6957_s23 + $0x270] sm:$0xff] %v815_v32  ;;  %v1358_v28 = vmax.f32 %v1200_v35, 0.0  ;;  %v1339_v17 = vmax.f32 %v1277_v1, 0.0  ;;  %v1202_v41 = vadd.f32 %v1201_v2, %v6940_v9  ;;  %v1269_v45 = vadd.f32 %v1268_v14, %v7320_v4  ;;  %v5888_v35 = vld [vmem:[%s6963_s22 + $0x20] ss:$8 sps:$4 sm:$0xff]  }
 0x12f   : > { %3904 = vmatprep.mubr.bf16.mxu0 %v5874_v27  ;;  %v1205_v48 = vpop.f32.mrf.mxu1  ;;  %3504 = vmatmul.mubr.bf16.gmra.mxu1 %v5868_v53  ;;  %v5342_v56 = vpop.f32.mrf.mxu0  ;;  %v5894_v53 = vld [vmem:[%s6796_s15 + $0x74] ss:$8 sps:$4 sm:$0xff]  }
 0x130   : > { %1406 = vst [vmem:[%s6957_s23 + $0x1b8] sm:$0xff] %v1358_v28  ;;  %1387 = vst [vmem:[%s6957_s23 + $0x78] sm:$0xff] %v1339_v17  ;;  %v1359_v24 = vmax.f32 %v1202_v41, 0.0  ;;  %v1333_v62 = vmax.f32 %v1269_v45, 0.0  ;;  %v1206_v60 = vadd.f32 %v1205_v48, %v6931_v33  ;;  %v1280_v36 = vadd.f32 %v5342_v56, %v7320_v4  ;;  %4306 = vmatpush1.bf16.msra.mxu0 %v7126_v22  ;;  %v7374_v22 = vld [vmem:[%s7996_s4 + $0x6b4] ss:$8 sps:$4 sm:$0xff]  }
 0x131   : > { %5381 = vmatpush2.bf16.msra.mxu1 %v7343_v61  ;;  %v1207_v52 = vpop.f32.mrf.mxu1  ;;  %v1271_v57 = vpop.f32.mrf.mxu0  ;;  %4307 = vmatprep.subr.bf16.mxu0 %v7136_v3  ;;  %v5880_v3 = vld [vmem:[%s6796_s15 + $0x60] ss:$8 sps:$4 sm:$0xff]  }
 0x132   : > { %5366 = vmatprep.subr.bf16.mxu1 %v7350_v55  ;;  %1407 = vst [vmem:[%s6957_s23 + $0x1c0] sm:$0xff] %v1359_v24  ;;  %1381 = vst [vmem:[%s6957_s23 + $0x18] sm:$0xff] %v1333_v62  ;;  %v1361_v31 = vmax.f32 %v1206_v60, 0.0  ;;  %v1342_v59 = vmax.f32 %v1280_v36, 0.0  ;;  %v1208_v63 = vadd.f32 %v1207_v52, %v6940_v9  ;;  %v1272_v0 = vadd.f32 %v1271_v57, %v7320_v4  ;;  %v7413_v28 = vld [vmem:[%s7996_s4 + $0x6a0] ss:$8 sps:$4 sm:$0xff]  }
 0x133   : > { %3513 = vmatprep.mubr.bf16.mxu1 %v5882_v47  ;;  %v1209_v40 = vpop.f32.mrf.mxu1  ;;  %3905 = vmatmul.mubr.bf16.gmra.mxu0 %v5876_v30  ;;  %v5345_v44 = vpop.f32.mrf.mxu0  ;;  %v5898_v30 = vld [vmem:[%s6963_s22 + $0x34] ss:$8 sps:$4 sm:$0xff]   ;;  %v5892_v60 = vld [vmem:[%s6796_s15 + $0x70] ss:$8 sps:$4 sm:$0xff]  }
 0x134   : > { %1409 = vst [vmem:[%s6957_s23 + $0x1e8] sm:$0xff] %v1361_v31  ;;  %1390 = vst [vmem:[%s6957_s23 + $0xa8] sm:$0xff] %v1342_v59  ;;  %v1362_v7 = vmax.f32 %v1208_v63, 0.0  ;;  %v1336_v12 = vmax.f32 %v1272_v0, 0.0  ;;  %v1210_v13 = vadd.f32 %v1209_v40, %v6931_v33  ;;  %4308 = vmatpush1.bf16.msra.mxu0 %v7150_v23  ;;  %v1293_v38 = vadd.f32 %v5345_v44, %v7320_v4  ;;  %v7398_v23 = vld [vmem:[%s7996_s4 + $0x6a4] ss:$8 sps:$4 sm:$0xff]  }
 0x135   : > { %5382 = vmatpush2.bf16.msra.mxu1 %v7367_v29  ;;  %v1211_v26 = vpop.f32.mrf.mxu1  ;;  %4309 = vmatprep.subr.bf16.mxu0 %v7162_v19  ;;  %v1284_v27 = vpop.f32.mrf.mxu0  ;;  %v7437_v31 = vld [vmem:[%s7996_s4 + $0x690] ss:$8 sps:$4 sm:$0xff]   ;;  %v5906_v44 = vld [vmem:[%s7048_s28 + $0x24] ss:$8 sps:$4 sm:$0xff]  }
 0x136   : > { %5367 = vmatprep.subr.bf16.mxu1 %v7374_v22  ;;  %1410 = vst [vmem:[%s6957_s23 + $0x1f0] sm:$0xff] %v1362_v7  ;;  %1384 = vst [vmem:[%s6957_s23 + $0x48] sm:$0xff] %v1336_v12  ;;  %v1364_v37 = vmax.f32 %v1210_v13, 0.0  ;;  %v1212_v15 = vadd.f32 %v1211_v26, %v6940_v9  ;;  %3914 = vmatprep.mubr.bf16.mxu0 %v5886_v50  ;;  %v1351_v11 = vmax.f32 %v1293_v38, 0.0  ;;  %v5900_v13 = vld [vmem:[%s6963_s22 + $0x30] ss:$8 sps:$4 sm:$0xff]  }
 0x137   : > { %v1285_v19 = vadd.f32 %v1284_v27, %v7320_v4  ;;  %v1215_v32 = vpop.f32.mrf.mxu1  ;;  %3514 = vmatmul.mubr.bf16.gmra.mxu1 %v5880_v3  ;;  %v5346_v1 = vpop.f32.mrf.mxu0 }
 0x138   : > { %1412 = vst [vmem:[%s6957_s23 + $0x218] sm:$0xff] %v1364_v37  ;;  %v1365_v2 = vmax.f32 %v1212_v15, 0.0  ;;  %v1216_v14 = vadd.f32 %v1215_v32, %v6931_v33  ;;  %4310 = vmatpush1.bf16.msra.mxu0 %v7176_v43  ;;  %1399 = vst [vmem:[%s6957_s23 + $0x138] sm:$0xff] %v1351_v11  ;;  %v1296_v41 = vadd.f32 %v5346_v1, %v7320_v4  ;;  %v7422_v43 = vld [vmem:[%s7996_s4 + $0x694] ss:$8 sps:$4 sm:$0xff]   ;;  %3523 = vmatprep.mubr.bf16.mxu1 %v5894_v53 }
 0x139   : > { %5383 = vmatpush2.bf16.msra.mxu1 %v7390_v18  ;;  %v1345_v17 = vmax.f32 %v1285_v19, 0.0  ;;  %v1217_v45 = vpop.f32.mrf.mxu1  ;;  %4311 = vmatprep.subr.bf16.mxu0 %v7188_v10  ;;  %v1287_v47 = vpop.f32.mrf.mxu0  ;;  %v7461_v37 = vld [vmem:[%s7996_s4 + $0x680] ss:$8 sps:$4 sm:$0xff]   ;;  %v5909_v19 = vld [vmem:[%s6963_s22 + $0x44] ss:$8 sps:$4 sm:$0xff]  }
 0x13a   : > { %5368 = vmatprep.subr.bf16.mxu1 %v7398_v23  ;;  %1413 = vst [vmem:[%s6957_s23 + $0x220] sm:$0xff] %v1365_v2  ;;  %v1367_v48 = vmax.f32 %v1216_v14, 0.0  ;;  %v1218_v56 = vadd.f32 %v1217_v45, %v6940_v9  ;;  %v1354_v24 = vmax.f32 %v1296_v41, 0.0  ;;  %v1288_v10 = vadd.f32 %v1287_v47, %v7320_v4  ;;  %v5912_v47 = vld [vmem:[%s7048_s28 + $0x34] ss:$8 sps:$4 sm:$0xff]  }
 0x13b   : > { %1393 = vst [vmem:[%s6957_s23 + $0xd8] sm:$0xff] %v1345_v17  ;;  %v1219_v62 = vpop.f32.mrf.mxu1  ;;  %3915 = vmatmul.mubr.bf16.gmra.mxu0 %v5888_v35  ;;  %v5349_v36 = vpop.f32.mrf.mxu0  ;;  %v5904_v17 = vld [vmem:[%s7048_s28 + $0x20] ss:$8 sps:$4 sm:$0xff]  }
 0x13c   : > { %1415 = vst [vmem:[%s6957_s23 + $0x248] sm:$0xff] %v1367_v48  ;;  %v1368_v52 = vmax.f32 %v1218_v56, 0.0  ;;  %v1220_v57 = vadd.f32 %v1219_v62, %v6931_v33  ;;  %4312 = vmatpush1.bf16.msra.mxu0 %v7200_v51  ;;  %1402 = vst [vmem:[%s6957_s23 + $0x168] sm:$0xff] %v1354_v24  ;;  %v1348_v59 = vmax.f32 %v1288_v10, 0.0  ;;  %v1309_v63 = vadd.f32 %v5349_v36, %v7320_v4  ;;  %v7446_v51 = vld [vmem:[%s7996_s4 + $0x684] ss:$8 sps:$4 sm:$0xff]  }
 0x13d   : > { %5384 = vmatpush2.bf16.msra.mxu1 %v7413_v28  ;;  %v1221_v0 = vpop.f32.mrf.mxu1  ;;  %4313 = vmatprep.subr.bf16.mxu0 %v7210_v46  ;;  %v1300_v50 = vpop.f32.mrf.mxu0  ;;  %v5907_v36 = vld [vmem:[%s6963_s22 + $0x40] ss:$8 sps:$4 sm:$0xff]  }
 0x13e   : > { %5369 = vmatprep.subr.bf16.mxu1 %v7422_v43  ;;  %1416 = vst [vmem:[%s6957_s23 + $0x250] sm:$0xff] %v1368_v52  ;;  %v1370_v40 = vmax.f32 %v1220_v57, 0.0  ;;  %v1222_v3 = vadd.f32 %v1221_v0, %v6940_v9  ;;  %3924 = vmatprep.mubr.bf16.mxu0 %v5898_v30  ;;  %1396 = vst [vmem:[%s6957_s23 + $0x108] sm:$0xff] %v1348_v59  ;;  %v1363_v7 = vmax.f32 %v1309_v63, 0.0  ;;  %v5915_v57 = vld [vmem:[%s6963_s22 + $0x54] ss:$8 sps:$4 sm:$0xff]  }
 0x13f   : > { %v1301_v46 = vadd.f32 %v1300_v50, %v7320_v4  ;;  %v1225_v12 = vpop.f32.mrf.mxu1  ;;  %3524 = vmatmul.mubr.bf16.gmra.mxu1 %v5892_v60  ;;  %v5350_v38 = vpop.f32.mrf.mxu0 }
 0x140   : > { %1418 = vst [vmem:[%s6957_s23 + $0x278] sm:$0xff] %v1370_v40  ;;  %v1371_v26 = vmax.f32 %v1222_v3, 0.0  ;;  %v1226_v27 = vadd.f32 %v1225_v12, %v6931_v33  ;;  %4314 = vmatpush1.bf16.msra.mxu0 %v7223_v58  ;;  %1411 = vst [vmem:[%s6957_s23 + $0x1f8] sm:$0xff] %v1363_v7  ;;  %v1312_v53 = vadd.f32 %v5350_v38, %v7320_v4  ;;  %4355 = vmatprep.mubr.bf16.mxu1 %v5906_v44  ;;  %v5910_v3 = vld [vmem:[%s7048_s28 + $0x30] ss:$8 sps:$4 sm:$0xff]  }
 0x141   : > { %5385 = vmatpush2.bf16.msra.mxu1 %v7437_v31  ;;  %v1357_v15 = vmax.f32 %v1301_v46, 0.0  ;;  %v1227_v11 = vpop.f32.mrf.mxu1  ;;  %4315 = vmatprep.subr.bf16.mxu0 %v7234_v34  ;;  %v1303_v58 = vpop.f32.mrf.mxu0  ;;  %v5918_v44 = vld [vmem:[%s7048_s28 + $0x44] ss:$8 sps:$4 sm:$0xff]   ;;  %v5916_v38 = vld [vmem:[%s7048_s28 + $0x40] ss:$8 sps:$4 sm:$0xff]  }
 0x142   : > { %5370 = vmatprep.subr.bf16.mxu1 %v7446_v51  ;;  %1419 = vst [vmem:[%s6957_s23 + $0x280] sm:$0xff] %v1371_v26  ;;  %v1373_v32 = vmax.f32 %v1226_v27, 0.0  ;;  %v1228_v35 = vadd.f32 %v1227_v11, %v6940_v9  ;;  %v1366_v1 = vmax.f32 %v1312_v53, 0.0  ;;  %v1304_v2 = vadd.f32 %v1303_v58, %v7320_v4  ;;  %v5919_v27 = vld [vmem:[%s6963_s22 + $0x60] ss:$8 sps:$4 sm:$0xff]  }
 0x143   : > { %1405 = vst [vmem:[%s6957_s23 + $0x198] sm:$0xff] %v1357_v15  ;;  %v1229_v14 = vpop.f32.mrf.mxu1  ;;  %3925 = vmatmul.mubr.bf16.gmra.mxu0 %v5900_v13  ;;  %v5353_v34 = vpop.f32.mrf.mxu0  ;;  %v5922_v53 = vld [vmem:[%s7048_s28 + $0x50] ss:$8 sps:$4 sm:$0xff]  }
 0x144   : > { %1421 = vst [vmem:[%s6957_s23 + $0x2a8] sm:$0xff] %v1373_v32  ;;  %v1374_v41 = vmax.f32 %v1228_v35, 0.0  ;;  %v1230_v45 = vadd.f32 %v1229_v14, %v6931_v33  ;;  %4316 = vmatpush1.bf16.msra.mxu0 %v7249_v25  ;;  %1414 = vst [vmem:[%s6957_s23 + $0x228] sm:$0xff] %v1366_v1  ;;  %v1360_v48 = vmax.f32 %v1304_v2, 0.0  ;;  %v1325_v56 = vadd.f32 %v5353_v34, %v7320_v4  ;;  %v5928_v32 = vld [vmem:[%s7048_s28 + $0x60] ss:$8 sps:$4 sm:$0xff]  }
 0x145   : > { %5386 = vmatpush2.bf16.msra.mxu1 %v7461_v37  ;;  %v1231_v30 = vpop.f32.mrf.mxu1  ;;  %4317 = vmatprep.subr.bf16.mxu0 %v7261_v16  ;;  %v1316_v24 = vpop.f32.mrf.mxu0  ;;  %v5931_v1 = vld [vmem:[%s7048_s28] ss:$8 sps:$4 sm:$0xff]  }
 0x146   : > { %3934 = vmatprep.mubr.bf16.mxu0 %v5909_v19  ;;  %1422 = vst [vmem:[%s6957_s23 + $0x2b0] sm:$0xff] %v1374_v41  ;;  %v1376_v33 = vmax.f32 %v1230_v45, 0.0  ;;  %v1232_v25 = vadd.f32 %v1231_v30, %v6940_v9  ;;  %1408 = vst [vmem:[%s6957_s23 + $0x1c8] sm:$0xff] %v1360_v48  ;;  %v1375_v10 = vmax.f32 %v1325_v56, 0.0  ;;  %v1317_v62 = vadd.f32 %v1316_v24, %v7320_v4  ;;  %v5925_v19 = vld [vmem:[%s6963_s22 + $0x70] ss:$8 sps:$4 sm:$0xff]  }
 0x147   : > { %v7485_v60 = vpop.f32.mrf.mxu1  ;;  %v5354_v52 = vpop.f32.mrf.mxu0  ;;  %v5937_v48 = vld [vmem:[%s7048_s28 + $0x10] ss:$8 sps:$4 sm:$0xff]  }
 0x148   : > { %4356 = vmatmul.mubr.bf16.vlgmr.msra.gmra.mxu1 %v5904_v17  ;;  %1424 = vst [vmem:[%s6957_s23 + $0x2d8] sm:$0xff] %v1376_v33  ;;  %v1377_v16 = vmax.f32 %v1232_v25, 0.0  ;;  %4318 = vmatpush1.bf16.msra.mxu0 %v7275_v20  ;;  %1423 = vst [vmem:[%s6957_s23 + $0x2b8] sm:$0xff] %v1375_v10  ;;  %v1369_v9 = vmax.f32 %v1317_v62, 0.0  ;;  %v1328_v59 = vadd.f32 %v5354_v52, %v7320_v4  ;;  %v5934_v17 = vld [vmem:[%s7048_s28 + $0x70] ss:$8 sps:$4 sm:$0xff]  }
 0x149   : > { %4365 = vmatprep.mubr.bf16.mxu1 %v5912_v47  ;;  %v7493_v63 = vpop.f32.mrf.mxu1  ;;  %4319 = vmatprep.subr.bf16.mxu0 %v7285_v49  ;;  %v1319_v0 = vpop.f32.mrf.mxu0 }
 0x14a   : > { %1425 = vst [vmem:[%s6957_s23 + $0x2e0] sm:$0xff] %v1377_v16  ;;  %1417 = vst [vmem:[%s6957_s23 + $0x258] sm:$0xff] %v1369_v9  ;;  %v1378_v50 = vmax.f32 %v1328_v59, 0.0  ;;  %v1320_v20 = vadd.f32 %v1319_v0, %v7320_v4  ;;  %v5913_v4 = vld [vmem:[%s6963_s22 + $0x50] ss:$8 sps:$4 sm:$0xff]  }
 0x14b   : > { %v7499_v40 = vpop.f32.mrf.mxu1  ;;  %3935 = vmatmul.mubr.bf16.gmra.mxu0 %v5907_v36 }
 0x14c   : > { %4320 = vmatpush2.bf16.msra.mxu0 %v7298_v54  ;;  %3944 = vmatprep.mubr.bf16.mxu0 %v5915_v57  ;;  %1426 = vst [vmem:[%s6957_s23 + $0x2e8] sm:$0xff] %v1378_v50  ;;  %v1372_v49 = vmax.f32 %v1320_v20, 0.0  ;;  %v5921_v54 = vld [vmem:[%s6963_s22 + $0x64] ss:$8 sps:$4 sm:$0xff]  }
 0x14d   : > { %v7505_v7 = vpop.f32.mrf.mxu1  ;;  %4321 = vmatprep.subr.bf16.mxu0 %v7305_v39  ;;  %v5924_v39 = vld [vmem:[%s7048_s28 + $0x54] ss:$8 sps:$4 sm:$0xff]  }
 0x14e   : > { %1420 = vst [vmem:[%s6957_s23 + $0x288] sm:$0xff] %v1372_v49 }
 0x14f   : > { %v7509_v46 = vpop.f32.mrf.mxu1 }
 0x150   : > { %4366 = vmatmul.mubr.bf16.gmra.mxu1 %v5910_v3  ;;  %4322 = vmatpush2.bf16.msra.mxu0 %v7317_v6 }
 0x151   : > { %4375 = vmatprep.mubr.bf16.mxu1 %v5918_v44  ;;  %v7514_v12 = vpop.f32.mrf.mxu1  ;;  %4323 = vmatprep.subr.bf16.mxu0 %v7327_v42  ;;  %v5927_v42 = vld [vmem:[%s6963_s22 + $0x74] ss:$8 sps:$4 sm:$0xff]  }
 0x153   : > { %v7517_v13 = vpop.f32.mrf.mxu1  ;;  %3945 = vmatmul.mubr.bf16.gmra.mxu0 %v5913_v4 }
 0x154   : > { %4324 = vmatpush2.bf16.msra.mxu0 %v7343_v61  ;;  %3954 = vmatprep.mubr.bf16.mxu0 %v5921_v54 }
 0x155   : > { %v7522_v26 = vpop.f32.mrf.mxu1  ;;  %4325 = vmatprep.subr.bf16.mxu0 %v7350_v55  ;;  %v5930_v55 = vld [vmem:[%s7048_s28 + $0x64] ss:$8 sps:$4 sm:$0xff]  }
 0x157   : > { %v7525_v6 = vpop.f32.mrf.mxu1 }
 0x158   : > { %4376 = vmatmul.mubr.bf16.gmra.mxu1 %v5916_v38  ;;  %4326 = vmatpush2.bf16.msra.mxu0 %v7367_v29 }
 0x159   : > { %4385 = vmatprep.mubr.bf16.mxu1 %v5924_v39  ;;  %v7530_v15 = vpop.f32.mrf.mxu1  ;;  %4327 = vmatprep.subr.bf16.mxu0 %v7374_v22  ;;  %v5933_v22 = vld [vmem:[%s7048_s28 + $0x4] ss:$8 sps:$4 sm:$0xff]  }
 0x15b   : > { %v7533_v61 = vpop.f32.mrf.mxu1  ;;  %3955 = vmatmul.mubr.bf16.gmra.mxu0 %v5919_v27 }
 0x15c   : > { %4328 = vmatpush2.bf16.msra.mxu0 %v7390_v18  ;;  %3964 = vmatprep.mubr.bf16.mxu0 %v5927_v42 }
 0x15d   : > { %v7538_v11 = vpop.f32.mrf.mxu1  ;;  %4329 = vmatprep.subr.bf16.mxu0 %v7398_v23  ;;  %v5936_v23 = vld [vmem:[%s7048_s28 + $0x74] ss:$8 sps:$4 sm:$0xff]  }
 0x15f   : > { %v7541_v29 = vpop.f32.mrf.mxu1 }
 0x160   : > { %4386 = vmatmul.mubr.bf16.gmra.mxu1 %v5922_v53  ;;  %4330 = vmatpush2.bf16.msra.mxu0 %v7413_v28 }
 0x161   : > { %4395 = vmatprep.mubr.bf16.mxu1 %v5930_v55  ;;  %v7546_v58 = vpop.f32.mrf.mxu1  ;;  %4331 = vmatprep.subr.bf16.mxu0 %v7422_v43  ;;  %v5939_v43 = vld [vmem:[%s7048_s28 + $0x14] ss:$8 sps:$4 sm:$0xff]  }
 0x163   : > { %v7549_v18 = vpop.f32.mrf.mxu1  ;;  %3965 = vmatmul.mubr.bf16.gmra.mxu0 %v5925_v19 }
 0x164   : > { %4332 = vmatpush2.bf16.msra.mxu0 %v7437_v31  ;;  %4335 = vmatprep.mubr.bf16.mxu0 %v5933_v22 }
 0x165   : > { %v7554_v35 = vpop.f32.mrf.mxu1  ;;  %4333 = vmatprep.subr.bf16.mxu0 %v7446_v51 }
 0x167   : > { %v7557_v28 = vpop.f32.mrf.mxu1 }
 0x168   : > { %4396 = vmatmul.mubr.bf16.gmra.mxu1 %v5928_v32  ;;  %4334 = vmatpush2.bf16.msra.mxu0 %v7461_v37 }
 0x169   : > { %4405 = vmatprep.mubr.bf16.mxu1 %v5936_v23  ;;  %v7562_v2 = vpop.f32.mrf.mxu1 }
 0x16b   : > { %v7564_v14 = vpop.f32.mrf.mxu1  ;;  %v2164_v31 = vpop.f32.mrf.mxu0  ;;  %4336 = vmatmul.mubr.bf16.vlgmr.msra.gmra.mxu0 %v5931_v1 }
 0x16c   : > { %v2165_v34 = vadd.f32 %v2164_v31, %v7485_v60  ;;  %4345 = vmatprep.mubr.bf16.mxu0 %v5939_v43 }
 0x16d   : > { %v7568_v51 = vpop.f32.mrf.mxu1  ;;  %v2166_v41 = vpop.f32.mrf.mxu0 }
 0x16e   : > { %v2167_v45 = vadd.f32 %v2166_v41, %v7493_v63 }
 0x16f   : > { %v7571_v47 = vpop.f32.mrf.mxu1  ;;  %v2168_v37 = vpop.f32.mrf.mxu0 }
 0x170   : > { %4406 = vmatmul.mubr.bf16.gmra.mxu1 %v5934_v17  ;;  %v2169_v56 = vadd.f32 %v2168_v37, %v7499_v40 }
 0x171   : > { %v7575_v30 = vpop.f32.mrf.mxu1  ;;  %v2170_v24 = vpop.f32.mrf.mxu0 }
 0x172   : > { %v2171_v33 = vadd.f32 %v2170_v24, %v7505_v7 }
 0x173   : > { %v7578_v25 = vpop.f32.mrf.mxu1  ;;  %v2174_v10 = vpop.f32.mrf.mxu0  ;;  %4346 = vmatmul.mubr.bf16.gmra.mxu0 %v5937_v48 }
 0x174   : > { %v2175_v62 = vadd.f32 %v2174_v10, %v7509_v46 }
 0x175   : > { %v7581_v60 = vpop.f32.mrf.mxu1  ;;  %v2176_v36 = vpop.f32.mrf.mxu0 }
 0x176   : > { %v2177_v52 = vadd.f32 %v2176_v36, %v7514_v12 }
 0x177   : > { %v7584_v16 = vpop.f32.mrf.mxu1  ;;  %v2178_v57 = vpop.f32.mrf.mxu0 }
 0x178   : > { %v2179_v9 = vadd.f32 %v2178_v57, %v7517_v13 }
 0x179   : > { %v7587_v59 = vpop.f32.mrf.mxu1  ;;  %v2180_v63 = vpop.f32.mrf.mxu0 }
 0x17a   : > { %v2181_v0 = vadd.f32 %v2180_v63, %v7522_v26 }
 0x17b   : > { %v7590_v50 = vpop.f32.mrf.mxu1  ;;  %v2184_v20 = vpop.f32.mrf.mxu0 }
 0x17c   : > { %v2185_v40 = vadd.f32 %v2184_v20, %v7525_v6 }
 0x17d   : > { %v7593_v3 = vpop.f32.mrf.mxu1  ;;  %v2186_v44 = vpop.f32.mrf.mxu0 }
 0x17e   : > { %v2187_v49 = vadd.f32 %v2186_v44, %v7530_v15 }
 0x17f   : > { %v7596_v7 = vpop.f32.mrf.mxu1  ;;  %v2188_v46 = vpop.f32.mrf.mxu0 }
 0x180   : > { %v2189_v4 = vadd.f32 %v2188_v46, %v7533_v61 }
 0x181   : > { %v7599_v54 = vpop.f32.mrf.mxu1  ;;  %v2190_v12 = vpop.f32.mrf.mxu0 }
 0x182   : > { %v2191_v13 = vadd.f32 %v2190_v12, %v7538_v11 }
 0x183   : > { %v7602_v38 = vpop.f32.mrf.mxu1  ;;  %v2194_v39 = vpop.f32.mrf.mxu0 }
 0x184   : > { %v2195_v26 = vadd.f32 %v2194_v39, %v7541_v29 }
 0x185   : > { %v7605_v6 = vpop.f32.mrf.mxu1  ;;  %v2196_v27 = vpop.f32.mrf.mxu0 }
 0x186   : > { %v2197_v42 = vadd.f32 %v2196_v27, %v7546_v58 }
 0x187   : > { %v2198_v15 = vpop.f32.mrf.mxu0  ;;  %v2573_v53 = vpop.f32.mrf.mxu1 }
 0x188   : > { %v2199_v55 = vadd.f32 %v2198_v15, %v7549_v18  ;;  %v7609_v61 = vadd.f32 %v2573_v53, %v2165_v34 }
 0x189   : > { %v2200_v19 = vpop.f32.mrf.mxu0  ;;  %v2575_v22 = vpop.f32.mrf.mxu1 }
 0x18a   : > { %v2201_v11 = vadd.f32 %v2200_v19, %v7554_v35  ;;  %v7612_v32 = vadd.f32 %v2575_v22, %v2167_v45 }
 0x18b   : > { %v2204_v23 = vpop.f32.mrf.mxu0  ;;  %v2577_v1 = vpop.f32.mrf.mxu1 }
 0x18c   : > { %v2205_v29 = vadd.f32 %v2204_v23, %v7557_v28  ;;  %v7615_v43 = vadd.f32 %v2577_v1, %v2169_v56 }
 0x18d   : > { %v2206_v31 = vpop.f32.mrf.mxu0  ;;  %v2579_v58 = vpop.f32.mrf.mxu1 }
 0x18e   : > { %v2207_v17 = vadd.f32 %v2206_v31, %v7562_v2  ;;  %v7618_v41 = vadd.f32 %v2579_v58, %v2171_v33 }
 0x18f   : > { %v2208_v18 = vpop.f32.mrf.mxu0  ;;  %v2583_v34 = vpop.f32.mrf.mxu1 }
 0x190   : > { %v2209_v37 = vadd.f32 %v2208_v18, %v7564_v14  ;;  %v7621_v48 = vadd.f32 %v2583_v34, %v2175_v62 }
 0x191   : > { %v2210_v35 = vpop.f32.mrf.mxu0  ;;  %v2585_v45 = vpop.f32.mrf.mxu1 }
 0x192   : > { %v2211_v24 = vadd.f32 %v2210_v35, %v7568_v51  ;;  %v7624_v10 = vadd.f32 %v2585_v45, %v2177_v52 }
 0x193   : > { %v2214_v28 = vpop.f32.mrf.mxu0  ;;  %v2587_v56 = vpop.f32.mrf.mxu1 }
 0x194   : > { %v2215_v36 = vadd.f32 %v2214_v28, %v7571_v47  ;;  %v7627_v57 = vadd.f32 %v2587_v56, %v2179_v9 }
 0x195   : > { %v2216_v2 = vpop.f32.mrf.mxu0  ;;  %v2589_v33 = vpop.f32.mrf.mxu1 }
 0x196   : > { %v2217_v63 = vadd.f32 %v2216_v2, %v7575_v30  ;;  %v7630_v20 = vadd.f32 %v2589_v33, %v2181_v0 }
 0x197   : > { %v2218_v14 = vpop.f32.mrf.mxu0  ;;  %v2593_v62 = vpop.f32.mrf.mxu1 }
 0x198   : > { %v2219_v44 = vadd.f32 %v2218_v14, %v7578_v25  ;;  %v7633_v46 = vadd.f32 %v2593_v62, %v2185_v40 }
 0x199   : > { %v2220_v51 = vpop.f32.mrf.mxu0  ;;  %v2595_v52 = vpop.f32.mrf.mxu1 }
 0x19a   : > { %v2221_v12 = vadd.f32 %v2220_v51, %v7581_v60  ;;  %v7636_v39 = vadd.f32 %v2595_v52, %v2187_v49 }
 0x19b   : > { %v2224_v47 = vpop.f32.mrf.mxu0  ;;  %v2597_v9 = vpop.f32.mrf.mxu1 }
 0x19c   : > { %v2225_v27 = vadd.f32 %v2224_v47, %v7584_v16  ;;  %v7639_v15 = vadd.f32 %v2597_v9, %v2189_v4 }
 0x19d   : > { %v2226_v30 = vpop.f32.mrf.mxu0  ;;  %v2599_v0 = vpop.f32.mrf.mxu1 }
 0x19e   : > { %v2227_v53 = vadd.f32 %v2226_v30, %v7587_v59  ;;  %v7642_v19 = vadd.f32 %v2599_v0, %v2191_v13 }
 0x19f   : > { %v2228_v25 = vpop.f32.mrf.mxu0  ;;  %v2603_v40 = vpop.f32.mrf.mxu1 }
 0x1a0   : > { %v2229_v22 = vadd.f32 %v2228_v25, %v7590_v50  ;;  %v7645_v23 = vadd.f32 %v2603_v40, %v2195_v26 }
 0x1a1   : > { %v2230_v60 = vpop.f32.mrf.mxu0  ;;  %v2605_v49 = vpop.f32.mrf.mxu1 }
 0x1a2   : > { %v2231_v1 = vadd.f32 %v2230_v60, %v7593_v3  ;;  %v7648_v31 = vadd.f32 %v2605_v49, %v2197_v42 }
 0x1a3   : > { %v2234_v16 = vpop.f32.mrf.mxu0  ;;  %v2607_v4 = vpop.f32.mrf.mxu1 }
 0x1a4   : > { %v2235_v58 = vadd.f32 %v2234_v16, %v7596_v7  ;;  %v7651_v18 = vadd.f32 %v2607_v4, %v2199_v55 }
 0x1a5   : > { %v2236_v59 = vpop.f32.mrf.mxu0  ;;  %v2609_v13 = vpop.f32.mrf.mxu1 }
 0x1a6   : > { %v2237_v34 = vadd.f32 %v2236_v59, %v7599_v54  ;;  %v7654_v35 = vadd.f32 %v2609_v13, %v2201_v11 }
 0x1a7   : > { %v2238_v50 = vpop.f32.mrf.mxu0  ;;  %v2613_v26 = vpop.f32.mrf.mxu1 }
 0x1a8   : > { %v2239_v45 = vadd.f32 %v2238_v50, %v7602_v38  ;;  %v7657_v28 = vadd.f32 %v2613_v26, %v2205_v29 }
 0x1a9   : > { %v2240_v3 = vpop.f32.mrf.mxu0  ;;  %v2615_v42 = vpop.f32.mrf.mxu1 }
 0x1aa   : > { %v2241_v56 = vadd.f32 %v2240_v3, %v7605_v6  ;;  %v7660_v2 = vadd.f32 %v2615_v42, %v2207_v17 }
 0x1ab   : > { %v2617_v7 = vpop.f32.mrf.mxu1  ;;  %v3014_v55 = vpop.f32.mrf.mxu0 }
 0x1ac   : > { %v7662_v33 = vadd.f32 %v2617_v7, %v2209_v37  ;;  %v3093_v54 = vadd.f32 %v3014_v55, %v7609_v61 }
 0x1ad   : > { %v2619_v11 = vpop.f32.mrf.mxu1  ;;  %v3016_v14 = vpop.f32.mrf.mxu0 }
 0x1ae   : > { %v7665_v62 = vadd.f32 %v2619_v11, %v2211_v24  ;;  %v3094_v38 = vadd.f32 %v3016_v14, %v7612_v32 }
 0x1af   : > { %v2623_v29 = vpop.f32.mrf.mxu1  ;;  %v3018_v51 = vpop.f32.mrf.mxu0 }
 0x1b0   : > { %v7668_v52 = vadd.f32 %v2623_v29, %v2215_v36  ;;  %v3095_v6 = vadd.f32 %v3018_v51, %v7615_v43 }
 0x1b1   : > { %v2625_v17 = vpop.f32.mrf.mxu1  ;;  %v3020_v47 = vpop.f32.mrf.mxu0 }
 0x1b2   : > { %v7671_v9 = vadd.f32 %v2625_v17, %v2217_v63  ;;  %v3096_v37 = vadd.f32 %v3020_v47, %v7618_v41 }
 0x1b3   : > { %v2627_v30 = vpop.f32.mrf.mxu1  ;;  %v3024_v61 = vpop.f32.mrf.mxu0 }
 0x1b4   : > { %v7674_v0 = vadd.f32 %v2627_v30, %v2219_v44  ;;  %v3097_v24 = vadd.f32 %v3024_v61, %v7621_v48 }
 0x1b5   : > { %v2629_v25 = vpop.f32.mrf.mxu1  ;;  %v3026_v32 = vpop.f32.mrf.mxu0 }
 0x1b6   : > { %v7677_v40 = vadd.f32 %v2629_v25, %v2221_v12  ;;  %v3098_v36 = vadd.f32 %v3026_v32, %v7624_v10 }
 0x1b7   : > { %v2633_v60 = vpop.f32.mrf.mxu1  ;;  %v3028_v43 = vpop.f32.mrf.mxu0 }
 0x1b8   : > { %v7680_v49 = vadd.f32 %v2633_v60, %v2225_v27  ;;  %v3099_v63 = vadd.f32 %v3028_v43, %v7627_v57 }
 0x1b9   : > { %v2635_v16 = vpop.f32.mrf.mxu1  ;;  %v3030_v41 = vpop.f32.mrf.mxu0 }
 0x1ba   : > { %v7683_v4 = vadd.f32 %v2635_v16, %v2227_v53  ;;  %v3100_v44 = vadd.f32 %v3030_v41, %v7630_v20 }
 0x1bb   : > { %v2637_v59 = vpop.f32.mrf.mxu1  ;;  %v3034_v48 = vpop.f32.mrf.mxu0 }
 0x1bc   : > { %v7686_v13 = vadd.f32 %v2637_v59, %v2229_v22  ;;  %v7689_v12 = vadd.f32 %v3034_v48, %v7633_v46 }
 0x1bd   : > { %v2639_v10 = vpop.f32.mrf.mxu1  ;;  %v3036_v50 = vpop.f32.mrf.mxu0 }
 0x1be   : > { %v7691_v26 = vadd.f32 %v2639_v10, %v2231_v1  ;;  %v7694_v27 = vadd.f32 %v3036_v50, %v7636_v39 }
 0x1bf   : > { %v2643_v57 = vpop.f32.mrf.mxu1  ;;  %v3038_v3 = vpop.f32.mrf.mxu0 }
 0x1c0   : > { %v7696_v53 = vadd.f32 %v2643_v57, %v2235_v58  ;;  %v7699_v20 = vadd.f32 %v3038_v3, %v7639_v15 }
 0x1c1   : > { %v2645_v42 = vpop.f32.mrf.mxu1  ;;  %v3040_v22 = vpop.f32.mrf.mxu0 }
 0x1c2   : > { %v7701_v7 = vadd.f32 %v2645_v42, %v2237_v34  ;;  %v7704_v46 = vadd.f32 %v3040_v22, %v7642_v19 }
 0x1c3   : > { %v2647_v55 = vpop.f32.mrf.mxu1  ;;  %v3044_v1 = vpop.f32.mrf.mxu0 }
 0x1c4   : > { %v7706_v11 = vadd.f32 %v2647_v55, %v2239_v45  ;;  %v7709_v39 = vadd.f32 %v3044_v1, %v7645_v23 }
 0x1c5   : > { %v2649_v14 = vpop.f32.mrf.mxu1  ;;  %v3046_v58 = vpop.f32.mrf.mxu0 }
 0x1c6   : > { %v7711_v29 = vadd.f32 %v2649_v14, %v2241_v56  ;;  %v7714_v15 = vadd.f32 %v3046_v58, %v7648_v31 }
 0x1c7   : > { %v3048_v51 = vpop.f32.mrf.mxu0  ;;  %v3455_v34 = vpop.f32.mrf.mxu1 }
 0x1c8   : > { %v7717_v17 = vadd.f32 %v3048_v51, %v7651_v18  ;;  %v7719_v19 = vadd.f32 %v3455_v34, %v3093_v54 }
 0x1c9   : > { %v3050_v47 = vpop.f32.mrf.mxu0  ;;  %v3457_v45 = vpop.f32.mrf.mxu1 }
 0x1ca   : > { %v7722_v30 = vadd.f32 %v3050_v47, %v7654_v35  ;;  %v7724_v23 = vadd.f32 %v3457_v45, %v3094_v38 }
 0x1cb   : > { %v3054_v61 = vpop.f32.mrf.mxu0  ;;  %v3459_v56 = vpop.f32.mrf.mxu1 }
 0x1cc   : > { %v7727_v25 = vadd.f32 %v3054_v61, %v7657_v28  ;;  %v7729_v31 = vadd.f32 %v3459_v56, %v3095_v6 }
 0x1cd   : > { %v3056_v32 = vpop.f32.mrf.mxu0  ;;  %v3461_v60 = vpop.f32.mrf.mxu1 }
 0x1ce   : > { %8005 = vst [vmem:[#allocation2_spill] sm:$0xff] %v7729_v31  ;;  %v7732_v18 = vadd.f32 %v3056_v32, %v7660_v2  ;;  %v7734_v54 = vadd.f32 %v3461_v60, %v3096_v37 }
 0x1cf   : > { %v3058_v43 = vpop.f32.mrf.mxu0  ;;  %v3465_v16 = vpop.f32.mrf.mxu1 }
 0x1d0   : > { %8006 = vst [vmem:[#allocation3_spill] sm:$0xff] %v7734_v54  ;;  %v7737_v35 = vadd.f32 %v3058_v43, %v7662_v33  ;;  %v7739_v38 = vadd.f32 %v3465_v16, %v3097_v24 }
 0x1d1   : > { %v3060_v41 = vpop.f32.mrf.mxu0  ;;  %v3467_v59 = vpop.f32.mrf.mxu1 }
 0x1d2   : > { %8007 = vst [vmem:[#allocation4_spill] sm:$0xff] %v7739_v38  ;;  %v7742_v28 = vadd.f32 %v3060_v41, %v7665_v62  ;;  %v7744_v6 = vadd.f32 %v3467_v59, %v3098_v36 }
 0x1d3   : > { %v3064_v48 = vpop.f32.mrf.mxu0  ;;  %v3469_v10 = vpop.f32.mrf.mxu1 }
 0x1d4   : > { %8008 = vst [vmem:[#allocation5_spill] sm:$0xff] %v7744_v6  ;;  %v7747_v2 = vadd.f32 %v3064_v48, %v7668_v52  ;;  %v7749_v37 = vadd.f32 %v3469_v10, %v3099_v63 }
 0x1d5   : > { %v3066_v50 = vpop.f32.mrf.mxu0  ;;  %v3471_v57 = vpop.f32.mrf.mxu1 }
 0x1d6   : > { %8009 = vst [vmem:[#allocation6_spill] sm:$0xff] %v7749_v37  ;;  %v7752_v33 = vadd.f32 %v3066_v50, %v7671_v9  ;;  %v7754_v24 = vadd.f32 %v3471_v57, %v3100_v44 }
 0x1d7   : > { %v3068_v3 = vpop.f32.mrf.mxu0  ;;  %v3475_v42 = vpop.f32.mrf.mxu1 }
 0x1d8   : > { %8010 = vst [vmem:[#allocation7_spill] sm:$0xff] %v7754_v24  ;;  %v7757_v62 = vadd.f32 %v3068_v3, %v7674_v0 }
 0x1d9   : > { %v3070_v36 = vpop.f32.mrf.mxu0  ;;  %v3477_v22 = vpop.f32.mrf.mxu1 }
 0x1da   : > { %v7760_v55 = vadd.f32 %v3070_v36, %v7677_v40  ;;  %v3543_v38 = vadd.f32 %v3477_v22, %v7694_v27 }
 0x1db   : > { %v3074_v52 = vpop.f32.mrf.mxu0  ;;  %v3479_v63 = vpop.f32.mrf.mxu1 }
 0x1dc   : > { %v7763_v1 = vadd.f32 %v3074_v52, %v7680_v49 }
 0x1dd   : > { %v3076_v14 = vpop.f32.mrf.mxu0  ;;  %v3481_v9 = vpop.f32.mrf.mxu1 }
 0x1de   : > { %v7766_v44 = vadd.f32 %v3076_v14, %v7683_v4  ;;  %v3545_v27 = vadd.f32 %v3481_v9, %v7704_v46 }
 0x1df   : > { %v3078_v58 = vpop.f32.mrf.mxu0  ;;  %v3485_v51 = vpop.f32.mrf.mxu1 }
 0x1e0   : > { %v7769_v0 = vadd.f32 %v3078_v58, %v7686_v13 }
 0x1e1   : > { %v3080_v34 = vpop.f32.mrf.mxu0  ;;  %v7771_v47 = vpop.f32.mrf.mxu1 }
 0x1e2   : > { %v7774_v40 = vadd.f32 %v3080_v34, %v7691_v26 }
 0x1e3   : > { %v3084_v45 = vpop.f32.mrf.mxu0  ;;  %v7776_v61 = vpop.f32.mrf.mxu1 }
 0x1e4   : > { %8011 = vst [vmem:[#allocation8_spill] sm:$0xff] %v7774_v40  ;;  %v7779_v49 = vadd.f32 %v3084_v45, %v7696_v53  ;;  %v8028_v40 = vsub.s32 1, %v6063_v5  ;;  %v3548_v9 = vadd.f32 %v7776_v61, %v7717_v17 }
 0x1e5   : > { %v3086_v56 = vpop.f32.mrf.mxu0  ;;  %v7781_v4 = vpop.f32.mrf.mxu1 }
 0x1e6   : > { %8012 = vst [vmem:[#allocation9_spill] sm:$0xff] %v7779_v49  ;;  %v7784_v32 = vadd.f32 %v3086_v56, %v7701_v7 }
 0x1e7   : > { %v3088_v13 = vpop.f32.mrf.mxu0  ;;  %v7786_v60 = vpop.f32.mrf.mxu1 }
 0x1e8   : > { %8013 = vst [vmem:[#allocation10_spill] sm:$0xff] %v7784_v32  ;;  %v7789_v43 = vadd.f32 %v3088_v13, %v7706_v11 }
 0x1e9   : > { %v3090_v26 = vpop.f32.mrf.mxu0  ;;  %v7791_v16 = vpop.f32.mrf.mxu1 }
 0x1ea   : > { %8014 = vst [vmem:[#allocation11_spill] sm:$0xff] %v7789_v43  ;;  %v7794_v41 = vadd.f32 %v3090_v26, %v7711_v29 }
 0x1eb   : > { %v7796_v53 = vpop.f32.mrf.mxu1  ;;  %v7798_v59 = vpop.f32.mrf.mxu0 }
 0x1ec   : > { %8015 = vst [vmem:[#allocation12_spill] sm:$0xff] %v7794_v41 }
 0x1ed   : > { %v7800_v48 = vpop.f32.mrf.mxu1  ;;  %v7802_v7 = vpop.f32.mrf.mxu0 }
 0x1ef   : > { %v7804_v10 = vpop.f32.mrf.mxu1  ;;  %v7806_v50 = vpop.f32.mrf.mxu0 }
 0x1f0   : > { %8016 = vst [vmem:[#allocation13_spill] sm:$0xff] %v7806_v50 }
 0x1f1   : > { %v7808_v11 = vpop.f32.mrf.mxu1  ;;  %v7810_v57 = vpop.f32.mrf.mxu0 }
 0x1f2   : > { %8017 = vst [vmem:[#allocation14_spill] sm:$0xff] %v7810_v57 }
 0x1f3   : > { %v7812_v3 = vpop.f32.mrf.mxu1  ;;  %v7814_v29 = vpop.f32.mrf.mxu0 }
 0x1f4   : > { %8018 = vst [vmem:[#allocation15_spill] sm:$0xff] %v7814_v29 }
 0x1f5   : > { %v7816_v36 = vpop.f32.mrf.mxu1  ;;  %v7818_v52 = vpop.f32.mrf.mxu0 }
 0x1f6   : > { %8019 = vst [vmem:[#allocation16_spill] sm:$0xff] %v7818_v52 }
 0x1f7   : > { %v7820_v14 = vpop.f32.mrf.mxu1  ;;  %v7822_v58 = vpop.f32.mrf.mxu0 }
 0x1f8   : > { %8020 = vst [vmem:[#allocation17_spill] sm:$0xff] %v7822_v58  ;;  %v4448_v58 = vld [vmem:[%s7999_s7] sm:$0x3] }
 0x1f9   : > { %v7824_v34 = vpop.f32.mrf.mxu1  ;;  %v7826_v45 = vpop.f32.mrf.mxu0  ;;  %v7852_v50 = vrot.slane %v4448_v58, %v8028_v40 }
 0x1fa   : > { %8021 = vst [vmem:[#allocation18_spill] sm:$0xff] %v7826_v45  ;;  %v3542_v45 = vadd.f32 %v3475_v42, %v7689_v12 }
 0x1fb   : > { %v7828_v56 = vpop.f32.mrf.mxu1  ;;  %v3916_v13 = vpop.f32.mrf.mxu0 }
 0x1fc   : > { %v3983_v32 = vadd.f32 %v3916_v13, %v3542_v45  ;;  %v3546_v13 = vadd.f32 %v3485_v51, %v7709_v39 }
 0x1fd   : > { %v7830_v26 = vpop.f32.mrf.mxu1  ;;  %v3918_v21 = vpop.f32.mrf.mxu0 }
 0x1fe   : > { %8022 = vst [vmem:[#allocation19_spill] sm:$0xff] %v7830_v26  ;;  %v3984_v54 = vadd.f32 %v3918_v21, %v3543_v38 }
 0x1ff   : > { %v7832_v8 = vpop.f32.mrf.mxu1  ;;  %v3920_v24 = vpop.f32.mrf.mxu0 }
 0x200   : > { %8023 = vst [vmem:[#allocation20_spill] sm:$0xff] %v7832_v8  ;;  %v8027_v8 = vsub.s32 0, %v6063_v5 }
 0x201   : > { %v7834_v37 = vpop.f32.mrf.mxu1  ;;  %v3922_v41 = vpop.f32.mrf.mxu0 }
 0x202   : > { %8024 = vst [vmem:[#allocation21_spill] sm:$0xff] %v7834_v37  ;;  %v7847_v49 = vrot.slane %v4448_v58, %v8027_v8 }
 0x203   : > { %v7836_v43 = vpop.f32.mrf.mxu1  ;;  %v3926_v52 = vpop.f32.mrf.mxu0 }
 0x204   : > { %8025 = vst [vmem:[#allocation22_spill] sm:$0xff] %v7836_v43  ;;  %v3544_v43 = vadd.f32 %v3479_v63, %v7699_v20  ;;  %v3986_v20 = vadd.f32 %v3922_v41, %v3545_v27  ;;  %v3547_v63 = vadd.f32 %v7771_v47, %v7714_v15  ;;  %v3987_v46 = vadd.f32 %v3926_v52, %v3546_v13 }
 0x205   : > { %v7842_v6 = vpop.f32.mrf.mxu1  ;;  %v3928_v29 = vpop.f32.mrf.mxu0 }
 0x206   : > { %8026 = vst [vmem:[#allocation23_spill] sm:$0xff] %v7842_v6  ;;  %v3985_v22 = vadd.f32 %v3920_v24, %v3544_v43  ;;  %v3988_v41 = vadd.f32 %v3928_v29, %v3547_v63  ;;  %v3550_v29 = vadd.f32 %v7786_v60, %v7727_v25 }
 0x207   : > { %v3930_v37 = vpop.f32.mrf.mxu0 }
 0x208   : > { %v4357_v57 = vpop.f32.mrf.mxu1 }
 0x209   : > { %v4424_v26 = vadd.f32 %v4357_v57, %v3983_v32  ;;  %v3932_v12 = vpop.f32.mrf.mxu0  ;;  %v3549_v57 = vadd.f32 %v7781_v4, %v7722_v30 }
 0x20a   : > { %v4359_v42 = vpop.f32.mrf.mxu1 }
 0x20b   : > { %v4468_v45 = vadd.f32 %v7847_v49, %v4424_v26  ;;  %v4425_v8 = vadd.f32 %v4359_v42, %v3984_v54  ;;  %v3936_v6 = vpop.f32.mrf.mxu0  ;;  %v3989_v26 = vadd.f32 %v3930_v37, %v3548_v9  ;;  %v3551_v37 = vadd.f32 %v7791_v16, %v7732_v18 }
 0x20c   : > { %v4361_v31 = vpop.f32.mrf.mxu1 }
 0x20d   : > { %v4500_v21 = vmax.f32 %v4468_v45, 0.0  ;;  %v4469_v5 = vadd.f32 %v7852_v50, %v4425_v8  ;;  %v4426_v38 = vadd.f32 %v4361_v31, %v3985_v22  ;;  %v3938_v40 = vpop.f32.mrf.mxu0  ;;  %v3990_v45 = vadd.f32 %v3932_v12, %v3549_v57 }
 0x20e   : > { %v4363_v32 = vpop.f32.mrf.mxu1  ;;  %v3552_v12 = vadd.f32 %v7796_v53, %v7737_v35 }
 0x20f   : > { %4532 = vst [vmem:[%s6957_s23 + $0xe0] sm:$0xff] %v4500_v21  ;;  %v4501_v24 = vmax.f32 %v4469_v5, 0.0  ;;  %v4470_v54 = vadd.f32 %v7847_v49, %v4426_v38  ;;  %v4427_v39 = vadd.f32 %v4363_v32, %v3986_v20  ;;  %v3940_v51 = vpop.f32.mrf.mxu0  ;;  %v3991_v21 = vadd.f32 %v3936_v6, %v3550_v29 }
 0x210   : > { %v4367_v43 = vpop.f32.mrf.mxu1  ;;  %v3992_v32 = vadd.f32 %v3938_v40, %v3551_v37  ;;  %v3553_v6 = vadd.f32 %v7800_v48, %v7742_v28  ;;  %v3554_v40 = vadd.f32 %v7804_v10, %v7747_v2 }
 0x211   : > { %4533 = vst [vmem:[%s6957_s23 + $0xe8] sm:$0xff] %v4501_v24  ;;  %v4502_v31 = vmax.f32 %v4470_v54, 0.0  ;;  %v4471_v15 = vadd.f32 %v7852_v50, %v4427_v39  ;;  %v4428_v47 = vadd.f32 %v4367_v43, %v3987_v46  ;;  %v3942_v52 = vpop.f32.mrf.mxu0  ;;  %v3993_v39 = vadd.f32 %v3940_v51, %v3552_v12 }
 0x212   : > { %v4369_v58 = vpop.f32.mrf.mxu1  ;;  %v3555_v51 = vadd.f32 %v7808_v11, %v7752_v33 }
 0x213   : > { %4534 = vst [vmem:[%s6957_s23 + $0x110] sm:$0xff] %v4502_v31  ;;  %v4503_v42 = vmax.f32 %v4471_v15, 0.0  ;;  %v4472_v17 = vadd.f32 %v7847_v49, %v4428_v47  ;;  %v4429_v61 = vadd.f32 %v4369_v58, %v3988_v41  ;;  %v3946_v27 = vpop.f32.mrf.mxu0  ;;  %v3994_v31 = vadd.f32 %v3942_v52, %v3553_v6 }
 0x214   : > { %v4371_v22 = vpop.f32.mrf.mxu1  ;;  %v3995_v58 = vadd.f32 %v3946_v27, %v3554_v40  ;;  %v3556_v52 = vadd.f32 %v7812_v3, %v7757_v62  ;;  %v3557_v27 = vadd.f32 %v7816_v36, %v7760_v55  ;;  %v3975_v6 = vadd.f32 %v7798_v59, %v7719_v19  ;;  %v8030_v40 = vld [vmem:[#allocation13_spill] sm:$0xff] }
 0x215   : > { %4535 = vst [vmem:[%s6957_s23 + $0x118] sm:$0xff] %v4503_v42  ;;  %v4504_v8 = vmax.f32 %v4472_v17, 0.0  ;;  %v4473_v30 = vadd.f32 %v7852_v50, %v4429_v61  ;;  %v4430_v4 = vadd.f32 %v4371_v22, %v3989_v26  ;;  %v3948_v13 = vpop.f32.mrf.mxu0 }
 0x216   : > { %v4373_v20 = vpop.f32.mrf.mxu1  ;;  %v3996_v61 = vadd.f32 %v3948_v13, %v3555_v51 }
 0x217   : > { %4536 = vst [vmem:[%s6957_s23 + $0x140] sm:$0xff] %v4504_v8  ;;  %v4505_v5 = vmax.f32 %v4473_v30, 0.0  ;;  %v4474_v25 = vadd.f32 %v7847_v49, %v4430_v4  ;;  %v4431_v60 = vadd.f32 %v4373_v20, %v3990_v45  ;;  %v3950_v38 = vpop.f32.mrf.mxu0  ;;  %v3558_v4 = vadd.f32 %v7820_v14, %v7763_v1 }
 0x218   : > { %v4377_v63 = vpop.f32.mrf.mxu1  ;;  %v3997_v8 = vadd.f32 %v3950_v38, %v3556_v52  ;;  %v8038_v52 = vld [vmem:[#allocation21_spill] sm:$0xff] }
 0x219   : > { %4537 = vst [vmem:[%s6957_s23 + $0x148] sm:$0xff] %v4505_v5  ;;  %v4506_v46 = vmax.f32 %v4474_v25, 0.0  ;;  %v4475_v18 = vadd.f32 %v7852_v50, %v4431_v60  ;;  %v4432_v16 = vadd.f32 %v4377_v63, %v3991_v21  ;;  %v3952_v24 = vpop.f32.mrf.mxu0  ;;  %v3559_v5 = vadd.f32 %v7824_v34, %v7766_v44 }
 0x21a   : > { %v4379_v54 = vpop.f32.mrf.mxu1  ;;  %v3998_v20 = vadd.f32 %v3952_v24, %v3557_v27  ;;  %v3560_v63 = vadd.f32 %v7828_v56, %v7769_v0 }
 0x21b   : > { %4538 = vst [vmem:[%s6957_s23 + $0x170] sm:$0xff] %v4506_v46  ;;  %v4507_v9 = vmax.f32 %v4475_v18, 0.0  ;;  %v4476_v35 = vadd.f32 %v7847_v49, %v4432_v16  ;;  %v4433_v53 = vadd.f32 %v4379_v54, %v3992_v32  ;;  %v3956_v43 = vpop.f32.mrf.mxu0 }
 0x21c   : > { %v4381_v41 = vpop.f32.mrf.mxu1  ;;  %v3999_v12 = vadd.f32 %v3956_v43, %v3558_v4 }
 0x21d   : > { %4539 = vst [vmem:[%s6957_s23 + $0x178] sm:$0xff] %v4507_v9  ;;  %v4508_v15 = vmax.f32 %v4476_v35, 0.0  ;;  %v4477_v28 = vadd.f32 %v7852_v50, %v4433_v53  ;;  %v4434_v48 = vadd.f32 %v4381_v41, %v3993_v39  ;;  %v3958_v47 = vpop.f32.mrf.mxu0  ;;  %v3976_v35 = vadd.f32 %v7802_v7, %v7724_v23  ;;  %v8029_v53 = vld [vmem:[#allocation2_spill] sm:$0xff]  ;;  %v8031_v41 = vld [vmem:[#allocation8_spill] sm:$0xff] }
 0x21e   : > { %v4383_v57 = vpop.f32.mrf.mxu1  ;;  %v4000_v18 = vadd.f32 %v3958_v47, %v3559_v5  ;;  %v3977_v43 = vadd.f32 %v8030_v40, %v8029_v53  ;;  %v8036_v23 = vld [vmem:[#allocation20_spill] sm:$0xff] }
 0x21f   : > { %4540 = vst [vmem:[%s6957_s23 + $0x1a0] sm:$0xff] %v4508_v15  ;;  %v4509_v26 = vmax.f32 %v4477_v28, 0.0  ;;  %v4478_v2 = vadd.f32 %v7847_v49, %v4434_v48  ;;  %v4435_v10 = vadd.f32 %v4383_v57, %v3994_v31  ;;  %v3960_v42 = vpop.f32.mrf.mxu0  ;;  %v8032_v31 = vld [vmem:[#allocation19_spill] sm:$0xff] }
 0x220   : > { %v4387_v17 = vpop.f32.mrf.mxu1  ;;  %v4001_v39 = vadd.f32 %v3960_v42, %v3560_v63  ;;  %v3561_v15 = vadd.f32 %v8032_v31, %v8031_v41  ;;  %v8033_v57 = vld [vmem:[#allocation3_spill] sm:$0xff] }
 0x221   : > { %4541 = vst [vmem:[%s6957_s23 + $0x1a8] sm:$0xff] %v4509_v26  ;;  %v4510_v29 = vmax.f32 %v4478_v2, 0.0  ;;  %v4479_v33 = vadd.f32 %v7852_v50, %v4435_v10  ;;  %v4436_v11 = vadd.f32 %v4387_v17, %v3995_v58  ;;  %v3962_v22 = vpop.f32.mrf.mxu0  ;;  %v8034_v58 = vld [vmem:[#allocation14_spill] sm:$0xff]  ;;  %v8035_v2 = vld [vmem:[#allocation9_spill] sm:$0xff] }
 0x222   : > { %v4389_v45 = vpop.f32.mrf.mxu1  ;;  %v3978_v26 = vadd.f32 %v8034_v58, %v8033_v57  ;;  %v3562_v7 = vadd.f32 %v8036_v23, %v8035_v2  ;;  %v8037_v10 = vld [vmem:[#allocation10_spill] sm:$0xff]  ;;  %v4002_v17 = vadd.f32 %v3962_v22, %v3561_v15 }
 0x223   : > { %4542 = vst [vmem:[%s6957_s23 + $0x1d0] sm:$0xff] %v4510_v29  ;;  %v4511_v30 = vmax.f32 %v4479_v33, 0.0  ;;  %v4480_v62 = vadd.f32 %v7847_v49, %v4436_v11  ;;  %v4437_v3 = vadd.f32 %v4389_v45, %v3996_v61  ;;  %v3966_v37 = vpop.f32.mrf.mxu0  ;;  %v3563_v42 = vadd.f32 %v8038_v52, %v8037_v10  ;;  %v8049_v52 = vld [vmem:[#allocation7_spill] sm:$0xff] }
 0x224   : > { %v4391_v13 = vpop.f32.mrf.mxu1 }
 0x225   : > { %4543 = vst [vmem:[%s6957_s23 + $0x1d8] sm:$0xff] %v4511_v30  ;;  %v4512_v21 = vmax.f32 %v4480_v62, 0.0  ;;  %v4481_v55 = vadd.f32 %v7852_v50, %v4437_v3  ;;  %v4438_v36 = vadd.f32 %v4391_v13, %v3997_v8  ;;  %v3968_v25 = vpop.f32.mrf.mxu0  ;;  %v8039_v8 = vld [vmem:[#allocation4_spill] sm:$0xff]  ;;  %v8040_v30 = vld [vmem:[#allocation15_spill] sm:$0xff]  ;;  %v4003_v3 = vadd.f32 %v3966_v37, %v3562_v7 }
 0x226   : > { %v4393_v60 = vpop.f32.mrf.mxu1  ;;  %v3979_v62 = vadd.f32 %v8040_v30, %v8039_v8  ;;  %v4004_v4 = vadd.f32 %v3968_v25, %v3563_v42  ;;  %v8050_v42 = vld [vmem:[#allocation18_spill] sm:$0xff] }
 0x227   : > { %4544 = vst [vmem:[%s6957_s23 + $0x200] sm:$0xff] %v4512_v21  ;;  %v4513_v38 = vmax.f32 %v4481_v55, 0.0  ;;  %v4482_v1 = vadd.f32 %v7847_v49, %v4438_v36  ;;  %v4439_v14 = vadd.f32 %v4393_v60, %v3998_v20  ;;  %v3970_v32 = vpop.f32.mrf.mxu0  ;;  %v8041_v60 = vld [vmem:[#allocation5_spill] sm:$0xff] }
 0x228   : > { %v4397_v46 = vpop.f32.mrf.mxu1 }
 0x229   : > { %4545 = vst [vmem:[%s6957_s23 + $0x208] sm:$0xff] %v4513_v38  ;;  %v4514_v16 = vmax.f32 %v4482_v1, 0.0  ;;  %v4483_v44 = vadd.f32 %v7852_v50, %v4439_v14  ;;  %v4440_v34 = vadd.f32 %v4397_v46, %v3999_v12  ;;  %v7916_v24 = vpop.f32.mrf.mxu0  ;;  %v8042_v12 = vld [vmem:[#allocation16_spill] sm:$0xff]  ;;  %v8043_v1 = vld [vmem:[#allocation11_spill] sm:$0xff]  ;;  %v8044_v14 = vld [vmem:[#allocation22_spill] sm:$0xff] }
 0x22a   : > { %v4399_v54 = vpop.f32.mrf.mxu1  ;;  %v3980_v38 = vadd.f32 %v8042_v12, %v8041_v60  ;;  %v3564_v63 = vadd.f32 %v8044_v14, %v8043_v1 }
 0x22b   : > { %4546 = vst [vmem:[%s6957_s23 + $0x230] sm:$0xff] %v4514_v16  ;;  %v4515_v9 = vmax.f32 %v4483_v44, 0.0  ;;  %v4484_v0 = vadd.f32 %v7847_v49, %v4440_v34  ;;  %v4441_v56 = vadd.f32 %v4399_v54, %v4000_v18  ;;  %v4337_v19 = vpop.f32.mrf.mxu0  ;;  %v8045_v54 = vld [vmem:[#allocation12_spill] sm:$0xff] }
 0x22c   : > { %v4401_v59 = vpop.f32.mrf.mxu1  ;;  %v4416_v51 = vadd.f32 %v4337_v19, %v3975_v6  ;;  %v8047_v19 = vld [vmem:[#allocation6_spill] sm:$0xff] }
 0x22d   : > { %4547 = vst [vmem:[%s6957_s23 + $0x238] sm:$0xff] %v4515_v9  ;;  %v4516_v28 = vmax.f32 %v4484_v0, 0.0  ;;  %v4485_v48 = vadd.f32 %v7852_v50, %v4441_v56  ;;  %v4442_v47 = vadd.f32 %v4401_v59, %v4001_v39  ;;  %v4339_v61 = vpop.f32.mrf.mxu0  ;;  %v8046_v39 = vld [vmem:[#allocation23_spill] sm:$0xff]  ;;  %v4005_v0 = vadd.f32 %v3970_v32, %v3564_v63  ;;  %v8048_v59 = vld [vmem:[#allocation17_spill] sm:$0xff] }
 0x22e   : > { %v4403_v29 = vpop.f32.mrf.mxu1  ;;  %v4460_v11 = vadd.f32 %v7847_v49, %v4416_v51  ;;  %v4417_v45 = vadd.f32 %v4339_v61, %v3976_v35  ;;  %v3565_v9 = vadd.f32 %v8046_v39, %v8045_v54 }
 0x22f   : > { %4548 = vst [vmem:[%s6957_s23 + $0x260] sm:$0xff] %v4516_v28  ;;  %v4517_v33 = vmax.f32 %v4485_v48, 0.0  ;;  %v4486_v27 = vadd.f32 %v7847_v49, %v4442_v47  ;;  %v4443_v13 = vadd.f32 %v4403_v29, %v4002_v17  ;;  %v4341_v20 = vpop.f32.mrf.mxu0  ;;  %v3981_v28 = vadd.f32 %v8048_v59, %v8047_v19 }
 0x230   : > { %v4407_v21 = vpop.f32.mrf.mxu1  ;;  %v4492_v22 = vmax.f32 %v4460_v11, 0.0  ;;  %v4461_v36 = vadd.f32 %v7852_v50, %v4417_v45  ;;  %v4418_v5 = vadd.f32 %v4341_v20, %v3977_v43  ;;  %v4006_v48 = vadd.f32 %v7916_v24, %v3565_v9 }
 0x231   : > { %4549 = vst [vmem:[%s6957_s23 + $0x268] sm:$0xff] %v4517_v33  ;;  %v4518_v55 = vmax.f32 %v4486_v27, 0.0  ;;  %v4487_v37 = vadd.f32 %v7852_v50, %v4443_v13  ;;  %v4444_v25 = vadd.f32 %v4407_v21, %v4003_v3  ;;  %v4343_v46 = vpop.f32.mrf.mxu0  ;;  %v3982_v17 = vadd.f32 %v8050_v42, %v8049_v52 }
 0x232   : > { %v4409_v18 = vpop.f32.mrf.mxu1  ;;  %4524 = vst [vmem:[%s6957_s23 + $0x20] sm:$0xff] %v4492_v22  ;;  %v4493_v16 = vmax.f32 %v4461_v36, 0.0  ;;  %v4462_v44 = vadd.f32 %v7847_v49, %v4418_v5  ;;  %v4419_v34 = vadd.f32 %v4343_v46, %v3978_v26 }
 0x233   : > { %4550 = vst [vmem:[%s6957_s23 + $0x290] sm:$0xff] %v4518_v55  ;;  %v4445_v6 = vadd.f32 %v4409_v18, %v4004_v4  ;;  %v4519_v56 = vmax.f32 %v4487_v37, 0.0  ;;  %v4488_v35 = vadd.f32 %v7847_v49, %v4444_v25  ;;  %v4347_v53 = vpop.f32.mrf.mxu0 }
 0x234   : > { %v4411_v40 = vpop.f32.mrf.mxu1  ;;  %4525 = vst [vmem:[%s6957_s23 + $0x28] sm:$0xff] %v4493_v16  ;;  %v4494_v43 = vmax.f32 %v4462_v44, 0.0  ;;  %v4463_v41 = vadd.f32 %v7852_v50, %v4419_v34  ;;  %v4420_v15 = vadd.f32 %v4347_v53, %v3979_v62 }
 0x235   : > { %v4489_v31 = vadd.f32 %v7852_v50, %v4445_v6  ;;  %4551 = vst [vmem:[%s6957_s23 + $0x298] sm:$0xff] %v4519_v56  ;;  %v4520_v32 = vmax.f32 %v4488_v35, 0.0  ;;  %v4446_v51 = vadd.f32 %v4411_v40, %v4005_v0  ;;  %v4349_v47 = vpop.f32.mrf.mxu0 }
 0x236   : > { %v4413_v57 = vpop.f32.mrf.mxu1  ;;  %4526 = vst [vmem:[%s6957_s23 + $0x50] sm:$0xff] %v4494_v43  ;;  %v4495_v58 = vmax.f32 %v4463_v41, 0.0  ;;  %v4464_v2 = vadd.f32 %v7847_v49, %v4420_v15  ;;  %v4421_v23 = vadd.f32 %v4349_v47, %v3980_v38 }
 0x237   : > { %v4521_v26 = vmax.f32 %v4489_v31, 0.0  ;;  %4552 = vst [vmem:[%s6957_s23 + $0x2c0] sm:$0xff] %v4520_v32  ;;  %v4490_v7 = vadd.f32 %v7847_v49, %v4446_v51  ;;  %v4447_v10 = vadd.f32 %v4413_v57, %v4006_v48  ;;  %v4351_v24 = vpop.f32.mrf.mxu0 }
 0x238   : > { %4527 = vst [vmem:[%s6957_s23 + $0x58] sm:$0xff] %v4495_v58  ;;  %v4496_v61 = vmax.f32 %v4464_v2, 0.0  ;;  %v4465_v29 = vadd.f32 %v7852_v50, %v4421_v23  ;;  %v4422_v33 = vadd.f32 %v4351_v24, %v3981_v28 }
 0x239   : > { %4553 = vst [vmem:[%s6957_s23 + $0x2c8] sm:$0xff] %v4521_v26  ;;  %v4522_v11 = vmax.f32 %v4490_v7, 0.0  ;;  %v4491_v27 = vadd.f32 %v7852_v50, %v4447_v10  ;;  %v4353_v45 = vpop.f32.mrf.mxu0 }
 0x23a   : > { %4528 = vst [vmem:[%s6957_s23 + $0x80] sm:$0xff] %v4496_v61  ;;  %v4497_v8 = vmax.f32 %v4465_v29, 0.0  ;;  %v4466_v30 = vadd.f32 %v7847_v49, %v4422_v33  ;;  %v4423_v62 = vadd.f32 %v4353_v45, %v3982_v17 }
 0x23b   : > { %4554 = vst [vmem:[%s6957_s23 + $0x2f0] sm:$0xff] %v4522_v11  ;;  %v4523_v3 = vmax.f32 %v4491_v27, 0.0 }
 0x23c   : > { %4529 = vst [vmem:[%s6957_s23 + $0x88] sm:$0xff] %v4497_v8  ;;  %v4498_v4 = vmax.f32 %v4466_v30, 0.0  ;;  %v4467_v13 = vadd.f32 %v7852_v50, %v4423_v62 }
 0x23d   : > { %4555 = vst [vmem:[%s6957_s23 + $0x2f8] sm:$0xff] %v4523_v3 }
 0x23e   : > { %4530 = vst [vmem:[%s6957_s23 + $0xb0] sm:$0xff] %v4498_v4  ;;  %v4499_v20 = vmax.f32 %v4467_v13, 0.0 }
 0x240   : > { %4531 = vst [vmem:[%s6957_s23 + $0xb8] sm:$0xff] %v4499_v20 }
 0x241 PF: > { %s18_s9 = sadd.s32 1, %s5978_s9   ;;  %s8051_s27 = smov %s5970_s29 }
 0x242   : > { %p15_p7 = scmp.ge.s32.totalorder %s18_s9, 6   ;;  %s8052_s28 = smov %s5974_s30 }
 0x243   : > { %s8053_s29 = smov %s8056_s10  ;;  %s8054_s30 = smov %s8060_s11 }
 0x244   :  { %17 = sbr.rel (!%p15_p7) target bundleno = 3 (0x3), region = 99 }

</bundles_post_ra>
